<compile_context>
chip_gen: v7x
topology: tpu7x:2x2x1
jax: 0.10.0
libtpu: 0.0.40
codegen_flags: <defaults>
</compile_context>

<pallas_src>
import functools

import jax
import jax.numpy as jnp
from jax import lax
from jax.experimental import pallas as pl
from jax.experimental.pallas import tpu as pltpu


def _pick_row_chunk(P, W, target=128):
    """Largest multiple of W that divides P and is <= target (falls back to P)."""
    cand = (target // W) * W
    while cand >= W:
        if P % cand == 0:
            return cand
        cand -= W
    return P


def _write_col_slabs(col_ref, b, a_f32, p0, keep_left, keep_right, *, W, C, cdt):
    """Write a TM-row chunk of (already relu'd, f32) activations into the three kx
    slabs of image b's dy-grouped im2col scratch.

    col row r = dy*W + p (p = output pixel) must hold, for kx slab kx,
    in_pad[(r // W) - 1, (r % W) + kx - 1, :]   (zero outside the image).

    a_f32      : (TM, C) f32 activations for pixels [p0, p0 + TM), p0 % W == 0
    keep_left  : (TM, 1) f32 {0,1}; 0 where the pixel is in the LAST image column
                 (must not wrap into the next row's w=0 output via the kx=0 tap)
    keep_right : (TM, 1) f32 {0,1}; 0 where the pixel is in the FIRST image column
    """
    TM = a_f32.shape[0]
    # kx = 1 (center tap): pixel p feeds col row p + W.
    col_ref[b, W + p0:W + p0 + TM, C:2 * C] = a_f32.astype(cdt)
    # kx = 0 (reader sees its left neighbour): pixel p feeds col row p + W + 1.
    col_ref[b, W + 1 + p0:W + 1 + p0 + TM, 0:C] = (a_f32 * keep_left).astype(cdt)
    # kx = 2 (reader sees its right neighbour): pixel p feeds col row p + W - 1.
    col_ref[b, W - 1 + p0:W - 1 + p0 + TM, 2 * C:3 * C] = (a_f32 * keep_right).astype(cdt)


def _conv_chunk(col_ref, b, wg_ref, p0, TM, *, W):
    """3x3 conv for TM output pixels of image b starting at p0: a pure 3-dot MXU
    chain with f32 accumulation (bias / residual are added by the caller)."""
    y = jnp.dot(col_ref[b, p0:p0 + TM, :], wg_ref[0],
                preferred_element_type=jnp.float32)
    y = y + jnp.dot(col_ref[b, W + p0:W + p0 + TM, :], wg_ref[1],
                    preferred_element_type=jnp.float32)
    y = y + jnp.dot(col_ref[b, 2 * W + p0:2 * W + p0 + TM, :], wg_ref[2],
                    preferred_element_type=jnp.float32)
    return y


def resblock_kernel(x_ref, w1_ref, b1_ref, w2_ref, b2_ref, o_ref, col1, col2):
    # x_ref : (Nb, H, W, C) f32         w1_ref: (3, 3*C, F) bf16   b1_ref: (1, F) f32
    # o_ref : (Nb, H, W, F)             w2_ref: (3, 3*F, F) bf16   b2_ref: (1, F) f32
    # col1  : VMEM (Nb, (H+2)*W, 3*C)   col2  : VMEM (Nb, (H+2)*W, 3*F)     (bf16)
    Nb, H, W, C = x_ref.shape
    F = o_ref.shape[-1]
    P = H * W
    TM = _pick_row_chunk(P, W)          # output pixels per chunk (<= 128, multiple of W)
    n_chunks = P // TM
    rpc = TM // W                       # image rows per chunk
    cdt = col1.dtype
    K3, K3f = 3 * C, 3 * F

    # W-boundary keep masks, computed ONCE (f32: v5e's VPU has no bf16 ALU).
    # Chunk starts are multiples of W, so the (TM, 1) pattern is chunk-invariant.
    wpos = lax.broadcasted_iota(jnp.int32, (TM, 1), 0) % W
    keep_left = (wpos != W - 1).astype(jnp.float32)      # kills wrap for the kx=0 slab
    keep_right = (wpos != 0).astype(jnp.float32)         # kills wrap for the kx=2 slab

    b1 = b1_ref[...]                    # (1, F) f32
    b2 = b2_ref[...]                    # (1, F) f32

    for b in range(Nb):                 # Nb is small: static unroll
        # Zero only the halo rows (top/bottom W+1 rows); interiors are written exactly
        # once by the slab stores (overwrite-after-zero at the seam rows is intended).
        col1[b, 0:W + 1, :] = jnp.zeros((W + 1, K3), cdt)
        col1[b, P + W - 1:P + 2 * W, :] = jnp.zeros((W + 1, K3), cdt)
        col2[b, 0:W + 1, :] = jnp.zeros((W + 1, K3f), cdt)
        col2[b, P + W - 1:P + 2 * W, :] = jnp.zeros((W + 1, K3f), cdt)

        # relu(x) -> col1 slabs (chunked so no (P, C) f32 value stays live).
        for ci in range(n_chunks):
            p0 = ci * TM
            h0 = p0 // W
            a1 = jnp.maximum(x_ref[b, h0:h0 + rpc].reshape(TM, C), 0.0)
            _write_col_slabs(col1, b, a1, p0, keep_left, keep_right, W=W, C=C, cdt=cdt)

        # conv1 (+b1) -> relu -> straight into col2 slabs (h1 never materialized).
        for ci in range(n_chunks):
            p0 = ci * TM
            a2 = jnp.maximum(_conv_chunk(col1, b, w1_ref, p0, TM, W=W) + b1, 0.0)
            _write_col_slabs(col2, b, a2, p0, keep_left, keep_right, W=W, C=F, cdt=cdt)

        # conv2 (+b2) + residual -> output, chunk by chunk (lane-dense stores, F=128).
        for ci in range(n_chunks):
            p0 = ci * TM
            h0 = p0 // W
            res = x_ref[b, h0:h0 + rpc].reshape(TM, F)
            out = _conv_chunk(col2, b, w2_ref, p0, TM, W=W) + b2 + res
            o_ref[b, h0:h0 + rpc] = out.reshape(rpc, W, F).astype(o_ref.dtype)


def pack_resblock_params(w1_oihw, b1, w2_oihw, b2, compute_dtype=jnp.bfloat16):
    """One-time weight repack (do at model init, NOT per forward call):
    PyTorch OIHW (F, C, 3, 3) -> dy-grouped (3, 3*C, F) in the MXU compute dtype;
    biases -> (1, F) f32."""
    F, C, kh, kw = w1_oihw.shape
    assert (kh, kw) == (3, 3), "ResBlock uses 3x3 convs"
    wg1 = jnp.transpose(w1_oihw, (2, 3, 1, 0)).reshape(3, 3 * C, F).astype(compute_dtype)
    wg2 = jnp.transpose(w2_oihw, (2, 3, 1, 0)).reshape(3, 3 * F, F).astype(compute_dtype)
    return (wg1, b1.reshape(1, F).astype(jnp.float32),
            wg2, b2.reshape(1, F).astype(jnp.float32))


@functools.partial(jax.jit, static_argnames=("images_per_step",))
def resblock_pallas(x_nhwc, wg1, b1r, wg2, b2r, *, images_per_step=2):
    """ResBlock forward. x_nhwc: (N, H, W, C) — activations stay NHWC end-to-end (no
    layout round-trips around the kernel). Weights come pre-packed from
    pack_resblock_params(). Returns (N, H, W, F) in x's dtype."""
    N, H, W, C = x_nhwc.shape
    F = wg1.shape[-1]
    if C != F:
        raise ValueError(
            f"ResBlock residual add requires in_dim == n_filters, got {C} vs {F}")
    if wg1.shape != (3, 3 * C, F) or wg2.shape != (3, 3 * F, F):
        raise ValueError("weights must be packed with pack_resblock_params()")

    # Fold images into each grid step (bigger matmul M / per-step MXU work), while
    # keeping the grid itself long enough to pipeline and shard across v7x's 2 TCs.
    nb = max(1, min(images_per_step, N))
    while N % nb:
        nb -= 1
    cdt = wg1.dtype

    return pl.pallas_call(
        resblock_kernel,
        out_shape=jax.ShapeDtypeStruct((N, H, W, F), x_nhwc.dtype),
        grid_spec=pltpu.PrefetchScalarGridSpec(
            num_scalar_prefetch=0,
            grid=(N // nb,),
            in_specs=[
                pl.BlockSpec((nb, H, W, C), lambda n: (n, 0, 0, 0)),
                pl.BlockSpec((3, 3 * C, F), lambda n: (0, 0, 0)),
                pl.BlockSpec((1, F), lambda n: (0, 0)),
                pl.BlockSpec((3, 3 * F, F), lambda n: (0, 0, 0)),
                pl.BlockSpec((1, F), lambda n: (0, 0)),
            ],
            out_specs=pl.BlockSpec((nb, H, W, F), lambda n: (n, 0, 0, 0)),
            scratch_shapes=[
                pltpu.VMEM((nb, (H + 2) * W, 3 * C), cdt),   # conv1 im2col
                pltpu.VMEM((nb, (H + 2) * W, 3 * F), cdt),   # conv2 im2col
            ],
        ),
        compiler_params=pltpu.CompilerParams(
            dimension_semantics=("parallel",),     # shard batch steps across TCs (v7x)
            vmem_limit_bytes=32 * 1024 * 1024,     # ~5 MiB used; v5e default is 16 MiB
        ),
    )(x_nhwc, wg1, b1r, wg2, b2r)


def resblock_reference(x_nhwc, w1_oihw, b1, w2_oihw, b2):
    """Pure-JAX f32 reference matching the PyTorch forward (NHWC activations)."""
    dn = ("NHWC", "OIHW", "NHWC")
    h = jax.nn.relu(x_nhwc)
    h = lax.conv_general_dilated(h, w1_oihw, (1, 1), "SAME", dimension_numbers=dn)
    h = h + b1[None, None, None, :]
    h = jax.nn.relu(h)
    h = lax.conv_general_dilated(h, w2_oihw, (1, 1), "SAME", dimension_numbers=dn)
    h = h + b2[None, None, None, :]
    return h + x_nhwc


if __name__ == "__main__":
    # Residual add requires in_dim == n_filters; 128 channels keeps the lane axis
    # dense (unmasked stores, full MXU K=384).  N=8 with 2 images per grid step gives
    # grid=(4,): >=2 steps per TensorCore on v7x and ~300 MFLOP of MXU work per step.
    N, H, W, C = 8, 16, 16, 128
    F = C

    key = jax.random.PRNGKey(0)
    kx, kw1, kb1, kw2, kb2 = jax.random.split(key, 5)

    x = jax.random.normal(kx, (N, H, W, C), jnp.float32)            # NHWC end-to-end
    w1 = jax.random.normal(kw1, (F, C, 3, 3), jnp.float32) * 0.05   # PyTorch OIHW
    b1 = jax.random.normal(kb1, (F,), jnp.float32) * 0.05
    w2 = jax.random.normal(kw2, (F, F, 3, 3), jnp.float32) * 0.05
    b2 = jax.random.normal(kb2, (F,), jnp.float32) * 0.05

    wg1, b1r, wg2, b2r = pack_resblock_params(w1, b1, w2, b2)       # one-time repack

    out = jax.block_until_ready(
        resblock_pallas(x, wg1, b1r, wg2, b2r, images_per_step=2))
    ref = resblock_reference(x, w1, b1, w2, b2)

    assert out.shape == (N, H, W, F)
    # bf16 matmul operands with f32 accumulation vs. a pure-f32 reference: the loose
    # tolerance is expected quantization error, not a correctness bug.
    max_err = jnp.max(jnp.abs(out - ref))
    assert jnp.allclose(out, ref, rtol=2e-2, atol=1.5e-1), f"max abs diff {max_err}"

    print("KERNEL_OK")
</pallas_src>

<mosaic_0001>
module attributes {stable_mosaic.version = 11 : i64} {
  func.func @resblock_kernel(%arg0: i32, %arg1: memref<2x16x16x128xf32, #tpu.memory_space<vmem>>, %arg2: memref<3x384x128xbf16, #tpu.memory_space<vmem>>, %arg3: memref<1x128xf32, #tpu.memory_space<vmem>>, %arg4: memref<3x384x128xbf16, #tpu.memory_space<vmem>>, %arg5: memref<1x128xf32, #tpu.memory_space<vmem>>, %arg6: memref<2x16x16x128xf32, #tpu.memory_space<vmem>>, %arg7: memref<2x288x384xbf16, #tpu.memory_space<vmem>>, %arg8: memref<2x288x384xbf16, #tpu.memory_space<vmem>>) attributes {dimension_semantics = [#tpu.dimension_semantics<parallel>], iteration_bounds = array<i64: 4>, scalar_prefetch = 0 : i64, scratch_operands = 2 : i64, tpu.core_type = #tpu.core_type<tc>, window_params = [{transform_indices = @transform_0, window_bounds = array<i64: 2, 16, 16, 128>}, {pipeline_mode = #tpu.pipeline_mode<synchronous>, transform_indices = @transform_1, window_bounds = array<i64: 3, 384, 128>}, {pipeline_mode = #tpu.pipeline_mode<synchronous>, transform_indices = @transform_2, window_bounds = array<i64: 1, 128>}, {pipeline_mode = #tpu.pipeline_mode<synchronous>, transform_indices = @transform_3, window_bounds = array<i64: 3, 384, 128>}, {pipeline_mode = #tpu.pipeline_mode<synchronous>, transform_indices = @transform_4, window_bounds = array<i64: 1, 128>}, {transform_indices = @transform_5, window_bounds = array<i64: 2, 16, 16, 128>}]} {
    %0 = tpu.iota {dimensions = array<i32: 0>} : vector<128x1xi32>
    %c16_i32 = arith.constant 16 : i32
    %c0_i32 = arith.constant 0 : i32
    %1 = arith.cmpi eq, %c16_i32, %c0_i32 : i32
    %c1_i32 = arith.constant 1 : i32
    %2 = arith.select %1, %c1_i32, %c16_i32 : i32
    %3 = vector.broadcast %2 : i32 to vector<128x1xi32>
    %4 = arith.remsi %0, %3 : vector<128x1xi32>
    %c0_i32_0 = arith.constant 0 : i32
    %5 = vector.broadcast %c0_i32_0 : i32 to vector<128x1xi32>
    %6 = arith.cmpi ne, %4, %5 : vector<128x1xi32>
    %c0_i32_1 = arith.constant 0 : i32
    %7 = vector.broadcast %c0_i32_1 : i32 to vector<128x1xi32>
    %8 = arith.cmpi slt, %4, %7 : vector<128x1xi32>
    %c0_i32_2 = arith.constant 0 : i32
    %9 = arith.cmpi slt, %2, %c0_i32_2 : i32
    %10 = vector.broadcast %9 : i1 to vector<128x1xi1>
    %11 = vector.broadcast %10 : vector<128x1xi1> to vector<128x1xi1>
    %12 = arith.xori %8, %11 : vector<128x1xi1>
    %13 = arith.andi %12, %6 : vector<128x1xi1>
    %14 = vector.broadcast %2 : i32 to vector<128x1xi32>
    %15 = arith.addi %4, %14 : vector<128x1xi32>
    %16 = arith.select %13, %15, %4 : vector<128x1xi1>, vector<128x1xi32>
    %c15_i32 = arith.constant 15 : i32
    %17 = vector.broadcast %c15_i32 : i32 to vector<128x1xi32>
    %18 = arith.cmpi ne, %16, %17 : vector<128x1xi32>
    %19 = arith.extui %18 : vector<128x1xi1> to vector<128x1xi32>
    %20 = arith.sitofp %19 : vector<128x1xi32> to vector<128x1xf32>
    %c0_i32_3 = arith.constant 0 : i32
    %21 = vector.broadcast %c0_i32_3 : i32 to vector<128x1xi32>
    %22 = arith.cmpi ne, %16, %21 : vector<128x1xi32>
    %23 = arith.extui %22 : vector<128x1xi1> to vector<128x1xi32>
    %24 = arith.sitofp %23 : vector<128x1xi32> to vector<128x1xf32>
    %c0 = arith.constant 0 : index
    %c0_4 = arith.constant 0 : index
    %25 = vector.load %arg3[%c0, %c0_4] : memref<1x128xf32, #tpu.memory_space<vmem>>, vector<1x128xf32>
    %c0_5 = arith.constant 0 : index
    %c0_6 = arith.constant 0 : index
    %26 = vector.load %arg5[%c0_5, %c0_6] : memref<1x128xf32, #tpu.memory_space<vmem>>, vector<1x128xf32>
    %cst = arith.constant 0.000000e+00 : bf16
    %27 = vector.broadcast %cst : bf16 to vector<17x384xbf16>
    %c0_7 = arith.constant 0 : index
    %c0_8 = arith.constant 0 : index
    %c0_9 = arith.constant 0 : index
    %28 = vector.load %arg7[%c0_7, %c0_8, %c0_9] : memref<2x288x384xbf16, #tpu.memory_space<vmem>>, vector<1x17x384xbf16>
    %29 = vector.shape_cast %28 : vector<1x17x384xbf16> to vector<17x384xbf16>
    %30 = vector.shape_cast %27 : vector<17x384xbf16> to vector<1x17x384xbf16>
    tpu.vector_store %arg7[%c0_7, %c0_8, %c0_9], %30 {strides = array<i32>} : memref<2x288x384xbf16, #tpu.memory_space<vmem>>, vector<1x17x384xbf16>,
    %cst_10 = arith.constant 0.000000e+00 : bf16
    %31 = vector.broadcast %cst_10 : bf16 to vector<17x384xbf16>
    %c0_11 = arith.constant 0 : index
    %c271 = arith.constant 271 : index
    %c0_12 = arith.constant 0 : index
    %32 = vector.load %arg7[%c0_11, %c271, %c0_12] : memref<2x288x384xbf16, #tpu.memory_space<vmem>>, vector<1x17x384xbf16>
    %33 = vector.shape_cast %32 : vector<1x17x384xbf16> to vector<17x384xbf16>
    %34 = vector.shape_cast %31 : vector<17x384xbf16> to vector<1x17x384xbf16>
    tpu.vector_store %arg7[%c0_11, %c271, %c0_12], %34 {strides = array<i32>} : memref<2x288x384xbf16, #tpu.memory_space<vmem>>, vector<1x17x384xbf16>,
    %cst_13 = arith.constant 0.000000e+00 : bf16
    %35 = vector.broadcast %cst_13 : bf16 to vector<17x384xbf16>
    %c0_14 = arith.constant 0 : index
    %c0_15 = arith.constant 0 : index
    %c0_16 = arith.constant 0 : index
    %36 = vector.load %arg8[%c0_14, %c0_15, %c0_16] : memref<2x288x384xbf16, #tpu.memory_space<vmem>>, vector<1x17x384xbf16>
    %37 = vector.shape_cast %36 : vector<1x17x384xbf16> to vector<17x384xbf16>
    %38 = vector.shape_cast %35 : vector<17x384xbf16> to vector<1x17x384xbf16>
    tpu.vector_store %arg8[%c0_14, %c0_15, %c0_16], %38 {strides = array<i32>} : memref<2x288x384xbf16, #tpu.memory_space<vmem>>, vector<1x17x384xbf16>,
    %cst_17 = arith.constant 0.000000e+00 : bf16
    %39 = vector.broadcast %cst_17 : bf16 to vector<17x384xbf16>
    %c0_18 = arith.constant 0 : index
    %c271_19 = arith.constant 271 : index
    %c0_20 = arith.constant 0 : index
    %40 = vector.load %arg8[%c0_18, %c271_19, %c0_20] : memref<2x288x384xbf16, #tpu.memory_space<vmem>>, vector<1x17x384xbf16>
    %41 = vector.shape_cast %40 : vector<1x17x384xbf16> to vector<17x384xbf16>
    %42 = vector.shape_cast %39 : vector<17x384xbf16> to vector<1x17x384xbf16>
    tpu.vector_store %arg8[%c0_18, %c271_19, %c0_20], %42 {strides = array<i32>} : memref<2x288x384xbf16, #tpu.memory_space<vmem>>, vector<1x17x384xbf16>,
    %c0_21 = arith.constant 0 : index
    %c0_22 = arith.constant 0 : index
    %c0_23 = arith.constant 0 : index
    %c0_24 = arith.constant 0 : index
    %43 = vector.load %arg1[%c0_21, %c0_22, %c0_23, %c0_24] : memref<2x16x16x128xf32, #tpu.memory_space<vmem>>, vector<1x8x16x128xf32>
    %44 = vector.shape_cast %43 : vector<1x8x16x128xf32> to vector<8x16x128xf32>
    %45 = vector.shape_cast %44 : vector<8x16x128xf32> to vector<128x128xf32>
    %cst_25 = arith.constant 0.000000e+00 : f32
    %46 = vector.broadcast %cst_25 : f32 to vector<128x128xf32>
    %47 = arith.maximumf %45, %46 : vector<128x128xf32>
    %48 = arith.truncf %47 : vector<128x128xf32> to vector<128x128xbf16>
    %c0_26 = arith.constant 0 : index
    %c16 = arith.constant 16 : index
    %c128 = arith.constant 128 : index
    %49 = vector.load %arg7[%c0_26, %c16, %c128] : memref<2x288x384xbf16, #tpu.memory_space<vmem>>, vector<1x128x128xbf16>
    %50 = vector.shape_cast %49 : vector<1x128x128xbf16> to vector<128x128xbf16>
    %51 = vector.shape_cast %48 : vector<128x128xbf16> to vector<1x128x128xbf16>
    tpu.vector_store %arg7[%c0_26, %c16, %c128], %51 {strides = array<i32>} : memref<2x288x384xbf16, #tpu.memory_space<vmem>>, vector<1x128x128xbf16>,
    %52 = vector.broadcast %20 : vector<128x1xf32> to vector<128x128xf32>
    %53 = arith.mulf %47, %52 : vector<128x128xf32>
    %54 = arith.truncf %53 : vector<128x128xf32> to vector<128x128xbf16>
    %c0_27 = arith.constant 0 : index
    %c17 = arith.constant 17 : index
    %c0_28 = arith.constant 0 : index
    %55 = vector.load %arg7[%c0_27, %c17, %c0_28] : memref<2x288x384xbf16, #tpu.memory_space<vmem>>, vector<1x128x128xbf16>
    %56 = vector.shape_cast %55 : vector<1x128x128xbf16> to vector<128x128xbf16>
    %57 = vector.shape_cast %54 : vector<128x128xbf16> to vector<1x128x128xbf16>
    tpu.vector_store %arg7[%c0_27, %c17, %c0_28], %57 {strides = array<i32>} : memref<2x288x384xbf16, #tpu.memory_space<vmem>>, vector<1x128x128xbf16>,
    %58 = vector.broadcast %24 : vector<128x1xf32> to vector<128x128xf32>
    %59 = arith.mulf %47, %58 : vector<128x128xf32>
    %60 = arith.truncf %59 : vector<128x128xf32> to vector<128x128xbf16>
    %c0_29 = arith.constant 0 : index
    %c15 = arith.constant 15 : index
    %c256 = arith.constant 256 : index
    %61 = vector.load %arg7[%c0_29, %c15, %c256] : memref<2x288x384xbf16, #tpu.memory_space<vmem>>, vector<1x128x128xbf16>
    %62 = vector.shape_cast %61 : vector<1x128x128xbf16> to vector<128x128xbf16>
    %63 = vector.shape_cast %60 : vector<128x128xbf16> to vector<1x128x128xbf16>
    tpu.vector_store %arg7[%c0_29, %c15, %c256], %63 {strides = array<i32>} : memref<2x288x384xbf16, #tpu.memory_space<vmem>>, vector<1x128x128xbf16>,
    %c0_30 = arith.constant 0 : index
    %c8 = arith.constant 8 : index
    %c0_31 = arith.constant 0 : index
    %c0_32 = arith.constant 0 : index
    %64 = vector.load %arg1[%c0_30, %c8, %c0_31, %c0_32] : memref<2x16x16x128xf32, #tpu.memory_space<vmem>>, vector<1x8x16x128xf32>
    %65 = vector.shape_cast %64 : vector<1x8x16x128xf32> to vector<8x16x128xf32>
    %66 = vector.shape_cast %65 : vector<8x16x128xf32> to vector<128x128xf32>
    %cst_33 = arith.constant 0.000000e+00 : f32
    %67 = vector.broadcast %cst_33 : f32 to vector<128x128xf32>
    %68 = arith.maximumf %66, %67 : vector<128x128xf32>
    %69 = arith.truncf %68 : vector<128x128xf32> to vector<128x128xbf16>
    %c0_34 = arith.constant 0 : index
    %c144 = arith.constant 144 : index
    %c128_35 = arith.constant 128 : index
    %70 = vector.load %arg7[%c0_34, %c144, %c128_35] : memref<2x288x384xbf16, #tpu.memory_space<vmem>>, vector<1x128x128xbf16>
    %71 = vector.shape_cast %70 : vector<1x128x128xbf16> to vector<128x128xbf16>
    %72 = vector.shape_cast %69 : vector<128x128xbf16> to vector<1x128x128xbf16>
    tpu.vector_store %arg7[%c0_34, %c144, %c128_35], %72 {strides = array<i32>} : memref<2x288x384xbf16, #tpu.memory_space<vmem>>, vector<1x128x128xbf16>,
    %73 = vector.broadcast %20 : vector<128x1xf32> to vector<128x128xf32>
    %74 = arith.mulf %68, %73 : vector<128x128xf32>
    %75 = arith.truncf %74 : vector<128x128xf32> to vector<128x128xbf16>
    %c0_36 = arith.constant 0 : index
    %c145 = arith.constant 145 : index
    %c0_37 = arith.constant 0 : index
    %76 = vector.load %arg7[%c0_36, %c145, %c0_37] : memref<2x288x384xbf16, #tpu.memory_space<vmem>>, vector<1x128x128xbf16>
    %77 = vector.shape_cast %76 : vector<1x128x128xbf16> to vector<128x128xbf16>
    %78 = vector.shape_cast %75 : vector<128x128xbf16> to vector<1x128x128xbf16>
    tpu.vector_store %arg7[%c0_36, %c145, %c0_37], %78 {strides = array<i32>} : memref<2x288x384xbf16, #tpu.memory_space<vmem>>, vector<1x128x128xbf16>,
    %79 = vector.broadcast %24 : vector<128x1xf32> to vector<128x128xf32>
    %80 = arith.mulf %68, %79 : vector<128x128xf32>
    %81 = arith.truncf %80 : vector<128x128xf32> to vector<128x128xbf16>
    %c0_38 = arith.constant 0 : index
    %c143 = arith.constant 143 : index
    %c256_39 = arith.constant 256 : index
    %82 = vector.load %arg7[%c0_38, %c143, %c256_39] : memref<2x288x384xbf16, #tpu.memory_space<vmem>>, vector<1x128x128xbf16>
    %83 = vector.shape_cast %82 : vector<1x128x128xbf16> to vector<128x128xbf16>
    %84 = vector.shape_cast %81 : vector<128x128xbf16> to vector<1x128x128xbf16>
    tpu.vector_store %arg7[%c0_38, %c143, %c256_39], %84 {strides = array<i32>} : memref<2x288x384xbf16, #tpu.memory_space<vmem>>, vector<1x128x128xbf16>,
    %c0_40 = arith.constant 0 : index
    %c0_41 = arith.constant 0 : index
    %c0_42 = arith.constant 0 : index
    %85 = vector.load %arg7[%c0_40, %c0_41, %c0_42] : memref<2x288x384xbf16, #tpu.memory_space<vmem>>, vector<1x128x384xbf16>
    %86 = vector.shape_cast %85 : vector<1x128x384xbf16> to vector<128x384xbf16>
    %c0_43 = arith.constant 0 : index
    %c0_44 = arith.constant 0 : index
    %c0_45 = arith.constant 0 : index
    %87 = vector.load %arg2[%c0_43, %c0_44, %c0_45] : memref<3x384x128xbf16, #tpu.memory_space<vmem>>, vector<1x384x128xbf16>
    %88 = vector.shape_cast %87 : vector<1x384x128xbf16> to vector<384x128xbf16>
    %cst_46 = arith.constant dense<0.000000e+00> : vector<128x128xf32>
    %89 = tpu.matmul %86, %88, %cst_46 {dimension_numbers = #tpu.dot_dimension_numbers<[1], [0], [0], [1], [0, 0, 1, 1], [], []>} : vector<128x384xbf16>, vector<384x128xbf16>, vector<128x128xf32> -> vector<128x128xf32>
    %c0_47 = arith.constant 0 : index
    %c16_48 = arith.constant 16 : index
    %c0_49 = arith.constant 0 : index
    %90 = vector.load %arg7[%c0_47, %c16_48, %c0_49] : memref<2x288x384xbf16, #tpu.memory_space<vmem>>, vector<1x128x384xbf16>
    %91 = vector.shape_cast %90 : vector<1x128x384xbf16> to vector<128x384xbf16>
    %c1 = arith.constant 1 : index
    %c0_50 = arith.constant 0 : index
    %c0_51 = arith.constant 0 : index
    %92 = vector.load %arg2[%c1, %c0_50, %c0_51] : memref<3x384x128xbf16, #tpu.memory_space<vmem>>, vector<1x384x128xbf16>
    %93 = vector.shape_cast %92 : vector<1x384x128xbf16> to vector<384x128xbf16>
    %cst_52 = arith.constant dense<0.000000e+00> : vector<128x128xf32>
    %94 = tpu.matmul %91, %93, %cst_52 {dimension_numbers = #tpu.dot_dimension_numbers<[1], [0], [0], [1], [0, 0, 1, 1], [], []>} : vector<128x384xbf16>, vector<384x128xbf16>, vector<128x128xf32> -> vector<128x128xf32>
    %95 = arith.addf %89, %94 : vector<128x128xf32>
    %c0_53 = arith.constant 0 : index
    %c32 = arith.constant 32 : index
    %c0_54 = arith.constant 0 : index
    %96 = vector.load %arg7[%c0_53, %c32, %c0_54] : memref<2x288x384xbf16, #tpu.memory_space<vmem>>, vector<1x128x384xbf16>
    %97 = vector.shape_cast %96 : vector<1x128x384xbf16> to vector<128x384xbf16>
    %c2 = arith.constant 2 : index
    %c0_55 = arith.constant 0 : index
    %c0_56 = arith.constant 0 : index
    %98 = vector.load %arg2[%c2, %c0_55, %c0_56] : memref<3x384x128xbf16, #tpu.memory_space<vmem>>, vector<1x384x128xbf16>
    %99 = vector.shape_cast %98 : vector<1x384x128xbf16> to vector<384x128xbf16>
    %cst_57 = arith.constant dense<0.000000e+00> : vector<128x128xf32>
    %100 = tpu.matmul %97, %99, %cst_57 {dimension_numbers = #tpu.dot_dimension_numbers<[1], [0], [0], [1], [0, 0, 1, 1], [], []>} : vector<128x384xbf16>, vector<384x128xbf16>, vector<128x128xf32> -> vector<128x128xf32>
    %101 = arith.addf %95, %100 : vector<128x128xf32>
    %102 = vector.broadcast %25 : vector<1x128xf32> to vector<128x128xf32>
    %103 = arith.addf %101, %102 : vector<128x128xf32>
    %cst_58 = arith.constant 0.000000e+00 : f32
    %104 = vector.broadcast %cst_58 : f32 to vector<128x128xf32>
    %105 = arith.maximumf %103, %104 : vector<128x128xf32>
    %106 = arith.truncf %105 : vector<128x128xf32> to vector<128x128xbf16>
    %c0_59 = arith.constant 0 : index
    %c16_60 = arith.constant 16 : index
    %c128_61 = arith.constant 128 : index
    %107 = vector.load %arg8[%c0_59, %c16_60, %c128_61] : memref<2x288x384xbf16, #tpu.memory_space<vmem>>, vector<1x128x128xbf16>
    %108 = vector.shape_cast %107 : vector<1x128x128xbf16> to vector<128x128xbf16>
    %109 = vector.shape_cast %106 : vector<128x128xbf16> to vector<1x128x128xbf16>
    tpu.vector_store %arg8[%c0_59, %c16_60, %c128_61], %109 {strides = array<i32>} : memref<2x288x384xbf16, #tpu.memory_space<vmem>>, vector<1x128x128xbf16>,
    %110 = vector.broadcast %20 : vector<128x1xf32> to vector<128x128xf32>
    %111 = arith.mulf %105, %110 : vector<128x128xf32>
    %112 = arith.truncf %111 : vector<128x128xf32> to vector<128x128xbf16>
    %c0_62 = arith.constant 0 : index
    %c17_63 = arith.constant 17 : index
    %c0_64 = arith.constant 0 : index
    %113 = vector.load %arg8[%c0_62, %c17_63, %c0_64] : memref<2x288x384xbf16, #tpu.memory_space<vmem>>, vector<1x128x128xbf16>
    %114 = vector.shape_cast %113 : vector<1x128x128xbf16> to vector<128x128xbf16>
    %115 = vector.shape_cast %112 : vector<128x128xbf16> to vector<1x128x128xbf16>
    tpu.vector_store %arg8[%c0_62, %c17_63, %c0_64], %115 {strides = array<i32>} : memref<2x288x384xbf16, #tpu.memory_space<vmem>>, vector<1x128x128xbf16>,
    %116 = vector.broadcast %24 : vector<128x1xf32> to vector<128x128xf32>
    %117 = arith.mulf %105, %116 : vector<128x128xf32>
    %118 = arith.truncf %117 : vector<128x128xf32> to vector<128x128xbf16>
    %c0_65 = arith.constant 0 : index
    %c15_66 = arith.constant 15 : index
    %c256_67 = arith.constant 256 : index
    %119 = vector.load %arg8[%c0_65, %c15_66, %c256_67] : memref<2x288x384xbf16, #tpu.memory_space<vmem>>, vector<1x128x128xbf16>
    %120 = vector.shape_cast %119 : vector<1x128x128xbf16> to vector<128x128xbf16>
    %121 = vector.shape_cast %118 : vector<128x128xbf16> to vector<1x128x128xbf16>
    tpu.vector_store %arg8[%c0_65, %c15_66, %c256_67], %121 {strides = array<i32>} : memref<2x288x384xbf16, #tpu.memory_space<vmem>>, vector<1x128x128xbf16>,
    %c0_68 = arith.constant 0 : index
    %c128_69 = arith.constant 128 : index
    %c0_70 = arith.constant 0 : index
    %122 = vector.load %arg7[%c0_68, %c128_69, %c0_70] : memref<2x288x384xbf16, #tpu.memory_space<vmem>>, vector<1x128x384xbf16>
    %123 = vector.shape_cast %122 : vector<1x128x384xbf16> to vector<128x384xbf16>
    %c0_71 = arith.constant 0 : index
    %c0_72 = arith.constant 0 : index
    %c0_73 = arith.constant 0 : index
    %124 = vector.load %arg2[%c0_71, %c0_72, %c0_73] : memref<3x384x128xbf16, #tpu.memory_space<vmem>>, vector<1x384x128xbf16>
    %125 = vector.shape_cast %124 : vector<1x384x128xbf16> to vector<384x128xbf16>
    %cst_74 = arith.constant dense<0.000000e+00> : vector<128x128xf32>
    %126 = tpu.matmul %123, %125, %cst_74 {dimension_numbers = #tpu.dot_dimension_numbers<[1], [0], [0], [1], [0, 0, 1, 1], [], []>} : vector<128x384xbf16>, vector<384x128xbf16>, vector<128x128xf32> -> vector<128x128xf32>
    %c0_75 = arith.constant 0 : index
    %c144_76 = arith.constant 144 : index
    %c0_77 = arith.constant 0 : index
    %127 = vector.load %arg7[%c0_75, %c144_76, %c0_77] : memref<2x288x384xbf16, #tpu.memory_space<vmem>>, vector<1x128x384xbf16>
    %128 = vector.shape_cast %127 : vector<1x128x384xbf16> to vector<128x384xbf16>
    %c1_78 = arith.constant 1 : index
    %c0_79 = arith.constant 0 : index
    %c0_80 = arith.constant 0 : index
    %129 = vector.load %arg2[%c1_78, %c0_79, %c0_80] : memref<3x384x128xbf16, #tpu.memory_space<vmem>>, vector<1x384x128xbf16>
    %130 = vector.shape_cast %129 : vector<1x384x128xbf16> to vector<384x128xbf16>
    %cst_81 = arith.constant dense<0.000000e+00> : vector<128x128xf32>
    %131 = tpu.matmul %128, %130, %cst_81 {dimension_numbers = #tpu.dot_dimension_numbers<[1], [0], [0], [1], [0, 0, 1, 1], [], []>} : vector<128x384xbf16>, vector<384x128xbf16>, vector<128x128xf32> -> vector<128x128xf32>
    %132 = arith.addf %126, %131 : vector<128x128xf32>
    %c0_82 = arith.constant 0 : index
    %c160 = arith.constant 160 : index
    %c0_83 = arith.constant 0 : index
    %133 = vector.load %arg7[%c0_82, %c160, %c0_83] : memref<2x288x384xbf16, #tpu.memory_space<vmem>>, vector<1x128x384xbf16>
    %134 = vector.shape_cast %133 : vector<1x128x384xbf16> to vector<128x384xbf16>
    %c2_84 = arith.constant 2 : index
    %c0_85 = arith.constant 0 : index
    %c0_86 = arith.constant 0 : index
    %135 = vector.load %arg2[%c2_84, %c0_85, %c0_86] : memref<3x384x128xbf16, #tpu.memory_space<vmem>>, vector<1x384x128xbf16>
    %136 = vector.shape_cast %135 : vector<1x384x128xbf16> to vector<384x128xbf16>
    %cst_87 = arith.constant dense<0.000000e+00> : vector<128x128xf32>
    %137 = tpu.matmul %134, %136, %cst_87 {dimension_numbers = #tpu.dot_dimension_numbers<[1], [0], [0], [1], [0, 0, 1, 1], [], []>} : vector<128x384xbf16>, vector<384x128xbf16>, vector<128x128xf32> -> vector<128x128xf32>
    %138 = arith.addf %132, %137 : vector<128x128xf32>
    %139 = vector.broadcast %25 : vector<1x128xf32> to vector<128x128xf32>
    %140 = arith.addf %138, %139 : vector<128x128xf32>
    %cst_88 = arith.constant 0.000000e+00 : f32
    %141 = vector.broadcast %cst_88 : f32 to vector<128x128xf32>
    %142 = arith.maximumf %140, %141 : vector<128x128xf32>
    %143 = arith.truncf %142 : vector<128x128xf32> to vector<128x128xbf16>
    %c0_89 = arith.constant 0 : index
    %c144_90 = arith.constant 144 : index
    %c128_91 = arith.constant 128 : index
    %144 = vector.load %arg8[%c0_89, %c144_90, %c128_91] : memref<2x288x384xbf16, #tpu.memory_space<vmem>>, vector<1x128x128xbf16>
    %145 = vector.shape_cast %144 : vector<1x128x128xbf16> to vector<128x128xbf16>
    %146 = vector.shape_cast %143 : vector<128x128xbf16> to vector<1x128x128xbf16>
    tpu.vector_store %arg8[%c0_89, %c144_90, %c128_91], %146 {strides = array<i32>} : memref<2x288x384xbf16, #tpu.memory_space<vmem>>, vector<1x128x128xbf16>,
    %147 = vector.broadcast %20 : vector<128x1xf32> to vector<128x128xf32>
    %148 = arith.mulf %142, %147 : vector<128x128xf32>
    %149 = arith.truncf %148 : vector<128x128xf32> to vector<128x128xbf16>
    %c0_92 = arith.constant 0 : index
    %c145_93 = arith.constant 145 : index
    %c0_94 = arith.constant 0 : index
    %150 = vector.load %arg8[%c0_92, %c145_93, %c0_94] : memref<2x288x384xbf16, #tpu.memory_space<vmem>>, vector<1x128x128xbf16>
    %151 = vector.shape_cast %150 : vector<1x128x128xbf16> to vector<128x128xbf16>
    %152 = vector.shape_cast %149 : vector<128x128xbf16> to vector<1x128x128xbf16>
    tpu.vector_store %arg8[%c0_92, %c145_93, %c0_94], %152 {strides = array<i32>} : memref<2x288x384xbf16, #tpu.memory_space<vmem>>, vector<1x128x128xbf16>,
    %153 = vector.broadcast %24 : vector<128x1xf32> to vector<128x128xf32>
    %154 = arith.mulf %142, %153 : vector<128x128xf32>
    %155 = arith.truncf %154 : vector<128x128xf32> to vector<128x128xbf16>
    %c0_95 = arith.constant 0 : index
    %c143_96 = arith.constant 143 : index
    %c256_97 = arith.constant 256 : index
    %156 = vector.load %arg8[%c0_95, %c143_96, %c256_97] : memref<2x288x384xbf16, #tpu.memory_space<vmem>>, vector<1x128x128xbf16>
    %157 = vector.shape_cast %156 : vector<1x128x128xbf16> to vector<128x128xbf16>
    %158 = vector.shape_cast %155 : vector<128x128xbf16> to vector<1x128x128xbf16>
    tpu.vector_store %arg8[%c0_95, %c143_96, %c256_97], %158 {strides = array<i32>} : memref<2x288x384xbf16, #tpu.memory_space<vmem>>, vector<1x128x128xbf16>,
    %c0_98 = arith.constant 0 : index
    %c0_99 = arith.constant 0 : index
    %c0_100 = arith.constant 0 : index
    %c0_101 = arith.constant 0 : index
    %159 = vector.load %arg1[%c0_98, %c0_99, %c0_100, %c0_101] : memref<2x16x16x128xf32, #tpu.memory_space<vmem>>, vector<1x8x16x128xf32>
    %160 = vector.shape_cast %159 : vector<1x8x16x128xf32> to vector<8x16x128xf32>
    %161 = vector.shape_cast %160 : vector<8x16x128xf32> to vector<128x128xf32>
    %c0_102 = arith.constant 0 : index
    %c0_103 = arith.constant 0 : index
    %c0_104 = arith.constant 0 : index
    %162 = vector.load %arg8[%c0_102, %c0_103, %c0_104] : memref<2x288x384xbf16, #tpu.memory_space<vmem>>, vector<1x128x384xbf16>
    %163 = vector.shape_cast %162 : vector<1x128x384xbf16> to vector<128x384xbf16>
    %c0_105 = arith.constant 0 : index
    %c0_106 = arith.constant 0 : index
    %c0_107 = arith.constant 0 : index
    %164 = vector.load %arg4[%c0_105, %c0_106, %c0_107] : memref<3x384x128xbf16, #tpu.memory_space<vmem>>, vector<1x384x128xbf16>
    %165 = vector.shape_cast %164 : vector<1x384x128xbf16> to vector<384x128xbf16>
    %cst_108 = arith.constant dense<0.000000e+00> : vector<128x128xf32>
    %166 = tpu.matmul %163, %165, %cst_108 {dimension_numbers = #tpu.dot_dimension_numbers<[1], [0], [0], [1], [0, 0, 1, 1], [], []>} : vector<128x384xbf16>, vector<384x128xbf16>, vector<128x128xf32> -> vector<128x128xf32>
    %c0_109 = arith.constant 0 : index
    %c16_110 = arith.constant 16 : index
    %c0_111 = arith.constant 0 : index
    %167 = vector.load %arg8[%c0_109, %c16_110, %c0_111] : memref<2x288x384xbf16, #tpu.memory_space<vmem>>, vector<1x128x384xbf16>
    %168 = vector.shape_cast %167 : vector<1x128x384xbf16> to vector<128x384xbf16>
    %c1_112 = arith.constant 1 : index
    %c0_113 = arith.constant 0 : index
    %c0_114 = arith.constant 0 : index
    %169 = vector.load %arg4[%c1_112, %c0_113, %c0_114] : memref<3x384x128xbf16, #tpu.memory_space<vmem>>, vector<1x384x128xbf16>
    %170 = vector.shape_cast %169 : vector<1x384x128xbf16> to vector<384x128xbf16>
    %cst_115 = arith.constant dense<0.000000e+00> : vector<128x128xf32>
    %171 = tpu.matmul %168, %170, %cst_115 {dimension_numbers = #tpu.dot_dimension_numbers<[1], [0], [0], [1], [0, 0, 1, 1], [], []>} : vector<128x384xbf16>, vector<384x128xbf16>, vector<128x128xf32> -> vector<128x128xf32>
    %172 = arith.addf %166, %171 : vector<128x128xf32>
    %c0_116 = arith.constant 0 : index
    %c32_117 = arith.constant 32 : index
    %c0_118 = arith.constant 0 : index
    %173 = vector.load %arg8[%c0_116, %c32_117, %c0_118] : memref<2x288x384xbf16, #tpu.memory_space<vmem>>, vector<1x128x384xbf16>
    %174 = vector.shape_cast %173 : vector<1x128x384xbf16> to vector<128x384xbf16>
    %c2_119 = arith.constant 2 : index
    %c0_120 = arith.constant 0 : index
    %c0_121 = arith.constant 0 : index
    %175 = vector.load %arg4[%c2_119, %c0_120, %c0_121] : memref<3x384x128xbf16, #tpu.memory_space<vmem>>, vector<1x384x128xbf16>
    %176 = vector.shape_cast %175 : vector<1x384x128xbf16> to vector<384x128xbf16>
    %cst_122 = arith.constant dense<0.000000e+00> : vector<128x128xf32>
    %177 = tpu.matmul %174, %176, %cst_122 {dimension_numbers = #tpu.dot_dimension_numbers<[1], [0], [0], [1], [0, 0, 1, 1], [], []>} : vector<128x384xbf16>, vector<384x128xbf16>, vector<128x128xf32> -> vector<128x128xf32>
    %178 = arith.addf %172, %177 : vector<128x128xf32>
    %179 = vector.broadcast %26 : vector<1x128xf32> to vector<128x128xf32>
    %180 = arith.addf %178, %179 : vector<128x128xf32>
    %181 = arith.addf %180, %161 : vector<128x128xf32>
    %182 = vector.shape_cast %181 : vector<128x128xf32> to vector<8x16x128xf32>
    %c0_123 = arith.constant 0 : index
    %c0_124 = arith.constant 0 : index
    %c0_125 = arith.constant 0 : index
    %c0_126 = arith.constant 0 : index
    %183 = vector.load %arg6[%c0_123, %c0_124, %c0_125, %c0_126] : memref<2x16x16x128xf32, #tpu.memory_space<vmem>>, vector<1x8x16x128xf32>
    %184 = vector.shape_cast %183 : vector<1x8x16x128xf32> to vector<8x16x128xf32>
    %185 = vector.shape_cast %182 : vector<8x16x128xf32> to vector<1x8x16x128xf32>
    tpu.vector_store %arg6[%c0_123, %c0_124, %c0_125, %c0_126], %185 {strides = array<i32>} : memref<2x16x16x128xf32, #tpu.memory_space<vmem>>, vector<1x8x16x128xf32>,
    %c0_127 = arith.constant 0 : index
    %c8_128 = arith.constant 8 : index
    %c0_129 = arith.constant 0 : index
    %c0_130 = arith.constant 0 : index
    %186 = vector.load %arg1[%c0_127, %c8_128, %c0_129, %c0_130] : memref<2x16x16x128xf32, #tpu.memory_space<vmem>>, vector<1x8x16x128xf32>
    %187 = vector.shape_cast %186 : vector<1x8x16x128xf32> to vector<8x16x128xf32>
    %188 = vector.shape_cast %187 : vector<8x16x128xf32> to vector<128x128xf32>
    %c0_131 = arith.constant 0 : index
    %c128_132 = arith.constant 128 : index
    %c0_133 = arith.constant 0 : index
    %189 = vector.load %arg8[%c0_131, %c128_132, %c0_133] : memref<2x288x384xbf16, #tpu.memory_space<vmem>>, vector<1x128x384xbf16>
    %190 = vector.shape_cast %189 : vector<1x128x384xbf16> to vector<128x384xbf16>
    %c0_134 = arith.constant 0 : index
    %c0_135 = arith.constant 0 : index
    %c0_136 = arith.constant 0 : index
    %191 = vector.load %arg4[%c0_134, %c0_135, %c0_136] : memref<3x384x128xbf16, #tpu.memory_space<vmem>>, vector<1x384x128xbf16>
    %192 = vector.shape_cast %191 : vector<1x384x128xbf16> to vector<384x128xbf16>
    %cst_137 = arith.constant dense<0.000000e+00> : vector<128x128xf32>
    %193 = tpu.matmul %190, %192, %cst_137 {dimension_numbers = #tpu.dot_dimension_numbers<[1], [0], [0], [1], [0, 0, 1, 1], [], []>} : vector<128x384xbf16>, vector<384x128xbf16>, vector<128x128xf32> -> vector<128x128xf32>
    %c0_138 = arith.constant 0 : index
    %c144_139 = arith.constant 144 : index
    %c0_140 = arith.constant 0 : index
    %194 = vector.load %arg8[%c0_138, %c144_139, %c0_140] : memref<2x288x384xbf16, #tpu.memory_space<vmem>>, vector<1x128x384xbf16>
    %195 = vector.shape_cast %194 : vector<1x128x384xbf16> to vector<128x384xbf16>
    %c1_141 = arith.constant 1 : index
    %c0_142 = arith.constant 0 : index
    %c0_143 = arith.constant 0 : index
    %196 = vector.load %arg4[%c1_141, %c0_142, %c0_143] : memref<3x384x128xbf16, #tpu.memory_space<vmem>>, vector<1x384x128xbf16>
    %197 = vector.shape_cast %196 : vector<1x384x128xbf16> to vector<384x128xbf16>
    %cst_144 = arith.constant dense<0.000000e+00> : vector<128x128xf32>
    %198 = tpu.matmul %195, %197, %cst_144 {dimension_numbers = #tpu.dot_dimension_numbers<[1], [0], [0], [1], [0, 0, 1, 1], [], []>} : vector<128x384xbf16>, vector<384x128xbf16>, vector<128x128xf32> -> vector<128x128xf32>
    %199 = arith.addf %193, %198 : vector<128x128xf32>
    %c0_145 = arith.constant 0 : index
    %c160_146 = arith.constant 160 : index
    %c0_147 = arith.constant 0 : index
    %200 = vector.load %arg8[%c0_145, %c160_146, %c0_147] : memref<2x288x384xbf16, #tpu.memory_space<vmem>>, vector<1x128x384xbf16>
    %201 = vector.shape_cast %200 : vector<1x128x384xbf16> to vector<128x384xbf16>
    %c2_148 = arith.constant 2 : index
    %c0_149 = arith.constant 0 : index
    %c0_150 = arith.constant 0 : index
    %202 = vector.load %arg4[%c2_148, %c0_149, %c0_150] : memref<3x384x128xbf16, #tpu.memory_space<vmem>>, vector<1x384x128xbf16>
    %203 = vector.shape_cast %202 : vector<1x384x128xbf16> to vector<384x128xbf16>
    %cst_151 = arith.constant dense<0.000000e+00> : vector<128x128xf32>
    %204 = tpu.matmul %201, %203, %cst_151 {dimension_numbers = #tpu.dot_dimension_numbers<[1], [0], [0], [1], [0, 0, 1, 1], [], []>} : vector<128x384xbf16>, vector<384x128xbf16>, vector<128x128xf32> -> vector<128x128xf32>
    %205 = arith.addf %199, %204 : vector<128x128xf32>
    %206 = vector.broadcast %26 : vector<1x128xf32> to vector<128x128xf32>
    %207 = arith.addf %205, %206 : vector<128x128xf32>
    %208 = arith.addf %207, %188 : vector<128x128xf32>
    %209 = vector.shape_cast %208 : vector<128x128xf32> to vector<8x16x128xf32>
    %c0_152 = arith.constant 0 : index
    %c8_153 = arith.constant 8 : index
    %c0_154 = arith.constant 0 : index
    %c0_155 = arith.constant 0 : index
    %210 = vector.load %arg6[%c0_152, %c8_153, %c0_154, %c0_155] : memref<2x16x16x128xf32, #tpu.memory_space<vmem>>, vector<1x8x16x128xf32>
    %211 = vector.shape_cast %210 : vector<1x8x16x128xf32> to vector<8x16x128xf32>
    %212 = vector.shape_cast %209 : vector<8x16x128xf32> to vector<1x8x16x128xf32>
    tpu.vector_store %arg6[%c0_152, %c8_153, %c0_154, %c0_155], %212 {strides = array<i32>} : memref<2x16x16x128xf32, #tpu.memory_space<vmem>>, vector<1x8x16x128xf32>,
    %cst_156 = arith.constant 0.000000e+00 : bf16
    %213 = vector.broadcast %cst_156 : bf16 to vector<17x384xbf16>
    %c1_157 = arith.constant 1 : index
    %c0_158 = arith.constant 0 : index
    %c0_159 = arith.constant 0 : index
    %214 = vector.load %arg7[%c1_157, %c0_158, %c0_159] : memref<2x288x384xbf16, #tpu.memory_space<vmem>>, vector<1x17x384xbf16>
    %215 = vector.shape_cast %214 : vector<1x17x384xbf16> to vector<17x384xbf16>
    %216 = vector.shape_cast %213 : vector<17x384xbf16> to vector<1x17x384xbf16>
    tpu.vector_store %arg7[%c1_157, %c0_158, %c0_159], %216 {strides = array<i32>} : memref<2x288x384xbf16, #tpu.memory_space<vmem>>, vector<1x17x384xbf16>,
    %cst_160 = arith.constant 0.000000e+00 : bf16
    %217 = vector.broadcast %cst_160 : bf16 to vector<17x384xbf16>
    %c1_161 = arith.constant 1 : index
    %c271_162 = arith.constant 271 : index
    %c0_163 = arith.constant 0 : index
    %218 = vector.load %arg7[%c1_161, %c271_162, %c0_163] : memref<2x288x384xbf16, #tpu.memory_space<vmem>>, vector<1x17x384xbf16>
    %219 = vector.shape_cast %218 : vector<1x17x384xbf16> to vector<17x384xbf16>
    %220 = vector.shape_cast %217 : vector<17x384xbf16> to vector<1x17x384xbf16>
    tpu.vector_store %arg7[%c1_161, %c271_162, %c0_163], %220 {strides = array<i32>} : memref<2x288x384xbf16, #tpu.memory_space<vmem>>, vector<1x17x384xbf16>,
    %cst_164 = arith.constant 0.000000e+00 : bf16
    %221 = vector.broadcast %cst_164 : bf16 to vector<17x384xbf16>
    %c1_165 = arith.constant 1 : index
    %c0_166 = arith.constant 0 : index
    %c0_167 = arith.constant 0 : index
    %222 = vector.load %arg8[%c1_165, %c0_166, %c0_167] : memref<2x288x384xbf16, #tpu.memory_space<vmem>>, vector<1x17x384xbf16>
    %223 = vector.shape_cast %222 : vector<1x17x384xbf16> to vector<17x384xbf16>
    %224 = vector.shape_cast %221 : vector<17x384xbf16> to vector<1x17x384xbf16>
    tpu.vector_store %arg8[%c1_165, %c0_166, %c0_167], %224 {strides = array<i32>} : memref<2x288x384xbf16, #tpu.memory_space<vmem>>, vector<1x17x384xbf16>,
    %cst_168 = arith.constant 0.000000e+00 : bf16
    %225 = vector.broadcast %cst_168 : bf16 to vector<17x384xbf16>
    %c1_169 = arith.constant 1 : index
    %c271_170 = arith.constant 271 : index
    %c0_171 = arith.constant 0 : index
    %226 = vector.load %arg8[%c1_169, %c271_170, %c0_171] : memref<2x288x384xbf16, #tpu.memory_space<vmem>>, vector<1x17x384xbf16>
    %227 = vector.shape_cast %226 : vector<1x17x384xbf16> to vector<17x384xbf16>
    %228 = vector.shape_cast %225 : vector<17x384xbf16> to vector<1x17x384xbf16>
    tpu.vector_store %arg8[%c1_169, %c271_170, %c0_171], %228 {strides = array<i32>} : memref<2x288x384xbf16, #tpu.memory_space<vmem>>, vector<1x17x384xbf16>,
    %c1_172 = arith.constant 1 : index
    %c0_173 = arith.constant 0 : index
    %c0_174 = arith.constant 0 : index
    %c0_175 = arith.constant 0 : index
    %229 = vector.load %arg1[%c1_172, %c0_173, %c0_174, %c0_175] : memref<2x16x16x128xf32, #tpu.memory_space<vmem>>, vector<1x8x16x128xf32>
    %230 = vector.shape_cast %229 : vector<1x8x16x128xf32> to vector<8x16x128xf32>
    %231 = vector.shape_cast %230 : vector<8x16x128xf32> to vector<128x128xf32>
    %cst_176 = arith.constant 0.000000e+00 : f32
    %232 = vector.broadcast %cst_176 : f32 to vector<128x128xf32>
    %233 = arith.maximumf %231, %232 : vector<128x128xf32>
    %234 = arith.truncf %233 : vector<128x128xf32> to vector<128x128xbf16>
    %c1_177 = arith.constant 1 : index
    %c16_178 = arith.constant 16 : index
    %c128_179 = arith.constant 128 : index
    %235 = vector.load %arg7[%c1_177, %c16_178, %c128_179] : memref<2x288x384xbf16, #tpu.memory_space<vmem>>, vector<1x128x128xbf16>
    %236 = vector.shape_cast %235 : vector<1x128x128xbf16> to vector<128x128xbf16>
    %237 = vector.shape_cast %234 : vector<128x128xbf16> to vector<1x128x128xbf16>
    tpu.vector_store %arg7[%c1_177, %c16_178, %c128_179], %237 {strides = array<i32>} : memref<2x288x384xbf16, #tpu.memory_space<vmem>>, vector<1x128x128xbf16>,
    %238 = vector.broadcast %20 : vector<128x1xf32> to vector<128x128xf32>
    %239 = arith.mulf %233, %238 : vector<128x128xf32>
    %240 = arith.truncf %239 : vector<128x128xf32> to vector<128x128xbf16>
    %c1_180 = arith.constant 1 : index
    %c17_181 = arith.constant 17 : index
    %c0_182 = arith.constant 0 : index
    %241 = vector.load %arg7[%c1_180, %c17_181, %c0_182] : memref<2x288x384xbf16, #tpu.memory_space<vmem>>, vector<1x128x128xbf16>
    %242 = vector.shape_cast %241 : vector<1x128x128xbf16> to vector<128x128xbf16>
    %243 = vector.shape_cast %240 : vector<128x128xbf16> to vector<1x128x128xbf16>
    tpu.vector_store %arg7[%c1_180, %c17_181, %c0_182], %243 {strides = array<i32>} : memref<2x288x384xbf16, #tpu.memory_space<vmem>>, vector<1x128x128xbf16>,
    %244 = vector.broadcast %24 : vector<128x1xf32> to vector<128x128xf32>
    %245 = arith.mulf %233, %244 : vector<128x128xf32>
    %246 = arith.truncf %245 : vector<128x128xf32> to vector<128x128xbf16>
    %c1_183 = arith.constant 1 : index
    %c15_184 = arith.constant 15 : index
    %c256_185 = arith.constant 256 : index
    %247 = vector.load %arg7[%c1_183, %c15_184, %c256_185] : memref<2x288x384xbf16, #tpu.memory_space<vmem>>, vector<1x128x128xbf16>
    %248 = vector.shape_cast %247 : vector<1x128x128xbf16> to vector<128x128xbf16>
    %249 = vector.shape_cast %246 : vector<128x128xbf16> to vector<1x128x128xbf16>
    tpu.vector_store %arg7[%c1_183, %c15_184, %c256_185], %249 {strides = array<i32>} : memref<2x288x384xbf16, #tpu.memory_space<vmem>>, vector<1x128x128xbf16>,
    %c1_186 = arith.constant 1 : index
    %c8_187 = arith.constant 8 : index
    %c0_188 = arith.constant 0 : index
    %c0_189 = arith.constant 0 : index
    %250 = vector.load %arg1[%c1_186, %c8_187, %c0_188, %c0_189] : memref<2x16x16x128xf32, #tpu.memory_space<vmem>>, vector<1x8x16x128xf32>
    %251 = vector.shape_cast %250 : vector<1x8x16x128xf32> to vector<8x16x128xf32>
    %252 = vector.shape_cast %251 : vector<8x16x128xf32> to vector<128x128xf32>
    %cst_190 = arith.constant 0.000000e+00 : f32
    %253 = vector.broadcast %cst_190 : f32 to vector<128x128xf32>
    %254 = arith.maximumf %252, %253 : vector<128x128xf32>
    %255 = arith.truncf %254 : vector<128x128xf32> to vector<128x128xbf16>
    %c1_191 = arith.constant 1 : index
    %c144_192 = arith.constant 144 : index
    %c128_193 = arith.constant 128 : index
    %256 = vector.load %arg7[%c1_191, %c144_192, %c128_193] : memref<2x288x384xbf16, #tpu.memory_space<vmem>>, vector<1x128x128xbf16>
    %257 = vector.shape_cast %256 : vector<1x128x128xbf16> to vector<128x128xbf16>
    %258 = vector.shape_cast %255 : vector<128x128xbf16> to vector<1x128x128xbf16>
    tpu.vector_store %arg7[%c1_191, %c144_192, %c128_193], %258 {strides = array<i32>} : memref<2x288x384xbf16, #tpu.memory_space<vmem>>, vector<1x128x128xbf16>,
    %259 = vector.broadcast %20 : vector<128x1xf32> to vector<128x128xf32>
    %260 = arith.mulf %254, %259 : vector<128x128xf32>
    %261 = arith.truncf %260 : vector<128x128xf32> to vector<128x128xbf16>
    %c1_194 = arith.constant 1 : index
    %c145_195 = arith.constant 145 : index
    %c0_196 = arith.constant 0 : index
    %262 = vector.load %arg7[%c1_194, %c145_195, %c0_196] : memref<2x288x384xbf16, #tpu.memory_space<vmem>>, vector<1x128x128xbf16>
    %263 = vector.shape_cast %262 : vector<1x128x128xbf16> to vector<128x128xbf16>
    %264 = vector.shape_cast %261 : vector<128x128xbf16> to vector<1x128x128xbf16>
    tpu.vector_store %arg7[%c1_194, %c145_195, %c0_196], %264 {strides = array<i32>} : memref<2x288x384xbf16, #tpu.memory_space<vmem>>, vector<1x128x128xbf16>,
    %265 = vector.broadcast %24 : vector<128x1xf32> to vector<128x128xf32>
    %266 = arith.mulf %254, %265 : vector<128x128xf32>
    %267 = arith.truncf %266 : vector<128x128xf32> to vector<128x128xbf16>
    %c1_197 = arith.constant 1 : index
    %c143_198 = arith.constant 143 : index
    %c256_199 = arith.constant 256 : index
    %268 = vector.load %arg7[%c1_197, %c143_198, %c256_199] : memref<2x288x384xbf16, #tpu.memory_space<vmem>>, vector<1x128x128xbf16>
    %269 = vector.shape_cast %268 : vector<1x128x128xbf16> to vector<128x128xbf16>
    %270 = vector.shape_cast %267 : vector<128x128xbf16> to vector<1x128x128xbf16>
    tpu.vector_store %arg7[%c1_197, %c143_198, %c256_199], %270 {strides = array<i32>} : memref<2x288x384xbf16, #tpu.memory_space<vmem>>, vector<1x128x128xbf16>,
    %c1_200 = arith.constant 1 : index
    %c0_201 = arith.constant 0 : index
    %c0_202 = arith.constant 0 : index
    %271 = vector.load %arg7[%c1_200, %c0_201, %c0_202] : memref<2x288x384xbf16, #tpu.memory_space<vmem>>, vector<1x128x384xbf16>
    %272 = vector.shape_cast %271 : vector<1x128x384xbf16> to vector<128x384xbf16>
    %c0_203 = arith.constant 0 : index
    %c0_204 = arith.constant 0 : index
    %c0_205 = arith.constant 0 : index
    %273 = vector.load %arg2[%c0_203, %c0_204, %c0_205] : memref<3x384x128xbf16, #tpu.memory_space<vmem>>, vector<1x384x128xbf16>
    %274 = vector.shape_cast %273 : vector<1x384x128xbf16> to vector<384x128xbf16>
    %cst_206 = arith.constant dense<0.000000e+00> : vector<128x128xf32>
    %275 = tpu.matmul %272, %274, %cst_206 {dimension_numbers = #tpu.dot_dimension_numbers<[1], [0], [0], [1], [0, 0, 1, 1], [], []>} : vector<128x384xbf16>, vector<384x128xbf16>, vector<128x128xf32> -> vector<128x128xf32>
    %c1_207 = arith.constant 1 : index
    %c16_208 = arith.constant 16 : index
    %c0_209 = arith.constant 0 : index
    %276 = vector.load %arg7[%c1_207, %c16_208, %c0_209] : memref<2x288x384xbf16, #tpu.memory_space<vmem>>, vector<1x128x384xbf16>
    %277 = vector.shape_cast %276 : vector<1x128x384xbf16> to vector<128x384xbf16>
    %c1_210 = arith.constant 1 : index
    %c0_211 = arith.constant 0 : index
    %c0_212 = arith.constant 0 : index
    %278 = vector.load %arg2[%c1_210, %c0_211, %c0_212] : memref<3x384x128xbf16, #tpu.memory_space<vmem>>, vector<1x384x128xbf16>
    %279 = vector.shape_cast %278 : vector<1x384x128xbf16> to vector<384x128xbf16>
    %cst_213 = arith.constant dense<0.000000e+00> : vector<128x128xf32>
    %280 = tpu.matmul %277, %279, %cst_213 {dimension_numbers = #tpu.dot_dimension_numbers<[1], [0], [0], [1], [0, 0, 1, 1], [], []>} : vector<128x384xbf16>, vector<384x128xbf16>, vector<128x128xf32> -> vector<128x128xf32>
    %281 = arith.addf %275, %280 : vector<128x128xf32>
    %c1_214 = arith.constant 1 : index
    %c32_215 = arith.constant 32 : index
    %c0_216 = arith.constant 0 : index
    %282 = vector.load %arg7[%c1_214, %c32_215, %c0_216] : memref<2x288x384xbf16, #tpu.memory_space<vmem>>, vector<1x128x384xbf16>
    %283 = vector.shape_cast %282 : vector<1x128x384xbf16> to vector<128x384xbf16>
    %c2_217 = arith.constant 2 : index
    %c0_218 = arith.constant 0 : index
    %c0_219 = arith.constant 0 : index
    %284 = vector.load %arg2[%c2_217, %c0_218, %c0_219] : memref<3x384x128xbf16, #tpu.memory_space<vmem>>, vector<1x384x128xbf16>
    %285 = vector.shape_cast %284 : vector<1x384x128xbf16> to vector<384x128xbf16>
    %cst_220 = arith.constant dense<0.000000e+00> : vector<128x128xf32>
    %286 = tpu.matmul %283, %285, %cst_220 {dimension_numbers = #tpu.dot_dimension_numbers<[1], [0], [0], [1], [0, 0, 1, 1], [], []>} : vector<128x384xbf16>, vector<384x128xbf16>, vector<128x128xf32> -> vector<128x128xf32>
    %287 = arith.addf %281, %286 : vector<128x128xf32>
    %288 = vector.broadcast %25 : vector<1x128xf32> to vector<128x128xf32>
    %289 = arith.addf %287, %288 : vector<128x128xf32>
    %cst_221 = arith.constant 0.000000e+00 : f32
    %290 = vector.broadcast %cst_221 : f32 to vector<128x128xf32>
    %291 = arith.maximumf %289, %290 : vector<128x128xf32>
    %292 = arith.truncf %291 : vector<128x128xf32> to vector<128x128xbf16>
    %c1_222 = arith.constant 1 : index
    %c16_223 = arith.constant 16 : index
    %c128_224 = arith.constant 128 : index
    %293 = vector.load %arg8[%c1_222, %c16_223, %c128_224] : memref<2x288x384xbf16, #tpu.memory_space<vmem>>, vector<1x128x128xbf16>
    %294 = vector.shape_cast %293 : vector<1x128x128xbf16> to vector<128x128xbf16>
    %295 = vector.shape_cast %292 : vector<128x128xbf16> to vector<1x128x128xbf16>
    tpu.vector_store %arg8[%c1_222, %c16_223, %c128_224], %295 {strides = array<i32>} : memref<2x288x384xbf16, #tpu.memory_space<vmem>>, vector<1x128x128xbf16>,
    %296 = vector.broadcast %20 : vector<128x1xf32> to vector<128x128xf32>
    %297 = arith.mulf %291, %296 : vector<128x128xf32>
    %298 = arith.truncf %297 : vector<128x128xf32> to vector<128x128xbf16>
    %c1_225 = arith.constant 1 : index
    %c17_226 = arith.constant 17 : index
    %c0_227 = arith.constant 0 : index
    %299 = vector.load %arg8[%c1_225, %c17_226, %c0_227] : memref<2x288x384xbf16, #tpu.memory_space<vmem>>, vector<1x128x128xbf16>
    %300 = vector.shape_cast %299 : vector<1x128x128xbf16> to vector<128x128xbf16>
    %301 = vector.shape_cast %298 : vector<128x128xbf16> to vector<1x128x128xbf16>
    tpu.vector_store %arg8[%c1_225, %c17_226, %c0_227], %301 {strides = array<i32>} : memref<2x288x384xbf16, #tpu.memory_space<vmem>>, vector<1x128x128xbf16>,
    %302 = vector.broadcast %24 : vector<128x1xf32> to vector<128x128xf32>
    %303 = arith.mulf %291, %302 : vector<128x128xf32>
    %304 = arith.truncf %303 : vector<128x128xf32> to vector<128x128xbf16>
    %c1_228 = arith.constant 1 : index
    %c15_229 = arith.constant 15 : index
    %c256_230 = arith.constant 256 : index
    %305 = vector.load %arg8[%c1_228, %c15_229, %c256_230] : memref<2x288x384xbf16, #tpu.memory_space<vmem>>, vector<1x128x128xbf16>
    %306 = vector.shape_cast %305 : vector<1x128x128xbf16> to vector<128x128xbf16>
    %307 = vector.shape_cast %304 : vector<128x128xbf16> to vector<1x128x128xbf16>
    tpu.vector_store %arg8[%c1_228, %c15_229, %c256_230], %307 {strides = array<i32>} : memref<2x288x384xbf16, #tpu.memory_space<vmem>>, vector<1x128x128xbf16>,
    %c1_231 = arith.constant 1 : index
    %c128_232 = arith.constant 128 : index
    %c0_233 = arith.constant 0 : index
    %308 = vector.load %arg7[%c1_231, %c128_232, %c0_233] : memref<2x288x384xbf16, #tpu.memory_space<vmem>>, vector<1x128x384xbf16>
    %309 = vector.shape_cast %308 : vector<1x128x384xbf16> to vector<128x384xbf16>
    %c0_234 = arith.constant 0 : index
    %c0_235 = arith.constant 0 : index
    %c0_236 = arith.constant 0 : index
    %310 = vector.load %arg2[%c0_234, %c0_235, %c0_236] : memref<3x384x128xbf16, #tpu.memory_space<vmem>>, vector<1x384x128xbf16>
    %311 = vector.shape_cast %310 : vector<1x384x128xbf16> to vector<384x128xbf16>
    %cst_237 = arith.constant dense<0.000000e+00> : vector<128x128xf32>
    %312 = tpu.matmul %309, %311, %cst_237 {dimension_numbers = #tpu.dot_dimension_numbers<[1], [0], [0], [1], [0, 0, 1, 1], [], []>} : vector<128x384xbf16>, vector<384x128xbf16>, vector<128x128xf32> -> vector<128x128xf32>
    %c1_238 = arith.constant 1 : index
    %c144_239 = arith.constant 144 : index
    %c0_240 = arith.constant 0 : index
    %313 = vector.load %arg7[%c1_238, %c144_239, %c0_240] : memref<2x288x384xbf16, #tpu.memory_space<vmem>>, vector<1x128x384xbf16>
    %314 = vector.shape_cast %313 : vector<1x128x384xbf16> to vector<128x384xbf16>
    %c1_241 = arith.constant 1 : index
    %c0_242 = arith.constant 0 : index
    %c0_243 = arith.constant 0 : index
    %315 = vector.load %arg2[%c1_241, %c0_242, %c0_243] : memref<3x384x128xbf16, #tpu.memory_space<vmem>>, vector<1x384x128xbf16>
    %316 = vector.shape_cast %315 : vector<1x384x128xbf16> to vector<384x128xbf16>
    %cst_244 = arith.constant dense<0.000000e+00> : vector<128x128xf32>
    %317 = tpu.matmul %314, %316, %cst_244 {dimension_numbers = #tpu.dot_dimension_numbers<[1], [0], [0], [1], [0, 0, 1, 1], [], []>} : vector<128x384xbf16>, vector<384x128xbf16>, vector<128x128xf32> -> vector<128x128xf32>
    %318 = arith.addf %312, %317 : vector<128x128xf32>
    %c1_245 = arith.constant 1 : index
    %c160_246 = arith.constant 160 : index
    %c0_247 = arith.constant 0 : index
    %319 = vector.load %arg7[%c1_245, %c160_246, %c0_247] : memref<2x288x384xbf16, #tpu.memory_space<vmem>>, vector<1x128x384xbf16>
    %320 = vector.shape_cast %319 : vector<1x128x384xbf16> to vector<128x384xbf16>
    %c2_248 = arith.constant 2 : index
    %c0_249 = arith.constant 0 : index
    %c0_250 = arith.constant 0 : index
    %321 = vector.load %arg2[%c2_248, %c0_249, %c0_250] : memref<3x384x128xbf16, #tpu.memory_space<vmem>>, vector<1x384x128xbf16>
    %322 = vector.shape_cast %321 : vector<1x384x128xbf16> to vector<384x128xbf16>
    %cst_251 = arith.constant dense<0.000000e+00> : vector<128x128xf32>
    %323 = tpu.matmul %320, %322, %cst_251 {dimension_numbers = #tpu.dot_dimension_numbers<[1], [0], [0], [1], [0, 0, 1, 1], [], []>} : vector<128x384xbf16>, vector<384x128xbf16>, vector<128x128xf32> -> vector<128x128xf32>
    %324 = arith.addf %318, %323 : vector<128x128xf32>
    %325 = vector.broadcast %25 : vector<1x128xf32> to vector<128x128xf32>
    %326 = arith.addf %324, %325 : vector<128x128xf32>
    %cst_252 = arith.constant 0.000000e+00 : f32
    %327 = vector.broadcast %cst_252 : f32 to vector<128x128xf32>
    %328 = arith.maximumf %326, %327 : vector<128x128xf32>
    %329 = arith.truncf %328 : vector<128x128xf32> to vector<128x128xbf16>
    %c1_253 = arith.constant 1 : index
    %c144_254 = arith.constant 144 : index
    %c128_255 = arith.constant 128 : index
    %330 = vector.load %arg8[%c1_253, %c144_254, %c128_255] : memref<2x288x384xbf16, #tpu.memory_space<vmem>>, vector<1x128x128xbf16>
    %331 = vector.shape_cast %330 : vector<1x128x128xbf16> to vector<128x128xbf16>
    %332 = vector.shape_cast %329 : vector<128x128xbf16> to vector<1x128x128xbf16>
    tpu.vector_store %arg8[%c1_253, %c144_254, %c128_255], %332 {strides = array<i32>} : memref<2x288x384xbf16, #tpu.memory_space<vmem>>, vector<1x128x128xbf16>,
    %333 = vector.broadcast %20 : vector<128x1xf32> to vector<128x128xf32>
    %334 = arith.mulf %328, %333 : vector<128x128xf32>
    %335 = arith.truncf %334 : vector<128x128xf32> to vector<128x128xbf16>
    %c1_256 = arith.constant 1 : index
    %c145_257 = arith.constant 145 : index
    %c0_258 = arith.constant 0 : index
    %336 = vector.load %arg8[%c1_256, %c145_257, %c0_258] : memref<2x288x384xbf16, #tpu.memory_space<vmem>>, vector<1x128x128xbf16>
    %337 = vector.shape_cast %336 : vector<1x128x128xbf16> to vector<128x128xbf16>
    %338 = vector.shape_cast %335 : vector<128x128xbf16> to vector<1x128x128xbf16>
    tpu.vector_store %arg8[%c1_256, %c145_257, %c0_258], %338 {strides = array<i32>} : memref<2x288x384xbf16, #tpu.memory_space<vmem>>, vector<1x128x128xbf16>,
    %339 = vector.broadcast %24 : vector<128x1xf32> to vector<128x128xf32>
    %340 = arith.mulf %328, %339 : vector<128x128xf32>
    %341 = arith.truncf %340 : vector<128x128xf32> to vector<128x128xbf16>
    %c1_259 = arith.constant 1 : index
    %c143_260 = arith.constant 143 : index
    %c256_261 = arith.constant 256 : index
    %342 = vector.load %arg8[%c1_259, %c143_260, %c256_261] : memref<2x288x384xbf16, #tpu.memory_space<vmem>>, vector<1x128x128xbf16>
    %343 = vector.shape_cast %342 : vector<1x128x128xbf16> to vector<128x128xbf16>
    %344 = vector.shape_cast %341 : vector<128x128xbf16> to vector<1x128x128xbf16>
    tpu.vector_store %arg8[%c1_259, %c143_260, %c256_261], %344 {strides = array<i32>} : memref<2x288x384xbf16, #tpu.memory_space<vmem>>, vector<1x128x128xbf16>,
    %c1_262 = arith.constant 1 : index
    %c0_263 = arith.constant 0 : index
    %c0_264 = arith.constant 0 : index
    %c0_265 = arith.constant 0 : index
    %345 = vector.load %arg1[%c1_262, %c0_263, %c0_264, %c0_265] : memref<2x16x16x128xf32, #tpu.memory_space<vmem>>, vector<1x8x16x128xf32>
    %346 = vector.shape_cast %345 : vector<1x8x16x128xf32> to vector<8x16x128xf32>
    %347 = vector.shape_cast %346 : vector<8x16x128xf32> to vector<128x128xf32>
    %c1_266 = arith.constant 1 : index
    %c0_267 = arith.constant 0 : index
    %c0_268 = arith.constant 0 : index
    %348 = vector.load %arg8[%c1_266, %c0_267, %c0_268] : memref<2x288x384xbf16, #tpu.memory_space<vmem>>, vector<1x128x384xbf16>
    %349 = vector.shape_cast %348 : vector<1x128x384xbf16> to vector<128x384xbf16>
    %c0_269 = arith.constant 0 : index
    %c0_270 = arith.constant 0 : index
    %c0_271 = arith.constant 0 : index
    %350 = vector.load %arg4[%c0_269, %c0_270, %c0_271] : memref<3x384x128xbf16, #tpu.memory_space<vmem>>, vector<1x384x128xbf16>
    %351 = vector.shape_cast %350 : vector<1x384x128xbf16> to vector<384x128xbf16>
    %cst_272 = arith.constant dense<0.000000e+00> : vector<128x128xf32>
    %352 = tpu.matmul %349, %351, %cst_272 {dimension_numbers = #tpu.dot_dimension_numbers<[1], [0], [0], [1], [0, 0, 1, 1], [], []>} : vector<128x384xbf16>, vector<384x128xbf16>, vector<128x128xf32> -> vector<128x128xf32>
    %c1_273 = arith.constant 1 : index
    %c16_274 = arith.constant 16 : index
    %c0_275 = arith.constant 0 : index
    %353 = vector.load %arg8[%c1_273, %c16_274, %c0_275] : memref<2x288x384xbf16, #tpu.memory_space<vmem>>, vector<1x128x384xbf16>
    %354 = vector.shape_cast %353 : vector<1x128x384xbf16> to vector<128x384xbf16>
    %c1_276 = arith.constant 1 : index
    %c0_277 = arith.constant 0 : index
    %c0_278 = arith.constant 0 : index
    %355 = vector.load %arg4[%c1_276, %c0_277, %c0_278] : memref<3x384x128xbf16, #tpu.memory_space<vmem>>, vector<1x384x128xbf16>
    %356 = vector.shape_cast %355 : vector<1x384x128xbf16> to vector<384x128xbf16>
    %cst_279 = arith.constant dense<0.000000e+00> : vector<128x128xf32>
    %357 = tpu.matmul %354, %356, %cst_279 {dimension_numbers = #tpu.dot_dimension_numbers<[1], [0], [0], [1], [0, 0, 1, 1], [], []>} : vector<128x384xbf16>, vector<384x128xbf16>, vector<128x128xf32> -> vector<128x128xf32>
    %358 = arith.addf %352, %357 : vector<128x128xf32>
    %c1_280 = arith.constant 1 : index
    %c32_281 = arith.constant 32 : index
    %c0_282 = arith.constant 0 : index
    %359 = vector.load %arg8[%c1_280, %c32_281, %c0_282] : memref<2x288x384xbf16, #tpu.memory_space<vmem>>, vector<1x128x384xbf16>
    %360 = vector.shape_cast %359 : vector<1x128x384xbf16> to vector<128x384xbf16>
    %c2_283 = arith.constant 2 : index
    %c0_284 = arith.constant 0 : index
    %c0_285 = arith.constant 0 : index
    %361 = vector.load %arg4[%c2_283, %c0_284, %c0_285] : memref<3x384x128xbf16, #tpu.memory_space<vmem>>, vector<1x384x128xbf16>
    %362 = vector.shape_cast %361 : vector<1x384x128xbf16> to vector<384x128xbf16>
    %cst_286 = arith.constant dense<0.000000e+00> : vector<128x128xf32>
    %363 = tpu.matmul %360, %362, %cst_286 {dimension_numbers = #tpu.dot_dimension_numbers<[1], [0], [0], [1], [0, 0, 1, 1], [], []>} : vector<128x384xbf16>, vector<384x128xbf16>, vector<128x128xf32> -> vector<128x128xf32>
    %364 = arith.addf %358, %363 : vector<128x128xf32>
    %365 = vector.broadcast %26 : vector<1x128xf32> to vector<128x128xf32>
    %366 = arith.addf %364, %365 : vector<128x128xf32>
    %367 = arith.addf %366, %347 : vector<128x128xf32>
    %368 = vector.shape_cast %367 : vector<128x128xf32> to vector<8x16x128xf32>
    %c1_287 = arith.constant 1 : index
    %c0_288 = arith.constant 0 : index
    %c0_289 = arith.constant 0 : index
    %c0_290 = arith.constant 0 : index
    %369 = vector.load %arg6[%c1_287, %c0_288, %c0_289, %c0_290] : memref<2x16x16x128xf32, #tpu.memory_space<vmem>>, vector<1x8x16x128xf32>
    %370 = vector.shape_cast %369 : vector<1x8x16x128xf32> to vector<8x16x128xf32>
    %371 = vector.shape_cast %368 : vector<8x16x128xf32> to vector<1x8x16x128xf32>
    tpu.vector_store %arg6[%c1_287, %c0_288, %c0_289, %c0_290], %371 {strides = array<i32>} : memref<2x16x16x128xf32, #tpu.memory_space<vmem>>, vector<1x8x16x128xf32>,
    %c1_291 = arith.constant 1 : index
    %c8_292 = arith.constant 8 : index
    %c0_293 = arith.constant 0 : index
    %c0_294 = arith.constant 0 : index
    %372 = vector.load %arg1[%c1_291, %c8_292, %c0_293, %c0_294] : memref<2x16x16x128xf32, #tpu.memory_space<vmem>>, vector<1x8x16x128xf32>
    %373 = vector.shape_cast %372 : vector<1x8x16x128xf32> to vector<8x16x128xf32>
    %374 = vector.shape_cast %373 : vector<8x16x128xf32> to vector<128x128xf32>
    %c1_295 = arith.constant 1 : index
    %c128_296 = arith.constant 128 : index
    %c0_297 = arith.constant 0 : index
    %375 = vector.load %arg8[%c1_295, %c128_296, %c0_297] : memref<2x288x384xbf16, #tpu.memory_space<vmem>>, vector<1x128x384xbf16>
    %376 = vector.shape_cast %375 : vector<1x128x384xbf16> to vector<128x384xbf16>
    %c0_298 = arith.constant 0 : index
    %c0_299 = arith.constant 0 : index
    %c0_300 = arith.constant 0 : index
    %377 = vector.load %arg4[%c0_298, %c0_299, %c0_300] : memref<3x384x128xbf16, #tpu.memory_space<vmem>>, vector<1x384x128xbf16>
    %378 = vector.shape_cast %377 : vector<1x384x128xbf16> to vector<384x128xbf16>
    %cst_301 = arith.constant dense<0.000000e+00> : vector<128x128xf32>
    %379 = tpu.matmul %376, %378, %cst_301 {dimension_numbers = #tpu.dot_dimension_numbers<[1], [0], [0], [1], [0, 0, 1, 1], [], []>} : vector<128x384xbf16>, vector<384x128xbf16>, vector<128x128xf32> -> vector<128x128xf32>
    %c1_302 = arith.constant 1 : index
    %c144_303 = arith.constant 144 : index
    %c0_304 = arith.constant 0 : index
    %380 = vector.load %arg8[%c1_302, %c144_303, %c0_304] : memref<2x288x384xbf16, #tpu.memory_space<vmem>>, vector<1x128x384xbf16>
    %381 = vector.shape_cast %380 : vector<1x128x384xbf16> to vector<128x384xbf16>
    %c1_305 = arith.constant 1 : index
    %c0_306 = arith.constant 0 : index
    %c0_307 = arith.constant 0 : index
    %382 = vector.load %arg4[%c1_305, %c0_306, %c0_307] : memref<3x384x128xbf16, #tpu.memory_space<vmem>>, vector<1x384x128xbf16>
    %383 = vector.shape_cast %382 : vector<1x384x128xbf16> to vector<384x128xbf16>
    %cst_308 = arith.constant dense<0.000000e+00> : vector<128x128xf32>
    %384 = tpu.matmul %381, %383, %cst_308 {dimension_numbers = #tpu.dot_dimension_numbers<[1], [0], [0], [1], [0, 0, 1, 1], [], []>} : vector<128x384xbf16>, vector<384x128xbf16>, vector<128x128xf32> -> vector<128x128xf32>
    %385 = arith.addf %379, %384 : vector<128x128xf32>
    %c1_309 = arith.constant 1 : index
    %c160_310 = arith.constant 160 : index
    %c0_311 = arith.constant 0 : index
    %386 = vector.load %arg8[%c1_309, %c160_310, %c0_311] : memref<2x288x384xbf16, #tpu.memory_space<vmem>>, vector<1x128x384xbf16>
    %387 = vector.shape_cast %386 : vector<1x128x384xbf16> to vector<128x384xbf16>
    %c2_312 = arith.constant 2 : index
    %c0_313 = arith.constant 0 : index
    %c0_314 = arith.constant 0 : index
    %388 = vector.load %arg4[%c2_312, %c0_313, %c0_314] : memref<3x384x128xbf16, #tpu.memory_space<vmem>>, vector<1x384x128xbf16>
    %389 = vector.shape_cast %388 : vector<1x384x128xbf16> to vector<384x128xbf16>
    %cst_315 = arith.constant dense<0.000000e+00> : vector<128x128xf32>
    %390 = tpu.matmul %387, %389, %cst_315 {dimension_numbers = #tpu.dot_dimension_numbers<[1], [0], [0], [1], [0, 0, 1, 1], [], []>} : vector<128x384xbf16>, vector<384x128xbf16>, vector<128x128xf32> -> vector<128x128xf32>
    %391 = arith.addf %385, %390 : vector<128x128xf32>
    %392 = vector.broadcast %26 : vector<1x128xf32> to vector<128x128xf32>
    %393 = arith.addf %391, %392 : vector<128x128xf32>
    %394 = arith.addf %393, %374 : vector<128x128xf32>
    %395 = vector.shape_cast %394 : vector<128x128xf32> to vector<8x16x128xf32>
    %c1_316 = arith.constant 1 : index
    %c8_317 = arith.constant 8 : index
    %c0_318 = arith.constant 0 : index
    %c0_319 = arith.constant 0 : index
    %396 = vector.load %arg6[%c1_316, %c8_317, %c0_318, %c0_319] : memref<2x16x16x128xf32, #tpu.memory_space<vmem>>, vector<1x8x16x128xf32>
    %397 = vector.shape_cast %396 : vector<1x8x16x128xf32> to vector<8x16x128xf32>
    %398 = vector.shape_cast %395 : vector<8x16x128xf32> to vector<1x8x16x128xf32>
    tpu.vector_store %arg6[%c1_316, %c8_317, %c0_318, %c0_319], %398 {strides = array<i32>} : memref<2x16x16x128xf32, #tpu.memory_space<vmem>>, vector<1x8x16x128xf32>,
    return
  }
  func.func @transform_0(%arg0: i32) -> (i32, i32, i32, i32) {
    %c0_i32 = arith.constant 0 : i32
    %c0_i32_0 = arith.constant 0 : i32
    %c0_i32_1 = arith.constant 0 : i32
    %c0_i32_2 = arith.constant 0 : i32
    return %arg0, %c0_i32, %c0_i32_0, %c0_i32_1 : i32, i32, i32, i32
  }
  func.func @transform_1(%arg0: i32) -> (i32, i32, i32) {
    %c0_i32 = arith.constant 0 : i32
    %c0_i32_0 = arith.constant 0 : i32
    %c0_i32_1 = arith.constant 0 : i32
    %c0_i32_2 = arith.constant 0 : i32
    return %c0_i32, %c0_i32_0, %c0_i32_1 : i32, i32, i32
  }
  func.func @transform_2(%arg0: i32) -> (i32, i32) {
    %c0_i32 = arith.constant 0 : i32
    %c0_i32_0 = arith.constant 0 : i32
    %c0_i32_1 = arith.constant 0 : i32
    return %c0_i32, %c0_i32_0 : i32, i32
  }
  func.func @transform_3(%arg0: i32) -> (i32, i32, i32) {
    %c0_i32 = arith.constant 0 : i32
    %c0_i32_0 = arith.constant 0 : i32
    %c0_i32_1 = arith.constant 0 : i32
    %c0_i32_2 = arith.constant 0 : i32
    return %c0_i32, %c0_i32_0, %c0_i32_1 : i32, i32, i32
  }
  func.func @transform_4(%arg0: i32) -> (i32, i32) {
    %c0_i32 = arith.constant 0 : i32
    %c0_i32_0 = arith.constant 0 : i32
    %c0_i32_1 = arith.constant 0 : i32
    return %c0_i32, %c0_i32_0 : i32, i32
  }
  func.func @transform_5(%arg0: i32) -> (i32, i32, i32, i32) {
    %c0_i32 = arith.constant 0 : i32
    %c0_i32_0 = arith.constant 0 : i32
    %c0_i32_1 = arith.constant 0 : i32
    %c0_i32_2 = arith.constant 0 : i32
    return %arg0, %c0_i32, %c0_i32_0, %c0_i32_1 : i32, i32, i32, i32
  }
}

</mosaic_0001>

<bundles_post_ra>
// kernel: resblock_pallas.1
= control target key start
LH: loop header
LB: loop body
LE: loop exit
PB: predicated region body
PF: predicated region fallthrough
CT: control target
= control target key end

     0   :  { %10 = vsyncpa [#allocation5], 0  ;;  %s21493_s0 = inlined_call_operand.hbm [shape: f32[8,16,16,128], index: 0, kind: input, shape index: {}]   ;;  %s21494_s1 = inlined_call_operand.hbm [shape: bf16[3,384,128], index: 1, kind: input, shape index: {}]   ;;  %s21495_s2 = inlined_call_operand.vmem [shape: f32[1,128], index: 2, kind: input, shape index: {}]   ;;  %s21496_s3 = inlined_call_operand.hbm [shape: bf16[3,384,128], index: 3, kind: input, shape index: {}]   ;;  %s21497_s4 = inlined_call_operand.vmem [shape: f32[1,128], index: 4, kind: input, shape index: {}]   ;;  %s21498_s5 = inlined_call_operand.hbm [shape: f32[8,16,16,128], index: 5, kind: output, shape index: {}]  }
   0x1   :  { %12 = vsyncpa [#allocation5 + $0x1], 0 }
   0x2   :  { %13 = vsyncpa [#allocation8], 0 }
   0x3   :  { %14 = vsyncpa [#allocation6], 0 }
   0x4   :  { %16 = vsyncpa [#allocation6 + $0x1], 0  ;;  %s18057_s18 = smov 0   ;;  %s18059_s19 = smov 0  }
   0x5   :  { %s18061_s20 = smov 0   ;;  %s18063_s21 = smov 0  }
   0x6 LB: > { %s18078_s22 = sadd.s32 4294967295, %s18013_s21   ;;  %s13005_s23 = sadd.s32 4294967294, %s18013_s21   ;;  %s18013_s21 = sphi %s18063_s21, %s21739_s21   ;;  %s18009_s20 = sphi %s18061_s20, %s21738_s20   ;;  %s18005_s19 = sphi %s18059_s19, %s21737_s19   ;;  %s18001_s18 = sphi %s18057_s18, %s21736_s18  }
   0x7   : > { %p42_p0 = scmp.ne.s32.totalorder %s18005_s19, %s18001_s18  ;;  %p21499_p1 = scmp.eq.s32.totalorder %s18078_s22, 0 }
   0x8   : > { %p156_p3 = scmp.eq.s32.totalorder %s13005_s23, 3  ;;  %p13006_p5 = scmp.ge.s32.totalorder %s18013_s21, 1 }
   0x9   : > { %p18087_p4 = por %p21499_p1, %p42_p0  ;;  %p163_p7 = scmp.lt.s32.totalorder %s18013_s21, 5 }
   0xa   : > { %p18092_p6 = por %p156_p3, %p42_p0  ;;  %s18015_s27 = smov [#allocation7]  }
   0xb   : > { %s21568_s24 = scalar_select %p18087_p4, 1, 0 }
   0xc   : > { %s21569_s25 = scalar_select %p18092_p6, 1, 0 }
   0xd   : > { %p18097_p8 = pnand %p13006_p5, %p163_p7  ;;  %s175_s28 = sshll.u32 %s18015_s27, 4  ;;  %s176_s28 = int_to_ptr.vmem [resolvable:$true] %s175_s28 }
   0xe   : > { %s18016_s30 = smov [#allocation9]   ;;  %s17857_s9 = scalar_lea.hbm %s21494_s1, 9216 }
   0xf   : > { %s21570_s26 = scalar_select %p18097_p8, 1, 0 }
  0x10   : > { %p17107_p9 = pneg %p18097_p8  ;;  %s191_s6 = sshll.u32 %s18016_s30, 4  ;;  %s18109_s6 = int_to_ptr.vmem [resolvable:$true] %s191_s6 }
  0x11   : > { %p17858_p11 = scmp.ne.s32.totalorder %s21494_s1, %s17857_s9  ;;  %p17864_p3 = scmp.lt.u32.totalorder %s17857_s9, %s21494_s1 }
  0x12   : > { %p18105_p10 = pnand %p17107_p9, %p21499_p1 }
  0x14   : > { %p17859_p12 = pneg %p18105_p10 }
  0x16   : > { %p17860_p13 = pnand %p17859_p12, %p17858_p11 }
  0x18   : > { %p17861_p0 = pneg %p17860_p13 }
  0x1a   : > { %p17866_p5 = pnand %p17864_p3, %p17861_p0 }
  0x1c   : > { %17869 = shalt.err (!%p17866_p5)
}
  0x1d   : > { %s17870_s14 = scalar_lea.vmem %s176_s28, 9216  ;;  %p17878_p2 = scmp.lt.s32.totalorder %s176_s28, %s176_s28 }
  0x1e   : > { %p17871_p7 = scmp.ne.s32.totalorder %s176_s28, %s17870_s14  ;;  %p17879_p6 = scmp.lt.s32.totalorder %s17870_s14, %s17870_s14 }
  0x20   : > { %p17873_p9 = pnand %p17871_p7, %p17859_p12  ;;  %p17880_p4 = por %p17879_p6, %p17878_p2 }
  0x22   : > { %p17874_p1 = pneg %p17873_p9 }
  0x24   : > { %p17881_p8 = pnand %p17880_p4, %p17874_p1 }
  0x26   : > { %17884 = shalt.err (!%p17881_p8)
}
  0x27   : > { %s18017_s15 = smov 64   ;;  %s18018_s16 = smov 4  }
  0x28   : > { %17110 = dma.hbm_to_vmem [thread:$0]  (!%p18105_p10), %s21494_s1, 9216, %s176_s28, [#allocation8], %s18017_s15, %s18017_s15, %s18018_s16  }
  0x29   : > { %s17885_s7 = scalar_lea.hbm %s21496_s3, 9216 }
  0x2a   : > { %p17886_p11 = scmp.ne.s32.totalorder %s21496_s3, %s17885_s7  ;;  %p17892_p4 = scmp.lt.u32.totalorder %s17885_s7, %s21496_s3 }
  0x2c   : > { %p17888_p1 = pnand %p17886_p11, %p17859_p12 }
  0x2e   : > { %p17889_p2 = pneg %p17888_p1 }
  0x30   : > { %p17894_p6 = pnand %p17892_p4, %p17889_p2 }
  0x32   : > { %17897 = shalt.err (!%p17894_p6)
}
  0x33   : > { %s17898_s28 = scalar_lea.vmem %s18109_s6, 9216  ;;  %p17906_p3 = scmp.lt.s32.totalorder %s18109_s6, %s18109_s6 }
  0x34   : > { %p17899_p8 = scmp.ne.s32.totalorder %s18109_s6, %s17898_s28  ;;  %p17907_p5 = scmp.lt.s32.totalorder %s17898_s28, %s17898_s28 }
  0x36   : > { %p17901_p13 = pnand %p17899_p8, %p17859_p12  ;;  %p17908_p7 = por %p17907_p5, %p17906_p3 }
  0x38   : > { %p17902_p0 = pneg %p17901_p13 }
  0x3a   : > { %p17909_p9 = pnand %p17908_p7, %p17902_p0 }
  0x3c   : > { %17912 = shalt.err (!%p17909_p9)
}
  0x3d   : > { %17113 = dma.hbm_to_vmem [thread:$0]  (!%p18105_p10), %s21496_s3, 9216, %s18109_s6, [#allocation8], %s18017_s15, %s18017_s15, %s18018_s16  }
  0x3e   : > { %s18159_s14 = sadd.s32 1, %s18013_s21   ;;  %s29_s29 = sadd.s32 1, %s18009_s20 }
  0x3f   : > { %s26_s17 = ssub.s32 %s18013_s21, %s18159_s14  ;;  %p36_p12 = scmp.ne.s32.totalorder %s18009_s20, %s18005_s19 }
  0x40   : > { %p27_p11 = scmp.eq.s32.totalorder %s26_s17, 0  ;;  %p37_p1 = scmp.eq.s32.totalorder %s18013_s21, 0 }
  0x41   : > { %p21572_p2 = scmp.eq.s32.totalorder %s18078_s22, 3  ;;  %p17124_p6 = scmp.lt.s32.totalorder %s18013_s21, 4 }
  0x42   : > { %s18175_s27 = scalar_select %p27_p11, %s18009_s20, %s29_s29  }
  0x43   : > { %p18169_p4 = por %p21572_p2, %p36_p12  ;;  %p38_p8 = por %p37_p1, %p36_p12 }
  0x44   : > { %s208_s30 = sand.u32 1, %s18009_s20   ;;  %s13764_s6 = sshll.u32 %s18013_s21, 13 }
  0x45   : > { %s13010_s7 = sshll.u32 %s208_s30, 9  ;;  %s18182_s8 = scalar_lea.hbm %s21493_s0, %s13764_s6 }
  0x46   : > { %s212_s9 = scalar_lea.vmem [#allocation4], %s13010_s7  ;;  %p18186_p10 = pnand %p17124_p6, %p38_p8 }
  0x47   : > { %s220_s10 = sshll.u32 %s212_s9, 4  ;;  %s18190_s28 = scalar_lea.sflag [#allocation5], %s208_s30  ;;  %s18184_s10 = int_to_ptr.vmem [resolvable:$true] %s220_s10 }
  0x48   : > { %s17913_s12 = scalar_lea.hbm %s18182_s8, 8192  ;;  %p17915_p0 = pneg %p18186_p10 }
  0x49   : > { %p17914_p13 = scmp.ne.s32.totalorder %s18182_s8, %s17913_s12  ;;  %s17918_s17 = scalar_lea.hbm %s21493_s0, 32768 }
  0x4a   : > { %p17919_p7 = scmp.lt.u32.totalorder %s18182_s8, %s21493_s0  ;;  %p17920_p9 = scmp.lt.u32.totalorder %s17918_s17, %s17913_s12 }
  0x4b   : > { %p17916_p3 = pnand %p17915_p0, %p17914_p13  ;;  %p17922_p11 = scmp.lt.u32.totalorder %s17913_s12, %s18182_s8 }
  0x4c   : > { %p17921_p12 = por %p17920_p9, %p17919_p7 }
  0x4d   : > { %p17917_p5 = pneg %p17916_p3 }
  0x4e   : > { %p17923_p1 = por %p17922_p11, %p17921_p12 }
  0x50   : > { %p17924_p2 = pnand %p17923_p1, %p17917_p5 }
  0x52   : > { %17927 = shalt.err (!%p17924_p2)
}
  0x53   : > { %s17928_s30 = scalar_lea.vmem %s18184_s10, 8192  ;;  %s18019_s15 = smov [#allocation4]  }
  0x54   : > { %p17929_p6 = scmp.ne.s32.totalorder %s18184_s10, %s17928_s30  ;;  %s17933_s16 = sshll.u32 %s18019_s15, 4  ;;  %s17934_s16 = int_to_ptr.vmem [resolvable:$false] %s17933_s16 }
  0x55   : > { %s17935_s9 = scalar_lea.vmem %s17934_s16, 16384  ;;  %p17936_p3 = scmp.lt.s32.totalorder %s18184_s10, %s17934_s16 }
  0x56   : > { %p17931_p8 = pnand %p17929_p6, %p17915_p0  ;;  %p17937_p7 = scmp.lt.s32.totalorder %s17935_s9, %s17928_s30 }
  0x58   : > { %p17932_p13 = pneg %p17931_p8  ;;  %p17938_p9 = por %p17937_p7, %p17936_p3 }
  0x5a   : > { %p17939_p12 = pnand %p17938_p9, %p17932_p13 }
  0x5c   : > { %17942 = shalt.err (!%p17939_p12)
}
  0x5d   : > { %s18020_s12 = smov 128   ;;  %s18021_s13 = smov 8  }
  0x5e   : > { %17117 = dma.hbm_to_vmem [thread:$0]  (!%p18186_p10), %s18182_s8, 8192, %s18184_s10, %s18190_s28, %s18020_s12, %s18020_s12, %s18021_s13  }
  0x5f   : > { %p21575_p0 = scmp.ne.s32.totalorder %s21570_s26, 0 }
  0x61   : > { %232 = sbr.rel (%p21575_p0) target bundleno = 1801 (0x709), region = 40 }
  0x68   : > { %s18221_s29 = sand.u32 1, %s18005_s19   ;;  %p21576_p5 = scmp.ne.s32.totalorder %s21568_s24, 0 }
  0x69   : > { %s13015_s17 = sshll.u32 %s18221_s29, 9  ;;  %s235_s7 = scalar_lea.sflag [#allocation5], %s18221_s29 }
  0x6a   : > { %s18227_s6 = scalar_lea.vmem [#allocation4], %s13015_s17 }
  0x6b   : > { %17988 = dma.done.wait (%p21576_p5), %s235_s7, 8192  }
  0x6c   : > { %17990 = vsyncadd (%p21576_p5), %s235_s7, 4294959104  ;;  %p21577_p10 = scmp.eq.s32.totalorder %s18078_s22, 0 }
  0x6e   : > { %17992 = dma.done.wait (%p21577_p10), [#allocation8], 18432   ;;  %p21578_p11 = pmov %p21577_p10 }
  0x6f   : > { %v276_v0 = vlaneseq  ;;  %v18022_v2 = vmov 0   ;;  %v17170_v12 = vld [vmem:[#allocation7 + $0x100] sm:$0xff]   ;;  %v17174_v20 = vld [vmem:[#allocation7 + $0x108] sm:$0xff]   ;;  %v18023_v24 = vmov 0.0   ;;  %v17178_v26 = vld [vmem:[#allocation7 + $0x110] sm:$0xff]   ;;  %vm586_vm4 = vcmask 1040384  }
  0x70   : > { %17994 = vsyncadd (%p21578_p11), [#allocation8], 4294948864  ;;  %584 = vst [vmem:[#allocation2 + $0x8] sm:$0xff] %v18022_v2  ;;  %1813 = vmatprep.mubr.bf16.mxu1 %v18022_v2  ;;  %v17171_v14 = vld [vmem:[#allocation7 + $0x40] sm:$0xff]   ;;  %13767 = vmatprep.subr.bf16.mxu0 %v17170_v12  ;;  %v17175_v21 = vld [vmem:[#allocation7 + $0x48] sm:$0xff]   ;;  %v21588_v54 = vmov 0 }
  0x71   : > { %v18237_v1 = vshrl.u32 %v276_v0, 7  ;;  %585 = vst [vmem:[#allocation2 + $0x10] sm:$0xff] %v18022_v2  ;;  %610 = vst [vmem:[#allocation2 + $0x198] sm:$0xff] %v18022_v2  ;;  %v17172_v16 = vld [vmem:[#allocation7 + $0xc0] sm:$0xff]   ;;  %13847 = vmatprep.subr.bf16.mxu1 %v17171_v14  ;;  %v17176_v22 = vld [vmem:[#allocation7 + $0xc8] sm:$0xff]   ;;  %vm781_vm13 = vcmask 1047552  }
  0x72   : > { %615 = vst [vmem:[#allocation3 + $0x10] sm:$0xff] %v18022_v2  ;;  %634 = vst [vmem:[#allocation3 + $0x198] sm:$0xff] %v18022_v2  ;;  %v17173_v18 = vld [vmem:[#allocation7] sm:$0xff]   ;;  %13768 = vmatpush3.bf16.msra.mxu0 %v17172_v16  ;;  %v17177_v23 = vld [vmem:[#allocation7 + $0x8] sm:$0xff]   ;;  %vm587_vm5 = vsmask.f32 256 }
  0x73   : > { %6755 = vst [vmem:[#allocation2 + $0x1c0] sm:$0xff] %v18022_v2  ;;  %6774 = vst [vmem:[#allocation2 + $0x348] sm:$0xff] %v18022_v2  ;;  %v278_v3 = vadd.s32 8, %v18237_v1  ;;  %v279_v4 = vadd.s32 16, %v18237_v1  ;;  %v280_v5 = vadd.s32 24, %v18237_v1  ;;  %v281_v6 = vadd.s32 32, %v18237_v1  ;;  %13848 = vmatpush3.bf16.msra.mxu1 %v17173_v18  ;;  %13769 = vmatprep.subr.bf16.mxu0 %v17174_v20 }
  0x74   : > { %6780 = vst [vmem:[#allocation3 + $0x1c0] sm:$0xff] %v18022_v2  ;;  %6799 = vst [vmem:[#allocation3 + $0x348] sm:$0xff] %v18022_v2  ;;  %v282_v7 = vadd.s32 40, %v18237_v1  ;;  %v284_v9 = vadd.s32 56, %v18237_v1  ;;  %v286_v10 = vadd.s32 72, %v18237_v1  ;;  %v18257_v11 = vadd.s32 88, %v18237_v1  ;;  %13849 = vmatprep.subr.bf16.mxu1 %v17175_v21 }
  0x75   : > { %v304_v8 = vand.u32 15, %v278_v3  ;;  %v311_v13 = vand.u32 15, %v279_v4  ;;  %v318_v15 = vand.u32 15, %v280_v5  ;;  %v325_v17 = vand.u32 15, %v281_v6  ;;  %v17179_v28 = vld [vmem:[#allocation7 + $0x50] sm:$0xff]   ;;  %v17182_v34 = vld [vmem:[#allocation7 + $0x118] sm:$0xff]   ;;  %vm18291_vm9 = vmand %vm586_vm4, %vm587_vm5 }
  0x76   : > { %v332_v19 = vand.u32 15, %v282_v7  ;;  %13770 = vmatpush3.bf16.msra.mxu0 %v17176_v22  ;;  %v17180_v30 = vld [vmem:[#allocation7 + $0xd0] sm:$0xff]   ;;  %v346_v33 = vand.u32 15, %v284_v9  ;;  %v17183_v35 = vld [vmem:[#allocation7 + $0x58] sm:$0xff]   ;;  %v360_v36 = vand.u32 15, %v286_v10  ;;  %v17186_v40 = vld [vmem:[#allocation7 + $0x120] sm:$0xff]  }
  0x77   : > { %vm486_vm0 = vcmp.ne.s32.totalorder %v304_v8, 15  ;;  %vm488_vm1 = vcmp.ne.s32.totalorder %v318_v15, 15  ;;  %vm535_vm2 = vcmp.ne.s32.totalorder %v311_v13, 0  ;;  %13850 = vmatpush3.bf16.msra.mxu1 %v17177_v23  ;;  %13771 = vmatprep.subr.bf16.mxu0 %v17178_v26  ;;  %v17181_v32 = vld [vmem:[#allocation7 + $0x10] sm:$0xff]   ;;  %vm537_vm6 = vcmp.ne.s32.totalorder %v325_v17, 0  ;;  %v17184_v37 = vld [vmem:[#allocation7 + $0xd8] sm:$0xff]  }
  0x78   : > { %v18260_v25 = vsel %vm486_vm0, 1.0, %v18023_v24  ;;  %v18263_v27 = vsel %vm488_vm1, 1.0, %v18023_v24  ;;  %v18266_v29 = vsel %vm535_vm2, 1.0, %v18023_v24  ;;  %vm18268_vm3 = vcmp.ne.s32.totalorder %v332_v19, 15  ;;  %13851 = vmatprep.subr.bf16.mxu1 %v17179_v28  ;;  %v17185_v38 = vld [vmem:[#allocation7 + $0x18] sm:$0xff]   ;;  %v17187_v42 = vld [vmem:[#allocation7 + $0x60] sm:$0xff]  }
  0x79   : > { %21579 = vst [vmem:[#allocation14_spill] sm:$0xff] %v18260_v25  ;;  %21580 = vst [vmem:[#allocation15_spill] sm:$0xff] %v18263_v27  ;;  %vm492_vm7 = vcmp.ne.s32.totalorder %v346_v33, 15  ;;  %v18275_v39 = vsel %vm18268_vm3, 1.0, %v18023_v24  ;;  %v18278_v41 = vsel %vm537_vm6, 1.0, %v18023_v24  ;;  %v17188_v44 = vld [vmem:[#allocation7 + $0xe0] sm:$0xff]  }
  0x7a   : > { %21581 = vst [vmem:[#allocation16_spill] sm:$0xff] %v18266_v29  ;;  %13772 = vmatpush3.bf16.msra.mxu0 %v17180_v30  ;;  %21584 = vst [vmem:[#allocation17_spill] sm:$0xff] %v18275_v39  ;;  %v18281_v43 = vsel %vm492_vm7, 1.0, %v18023_v24  ;;  %vm494_vm8 = vcmp.ne.s32.totalorder %v360_v36, 15  ;;  %v17189_v45 = vld [vmem:[#allocation7 + $0x20] sm:$0xff]   ;;  %v290_v46 = vadd.s32 104, %v18237_v1 }
  0x7b   : > { %13852 = vmatpush3.bf16.msra.mxu1 %v17181_v32  ;;  %13773 = vmatprep.subr.bf16.mxu0 %v17182_v34  ;;  %21585 = vst [vmem:[#allocation18_spill] sm:$0xff] %v18278_v41  ;;  %21586 = vst [vmem:[#allocation19_spill] sm:$0xff] %v18281_v43  ;;  %v17190_v47 = vld [vmem:[#allocation7 + $0x128] sm:$0xff]   ;;  %v374_v48 = vand.u32 15, %v18257_v11  ;;  %v18286_v50 = vsel %vm494_vm8, 1.0, %v18023_v24  ;;  %v292_v52 = vadd.s32 120, %v18237_v1 }
  0x7c   : > { %13853 = vmatprep.subr.bf16.mxu1 %v17183_v35  ;;  %v17191_v49 = vld [vmem:[#allocation7 + $0x68] sm:$0xff]   ;;  %21587 = vst [vmem:[#allocation20_spill] sm:$0xff] %v18286_v50  ;;  %v21589_v54 = vsel %vm18291_vm9, 4294967295, %v21588_v54  ;;  %v388_v55 = vand.u32 15, %v290_v46  ;;  %v17194_v56 = vld [vmem:[#allocation7 + $0x130] sm:$0xff]   ;;  %v297_v61 = vand.u32 15, %v18237_v1 }
  0x7d   : > { %v17192_v51 = vld [vmem:[#allocation7 + $0xe8] sm:$0xff]   ;;  %21590 = vst [vmem:[#allocation21_spill] sm:$0xff] %v21589_v54  ;;  %vm18295_vm10 = vcmp.ne.s32.totalorder %v374_v48, 15  ;;  %v17195_v58 = vld [vmem:[#allocation7 + $0x70] sm:$0xff]   ;;  %v402_v59 = vand.u32 15, %v292_v52  ;;  %v17198_v63 = vld [vmem:[#allocation7 + $0x138] sm:$0xff]  }
  0x7e   : > { %13774 = vmatpush3.bf16.msra.mxu0 %v17184_v37  ;;  %v17193_v53 = vld [vmem:[#allocation7 + $0x28] sm:$0xff]   ;;  %v17196_v60 = vld [vmem:[#allocation7 + $0xf0] sm:$0xff]   ;;  %vm498_vm11 = vcmp.ne.s32.totalorder %v388_v55, 15  ;;  %v17199_v3 = vld [vmem:[#allocation7 + $0x78] sm:$0xff]   ;;  %vm782_vm14 = vsmask.f32 7938 }
  0x7f   : > { %13854 = vmatpush3.bf16.msra.mxu1 %v17185_v38  ;;  %13775 = vmatprep.subr.bf16.mxu0 %v17186_v40  ;;  %v17197_v62 = vld [vmem:[#allocation7 + $0x30] sm:$0xff]   ;;  %vm18300_vm12 = vcmp.ne.s32.totalorder %v402_v59, 15  ;;  %vm533_vm15 = vcmp.ne.s32.totalorder %v297_v61, 0  ;;  %v17200_v4 = vld [vmem:[#allocation7 + $0xf8] sm:$0xff]   ;;  %v18307_v5 = vsel %vm18295_vm10, 1.0, %v18023_v24  ;;  %v18310_v7 = vsel %vm498_vm11, 1.0, %v18023_v24  ;;  %vm18365_vm0 = vmand %vm781_vm13, %vm782_vm14 }
  0x80   : > { %13855 = vmatprep.subr.bf16.mxu1 %v17187_v42  ;;  %21595 = vst [vmem:[#allocation22_spill] sm:$0xff] %v18307_v5  ;;  %v17201_v6 = vld [vmem:[#allocation7 + $0x38] sm:$0xff]   ;;  %21596 = vst [vmem:[#allocation23_spill] sm:$0xff] %v18310_v7  ;;  %v592_v8 = vld [vmem:[#allocation2 + $0x20] sm:$0x1]  ;;  %v18317_v11 = vsel %vm18300_vm12, 1.0, %v18023_v24 }
  0x81   : > { %v637_v9 = vld [vmem:[%s18227_s6] sm:$0xff]  ;;  %v638_v10 = vld [vmem:[%s18227_s6 + $0x8] sm:$0xff]  ;;  %21597 = vst [vmem:[#allocation24_spill] sm:$0xff] %v18317_v11  ;;  %v18320_v12 = vsel %vm533_vm15, 1.0, %v18023_v24  ;;  %v593_v13 = vsel %vm18291_vm9, 0, %v592_v8  ;;  %v639_v19 = vld [vmem:[%s18227_s6 + $0x10] sm:$0xff] }
  0x82   : > { %13776 = vmatpush3.bf16.msra.mxu0 %v17188_v44  ;;  %21598 = vst [vmem:[#allocation25_spill] sm:$0xff] %v18320_v12  ;;  %v653_v14 = vmax.f32 %v637_v9, 0.0  ;;  %v18324_v15 = vmax.f32 %v638_v10, 0.0  ;;  %v589_v16 = vld [vmem:[#allocation2 + $0x18] sm:$0x1]  ;;  %v17202_v17 = vld [vmem:[#allocation7 + $0x80] sm:$0xff]  }
  0x83   : > { %13856 = vmatpush3.bf16.msra.mxu1 %v17189_v45  ;;  %13777 = vmatprep.subr.bf16.mxu0 %v17190_v47  ;;  %594 = vst [vmem:[#allocation2 + $0x20] sm:$0x1] %v593_v13  ;;  %v590_v18 = vsel %vm18291_vm9, 0, %v589_v16  ;;  %v640_v22 = vld [vmem:[%s18227_s6 + $0x18] sm:$0xff]  ;;  %v18334_v23 = vadd.s32 48, %v18237_v1  ;;  %v655_v26 = vmax.f32 %v639_v19, 0.0 }
  0x84   : > { %13857 = vmatprep.subr.bf16.mxu1 %v17191_v49  ;;  %v669_v20 = vpack.c.bf16 %v18324_v15, %v653_v14  ;;  %v686_v21 = vmul.f32 %v18260_v25, %v18324_v15  ;;  %591 = vst [vmem:[#allocation2 + $0x18] sm:$0x1] %v590_v18  ;;  %v18337_v28 = vmax.f32 %v640_v22, 0.0  ;;  %v17203_v30 = vld [vmem:[#allocation7 + $0x88] sm:$0xff]   ;;  %v641_v31 = vld [vmem:[%s18227_s6 + $0x20] sm:$0xff]  ;;  %v18342_v33 = vadd.s32 64, %v18237_v1 }
  0x85   : > { %v642_v32 = vld [vmem:[%s18227_s6 + $0x28] sm:$0xff]  ;;  %v18344_v35 = vmax.f32 %v641_v31, 0.0  ;;  %v17204_v38 = vld [vmem:[#allocation7 + $0x90] sm:$0xff]   ;;  %v644_v42 = vld [vmem:[%s18227_s6 + $0x38] sm:$0xff]  ;;  %v797_v44 = vmul.f32 %v18320_v12, %v653_v14  ;;  %v18355_v45 = vadd.s32 80, %v18237_v1  ;;  %v339_v57 = vand.u32 15, %v18334_v23 }
  0x86   : > { %13778 = vmatpush3.bf16.msra.mxu0 %v17192_v51  ;;  %677 = vst [vmem:[#allocation2 + $0x20] sm:$0xff] %v669_v20  ;;  %1475 = vmatprep.mubr.bf16.mxu0 %v669_v20  ;;  %v701_v34 = vpack.c.bf16 %v686_v21, %v653_v14  ;;  %v18346_v36 = vmax.f32 %v642_v32, 0.0  ;;  %v688_v37 = vmul.f32 %v18263_v27, %v18337_v28  ;;  %v643_v40 = vld [vmem:[%s18227_s6 + $0x30] sm:$0xff]  ;;  %v21599_v51 = vmov 0  ;;  %v645_v61 = vld [vmem:[%s18227_s6 + $0x40] sm:$0xff]  ;;  %v17205_v8 = vld [vmem:[#allocation7 + $0x98] sm:$0xff]  }
  0x87   : > { %13858 = vmatpush3.bf16.msra.mxu1 %v17193_v53  ;;  %13779 = vmatprep.subr.bf16.mxu0 %v17194_v56  ;;  %v21600_v51 = vsel %vm18365_vm0, 4294967295, %v21599_v51  ;;  %v18369_v53 = vmax.f32 %v643_v40, 0.0  ;;  %v18371_v55 = vmax.f32 %v644_v42, 0.0  ;;  %v17206_v56 = vld [vmem:[#allocation7 + $0x140] sm:$0xff]   ;;  %v799_v59 = vmul.f32 %v18266_v29, %v655_v26  ;;  %v17208_v19 = vld [vmem:[#allocation7 + $0x148] sm:$0xff]   ;;  %v648_v31 = vld [vmem:[%s18227_s6 + $0x58] sm:$0xff] }
  0x88   : > { %13859 = vmatprep.subr.bf16.mxu1 %v17195_v58  ;;  %v710_v46 = vshrl.u32 %v701_v34, 16  ;;  %v713_v47 = vshll.u32 %v701_v34, 16  ;;  %v18359_v48 = vpack.c.bf16 %v18346_v36, %v18344_v35  ;;  %v690_v49 = vmul.f32 %v18275_v39, %v18346_v36  ;;  %21601 = vst [vmem:[#allocation26_spill] sm:$0xff] %v21600_v51  ;;  %v17207_v40 = vld [vmem:[#allocation7 + $0xa0] sm:$0xff]   ;;  %v17342_v54 = vld [vmem:[#allocation9 + $0x130] sm:$0xff]   ;;  %v13398_v51 = vld [vmem:[%s18227_s6 + $0x1c8] sm:$0xff] }
  0x89   : > { %v702_v52 = vpack.c.bf16 %v688_v37, %v655_v26  ;;  %v692_v14 = vmul.f32 %v18281_v43, %v18371_v55  ;;  %vm598_vm1 = vcmask 1047559   ;;  %vm599_vm2 = vsmask.f32 7966  ;;  %s20181_s30 = scalar_lea.vmem [#allocation10], %s13015_s17  ;;  %s13766_s26 = sshll.u32 %s18078_s22, 13 }
  0x8a   : > { %13780 = vmatpush3.bf16.msra.mxu0 %v17196_v60  ;;  %v712_v58 = vrot.slane %v710_v46, 7  ;;  %679 = vst [vmem:[#allocation2 + $0x50] sm:$0xff] %v18359_v48  ;;  %v703_v60 = vpack.c.bf16 %v690_v49, %v18344_v35  ;;  %v18400_v32 = vpack.c.bf16 %v18337_v28, %v799_v59  ;;  %v18410_v46 = vmax.f32 %v648_v31, 0.0  ;;  %v17209_v59 = vld [vmem:[#allocation7 + $0x150] sm:$0xff]   ;;  %vm18469_vm6 = vmand %vm598_vm1, %vm599_vm2  ;;  %s12913_s8 = sshll.u32 %s20181_s30, 4  ;;  %s21445_s28 = scalar_lea.hbm %s21498_s5, %s13766_s26  ;;  %s21447_s8 = int_to_ptr.vmem [resolvable:$true] %s12913_s8 }
  0x8b   : > { %13860 = vmatpush3.bf16.msra.mxu1 %v17197_v62  ;;  %13781 = vmatprep.subr.bf16.mxu0 %v17198_v63  ;;  %v646_v62 = vld [vmem:[%s18227_s6 + $0x48] sm:$0xff]  ;;  %v353_v63 = vand.u32 15, %v18342_v33  ;;  %v784_v0 = vld [vmem:[#allocation2 + $0x18] sm:$0xff]  ;;  %v801_v49 = vmul.f32 %v18278_v41, %v18344_v35  ;;  %vm821_vm3 = vsmask.f32 7424  ;;  %vm18440_vm4 = vcmp.ne.s32.totalorder %v339_v57, 0 }
  0x8c   : > { %13861 = vmatprep.subr.bf16.mxu1 %v17199_v3  ;;  %v717_v3 = vshrl.u32 %v702_v52, 16  ;;  %v715_v9 = vor.u32 %v713_v47, %v712_v58  ;;  %v725_v10 = vshrl.u32 %v703_v60, 16  ;;  %v728_v13 = vshll.u32 %v703_v60, 16  ;;  %v17213_v57 = vld [vmem:[#allocation7 + $0xb0] sm:$0xff]   ;;  %vm18585_vm12 = vmand %vm781_vm13, %vm821_vm3  ;;  %s12899_s22 = scalar_lea.sflag [#allocation6], %s18221_s29  ;;  %s18024_s15 = smov [#allocation10]  }
  0x8d   : > { %v18389_v18 = vmax.f32 %v646_v62, 0.0  ;;  %v650_v62 = vld [vmem:[%s18227_s6 + $0x68] sm:$0xff]  ;;  %vm541_vm7 = vcmp.ne.s32.totalorder %v353_v63, 0  ;;  %s17947_s16 = sshll.u32 %s18024_s15, 4  ;;  %s17948_s16 = int_to_ptr.vmem [resolvable:$false] %s17947_s16 }
  0x8e   : > { %13782 = vmatpush3.bf16.msra.mxu0 %v17200_v4  ;;  %v720_v4 = vshll.u32 %v702_v52, 16  ;;  %v719_v16 = vrot.slane %v717_v3, 7  ;;  %v785_v21 = vsel %vm18365_vm0, %v715_v9, %v784_v0  ;;  %v727_v22 = vrot.slane %v725_v10, 7  ;;  %s17949_s9 = scalar_lea.vmem %s17948_s16, 16384  ;;  %p17950_p8 = scmp.lt.s32.totalorder %s21447_s8, %s17948_s16 }
  0x8f   : > { %13862 = vmatpush3.bf16.msra.mxu1 %v17201_v6  ;;  %v18382_v6 = vpack.c.bf16 %v18371_v55, %v18369_v53  ;;  %15687 = vmatprep.subr.bf16.mxu0 %v17206_v56  ;;  %786 = vst [vmem:[#allocation2 + $0x18] sm:$0xff] %v785_v21  ;;  %v694_v37 = vmul.f32 %v18286_v50, %v18389_v18  ;;  %v18432_v10 = vmax.f32 %v650_v62, 0.0  ;;  %v21604_v62 = vmov 0 }
  0x90   : > { %15719 = vmatprep.subr.bf16.mxu1 %v17202_v17  ;;  %v722_v34 = vor.u32 %v720_v4, %v719_v16  ;;  %v730_v42 = vor.u32 %v728_v13, %v727_v22  ;;  %v17210_v4 = vld [vmem:[#allocation7 + $0xa8] sm:$0xff]   ;;  %v21605_v62 = vsel %vm18469_vm6, 4294967295, %v21604_v62 }
  0x91   : > { %680 = vst [vmem:[#allocation2 + $0x68] sm:$0xff] %v18382_v6  ;;  %1476 = vmatmul.mubr.bf16.vlgmr.msra.gmra.mrb[0].mxu0 %v785_v21  ;;  %21606 = vst [vmem:[#allocation27_spill] sm:$0xff] %v21605_v62 }
  0x92   : > { %1814 = vmatmul.mubr.bf16.vlgmr.msra.gmra.mrb[0].mxu1 %v18022_v2  ;;  %v670_v2 = vpack.c.bf16 %v18337_v28, %v655_v26  ;;  %v704_v26 = vpack.c.bf16 %v692_v14, %v18369_v53  ;;  %v723_v47 = vsel %vm587_vm5, %v712_v58, %v722_v34  ;;  %15688 = vmatpush3.bf16.msra.mxu0 %v17206_v56 }
  0x93   : > { %15720 = vmatpush3.bf16.msra.mxu1 %v17202_v17  ;;  %1821 = vmatprep.mubr.bf16.mxu1 %v669_v20  ;;  %v18387_v17 = vmax.f32 %v645_v61, 0.0  ;;  %v18392_v20 = vpack.c.bf16 %v18324_v15, %v797_v44  ;;  %787 = vst [vmem:[#allocation2 + $0x30] sm:$0xff] %v723_v47  ;;  %v18419_v60 = vsel %vm587_vm5, %v719_v16, %v730_v42  ;;  %v649_v61 = vld [vmem:[%s18227_s6 + $0x60] sm:$0xff]  ;;  %v830_v16 = vshll.u32 %v18400_v32, 16  ;;  %v651_v42 = vld [vmem:[%s18227_s6 + $0x70] sm:$0xff] }
  0x94   : > { %15721 = vmatprep.subr.bf16.mxu1 %v17203_v30  ;;  %678 = vst [vmem:[#allocation2 + $0x38] sm:$0xff] %v670_v2  ;;  %1483 = vmatprep.mubr.bf16.mxu0 %v670_v2  ;;  %v733_v44 = vshrl.u32 %v704_v26, 16  ;;  %v736_v28 = vshll.u32 %v704_v26, 16  ;;  %v696_v56 = vmul.f32 %v18307_v5, %v18410_v46  ;;  %788 = vst [vmem:[#allocation2 + $0x48] sm:$0xff] %v18419_v60  ;;  %v18430_v9 = vmax.f32 %v649_v61, 0.0 }
  0x95   : > { %v18404_v15 = vpack.c.bf16 %v18389_v18, %v18387_v17  ;;  %v705_v52 = vpack.c.bf16 %v694_v37, %v18387_v17  ;;  %15689 = vmatprep.subr.bf16.mxu0 %v17208_v19  ;;  %v826_v14 = vshrl.u32 %v18392_v20, 16  ;;  %v698_v34 = vmul.f32 %v18310_v7, %v18432_v10 }
  0x96   : > { %v735_v58 = vrot.slane %v733_v44, 7  ;;  %15690 = vmatpush3.bf16.msra.mxu0 %v17208_v19  ;;  %v18446_v31 = vpack.c.bf16 %v18432_v10, %v18430_v9  ;;  %v652_v44 = vld [vmem:[%s18227_s6 + $0x78] sm:$0xff]  ;;  %v832_v61 = vrot.slane %v830_v16, 1 }
  0x97   : > { %15722 = vmatpush3.bf16.msra.mxu1 %v17203_v30  ;;  %v647_v30 = vld [vmem:[%s18227_s6 + $0x50] sm:$0xff]  ;;  %681 = vst [vmem:[#allocation2 + $0x80] sm:$0xff] %v18404_v15  ;;  %v741_v0 = vshrl.u32 %v705_v52, 16  ;;  %v744_v3 = vshll.u32 %v705_v52, 16  ;;  %15691 = vmatprep.subr.bf16.mxu0 %v17209_v59  ;;  %v707_v52 = vpack.c.bf16 %v698_v34, %v18430_v9 }
  0x98   : > { %15723 = vmatprep.subr.bf16.mxu1 %v17204_v38  ;;  %683 = vst [vmem:[#allocation2 + $0xb0] sm:$0xff] %v18446_v31 }
  0x99   : > { %v743_v26 = vrot.slane %v741_v0, 7  ;;  %1484 = vmatmul.mubr.bf16.gmra.mrb[4].mxu0 %v723_v47 }
  0x9a   : > { %1822 = vmatmul.mubr.bf16.gmra.mrb[4].mxu1 %v785_v21  ;;  %1491 = vmatprep.mubr.bf16.mxu0 %v18359_v48 }
  0x9b   : > { %15724 = vmatpush3.bf16.msra.mxu1 %v17204_v38  ;;  %v18408_v38 = vmax.f32 %v647_v30, 0.0  ;;  %1829 = vmatprep.mubr.bf16.mxu1 %v670_v2  ;;  %v823_v2 = vshll.u32 %v18392_v20, 16  ;;  %v17211_v30 = vld [vmem:[#allocation7 + $0x158] sm:$0xff]   ;;  %v746_v19 = vor.u32 %v744_v3, %v743_v26  ;;  %v17212_v3 = vld [vmem:[#allocation7 + $0x160] sm:$0xff]  }
  0x9c   : > { %15725 = vmatprep.subr.bf16.mxu1 %v17205_v8  ;;  %15692 = vmatpush3.bf16.msra.mxu0 %v17209_v59 }
  0x9d   : > { %v18423_v35 = vpack.c.bf16 %v18410_v46, %v18408_v38  ;;  %v706_v13 = vpack.c.bf16 %v696_v56, %v18408_v38  ;;  %v18458_v56 = vmax.f32 %v651_v42, 0.0  ;;  %v18474_v0 = vsel %vm587_vm5, %v735_v58, %v746_v19  ;;  %15693 = vmatprep.subr.bf16.mxu0 %v17211_v30  ;;  %v17216_v42 = vld [vmem:[#allocation7 + $0xb8] sm:$0xff]  }
  0x9e   : > { %790 = vst [vmem:[#allocation2 + $0x78] sm:$0xff] %v18474_v0 }
  0x9f   : > { %15726 = vmatpush3.bf16.msra.mxu1 %v17205_v8  ;;  %v738_v8 = vor.u32 %v736_v28, %v735_v58  ;;  %682 = vst [vmem:[#allocation2 + $0x98] sm:$0xff] %v18423_v35  ;;  %v749_v37 = vshrl.u32 %v706_v13, 16  ;;  %v752_v23 = vshll.u32 %v706_v13, 16  ;;  %v825_v28 = vrot.slane %v823_v2, 1  ;;  %v894_v58 = vld [vmem:[#allocation2 + $0x10] sm:$0x80] }
  0xa0   : > { %15727 = vmatprep.subr.bf16.mxu1 %v17207_v40  ;;  %15694 = vmatpush3.bf16.msra.mxu0 %v17211_v30  ;;  %v18509_v30 = vsel %vm18440_vm4, 1.0, %v18023_v24 }
  0xa1   : > { %v18451_v20 = vsel %vm587_vm5, %v727_v22, %v738_v8  ;;  %v18460_v22 = vmax.f32 %v652_v44, 0.0  ;;  %v751_v2 = vrot.slane %v749_v37, 7  ;;  %v895_v34 = vsel %vm18469_vm6, %v825_v28, %v894_v58  ;;  %15695 = vmatprep.subr.bf16.mxu0 %v17212_v3  ;;  %1492 = vmatmul.mubr.bf16.gmra.mrb[8].mxu0 %v18419_v60  ;;  %21607 = vst [vmem:[#allocation28_spill] sm:$0xff] %v18509_v30 }
  0xa2   : > { %1830 = vmatmul.mubr.bf16.gmra.mrb[8].mxu1 %v723_v47  ;;  %789 = vst [vmem:[#allocation2 + $0x60] sm:$0xff] %v18451_v20  ;;  %v828_v47 = vor.u32 %v826_v14, %v825_v28  ;;  %v595_v14 = vld [vmem:[#allocation2 + $0x28] sm:$0x1]  ;;  %v834_v37 = vshrl.u32 %v18400_v32, 16  ;;  %896 = vst [vmem:[#allocation2 + $0x10] sm:$0x80] %v895_v34  ;;  %1499 = vmatprep.mubr.bf16.mxu0 %v18382_v6 }
  0xa3   : > { %15728 = vmatpush3.bf16.msra.mxu1 %v17207_v40  ;;  %v18463_v40 = vpack.c.bf16 %v18346_v36, %v801_v49  ;;  %1837 = vmatprep.mubr.bf16.mxu1 %v18359_v48  ;;  %v757_v36 = vshrl.u32 %v707_v52, 16  ;;  %v760_v49 = vshll.u32 %v707_v52, 16  ;;  %v18478_v48 = vpack.c.bf16 %v18460_v22, %v18458_v56 }
  0xa4   : > { %15729 = vmatprep.subr.bf16.mxu1 %v17210_v4  ;;  %v754_v8 = vor.u32 %v752_v23, %v751_v2  ;;  %v700_v13 = vmul.f32 %v18317_v11, %v18460_v22  ;;  %v596_v59 = vsel %vm18291_vm9, 0, %v595_v14  ;;  %v18494_v44 = vsel %vm821_vm3, %v828_v47, %v832_v61  ;;  %15696 = vmatpush3.bf16.msra.mxu0 %v17212_v3 }
  0xa5   : > { %v759_v16 = vrot.slane %v757_v36, 7  ;;  %684 = vst [vmem:[#allocation2 + $0xc8] sm:$0xff] %v18478_v48  ;;  %597 = vst [vmem:[#allocation2 + $0x28] sm:$0x1] %v596_v59  ;;  %v838_v19 = vshll.u32 %v18463_v40, 16  ;;  %v836_v32 = vor.u32 %v834_v37, %v832_v61  ;;  %v842_v21 = vshrl.u32 %v18463_v40, 16 }
  0xa6   : > { %v708_v23 = vpack.c.bf16 %v700_v13, %v18458_v56  ;;  %897 = vst [vmem:[#allocation2 + $0x28] sm:$0xff] %v18494_v44  ;;  %v18504_v13 = vld [vmem:[#allocation7 + $0x200] sm:$0xff]   ;;  %v17215_v61 = vld [vmem:[#allocation7 + $0x170] sm:$0xff]   ;;  %v18527_v14 = vsel %vm541_vm7, 1.0, %v18023_v24  ;;  %v367_v40 = vand.u32 15, %v18355_v45  ;;  %v17217_v59 = vld [vmem:[#allocation7 + $0x178] sm:$0xff]  }
  0xa7   : > { %15730 = vmatpush3.bf16.msra.mxu1 %v17210_v4  ;;  %v18490_v4 = vsel %vm587_vm5, %v743_v26, %v754_v8  ;;  %v762_v52 = vor.u32 %v760_v49, %v759_v16  ;;  %v17214_v26 = vld [vmem:[#allocation7 + $0x168] sm:$0xff]   ;;  %v840_v8 = vrot.slane %v838_v19, 1  ;;  %21608 = vst [vmem:[#allocation29_spill] sm:$0xff] %v18527_v14  ;;  %v17218_v19 = vld [vmem:[#allocation7 + $0x1c0] sm:$0xff]  }
  0xa8   : > { %15731 = vmatprep.subr.bf16.mxu1 %v17213_v57  ;;  %791 = vst [vmem:[#allocation2 + $0x90] sm:$0xff] %v18490_v4  ;;  %v765_v28 = vshrl.u32 %v708_v23, 16  ;;  %v768_v36 = vshll.u32 %v708_v23, 16  ;;  %15697 = vmatprep.subr.bf16.mxu0 %v17214_v26  ;;  %vm543_vm8 = vcmp.ne.s32.totalorder %v367_v40, 0 }
  0xa9   : > { %v18502_v47 = vsel %vm587_vm5, %v751_v2, %v762_v52  ;;  %v803_v2 = vmul.f32 %v18509_v30, %v18369_v53  ;;  %v805_v53 = vmul.f32 %v18527_v14, %v18387_v17  ;;  %v844_v63 = vor.u32 %v842_v21, %v840_v8  ;;  %15698 = vmatpush3.bf16.msra.mxu0 %v17214_v26  ;;  %v13035_v21 = vld [vmem:[%s18227_s6 + $0x80] sm:$0xff] }
  0xaa   : > { %1838 = vmatmul.mubr.bf16.gmra.mrb[12].mxu1 %v18419_v60  ;;  %792 = vst [vmem:[#allocation2 + $0xa8] sm:$0xff] %v18502_v47  ;;  %v18517_v60 = vsel %vm821_vm3, %v836_v32, %v840_v8  ;;  %15699 = vmatprep.subr.bf16.mxu0 %v17215_v61  ;;  %v18546_v37 = vsel %vm543_vm8, 1.0, %v18023_v24  ;;  %v291_v52 = vadd.s32 112, %v18237_v1 }
  0xab   : > { %15732 = vmatpush3.bf16.msra.mxu1 %v17213_v57  ;;  %1845 = vmatprep.mubr.bf16.mxu1 %v18382_v6  ;;  %v18514_v57 = vrot.slane %v765_v28, 7  ;;  %v816_v49 = vpack.c.bf16 %v18371_v55, %v803_v2  ;;  %v817_v55 = vpack.c.bf16 %v18389_v18, %v805_v53  ;;  %21609 = vst [vmem:[#allocation30_spill] sm:$0xff] %v18546_v37 }
  0xac   : > { %15733 = vmatprep.subr.bf16.mxu1 %v17216_v42  ;;  %1500 = vmatmul.mubr.bf16.gmra.mrb[12].mxu0 %v18451_v20  ;;  %v395_v28 = vand.u32 15, %v291_v52 }
  0xad   : > { %v770_v6 = vor.u32 %v768_v36, %v18514_v57  ;;  %v846_v3 = vshll.u32 %v816_v49, 16  ;;  %v850_v58 = vshrl.u32 %v816_v49, 16  ;;  %v854_v45 = vshll.u32 %v817_v55, 16  ;;  %1507 = vmatprep.mubr.bf16.mxu0 %v18404_v15  ;;  %15700 = vmatpush3.bf16.msra.mxu0 %v17215_v61 }
  0xae   : > { %v858_v18 = vshrl.u32 %v817_v55, 16  ;;  %15701 = vmatprep.subr.bf16.mxu0 %v17217_v59  ;;  %vm547_vm11 = vcmp.ne.s32.totalorder %v395_v28, 0  ;;  %v925_v49 = vmax.f32 %v13035_v21, 0.0 }
  0xaf   : > { %15734 = vmatpush3.bf16.msra.mxu1 %v17216_v42  ;;  %v18534_v33 = vsel %vm587_vm5, %v759_v16, %v770_v6  ;;  %v848_v34 = vrot.slane %v846_v3, 1  ;;  %v856_v23 = vrot.slane %v854_v45, 1  ;;  %v807_v42 = vmul.f32 %v18546_v37, %v18408_v38  ;;  %v13036_v6 = vld [vmem:[%s18227_s6 + $0x88] sm:$0xff] }
  0xb0   : > { %15751 = vmatprep.subr.bf16.mxu1 %v18504_v13  ;;  %793 = vst [vmem:[#allocation2 + $0xc0] sm:$0xff] %v18534_v33  ;;  %v18568_v61 = vsel %vm547_vm11, 1.0, %v18023_v24  ;;  %v926_v53 = vmax.f32 %v13036_v6, 0.0 }
  0xb1   : > { %v18543_v17 = vsel %vm821_vm3, %v844_v63, %v848_v34  ;;  %v852_v16 = vor.u32 %v850_v58, %v848_v34  ;;  %v818_v32 = vpack.c.bf16 %v18410_v46, %v807_v42  ;;  %15702 = vmatpush3.bf16.msra.mxu0 %v17217_v59  ;;  %v860_v36 = vor.u32 %v858_v18, %v856_v23  ;;  %v905_v18 = vld [vmem:[#allocation2 + $0xd0] sm:$0xff] }
  0xb2   : > { %1846 = vmatmul.mubr.bf16.gmra.mrb[16].mxu1 %v18451_v20  ;;  %v289_v20 = vadd.s32 96, %v18237_v1  ;;  %13927 = vmatprep.subr.bf16.mxu0 %v17218_v19  ;;  %21611 = vst [vmem:[#allocation32_spill] sm:$0xff] %v18568_v61  ;;  %v941_v63 = vpack.c.bf16 %v926_v53, %v925_v49  ;;  %v1177_v19 = vld [vmem:[#allocation2 + $0x10] sm:$0xff] }
  0xb3   : > { %1853 = vmatprep.mubr.bf16.mxu1 %v18404_v15  ;;  %v18553_v15 = vsel %vm821_vm3, %v852_v16, %v856_v23  ;;  %v862_v8 = vshll.u32 %v818_v32, 16  ;;  %v866_v46 = vshrl.u32 %v818_v32, 16  ;;  %v13037_v32 = vld [vmem:[%s18227_s6 + $0x90] sm:$0xff] }
  0xb4   : > { %v381_v26 = vand.u32 15, %v289_v20  ;;  %1508 = vmatmul.mubr.bf16.gmra.mrb[16].mxu0 %v18474_v0  ;;  %949 = vst [vmem:[#allocation2 + $0xe0] sm:$0xff] %v941_v63  ;;  %v927_v28 = vmax.f32 %v13037_v32, 0.0 }
  0xb5   : > { %v864_v1 = vrot.slane %v862_v8, 1  ;;  %1515 = vmatprep.mubr.bf16.mxu0 %v18423_v35 }
  0xb6   : > { %vm545_vm10 = vcmp.ne.s32.totalorder %v381_v26, 0  ;;  %v13038_v26 = vld [vmem:[%s18227_s6 + $0x98] sm:$0xff]  ;;  %v1068_v8 = vmul.f32 %v18266_v29, %v927_v28 }
  0xb7   : > { %v18557_v38 = vsel %vm545_vm10, 1.0, %v18023_v24  ;;  %v18571_v40 = vsel %vm821_vm3, %v860_v36, %v864_v1  ;;  %v868_v3 = vor.u32 %v866_v46, %v864_v1  ;;  %v928_v36 = vmax.f32 %v13038_v26, 0.0 }
  0xb8   : > { %21610 = vst [vmem:[#allocation31_spill] sm:$0xff] %v18557_v38  ;;  %v809_v2 = vmul.f32 %v18557_v38, %v18430_v9  ;;  %v811_v9 = vmul.f32 %v18568_v61, %v18458_v56 }
  0xb9   : > { %v942_v46 = vpack.c.bf16 %v928_v36, %v927_v28  ;;  %v960_v21 = vmul.f32 %v18263_v27, %v928_v36  ;;  %v1083_v6 = vpack.c.bf16 %v928_v36, %v1068_v8 }
  0xba   : > { %1854 = vmatmul.mubr.bf16.gmra.mrb[20].mxu1 %v18474_v0  ;;  %v819_v0 = vpack.c.bf16 %v18432_v10, %v809_v2  ;;  %v820_v55 = vpack.c.bf16 %v18460_v22, %v811_v9  ;;  %v21612_v22 = vmov 0  ;;  %v13040_v9 = vld [vmem:[%s18227_s6 + $0xa8] sm:$0xff] }
  0xbb   : > { %1861 = vmatprep.mubr.bf16.mxu1 %v18423_v35  ;;  %v1066_v35 = vmul.f32 %v18320_v12, %v925_v49  ;;  %v21613_v22 = vsel %vm18585_vm12, 4294967295, %v21612_v22  ;;  %950 = vst [vmem:[#allocation2 + $0xf8] sm:$0xff] %v942_v46 }
  0xbc   : > { %v870_v58 = vshll.u32 %v819_v0, 16  ;;  %v874_v59 = vshrl.u32 %v819_v0, 16  ;;  %v878_v34 = vshll.u32 %v820_v55, 16  ;;  %v882_v45 = vshrl.u32 %v820_v55, 16  ;;  %1516 = vmatmul.mubr.bf16.gmra.mrb[20].mxu0 %v18490_v4  ;;  %21614 = vst [vmem:[#allocation33_spill] sm:$0xff] %v21613_v22  ;;  %v13039_v0 = vld [vmem:[%s18227_s6 + $0xa0] sm:$0xff] }
  0xbd   : > { %1523 = vmatprep.mubr.bf16.mxu0 %v18446_v31  ;;  %v1082_v23 = vpack.c.bf16 %v926_v53, %v1066_v35  ;;  %v929_v63 = vmax.f32 %v13039_v0, 0.0  ;;  %v1102_v35 = vshrl.u32 %v1083_v6, 16  ;;  %v17341_v22 = vld [vmem:[#allocation9 + $0xe8] sm:$0xff]  }
  0xbe   : > { %v872_v24 = vrot.slane %v870_v58, 1  ;;  %v880_v16 = vrot.slane %v878_v34, 1 }
  0xbf   : > { %v1091_v52 = vshll.u32 %v1082_v23, 16  ;;  %v1094_v1 = vshrl.u32 %v1082_v23, 16 }
  0xc0   : > { %v18581_v10 = vsel %vm821_vm3, %v868_v3, %v872_v24  ;;  %v876_v56 = vor.u32 %v874_v59, %v872_v24  ;;  %v884_v42 = vor.u32 %v882_v45, %v880_v16  ;;  %v930_v3 = vmax.f32 %v13040_v9, 0.0 }
  0xc1   : > { %v1093_v2 = vrot.slane %v1091_v52, 1  ;;  %v1098_v59 = vshll.u32 %v1083_v6, 16  ;;  %v1070_v24 = vmul.f32 %v18278_v41, %v929_v63  ;;  %v13042_v52 = vld [vmem:[%s18227_s6 + $0xb8] sm:$0xff] }
  0xc2   : > { %1862 = vmatmul.mubr.bf16.gmra.mrb[24].mxu1 %v18490_v4  ;;  %v18592_v4 = vsel %vm821_vm3, %v876_v56, %v880_v16  ;;  %v906_v20 = vsel %vm18585_vm12, %v884_v42, %v905_v18  ;;  %v943_v34 = vpack.c.bf16 %v930_v3, %v929_v63  ;;  %v962_v45 = vmul.f32 %v18275_v39, %v930_v3  ;;  %v17222_v56 = vld [vmem:[#allocation7 + $0x208] sm:$0xff]   ;;  %v13041_v18 = vld [vmem:[%s18227_s6 + $0xb0] sm:$0xff] }
  0xc3   : > { %1869 = vmatprep.mubr.bf16.mxu1 %v18446_v31  ;;  %907 = vst [vmem:[#allocation2 + $0xd0] sm:$0xff] %v906_v20  ;;  %v958_v31 = vmul.f32 %v18260_v25, %v926_v53  ;;  %v1096_v55 = vor.u32 %v1094_v1, %v1093_v2  ;;  %v1100_v16 = vrot.slane %v1098_v59, 1  ;;  %v931_v32 = vmax.f32 %v13041_v18, 0.0 }
  0xc4   : > { %1524 = vmatmul.mubr.bf16.gmra.mrb[24].mxu0 %v18502_v47  ;;  %951 = vst [vmem:[#allocation2 + $0x110] sm:$0xff] %v943_v34  ;;  %v975_v26 = vpack.c.bf16 %v962_v45, %v929_v63  ;;  %v932_v8 = vmax.f32 %v13042_v52, 0.0  ;;  %v17221_v34 = vld [vmem:[#allocation7 + $0x1c8] sm:$0xff]   ;;  %v17228_v45 = vld [vmem:[#allocation7 + $0x218] sm:$0xff]  }
  0xc5   : > { %1531 = vmatprep.mubr.bf16.mxu0 %v18478_v48  ;;  %v18606_v53 = vpack.c.bf16 %v958_v31, %v925_v49  ;;  %v1084_v49 = vpack.c.bf16 %v930_v3, %v1070_v24  ;;  %v1104_v36 = vor.u32 %v1102_v35, %v1100_v16  ;;  %v1072_v46 = vmul.f32 %v18509_v30, %v931_v32 }
  0xc6   : > { %v964_v9 = vmul.f32 %v18281_v43, %v932_v8  ;;  %v1000_v24 = vshll.u32 %v975_v26, 16 }
  0xc7   : > { %v982_v23 = vshrl.u32 %v18606_v53, 16  ;;  %v1106_v31 = vshll.u32 %v1084_v49, 16  ;;  %v1110_v1 = vshrl.u32 %v1084_v49, 16  ;;  %v1085_v63 = vpack.c.bf16 %v932_v8, %v1072_v46  ;;  %v13047_v46 = vld [vmem:[%s18227_s6 + $0xe0] sm:$0xff] }
  0xc9   : > { %v18629_v0 = vrot.slane %v982_v23, 7  ;;  %v1118_v18 = vshrl.u32 %v1085_v63, 16 }
  0xca   : > { %1870 = vmatmul.mubr.bf16.gmra.mrb[28].mxu1 %v18502_v47  ;;  %v974_v47 = vpack.c.bf16 %v960_v21, %v927_v28  ;;  %v1162_v58 = vld [vmem:[#allocation2 + $0xd0] sm:$0x80] }
  0xcb   : > { %15735 = vmatprep.mubr.bf16.mxu1 %v1177_v19  ;;  %v1163_v48 = vsel %vm18469_vm6, %v1093_v2, %v1162_v58  ;;  %v18617_v19 = vsel %vm821_vm3, %v1096_v55, %v1100_v16  ;;  %v17225_v28 = vld [vmem:[#allocation7 + $0x210] sm:$0xff]   ;;  %v13044_v2 = vld [vmem:[%s18227_s6 + $0xc8] sm:$0xff]  ;;  %v17220_v55 = vld [vmem:[#allocation7 + $0x180] sm:$0xff]   ;;  %v1114_v16 = vshll.u32 %v1085_v63, 16 }
  0xcc   : > { %1164 = vst [vmem:[#allocation2 + $0xd0] sm:$0x80] %v1163_v48  ;;  %v989_v42 = vshrl.u32 %v974_v47, 16  ;;  %v992_v20 = vshll.u32 %v974_v47, 16  ;;  %1532 = vmatmul.mubr.bf16.gmra.mrb[28].mxu0 %v18534_v33  ;;  %1165 = vst [vmem:[#allocation2 + $0xe8] sm:$0xff] %v18617_v19  ;;  %v13043_v33 = vld [vmem:[%s18227_s6 + $0xc0] sm:$0xff] }
  0xcd   : > { %15703 = vmatprep.mubr.bf16.mxu0 %v18494_v44  ;;  %v18627_v21 = vmax.f32 %v13043_v33, 0.0  ;;  %v934_v6 = vmax.f32 %v13044_v2, 0.0  ;;  %v997_v48 = vshrl.u32 %v975_v26, 16  ;;  %v17224_v26 = vld [vmem:[#allocation7 + $0x1d0] sm:$0xff]  }
  0xce   : > { %v991_v47 = vrot.slane %v989_v42, 7  ;;  %v13045_v42 = vld [vmem:[%s18227_s6 + $0xd0] sm:$0xff] }
  0xcf   : > { %v1074_v3 = vmul.f32 %v18527_v14, %v18627_v21  ;;  %v945_v58 = vpack.c.bf16 %v934_v6, %v18627_v21  ;;  %v18640_v52 = vrot.slane %v997_v48, 7  ;;  %v18647_v33 = vmax.f32 %v13045_v42, 0.0  ;;  %v17226_v48 = vld [vmem:[#allocation7 + $0x190] sm:$0xff]  }
  0xd0   : > { %v994_v23 = vor.u32 %v992_v20, %v991_v47 }
  0xd1   : > { %v1086_v49 = vpack.c.bf16 %v934_v6, %v1074_v3  ;;  %953 = vst [vmem:[#allocation2 + $0x140] sm:$0xff] %v945_v58  ;;  %v1076_v58 = vmul.f32 %v18546_v37, %v18647_v33 }
  0xd2   : > { %15736 = vmatmul.mubr.bf16.vlgmr.msra.gmra.mrb[32].mxu1 %v18494_v44  ;;  %v1108_v44 = vrot.slane %v1106_v31, 1  ;;  %v1116_v31 = vrot.slane %v1114_v16, 1  ;;  %v17231_v16 = vld [vmem:[#allocation7 + $0x220] sm:$0xff]  }
  0xd3   : > { %15752 = vmatpush3.bf16.msra.mxu1 %v18504_v13  ;;  %15739 = vmatprep.mubr.bf16.mxu1 %v18517_v60  ;;  %v944_v13 = vpack.c.bf16 %v932_v8, %v931_v32  ;;  %v1122_v8 = vshll.u32 %v1086_v49, 16  ;;  %v1126_v20 = vshrl.u32 %v1086_v49, 16 }
  0xd4   : > { %15753 = vmatprep.subr.bf16.mxu1 %v17222_v56  ;;  %v18636_v59 = vsel %vm821_vm3, %v1104_v36, %v1108_v44  ;;  %v1112_v35 = vor.u32 %v1110_v1, %v1108_v44  ;;  %v18642_v36 = vpack.c.bf16 %v964_v9, %v931_v32  ;;  %15704 = vmatmul.mubr.bf16.vlgmr.msra.gmra.mrb[32].mxu0 %v18517_v60  ;;  %v13046_v1 = vld [vmem:[%s18227_s6 + $0xd8] sm:$0xff] }
  0xd5   : > { %952 = vst [vmem:[#allocation2 + $0x128] sm:$0xff] %v944_v13  ;;  %1166 = vst [vmem:[#allocation2 + $0x100] sm:$0xff] %v18636_v59  ;;  %13928 = vmatpush3.bf16.msra.mxu0 %v17220_v55  ;;  %15707 = vmatprep.mubr.bf16.mxu0 %v18543_v17  ;;  %v936_v2 = vmax.f32 %v13046_v1, 0.0  ;;  %v995_v32 = vsel %vm587_vm5, %v18629_v0, %v994_v23  ;;  %v1002_v44 = vor.u32 %v1000_v24, %v18640_v52  ;;  %v13048_v55 = vld [vmem:[%s18227_s6 + $0xe8] sm:$0xff] }
  0xd6   : > { %v966_v13 = vmul.f32 %v18286_v50, %v934_v6  ;;  %13929 = vmatprep.subr.bf16.mxu0 %v17221_v34  ;;  %v18656_v9 = vsel %vm821_vm3, %v1112_v35, %v1116_v31  ;;  %v1120_v63 = vor.u32 %v1118_v18, %v1116_v31  ;;  %v1124_v3 = vrot.slane %v1122_v8, 1  ;;  %1056 = vst [vmem:[#allocation2 + $0xf0] sm:$0xff] %v995_v32  ;;  %v17234_v31 = vld [vmem:[#allocation7 + $0x228] sm:$0xff]   ;;  %v17229_v32 = vld [vmem:[#allocation7 + $0x198] sm:$0xff]  }
  0xd7   : > { %15754 = vmatpush3.bf16.msra.mxu1 %v17222_v56  ;;  %v17223_v56 = vld [vmem:[#allocation7 + $0x188] sm:$0xff]   ;;  %1167 = vst [vmem:[#allocation2 + $0x118] sm:$0xff] %v18656_v9  ;;  %v18663_v6 = vmax.f32 %v13047_v46, 0.0  ;;  %v1003_v35 = vsel %vm587_vm5, %v991_v47, %v1002_v44  ;;  %v946_v24 = vpack.c.bf16 %v936_v2, %v18647_v33  ;;  %v1087_v49 = vpack.c.bf16 %v936_v2, %v1076_v58  ;;  %v17227_v47 = vld [vmem:[#allocation7 + $0x1d8] sm:$0xff]  }
  0xd8   : > { %15755 = vmatprep.subr.bf16.mxu1 %v17225_v28  ;;  %v18668_v34 = vsel %vm821_vm3, %v1120_v63, %v1124_v3  ;;  %1057 = vst [vmem:[#allocation2 + $0x108] sm:$0xff] %v1003_v35  ;;  %v985_v23 = vshll.u32 %v18606_v53, 16  ;;  %v1005_v42 = vshrl.u32 %v18642_v36, 16  ;;  %v1128_v8 = vor.u32 %v1126_v20, %v1124_v3  ;;  %v13049_v63 = vld [vmem:[%s18227_s6 + $0xf0] sm:$0xff]  ;;  %v13050_v58 = vld [vmem:[%s18227_s6 + $0xf8] sm:$0xff] }
  0xd9   : > { %13930 = vmatpush3.bf16.msra.mxu0 %v17223_v56  ;;  %1168 = vst [vmem:[#allocation2 + $0x130] sm:$0xff] %v18668_v34  ;;  %v1078_v18 = vmul.f32 %v18557_v38, %v18663_v6  ;;  %954 = vst [vmem:[#allocation2 + $0x158] sm:$0xff] %v946_v24  ;;  %v1130_v1 = vshll.u32 %v1087_v49, 16  ;;  %v1134_v46 = vshrl.u32 %v1087_v49, 16  ;;  %v18676_v56 = vpack.c.bf16 %v966_v13, %v18627_v21  ;;  %v794_v13 = vld [vmem:[#allocation2 + $0xd8] sm:$0x1] }
  0xda   : > { %15740 = vmatmul.mubr.bf16.gmra.mrb[36].mxu1 %v18543_v17  ;;  %13931 = vmatprep.subr.bf16.mxu0 %v17224_v26  ;;  %v1008_v53 = vshll.u32 %v18642_v36, 16  ;;  %v968_v26 = vmul.f32 %v18307_v5, %v936_v2  ;;  %v18686_v3 = vmax.f32 %v13049_v63, 0.0  ;;  %v18688_v21 = vmax.f32 %v13050_v58, 0.0  ;;  %v17232_v63 = vld [vmem:[#allocation7 + $0x1a0] sm:$0xff]  }
  0xdb   : > { %15756 = vmatpush3.bf16.msra.mxu1 %v17225_v28  ;;  %15743 = vmatprep.mubr.bf16.mxu1 %v18553_v15  ;;  %v938_v28 = vmax.f32 %v13048_v55, 0.0  ;;  %v18680_v55 = vrot.slane %v1005_v42, 7  ;;  %v1132_v20 = vrot.slane %v1130_v1, 1  ;;  %v795_v2 = vsel %vm18291_vm9, %v18514_v57, %v794_v13  ;;  %v17233_v13 = vld [vmem:[#allocation7 + $0x1e8] sm:$0xff]  }
  0xdc   : > { %15757 = vmatprep.subr.bf16.mxu1 %v17228_v45  ;;  %15708 = vmatmul.mubr.bf16.gmra.mrb[36].mxu0 %v18553_v15  ;;  %v1080_v1 = vmul.f32 %v18568_v61, %v18686_v3  ;;  %796 = vst [vmem:[#allocation2 + $0xd8] sm:$0x1] %v795_v2  ;;  %v978_v2 = vpack.c.bf16 %v968_v26, %v18647_v33 }
  0xdd   : > { %v1088_v44 = vpack.c.bf16 %v938_v28, %v1078_v18  ;;  %v947_v35 = vpack.c.bf16 %v938_v28, %v18663_v6  ;;  %13932 = vmatpush3.bf16.msra.mxu0 %v17226_v48  ;;  %15711 = vmatprep.mubr.bf16.mxu0 %v18571_v40  ;;  %v1010_v49 = vor.u32 %v1008_v53, %v18680_v55  ;;  %v607_v48 = vld [vmem:[#allocation2 + $0x190] sm:$0x80] }
  0xde   : > { %13933 = vmatprep.subr.bf16.mxu0 %v17227_v47  ;;  %v18697_v18 = vsel %vm821_vm3, %v1128_v8, %v1132_v20  ;;  %v1136_v42 = vor.u32 %v1134_v46, %v1132_v20  ;;  %v970_v8 = vmul.f32 %v18310_v7, %v938_v28  ;;  %v1089_v46 = vpack.c.bf16 %v18688_v21, %v1080_v1  ;;  %v17242_v1 = vld [vmem:[#allocation7 + $0x140] sm:$0xff]   ;;  %v17345_v7 = vld [vmem:[#allocation9 + $0xf8] sm:$0xff]  }
  0xdf   : > { %15758 = vmatpush3.bf16.msra.mxu1 %v17228_v45  ;;  %v17230_v45 = vld [vmem:[#allocation7 + $0x1e0] sm:$0xff]   ;;  %v1138_v24 = vshll.u32 %v1088_v44, 16  ;;  %v1142_v36 = vshrl.u32 %v1088_v44, 16  ;;  %955 = vst [vmem:[#allocation2 + $0x170] sm:$0xff] %v947_v35  ;;  %v17237_v44 = vld [vmem:[#allocation7 + $0x230] sm:$0xff]   ;;  %1169 = vst [vmem:[#allocation2 + $0x148] sm:$0xff] %v18697_v18  ;;  %v1011_v47 = vsel %vm587_vm5, %v18640_v52, %v1010_v49  ;;  %v987_v53 = vor.u32 %v985_v23, %v18629_v0 }
  0xe0   : > { %15759 = vmatprep.subr.bf16.mxu1 %v17231_v16  ;;  %1058 = vst [vmem:[#allocation2 + $0x120] sm:$0xff] %v1011_v47  ;;  %v1013_v20 = vshrl.u32 %v18676_v56, 16  ;;  %v17240_v35 = vld [vmem:[#allocation7 + $0x238] sm:$0xff]   ;;  %v1146_v28 = vshll.u32 %v1089_v46, 16  ;;  %v17235_v23 = vld [vmem:[#allocation7 + $0x1a8] sm:$0xff]   ;;  %v17236_v49 = vld [vmem:[#allocation7 + $0x1f0] sm:$0xff]  }
  0xe1   : > { %v1140_v57 = vrot.slane %v1138_v24, 1  ;;  %13934 = vmatpush3.bf16.msra.mxu0 %v17229_v32  ;;  %v1150_v24 = vshrl.u32 %v1089_v46, 16  ;;  %v979_v32 = vpack.c.bf16 %v970_v8, %v18663_v6  ;;  %v18735_v46 = vld [vmem:[#allocation2 + $0xd0] sm:$0xff] }
  0xe2   : > { %15744 = vmatmul.mubr.bf16.gmra.mrb[40].mxu1 %v18571_v40  ;;  %13935 = vmatprep.subr.bf16.mxu0 %v17230_v45  ;;  %v1148_v0 = vrot.slane %v1146_v28, 1  ;;  %v1015_v45 = vrot.slane %v1013_v20, 7 }
  0xe3   : > { %15760 = vmatpush3.bf16.msra.mxu1 %v17231_v16  ;;  %15747 = vmatprep.mubr.bf16.mxu1 %v18581_v10  ;;  %v608_v16 = vsel %vm18469_vm6, 0, %v607_v48  ;;  %v18710_v58 = vsel %vm821_vm3, %v1136_v42, %v1140_v57  ;;  %v1144_v52 = vor.u32 %v1142_v36, %v1140_v57  ;;  %v1016_v36 = vshll.u32 %v18676_v56, 16 }
  0xe4   : > { %15761 = vmatprep.subr.bf16.mxu1 %v17234_v31  ;;  %609 = vst [vmem:[#allocation2 + $0x190] sm:$0x80] %v608_v16  ;;  %1170 = vst [vmem:[#allocation2 + $0x160] sm:$0xff] %v18710_v58  ;;  %15712 = vmatmul.mubr.bf16.gmra.mrb[40].mxu0 %v18581_v10  ;;  %v1152_v6 = vor.u32 %v1150_v24, %v1148_v0  ;;  %v1021_v42 = vshrl.u32 %v978_v2, 16  ;;  %v1029_v57 = vshrl.u32 %v979_v32, 16  ;;  %v17238_v16 = vld [vmem:[#allocation7 + $0x1b0] sm:$0xff]  }
  0xe5   : > { %13936 = vmatpush3.bf16.msra.mxu0 %v17232_v63  ;;  %15715 = vmatprep.mubr.bf16.mxu0 %v18592_v4  ;;  %v18722_v33 = vsel %vm821_vm3, %v1144_v52, %v1148_v0  ;;  %v1018_v48 = vor.u32 %v1016_v36, %v1015_v45  ;;  %v17243_v52 = vld [vmem:[#allocation7 + $0x148] sm:$0xff]   ;;  %v17244_v0 = vld [vmem:[#allocation7 + $0x150] sm:$0xff]  }
  0xe6   : > { %13937 = vmatprep.subr.bf16.mxu0 %v17233_v13  ;;  %1171 = vst [vmem:[#allocation2 + $0x178] sm:$0xff] %v18722_v33  ;;  %v1023_v8 = vrot.slane %v1021_v42, 7  ;;  %v18742_v63 = vrot.slane %v1029_v57, 7  ;;  %v1032_v13 = vshll.u32 %v979_v32, 16  ;;  %v17747_v36 = vld [vmem:[#allocation2 + $0x30] sm:$0xff]  ;;  %v17247_v57 = vld [vmem:[#allocation7 + $0x168] sm:$0xff]  }
  0xe7   : > { %15762 = vmatpush3.bf16.msra.mxu1 %v17234_v31  ;;  %v1053_v31 = vld [vmem:[#allocation2 + $0xd8] sm:$0xff]  ;;  %v17256_v42 = vld [vmem:[#allocation7 + $0x110] sm:$0xff]  }
  0xe8   : > { %15763 = vmatprep.subr.bf16.mxu1 %v17237_v44  ;;  %v18726_v26 = vsel %vm18365_vm0, %v987_v53, %v1053_v31  ;;  %v17239_v53 = vld [vmem:[#allocation7 + $0x1f8] sm:$0xff]   ;;  %v1034_v24 = vor.u32 %v1032_v13, %v18742_v63  ;;  %v972_v31 = vmul.f32 %v18317_v11, %v18688_v21  ;;  %v17248_v13 = vld [vmem:[#allocation7 + $0x170] sm:$0xff]   ;;  %v17315_v11 = vld [vmem:[#allocation9] sm:$0xff]  }
  0xe9   : > { %1055 = vst [vmem:[#allocation2 + $0xd8] sm:$0xff] %v18726_v26  ;;  %13938 = vmatpush3.bf16.msra.mxu0 %v17235_v23  ;;  %v17250_v23 = vld [vmem:[#allocation7 + $0xc0] sm:$0xff]  }
  0xea   : > { %15748 = vmatmul.mubr.bf16.gmra.mrb[44].mxu1 %v18592_v4  ;;  %13939 = vmatprep.subr.bf16.mxu0 %v17236_v49  ;;  %v1035_v32 = vsel %vm587_vm5, %v1023_v8, %v1034_v24  ;;  %v17748_v49 = vld [vmem:[#allocation2 + $0x50] sm:$0xff] }
  0xeb   : > { %15764 = vmatpush3.bf16.msra.mxu1 %v17237_v44  ;;  %15767 = vmatprep.mubr.bf16.mxu1 %v18517_v60  ;;  %v1172_v56 = vld [vmem:[#allocation2 + $0x190] sm:$0xff]  ;;  %v1024_v44 = vshll.u32 %v978_v2, 16  ;;  %v18740_v60 = vsel %vm587_vm5, %v18680_v55, %v1018_v48  ;;  %v17241_v55 = vld [vmem:[#allocation7 + $0x1b8] sm:$0xff]   ;;  %1061 = vst [vmem:[#allocation2 + $0x168] sm:$0xff] %v1035_v32  ;;  %v17751_v32 = vld [vmem:[#allocation2 + $0x60] sm:$0xff] }
  0xec   : > { %15765 = vmatprep.subr.bf16.mxu1 %v17240_v35  ;;  %v18733_v47 = vsel %vm18585_vm12, %v1152_v6, %v1172_v56  ;;  %1059 = vst [vmem:[#allocation2 + $0x138] sm:$0xff] %v18740_v60  ;;  %15716 = vmatmul.mubr.bf16.gmra.mrb[44].mxu0 %v18735_v46  ;;  %v17746_v2 = vld [vmem:[#allocation2 + $0x38] sm:$0xff]  ;;  %v17254_v6 = vld [vmem:[#allocation7 + $0xc8] sm:$0xff]   ;;  %v17258_v56 = vld [vmem:[#allocation7 + $0xd0] sm:$0xff]  }
  0xed   : > { %1174 = vst [vmem:[#allocation2 + $0x190] sm:$0xff] %v18733_v47  ;;  %v1026_v20 = vor.u32 %v1024_v44, %v1023_v8  ;;  %13940 = vmatpush3.bf16.msra.mxu0 %v17238_v16  ;;  %2224 = vmatprep.mubr.bf16.mxu0 %v17746_v2  ;;  %v17259_v44 = vld [vmem:[#allocation7 + $0x118] sm:$0xff]   ;;  %v17749_v16 = vld [vmem:[#allocation2 + $0x48] sm:$0xff] }
  0xee   : > { %13941 = vmatprep.subr.bf16.mxu0 %v17239_v53  ;;  %v17261_v8 = vld [vmem:[#allocation7 + $0xd8] sm:$0xff]   ;;  %v17750_v53 = vld [vmem:[#allocation2 + $0x68] sm:$0xff] }
  0xef   : > { %15766 = vmatpush3.bf16.msra.mxu1 %v17240_v35  ;;  %v18747_v28 = vsel %vm587_vm5, %v1015_v45, %v1026_v20  ;;  %v17249_v35 = vld [vmem:[#allocation7 + $0x100] sm:$0xff]   ;;  %v17253_v45 = vld [vmem:[#allocation7 + $0x108] sm:$0xff]  }
  0xf0   : > { %15783 = vmatprep.subr.bf16.mxu1 %v17242_v1  ;;  %1060 = vst [vmem:[#allocation2 + $0x150] sm:$0xff] %v18747_v28  ;;  %v604_v2 = vld [vmem:[#allocation2 + $0x188] sm:$0x80] }
  0xf1   : > { %13942 = vmatpush3.bf16.msra.mxu0 %v17241_v55  ;;  %v17265_v55 = vld [vmem:[#allocation7 + $0x128] sm:$0xff]  }
  0xf2   : > { %15768 = vmatmul.mubr.bf16.vlgmr.msra.gmra.mrb[32].mxu1 %v18543_v17  ;;  %14007 = vmatprep.subr.bf16.mxu0 %v17249_v35  ;;  %v17245_v17 = vld [vmem:[#allocation7 + $0x158] sm:$0xff]   ;;  %v601_v35 = vld [vmem:[#allocation2 + $0x180] sm:$0x80] }
  0xf3   : > { %15784 = vmatpush3.bf16.msra.mxu1 %v17242_v1  ;;  %15771 = vmatprep.mubr.bf16.mxu1 %v18553_v15  ;;  %v980_v15 = vpack.c.bf16 %v972_v31, %v18686_v3  ;;  %v17246_v1 = vld [vmem:[#allocation7 + $0x160] sm:$0xff]   ;;  %v18765_v31 = vpack.c.bf16 %v18688_v21, %v18686_v3  ;;  %v17270_v21 = vld [vmem:[#allocation7 + $0xf0] sm:$0xff]  }
  0xf4   : > { %15785 = vmatprep.subr.bf16.mxu1 %v17243_v52  ;;  %2225 = vmatmul.mubr.bf16.vlgmr.msra.gmra.mrb[48].mxu0 %v17747_v36  ;;  %v17752_v36 = vld [vmem:[#allocation2 + $0x80] sm:$0xff] }
  0xf5   : > { %2232 = vmatprep.mubr.bf16.mxu0 %v17748_v49  ;;  %14008 = vmatpush3.bf16.msra.mxu0 %v17250_v23  ;;  %v1037_v48 = vshrl.u32 %v980_v15, 16  ;;  %v1040_v20 = vshll.u32 %v980_v15, 16  ;;  %v605_v23 = vsel %vm18469_vm6, 0, %v604_v2  ;;  %v17268_v49 = vld [vmem:[#allocation7 + $0x130] sm:$0xff]   ;;  %v17252_v3 = vld [vmem:[#allocation7 + $0x80] sm:$0xff]   ;;  %v17255_v15 = vld [vmem:[#allocation7 + $0x88] sm:$0xff]  }
  0xf6   : > { %14009 = vmatprep.subr.bf16.mxu0 %v17253_v45  ;;  %v602_v45 = vsel %vm18469_vm6, 0, %v601_v35  ;;  %606 = vst [vmem:[#allocation2 + $0x188] sm:$0x80] %v605_v23  ;;  %v17274_v2 = vld [vmem:[#allocation7 + $0x1c0] sm:$0xff]   ;;  %v17278_v23 = vld [vmem:[#allocation7 + $0x1d0] sm:$0xff]  }
  0xf7   : > { %15786 = vmatpush3.bf16.msra.mxu1 %v17243_v52  ;;  %v17264_v52 = vld [vmem:[#allocation7 + $0xe0] sm:$0xff]   ;;  %603 = vst [vmem:[#allocation2 + $0x180] sm:$0x80] %v602_v45  ;;  %956 = vst [vmem:[#allocation2 + $0x188] sm:$0xff] %v18765_v31  ;;  %v17293_v45 = vld [vmem:[#allocation7 + $0x48] sm:$0xff]  }
  0xf8   : > { %15787 = vmatprep.subr.bf16.mxu1 %v17244_v0  ;;  %v17275_v35 = vld [vmem:[#allocation7 + $0x180] sm:$0xff]  }
  0xf9   : > { %14010 = vmatpush3.bf16.msra.mxu0 %v17254_v6  ;;  %v17271_v6 = vld [vmem:[#allocation7 + $0x138] sm:$0xff]  }
  0xfa   : > { %15772 = vmatmul.mubr.bf16.gmra.mrb[36].mxu1 %v18571_v40  ;;  %14011 = vmatprep.subr.bf16.mxu0 %v17256_v42  ;;  %v1039_v40 = vrot.slane %v1037_v48, 7  ;;  %v1063_v42 = vld [vmem:[#allocation2 + $0x198] sm:$0x1]  ;;  %v17288_v48 = vld [vmem:[#allocation7 + $0x40] sm:$0xff]  }
  0xfb   : > { %15788 = vmatpush3.bf16.msra.mxu1 %v17244_v0  ;;  %15775 = vmatprep.mubr.bf16.mxu1 %v18581_v10  ;;  %v17262_v10 = vld [vmem:[#allocation7 + $0x120] sm:$0xff]   ;;  %v17251_v0 = vld [vmem:[#allocation7 + $0x178] sm:$0xff]  }
  0xfc   : > { %15789 = vmatprep.subr.bf16.mxu1 %v17245_v17  ;;  %2233 = vmatmul.mubr.bf16.gmra.mrb[52].mxu0 %v17749_v16  ;;  %v1042_v24 = vor.u32 %v1040_v20, %v1039_v40  ;;  %v17755_v16 = vld [vmem:[#allocation2 + $0x90] sm:$0xff]  ;;  %v17757_v20 = vld [vmem:[#allocation2 + $0xa8] sm:$0xff] }
  0xfd   : > { %2240 = vmatprep.mubr.bf16.mxu0 %v17750_v53  ;;  %14012 = vmatpush3.bf16.msra.mxu0 %v17258_v56  ;;  %v17273_v56 = vld [vmem:[#allocation7 + $0xf8] sm:$0xff]   ;;  %v17263_v53 = vld [vmem:[#allocation7 + $0xa0] sm:$0xff]  }
  0xfe   : > { %14013 = vmatprep.subr.bf16.mxu0 %v17259_v44  ;;  %v17257_v44 = vld [vmem:[#allocation7 + $0x90] sm:$0xff]  }
  0xff   : > { %15790 = vmatpush3.bf16.msra.mxu1 %v17245_v17  ;;  %v18771_v17 = vsel %vm587_vm5, %v18742_v63, %v1042_v24  ;;  %v17753_v63 = vld [vmem:[#allocation2 + $0x78] sm:$0xff]  ;;  %v17759_v24 = vld [vmem:[#allocation2 + $0xc0] sm:$0xff] }
 0x100   : > { %15791 = vmatprep.subr.bf16.mxu1 %v17246_v1  ;;  %1062 = vst [vmem:[#allocation2 + $0x180] sm:$0xff] %v18771_v17 }
 0x101   : > { %14014 = vmatpush3.bf16.msra.mxu0 %v17261_v8  ;;  %v17756_v8 = vld [vmem:[#allocation2 + $0xb0] sm:$0xff] }
 0x102   : > { %15776 = vmatmul.mubr.bf16.gmra.mrb[40].mxu1 %v18592_v4  ;;  %14015 = vmatprep.subr.bf16.mxu0 %v17262_v10  ;;  %v17267_v4 = vld [vmem:[#allocation7 + $0xe8] sm:$0xff]  }
 0x103   : > { %15792 = vmatpush3.bf16.msra.mxu1 %v17246_v1  ;;  %15779 = vmatprep.mubr.bf16.mxu1 %v18735_v46  ;;  %v17754_v1 = vld [vmem:[#allocation2 + $0x98] sm:$0xff]  ;;  %v17758_v10 = vld [vmem:[#allocation2 + $0xc8] sm:$0xff] }
 0x104   : > { %15793 = vmatprep.subr.bf16.mxu1 %v17247_v57  ;;  %2241 = vmatmul.mubr.bf16.gmra.mrb[56].mxu0 %v17751_v32  ;;  %v17276_v32 = vld [vmem:[#allocation7 + $0x1c8] sm:$0xff]  }
 0x105   : > { %2248 = vmatprep.mubr.bf16.mxu0 %v17752_v36  ;;  %14016 = vmatpush3.bf16.msra.mxu0 %v17264_v52  ;;  %v17272_v52 = vld [vmem:[#allocation7 + $0xb8] sm:$0xff]  }
 0x106   : > { %14017 = vmatprep.subr.bf16.mxu0 %v17265_v55  ;;  %v18785_v55 = vld [vmem:[#allocation2 + $0xe0] sm:$0xff]  ;;  %v17280_v36 = vld [vmem:[#allocation7 + $0x1d8] sm:$0xff]  }
 0x107   : > { %15794 = vmatpush3.bf16.msra.mxu1 %v17247_v57  ;;  %v17260_v57 = vld [vmem:[#allocation7 + $0x98] sm:$0xff]  }
 0x108   : > { %15795 = vmatprep.subr.bf16.mxu1 %v17248_v13 }
 0x109   : > { %14018 = vmatpush3.bf16.msra.mxu0 %v17267_v4  ;;  %v17761_v4 = vld [vmem:[#allocation2 + $0xe8] sm:$0xff] }
 0x10a   : > { %15780 = vmatmul.mubr.bf16.gmra.mrb[44].mxu1 %v18617_v19  ;;  %14019 = vmatprep.subr.bf16.mxu0 %v17268_v49  ;;  %v17294_v49 = vld [vmem:[#allocation7 + $0x8] sm:$0xff]  }
 0x10b   : > { %15796 = vmatpush3.bf16.msra.mxu1 %v17248_v13  ;;  %15799 = vmatprep.mubr.bf16.mxu1 %v18617_v19  ;;  %v1064_v19 = vsel %vm18291_vm9, %v1039_v40, %v1063_v42  ;;  %v17266_v40 = vld [vmem:[#allocation7 + $0xa8] sm:$0xff]   ;;  %v17269_v13 = vld [vmem:[#allocation7 + $0xb0] sm:$0xff]  }
 0x10c   : > { %15797 = vmatprep.subr.bf16.mxu1 %v17251_v0  ;;  %2249 = vmatmul.mubr.bf16.gmra.mrb[60].mxu0 %v17753_v63  ;;  %1065 = vst [vmem:[#allocation2 + $0x198] sm:$0x1] %v1064_v19  ;;  %v17297_v63 = vld [vmem:[#allocation7 + $0x10] sm:$0xff]  }
 0x10d   : > { %2256 = vmatprep.mubr.bf16.mxu0 %v17754_v1  ;;  %14020 = vmatpush3.bf16.msra.mxu0 %v17270_v21  ;;  %v17281_v21 = vld [vmem:[#allocation7 + $0x198] sm:$0xff]   ;;  %v18799_v42 = vld [vmem:[#allocation2 + $0xf0] sm:$0xff]  ;;  %v17284_v1 = vld [vmem:[#allocation7 + $0x1e8] sm:$0xff]  }
 0x10e   : > { %14021 = vmatprep.subr.bf16.mxu0 %v17271_v6  ;;  %v17295_v6 = vld [vmem:[#allocation7 + $0x50] sm:$0xff]  }
 0x10f   : > { %15798 = vmatpush3.bf16.msra.mxu1 %v17251_v0  ;;  %v17277_v0 = vld [vmem:[#allocation7 + $0x188] sm:$0xff]   ;;  %v17286_v19 = vld [vmem:[#allocation7 + $0x1f0] sm:$0xff]  }
 0x110   : > { %15815 = vmatprep.subr.bf16.mxu1 %v17252_v3 }
 0x111   : > { %14022 = vmatpush3.bf16.msra.mxu0 %v17273_v56  ;;  %v18802_v56 = vld [vmem:[#allocation2 + $0x110] sm:$0xff] }
 0x112   : > { %15800 = vmatmul.mubr.bf16.vlgmr.msra.gmra.mrb[48].mxu1 %v18636_v59  ;;  %14087 = vmatprep.subr.bf16.mxu0 %v17288_v48  ;;  %v17285_v48 = vld [vmem:[#allocation7 + $0x1a8] sm:$0xff]  }
 0x113   : > { %15816 = vmatpush3.bf16.msra.mxu1 %v17252_v3  ;;  %15803 = vmatprep.mubr.bf16.mxu1 %v18656_v9  ;;  %v18794_v3 = vld [vmem:[#allocation2 + $0xf8] sm:$0xff] }
 0x114   : > { %15817 = vmatprep.subr.bf16.mxu1 %v17255_v15  ;;  %2257 = vmatmul.mubr.bf16.gmra.mrb[64].mxu0 %v17755_v16  ;;  %v17287_v16 = vld [vmem:[#allocation7 + $0x1b0] sm:$0xff]  }
 0x115   : > { %2264 = vmatprep.mubr.bf16.mxu0 %v17756_v8  ;;  %v18807_v8 = vld [vmem:[#allocation2 + $0x108] sm:$0xff] }
 0x117   : > { %15818 = vmatpush3.bf16.msra.mxu1 %v17255_v15  ;;  %v17283_v15 = vld [vmem:[#allocation7 + $0x1a0] sm:$0xff]  }
 0x118   : > { %15819 = vmatprep.subr.bf16.mxu1 %v17257_v44 }
 0x11a   : > { %15804 = vmatmul.mubr.bf16.gmra.mrb[52].mxu1 %v18668_v34 }
 0x11b   : > { %15820 = vmatpush3.bf16.msra.mxu1 %v17257_v44  ;;  %15807 = vmatprep.mubr.bf16.mxu1 %v18697_v18  ;;  %v17302_v44 = vld [vmem:[#allocation7 + $0x20] sm:$0xff]  }
 0x11c   : > { %15821 = vmatprep.subr.bf16.mxu1 %v17260_v57  ;;  %2265 = vmatmul.mubr.bf16.gmra.mrb[68].mxu0 %v17757_v20  ;;  %v17305_v20 = vld [vmem:[#allocation7 + $0x70] sm:$0xff]  }
 0x11d   : > { %2272 = vmatprep.mubr.bf16.mxu0 %v17758_v10  ;;  %v17292_v10 = vld [vmem:[#allocation7 + $0x200] sm:$0xff]  }
 0x11f   : > { %15822 = vmatpush3.bf16.msra.mxu1 %v17260_v57  ;;  %v17303_v57 = vld [vmem:[#allocation7 + $0x68] sm:$0xff]  }
 0x120   : > { %15823 = vmatprep.subr.bf16.mxu1 %v17263_v53 }
 0x122   : > { %15808 = vmatmul.mubr.bf16.gmra.mrb[56].mxu1 %v18710_v58 }
 0x123   : > { %15824 = vmatpush3.bf16.msra.mxu1 %v17263_v53  ;;  %15811 = vmatprep.mubr.bf16.mxu1 %v18722_v33  ;;  %v18810_v53 = vld [vmem:[#allocation2 + $0x128] sm:$0xff] }
 0x124   : > { %15825 = vmatprep.subr.bf16.mxu1 %v17266_v40  ;;  %2273 = vmatmul.mubr.bf16.gmra.mrb[72].mxu0 %v17759_v24  ;;  %v18815_v24 = vld [vmem:[#allocation2 + $0x120] sm:$0xff] }
 0x125   : > { %2280 = vmatprep.mubr.bf16.mxu0 %v18785_v55 }
 0x127   : > { %15826 = vmatpush3.bf16.msra.mxu1 %v17266_v40  ;;  %v17291_v40 = vld [vmem:[#allocation7 + $0x1b8] sm:$0xff]  }
 0x128   : > { %15827 = vmatprep.subr.bf16.mxu1 %v17269_v13 }
 0x12a   : > { %15812 = vmatmul.mubr.bf16.gmra.mrb[60].mxu1 %v18733_v47  ;;  %v17289_v47 = vld [vmem:[#allocation7] sm:$0xff]  }
 0x12b   : > { %15828 = vmatpush3.bf16.msra.mxu1 %v17269_v13  ;;  %15831 = vmatprep.mubr.bf16.mxu1 %v18735_v46  ;;  %v17279_v46 = vld [vmem:[#allocation7 + $0x190] sm:$0xff]  }
 0x12c   : > { %15829 = vmatprep.subr.bf16.mxu1 %v17272_v52  ;;  %2281 = vmatmul.mubr.bf16.gmra.mrb[76].mxu0 %v18726_v26  ;;  %v17307_v13 = vld [vmem:[#allocation7 + $0x30] sm:$0xff]  }
 0x12d   : > { %2973 = vmatprep.mubr.bf16.mxu0 %v18785_v55 }
 0x12f   : > { %15830 = vmatpush3.bf16.msra.mxu1 %v17272_v52  ;;  %v17308_v52 = vld [vmem:[#allocation7 + $0x78] sm:$0xff]  }
 0x130   : > { %14167 = vmatprep.subr.bf16.mxu1 %v17274_v2  ;;  %v17296_v2 = vld [vmem:[#allocation7 + $0x208] sm:$0xff]  }
 0x132   : > { %15832 = vmatmul.mubr.bf16.vlgmr.msra.gmra.mrb[48].mxu1 %v17761_v4  ;;  %v616_v4 = vld [vmem:[#allocation3 + $0x18] sm:$0x1] }
 0x133   : > { %14168 = vmatpush3.bf16.msra.mxu1 %v17275_v35  ;;  %15835 = vmatprep.mubr.bf16.mxu1 %v18636_v59  ;;  %v17282_v59 = vld [vmem:[#allocation7 + $0x1e0] sm:$0xff]  }
 0x134   : > { %14169 = vmatprep.subr.bf16.mxu1 %v17276_v32  ;;  %2974 = vmatmul.mubr.bf16.vlgmr.msra.gmra.mrb[80].mxu0 %v18726_v26  ;;  %v17298_v26 = vld [vmem:[#allocation7 + $0x58] sm:$0xff]   ;;  %v18818_v35 = vld [vmem:[#allocation2 + $0x140] sm:$0xff] }
 0x135   : > { %2981 = vmatprep.mubr.bf16.mxu0 %v18794_v3  ;;  %14088 = vmatpush3.bf16.msra.mxu0 %v17289_v47  ;;  %v17320_v32 = vld [vmem:[#allocation9 + $0x100] sm:$0xff]   ;;  %v17306_v47 = vld [vmem:[#allocation7 + $0x218] sm:$0xff]  }
 0x136   : > { %14089 = vmatprep.subr.bf16.mxu0 %v17293_v45  ;;  %v617_v45 = vsel %vm18291_vm9, 0, %v616_v4 }
 0x137   : > { %14170 = vmatpush3.bf16.msra.mxu1 %v17277_v0  ;;  %v17301_v0 = vld [vmem:[#allocation7 + $0x210] sm:$0xff]   ;;  %618 = vst [vmem:[#allocation3 + $0x18] sm:$0x1] %v617_v45 }
 0x138   : > { %14171 = vmatprep.subr.bf16.mxu1 %v17278_v23  ;;  %v619_v23 = vld [vmem:[#allocation3 + $0x20] sm:$0x1] }
 0x139   : > { %14090 = vmatpush3.bf16.msra.mxu0 %v17294_v49  ;;  %v17311_v49 = vld [vmem:[#allocation7 + $0x228] sm:$0xff]  }
 0x13a   : > { %15836 = vmatmul.mubr.bf16.gmra.mrb[52].mxu1 %v18656_v9  ;;  %14091 = vmatprep.subr.bf16.mxu0 %v17295_v6  ;;  %v17299_v9 = vld [vmem:[#allocation7 + $0x18] sm:$0xff]  }
 0x13b   : > { %14172 = vmatpush3.bf16.msra.mxu1 %v17279_v46  ;;  %15839 = vmatprep.mubr.bf16.mxu1 %v18668_v34  ;;  %v17300_v34 = vld [vmem:[#allocation7 + $0x60] sm:$0xff]   ;;  %v620_v46 = vsel %vm18291_vm9, 0, %v619_v23  ;;  %v18862_v23 = vld [vmem:[#allocation2 + $0x150] sm:$0xff] }
 0x13c   : > { %14173 = vmatprep.subr.bf16.mxu1 %v17280_v36  ;;  %2982 = vmatmul.mubr.bf16.gmra.mrb[84].mxu0 %v18799_v42  ;;  %v18828_v36 = vld [vmem:[#allocation2 + $0x158] sm:$0xff]  ;;  %621 = vst [vmem:[#allocation3 + $0x20] sm:$0x1] %v620_v46 }
 0x13d   : > { %2989 = vmatprep.mubr.bf16.mxu0 %v18802_v56  ;;  %14092 = vmatpush3.bf16.msra.mxu0 %v17297_v63 }
 0x13e   : > { %14093 = vmatprep.subr.bf16.mxu0 %v17298_v26 }
 0x13f   : > { %14174 = vmatpush3.bf16.msra.mxu1 %v17281_v21  ;;  %v18834_v21 = vld [vmem:[#allocation2 + $0x170] sm:$0xff] }
 0x140   : > { %14175 = vmatprep.subr.bf16.mxu1 %v17282_v59 }
 0x141   : > { %14094 = vmatpush3.bf16.msra.mxu0 %v17299_v9 }
 0x142   : > { %15840 = vmatmul.mubr.bf16.gmra.mrb[56].mxu1 %v18697_v18  ;;  %14095 = vmatprep.subr.bf16.mxu0 %v17300_v34  ;;  %v17290_v18 = vld [vmem:[#allocation7 + $0x1f8] sm:$0xff]  }
 0x143   : > { %14176 = vmatpush3.bf16.msra.mxu1 %v17283_v15  ;;  %15843 = vmatprep.mubr.bf16.mxu1 %v18710_v58  ;;  %v17304_v58 = vld [vmem:[#allocation7 + $0x28] sm:$0xff]  }
 0x144   : > { %14177 = vmatprep.subr.bf16.mxu1 %v17284_v1  ;;  %2990 = vmatmul.mubr.bf16.gmra.mrb[88].mxu0 %v18807_v8  ;;  %v17312_v1 = vld [vmem:[#allocation7 + $0x230] sm:$0xff]  }
 0x145   : > { %2997 = vmatprep.mubr.bf16.mxu0 %v18810_v53  ;;  %14096 = vmatpush3.bf16.msra.mxu0 %v17302_v44  ;;  %v18849_v44 = vld [vmem:[#allocation2 + $0x138] sm:$0xff] }
 0x146   : > { %14097 = vmatprep.subr.bf16.mxu0 %v17303_v57  ;;  %v17314_v57 = vld [vmem:[#allocation9 + $0x40] sm:$0xff]  }
 0x147   : > { %14178 = vmatpush3.bf16.msra.mxu1 %v17285_v48  ;;  %v17313_v48 = vld [vmem:[#allocation7 + $0x238] sm:$0xff]  }
 0x148   : > { %14179 = vmatprep.subr.bf16.mxu1 %v17286_v19  ;;  %v18845_v19 = vld [vmem:[#allocation2 + $0x168] sm:$0xff] }
 0x149   : > { %14098 = vmatpush3.bf16.msra.mxu0 %v17304_v58  ;;  %v2675_v58 = vld [vmem:[#allocation2 + $0xc8] sm:$0xff] }
 0x14a   : > { %15844 = vmatmul.mubr.bf16.gmra.mrb[60].mxu1 %v18722_v33  ;;  %14099 = vmatprep.subr.bf16.mxu0 %v17305_v20  ;;  %v17309_v33 = vld [vmem:[#allocation7 + $0x38] sm:$0xff]  }
 0x14b   : > { %14180 = vmatpush3.bf16.msra.mxu1 %v17287_v16  ;;  %3721 = vmatprep.mubr.bf16.mxu1 %v18794_v3 }
 0x14c   : > { %14181 = vmatprep.subr.bf16.mxu1 %v17290_v18  ;;  %2998 = vmatmul.mubr.bf16.gmra.mrb[92].mxu0 %v18815_v24 }
 0x14d   : > { %3005 = vmatprep.mubr.bf16.mxu0 %v18818_v35  ;;  %14100 = vmatpush3.bf16.msra.mxu0 %v17307_v13 }
 0x14e   : > { %14101 = vmatprep.subr.bf16.mxu0 %v17308_v52 }
 0x14f   : > { %14182 = vmatpush3.bf16.msra.mxu1 %v17291_v40 }
 0x150   : > { %15847 = vmatprep.subr.bf16.mxu1 %v17292_v10 }
 0x151   : > { %14102 = vmatpush3.bf16.msra.mxu0 %v17309_v33 }
 0x152   : > { %3722 = vmatmul.mubr.bf16.vlgmr.msra.gmra.mrb[64].mxu1 %v18799_v42  ;;  %14247 = vmatprep.subr.bf16.mxu0 %v17320_v32 }
 0x153   : > { %15848 = vmatpush3.bf16.msra.mxu1 %v17292_v10  ;;  %3729 = vmatprep.mubr.bf16.mxu1 %v18802_v56 }
 0x154   : > { %15849 = vmatprep.subr.bf16.mxu1 %v17296_v2  ;;  %3006 = vmatmul.mubr.bf16.gmra.mrb[96].mxu0 %v18740_v60  ;;  %v17310_v60 = vld [vmem:[#allocation7 + $0x220] sm:$0xff]  }
 0x155   : > { %3013 = vmatprep.mubr.bf16.mxu0 %v18828_v36 }
 0x157   : > { %15850 = vmatpush3.bf16.msra.mxu1 %v17296_v2 }
 0x158   : > { %15851 = vmatprep.subr.bf16.mxu1 %v17301_v0 }
 0x15a   : > { %3730 = vmatmul.mubr.bf16.gmra.mrb[68].mxu1 %v18807_v8 }
 0x15b   : > { %3737 = vmatprep.mubr.bf16.mxu1 %v18810_v53  ;;  %15852 = vmatpush3.bf16.msra.mxu1 %v17301_v0 }
 0x15c   : > { %15853 = vmatprep.subr.bf16.mxu1 %v17306_v47  ;;  %3014 = vmatmul.mubr.bf16.gmra.mrb[100].mxu0 %v18747_v28  ;;  %v622_v28 = vld [vmem:[#allocation3 + $0x28] sm:$0x1] }
 0x15d   : > { %3021 = vmatprep.mubr.bf16.mxu0 %v18834_v21  ;;  %v623_v34 = vsel %vm18291_vm9, 0, %v622_v28 }
 0x15e   : > { %624 = vst [vmem:[#allocation3 + $0x28] sm:$0x1] %v623_v34 }
 0x15f   : > { %15854 = vmatpush3.bf16.msra.mxu1 %v17306_v47  ;;  %v2674_v47 = vld [vmem:[#allocation2 + $0xc0] sm:$0xff] }
 0x160   : > { %15855 = vmatprep.subr.bf16.mxu1 %v17310_v60 }
 0x162   : > { %3738 = vmatmul.mubr.bf16.gmra.mrb[72].mxu1 %v18815_v24 }
 0x163   : > { %3745 = vmatprep.mubr.bf16.mxu1 %v18818_v35  ;;  %15856 = vmatpush3.bf16.msra.mxu1 %v17310_v60  ;;  %v17321_v60 = vld [vmem:[#allocation9 + $0xc0] sm:$0xff]  }
 0x164   : > { %15857 = vmatprep.subr.bf16.mxu1 %v17311_v49  ;;  %3022 = vmatmul.mubr.bf16.gmra.mrb[104].mxu0 %v18845_v19  ;;  %v13783_v18 = vpop.f32.mrb[0].mxu0 }
 0x165   : > { %v13863_v6 = vpop.f32.mrb[0].mxu1  ;;  %3029 = vmatprep.mubr.bf16.mxu0 %v18765_v31  ;;  %v13784_v20 = vpop.f32.mrb[1].mxu0 }
 0x166   : > { %v13864_v59 = vpop.f32.mrb[1].mxu1  ;;  %v18855_v52 = vadd.f32 %v13784_v20, %v13783_v18  ;;  %v13786_v2 = vpop.f32.mrb[2].mxu0  ;;  %v17328_v18 = vld [vmem:[#allocation9 + $0x110] sm:$0xff]  }
 0x167   : > { %v18838_v63 = vadd.f32 %v13864_v59, %v13863_v6  ;;  %v13866_v15 = vpop.f32.mrb[2].mxu1  ;;  %15858 = vmatpush3.bf16.msra.mxu1 %v17311_v49  ;;  %v13787_v32 = vpop.f32.mrb[3].mxu0  ;;  %v17324_v59 = vld [vmem:[#allocation9 + $0x108] sm:$0xff]   ;;  %v17329_v20 = vld [vmem:[#allocation9 + $0xd0] sm:$0xff]  }
 0x168   : > { %v13867_v26 = vpop.f32.mrb[3].mxu1  ;;  %15859 = vmatprep.subr.bf16.mxu1 %v17312_v1  ;;  %v18859_v4 = vadd.f32 %v13787_v32, %v13786_v2 }
 0x169   : > { %v18841_v9 = vadd.f32 %v13867_v26, %v13866_v15 }
 0x16a   : > { %3746 = vmatmul.mubr.bf16.gmra.mrb[76].mxu1 %v18849_v44 }
 0x16b   : > { %3753 = vmatprep.mubr.bf16.mxu1 %v18828_v36  ;;  %15860 = vmatpush3.bf16.msra.mxu1 %v17312_v1 }
 0x16c   : > { %15861 = vmatprep.subr.bf16.mxu1 %v17313_v48  ;;  %3030 = vmatmul.mubr.bf16.gmra.mrb[108].mxu0 %v18771_v17  ;;  %v13789_v46 = vpop.f32.mrb[4].mxu0 }
 0x16d   : > { %v13869_v16 = vpop.f32.mrb[4].mxu1  ;;  %3311 = vmatprep.mubr.bf16.mxu0 %v2675_v58  ;;  %v13790_v6 = vpop.f32.mrb[5].mxu0 }
 0x16e   : > { %v13870_v40 = vpop.f32.mrb[5].mxu1  ;;  %v18868_v1 = vadd.f32 %v13790_v6, %v13789_v46  ;;  %v13792_v17 = vpop.f32.mrb[6].mxu0 }
 0x16f   : > { %v18853_v10 = vadd.f32 %v13870_v40, %v13869_v16  ;;  %v13872_v13 = vpop.f32.mrb[6].mxu1  ;;  %15862 = vmatpush3.bf16.msra.mxu1 %v17313_v48  ;;  %v13793_v34 = vpop.f32.mrb[7].mxu0  ;;  %v17325_v16 = vld [vmem:[#allocation9 + $0xc8] sm:$0xff]  }
 0x170   : > { %v13873_v33 = vpop.f32.mrb[7].mxu1  ;;  %14327 = vmatprep.subr.bf16.mxu1 %v17314_v57  ;;  %v18872_v57 = vadd.f32 %v13793_v34, %v13792_v17  ;;  %v17775_v17 = vld [vmem:[#allocation2 + $0x180] sm:$0xff]  ;;  %v18886_v34 = vld [vmem:[#allocation2 + $0x8] sm:$0xff] }
 0x171   : > { %v18857_v0 = vadd.f32 %v13873_v33, %v13872_v13  ;;  %v17332_v33 = vld [vmem:[#allocation9 + $0x118] sm:$0xff]  }
 0x172   : > { %3754 = vmatmul.mubr.bf16.gmra.mrb[80].mxu1 %v18862_v23 }
 0x173   : > { %3761 = vmatprep.mubr.bf16.mxu1 %v18834_v21 }
 0x174   : > { %3312 = vmatmul.mubr.bf16.vlgmr.msra.gmra.mrb[112].mxu0 %v2674_v47  ;;  %v13795_v58 = vpop.f32.mrb[8].mxu0 }
 0x175   : > { %v13875_v45 = vpop.f32.mrb[8].mxu1  ;;  %3319 = vmatprep.mubr.bf16.mxu0 %v18785_v55  ;;  %14248 = vmatpush3.bf16.msra.mxu0 %v17321_v60  ;;  %v13796_v2 = vpop.f32.mrb[9].mxu0 }
 0x176   : > { %v13876_v49 = vpop.f32.mrb[9].mxu1  ;;  %14249 = vmatprep.subr.bf16.mxu0 %v17324_v59  ;;  %v18879_v46 = vadd.f32 %v13796_v2, %v13795_v58  ;;  %v13798_v47 = vpop.f32.mrb[10].mxu0  ;;  %v17774_v59 = vld [vmem:[#allocation2 + $0xd8] sm:$0xff]  ;;  %v17337_v58 = vld [vmem:[#allocation9 + $0xe0] sm:$0xff]  }
 0x177   : > { %v18866_v15 = vadd.f32 %v13876_v49, %v13875_v45  ;;  %v13878_v26 = vpop.f32.mrb[10].mxu1  ;;  %v13799_v60 = vpop.f32.mrb[11].mxu0 }
 0x178   : > { %v13879_v28 = vpop.f32.mrb[11].mxu1  ;;  %v18883_v6 = vadd.f32 %v13799_v60, %v13798_v47  ;;  %v3494_v47 = vld [vmem:[#allocation2 + $0x198] sm:$0xff] }
 0x179   : > { %v18870_v48 = vadd.f32 %v13879_v28, %v13878_v26  ;;  %14250 = vmatpush3.bf16.msra.mxu0 %v17325_v16  ;;  %v17336_v26 = vld [vmem:[#allocation9 + $0x120] sm:$0xff]  }
 0x17a   : > { %3762 = vmatmul.mubr.bf16.gmra.mrb[84].mxu1 %v18845_v19  ;;  %14251 = vmatprep.subr.bf16.mxu0 %v17328_v18 }
 0x17b   : > { %3769 = vmatprep.mubr.bf16.mxu1 %v18765_v31  ;;  %v17333_v31 = vld [vmem:[#allocation9 + $0xd8] sm:$0xff]  }
 0x17c   : > { %3320 = vmatmul.mubr.bf16.gmra.mrb[116].mxu0 %v17774_v59 }
 0x17d   : > { %v13881_v40 = vpop.f32.mrb[12].mxu1  ;;  %3327 = vmatprep.mubr.bf16.mxu0 %v18794_v3  ;;  %14252 = vmatpush3.bf16.msra.mxu0 %v17329_v20 }
 0x17e   : > { %v13882_v13 = vpop.f32.mrb[13].mxu1  ;;  %14253 = vmatprep.subr.bf16.mxu0 %v17332_v33  ;;  %v3475_v33 = vld [vmem:[#allocation2 + $0x100] sm:$0xff] }
 0x17f   : > { %v18877_v32 = vadd.f32 %v13882_v13, %v13881_v40  ;;  %v13884_v45 = vpop.f32.mrb[14].mxu1  ;;  %v13801_v16 = vpop.f32.mrb[12].mxu0  ;;  %v17340_v13 = vld [vmem:[#allocation9 + $0x128] sm:$0xff]  }
 0x180   : > { %v13885_v55 = vpop.f32.mrb[15].mxu1  ;;  %v13802_v40 = vpop.f32.mrb[13].mxu0 }
 0x181   : > { %v18881_v49 = vadd.f32 %v13885_v55, %v13884_v45  ;;  %v18891_v55 = vadd.f32 %v13802_v40, %v13801_v16  ;;  %v13804_v3 = vpop.f32.mrb[14].mxu0  ;;  %14254 = vmatpush3.bf16.msra.mxu0 %v17333_v31  ;;  %v17343_v40 = vld [vmem:[#allocation9 + $0xf0] sm:$0xff]  }
 0x182   : > { %3770 = vmatmul.mubr.bf16.gmra.mrb[88].mxu1 %v17775_v17  ;;  %v13805_v60 = vpop.f32.mrb[15].mxu0  ;;  %14255 = vmatprep.subr.bf16.mxu0 %v17336_v26  ;;  %v17344_v26 = vld [vmem:[#allocation9 + $0x138] sm:$0xff]  }
 0x183   : > { %3777 = vmatprep.mubr.bf16.mxu1 %v18886_v34  ;;  %v18895_v17 = vadd.f32 %v13805_v60, %v13804_v3 }
 0x184   : > { %3328 = vmatmul.mubr.bf16.gmra.mrb[120].mxu0 %v18799_v42 }
 0x185   : > { %v13887_v28 = vpop.f32.mrb[16].mxu1  ;;  %3335 = vmatprep.mubr.bf16.mxu0 %v18802_v56  ;;  %14256 = vmatpush3.bf16.msra.mxu0 %v17337_v58 }
 0x186   : > { %v13888_v18 = vpop.f32.mrb[17].mxu1  ;;  %14257 = vmatprep.subr.bf16.mxu0 %v17340_v13  ;;  %v17316_v13 = vld [vmem:[#allocation9 + $0x48] sm:$0xff]  }
 0x187   : > { %v18889_v2 = vadd.f32 %v13888_v18, %v13887_v28  ;;  %v13890_v45 = vpop.f32.mrb[18].mxu1  ;;  %v13807_v31 = vpop.f32.mrb[16].mxu0 }
 0x188   : > { %v13891_v20 = vpop.f32.mrb[19].mxu1  ;;  %v13808_v18 = vpop.f32.mrb[17].mxu0 }
 0x189   : > { %v18893_v59 = vadd.f32 %v13891_v20, %v13890_v45  ;;  %v3478_v20 = vld [vmem:[#allocation2 + $0x118] sm:$0xff]  ;;  %v18901_v60 = vadd.f32 %v13808_v18, %v13807_v31  ;;  %v13810_v42 = vpop.f32.mrb[18].mxu0  ;;  %14258 = vmatpush3.bf16.msra.mxu0 %v17341_v22  ;;  %v17317_v31 = vld [vmem:[#allocation9 + $0x8] sm:$0xff]  }
 0x18a   : > { %3778 = vmatmul.mubr.bf16.gmra.mrb[92].mxu1 %v3494_v47  ;;  %v13811_v58 = vpop.f32.mrb[19].mxu0  ;;  %v3481_v47 = vld [vmem:[#allocation2 + $0x130] sm:$0xff]  ;;  %14259 = vmatprep.subr.bf16.mxu0 %v17342_v54 }
 0x18b   : > { %15863 = vmatprep.mubr.bf16.mxu1 %v3475_v33  ;;  %v18905_v61 = vadd.f32 %v13811_v58, %v13810_v42  ;;  %v3484_v58 = vld [vmem:[#allocation2 + $0x148] sm:$0xff] }
 0x18c   : > { %3336 = vmatmul.mubr.bf16.gmra.mrb[124].mxu0 %v18807_v8 }
 0x18d   : > { %v13893_v28 = vpop.f32.mrb[20].mxu1  ;;  %3343 = vmatprep.mubr.bf16.mxu0 %v18810_v53  ;;  %14260 = vmatpush3.bf16.msra.mxu0 %v17343_v40  ;;  %v17319_v53 = vld [vmem:[#allocation9 + $0x10] sm:$0xff]  }
 0x18e   : > { %v13894_v16 = vpop.f32.mrb[21].mxu1  ;;  %14261 = vmatprep.subr.bf16.mxu0 %v17344_v26  ;;  %v3487_v26 = vld [vmem:[#allocation2 + $0x160] sm:$0xff] }
 0x18f   : > { %v18899_v45 = vadd.f32 %v13894_v16, %v13893_v28  ;;  %v13896_v3 = vpop.f32.mrb[22].mxu1  ;;  %v18908_v28 = vld [vmem:[#allocation9 + $0x140] sm:$0xff]   ;;  %v13813_v16 = vpop.f32.mrb[20].mxu0 }
 0x190   : > { %v13897_v56 = vpop.f32.mrb[23].mxu1  ;;  %v13814_v18 = vpop.f32.mrb[21].mxu0 }
 0x191   : > { %v18903_v33 = vadd.f32 %v13897_v56, %v13896_v3  ;;  %v17318_v3 = vld [vmem:[#allocation9 + $0x50] sm:$0xff]   ;;  %v18913_v8 = vadd.f32 %v13814_v18, %v13813_v16  ;;  %v13816_v38 = vpop.f32.mrb[22].mxu0  ;;  %14262 = vmatpush3.bf16.msra.mxu0 %v17345_v7 }
 0x192   : > { %15864 = vmatmul.mubr.bf16.vlgmr.msra.gmra.mrb[48].mxu1 %v3478_v20  ;;  %v13817_v20 = vpop.f32.mrb[23].mxu0  ;;  %15879 = vmatprep.subr.bf16.mxu0 %v18908_v28 }
 0x193   : > { %15867 = vmatprep.mubr.bf16.mxu1 %v3481_v47  ;;  %14328 = vmatpush3.bf16.msra.mxu1 %v17315_v11  ;;  %v18918_v11 = vadd.f32 %v13817_v20, %v13816_v38 }
 0x194   : > { %14329 = vmatprep.subr.bf16.mxu1 %v17316_v13  ;;  %3344 = vmatmul.mubr.bf16.gmra.mrb[128].mxu0 %v18815_v24  ;;  %v17322_v13 = vld [vmem:[#allocation9 + $0x58] sm:$0xff]  }
 0x195   : > { %v13899_v22 = vpop.f32.mrb[24].mxu1  ;;  %3351 = vmatprep.mubr.bf16.mxu0 %v18818_v35 }
 0x196   : > { %v13900_v54 = vpop.f32.mrb[25].mxu1 }
 0x197   : > { %v18911_v42 = vadd.f32 %v13900_v54, %v13899_v22  ;;  %v13902_v56 = vpop.f32.mrb[26].mxu1  ;;  %14330 = vmatpush3.bf16.msra.mxu1 %v17317_v31  ;;  %v17323_v22 = vld [vmem:[#allocation9 + $0x18] sm:$0xff]   ;;  %v13819_v16 = vpop.f32.mrb[24].mxu0 }
 0x198   : > { %v13903_v40 = vpop.f32.mrb[27].mxu1  ;;  %14331 = vmatprep.subr.bf16.mxu1 %v17318_v3  ;;  %v13820_v54 = vpop.f32.mrb[25].mxu0  ;;  %v17327_v3 = vld [vmem:[#allocation9 + $0x20] sm:$0xff]  }
 0x199   : > { %v18916_v47 = vadd.f32 %v13903_v40, %v13902_v56  ;;  %v17326_v56 = vld [vmem:[#allocation9 + $0x60] sm:$0xff]   ;;  %v18922_v40 = vadd.f32 %v13820_v54, %v13819_v16  ;;  %v13822_v31 = vpop.f32.mrb[26].mxu0  ;;  %v17778_v16 = vld [vmem:[#allocation2 + $0x190] sm:$0xff] }
 0x19a   : > { %15868 = vmatmul.mubr.bf16.gmra.mrb[52].mxu1 %v3484_v58  ;;  %v13823_v20 = vpop.f32.mrb[27].mxu0 }
 0x19b   : > { %15871 = vmatprep.mubr.bf16.mxu1 %v3487_v26  ;;  %14332 = vmatpush3.bf16.msra.mxu1 %v17319_v53  ;;  %v18926_v35 = vadd.f32 %v13823_v20, %v13822_v31  ;;  %v17330_v26 = vld [vmem:[#allocation9 + $0x68] sm:$0xff]   ;;  %v17777_v53 = vld [vmem:[#allocation2 + $0x178] sm:$0xff] }
 0x19c   : > { %14333 = vmatprep.subr.bf16.mxu1 %v17322_v13  ;;  %3352 = vmatmul.mubr.bf16.gmra.mrb[132].mxu0 %v18849_v44  ;;  %v17338_v20 = vld [vmem:[#allocation9 + $0x78] sm:$0xff]  }
 0x19d   : > { %v13905_v7 = vpop.f32.mrb[28].mxu1  ;;  %3359 = vmatprep.mubr.bf16.mxu0 %v18828_v36  ;;  %v17339_v44 = vld [vmem:[#allocation9 + $0x38] sm:$0xff]  }
 0x19e   : > { %v13906_v18 = vpop.f32.mrb[29].mxu1 }
 0x19f   : > { %v18924_v38 = vadd.f32 %v13906_v18, %v13905_v7  ;;  %v13908_v24 = vpop.f32.mrb[30].mxu1  ;;  %14334 = vmatpush3.bf16.msra.mxu1 %v17323_v22  ;;  %v13825_v13 = vpop.f32.mrb[28].mxu0  ;;  %v17331_v7 = vld [vmem:[#allocation9 + $0x28] sm:$0xff]   ;;  %v17334_v18 = vld [vmem:[#allocation9 + $0x70] sm:$0xff]  }
 0x1a0   : > { %v13909_v5 = vpop.f32.mrb[31].mxu1  ;;  %14335 = vmatprep.subr.bf16.mxu1 %v17326_v56  ;;  %v13826_v54 = vpop.f32.mrb[29].mxu0 }
 0x1a1   : > { %v18928_v58 = vadd.f32 %v13909_v5, %v13908_v24  ;;  %v13827_v31 = vadd.f32 %v13826_v54, %v13825_v13  ;;  %v13828_v5 = vpop.f32.mrb[30].mxu0  ;;  %v17335_v24 = vld [vmem:[#allocation9 + $0x30] sm:$0xff]  }
 0x1a2   : > { %15872 = vmatmul.mubr.bf16.gmra.mrb[56].mxu1 %v17777_v53  ;;  %v13829_v22 = vpop.f32.mrb[31].mxu0 }
 0x1a3   : > { %15875 = vmatprep.mubr.bf16.mxu1 %v17778_v16  ;;  %14336 = vmatpush3.bf16.msra.mxu1 %v17327_v3  ;;  %v13830_v37 = vadd.f32 %v13829_v22, %v13828_v5 }
 0x1a4   : > { %14337 = vmatprep.subr.bf16.mxu1 %v17330_v26  ;;  %3360 = vmatmul.mubr.bf16.gmra.mrb[136].mxu0 %v18862_v23 }
 0x1a5   : > { %3367 = vmatprep.mubr.bf16.mxu0 %v18834_v21 }
 0x1a7   : > { %14338 = vmatpush3.bf16.msra.mxu1 %v17331_v7  ;;  %v15705_v36 = vpop.f32.mrb[32].mxu0 }
 0x1a8   : > { %14339 = vmatprep.subr.bf16.mxu1 %v17334_v18  ;;  %v1583_v56 = vadd.f32 %v15705_v36, %v18868_v1  ;;  %v1574_v3 = vpop.f32.mrb[33].mxu0 }
 0x1a9   : > { %v1575_v26 = vadd.f32 %v18855_v52, %v1574_v3  ;;  %v15706_v53 = vpop.f32.mrb[34].mxu0 }
 0x1aa   : > { %15876 = vmatmul.mubr.bf16.gmra.mrb[60].mxu1 %v18886_v34  ;;  %v1586_v13 = vadd.f32 %v15706_v53, %v18872_v57  ;;  %v1577_v23 = vpop.f32.mrb[35].mxu0  ;;  %v18940_v16 = vadd.f32 %v18853_v10, %v1583_v56  ;;  %v17355_v53 = vld [vmem:[#allocation9 + $0xc0] sm:$0xff]  }
 0x1ab   : > { %14340 = vmatpush3.bf16.msra.mxu1 %v17335_v24  ;;  %4819 = vmatprep.mubr.bf16.mxu1 %v18886_v34  ;;  %v1578_v21 = vadd.f32 %v18859_v4, %v1577_v23  ;;  %v1816_v7 = vadd.f32 %v18838_v63, %v1575_v26 }
 0x1ac   : > { %14341 = vmatprep.subr.bf16.mxu1 %v17338_v20  ;;  %3368 = vmatmul.mubr.bf16.gmra.mrb[140].mxu0 %v18845_v19  ;;  %v18946_v1 = vadd.f32 %v18857_v0, %v1586_v13 }
 0x1ad   : > { %v1819_v54 = vadd.f32 %v18841_v9, %v1578_v21 }
 0x1af   : > { %14342 = vmatpush3.bf16.msra.mxu1 %v17339_v44  ;;  %v15709_v52 = vpop.f32.mrb[36].mxu0 }
 0x1b0   : > { %v1599_v57 = vadd.f32 %v15709_v52, %v18891_v55  ;;  %v1590_v18 = vpop.f32.mrb[37].mxu0 }
 0x1b1   : > { %v1591_v10 = vadd.f32 %v18879_v46, %v1590_v18  ;;  %v15710_v5 = vpop.f32.mrb[38].mxu0 }
 0x1b2   : > { %4820 = vmatmul.mubr.bf16.vlgmr.msra.gmra.mrb[96].mxu1 %v18886_v34  ;;  %v1602_v4 = vadd.f32 %v15710_v5, %v18895_v17  ;;  %v1593_v63 = vpop.f32.mrb[39].mxu0  ;;  %v18954_v24 = vadd.f32 %v18877_v32, %v1599_v57 }
 0x1b3   : > { %v1594_v19 = vadd.f32 %v18883_v6, %v1593_v63  ;;  %v18958_v0 = vadd.f32 %v18866_v15, %v1591_v10 }
 0x1b4   : > { %v18961_v9 = vadd.f32 %v18881_v49, %v1602_v4 }
 0x1b5   : > { %v18964_v34 = vadd.f32 %v18870_v48, %v1594_v19 }
 0x1b7   : > { %v15713_v55 = vpop.f32.mrb[40].mxu0 }
 0x1b8   : > { %v1615_v46 = vadd.f32 %v15713_v55, %v18913_v8  ;;  %v1606_v22 = vpop.f32.mrb[41].mxu0 }
 0x1b9   : > { %v1607_v17 = vadd.f32 %v18901_v60, %v1606_v22  ;;  %v15714_v20 = vpop.f32.mrb[42].mxu0  ;;  %v17357_v22 = vld [vmem:[#allocation9 + $0xc8] sm:$0xff]  }
 0x1ba   : > { %v1618_v32 = vadd.f32 %v15714_v20, %v18918_v11  ;;  %v1609_v36 = vpop.f32.mrb[43].mxu0  ;;  %v18970_v6 = vadd.f32 %v18899_v45, %v1615_v46  ;;  %v17354_v45 = vld [vmem:[#allocation9 + $0x100] sm:$0xff]   ;;  %v17356_v46 = vld [vmem:[#allocation9 + $0x108] sm:$0xff]  }
 0x1bb   : > { %v1610_v15 = vadd.f32 %v18905_v61, %v1609_v36  ;;  %v18974_v49 = vadd.f32 %v18889_v2, %v1607_v17  ;;  %14487 = vmatprep.subr.bf16.mxu1 %v17354_v45 }
 0x1bc   : > { %v18977_v48 = vadd.f32 %v18903_v33, %v1618_v32  ;;  %14488 = vmatpush3.bf16.msra.mxu1 %v17355_v53 }
 0x1bd   : > { %v18980_v8 = vadd.f32 %v18893_v59, %v1610_v15  ;;  %14489 = vmatprep.subr.bf16.mxu1 %v17356_v46 }
 0x1bf   : > { %v15717_v44 = vpop.f32.mrb[44].mxu0 }
 0x1c0   : > { %v1631_v60 = vadd.f32 %v15717_v44, %v13827_v31  ;;  %v1622_v56 = vpop.f32.mrb[45].mxu0  ;;  %14490 = vmatpush3.bf16.msra.mxu1 %v17357_v22 }
 0x1c1   : > { %v1623_v11 = vadd.f32 %v18922_v40, %v1622_v56  ;;  %v15718_v3 = vpop.f32.mrb[46].mxu0 }
 0x1c2   : > { %v1634_v13 = vadd.f32 %v15718_v3, %v13830_v37  ;;  %v1625_v61 = vpop.f32.mrb[47].mxu0  ;;  %v18984_v2 = vadd.f32 %v18924_v38, %v1631_v60 }
 0x1c3   : > { %v1626_v33 = vadd.f32 %v18926_v35, %v1625_v61  ;;  %v18988_v59 = vadd.f32 %v18911_v42, %v1623_v11  ;;  %v19001_v42 = vld [vmem:[%s21495_s2] ss:$0 sm:$0xff] }
 0x1c4   : > { %v18991_v40 = vadd.f32 %v18928_v58, %v1634_v13 }
 0x1c5   : > { %v15769_v26 = vpop.f32.mrb[32].mxu1  ;;  %v18994_v52 = vadd.f32 %v18916_v47, %v1626_v33 }
 0x1c6   : > { %v2323_v23 = vpop.f32.mrb[33].mxu1 }
 0x1c7   : > { %v15770_v21 = vpop.f32.mrb[34].mxu1  ;;  %v13943_v37 = vpop.f32.mrb[48].mxu0 }
 0x1c8   : > { %v2326_v31 = vpop.f32.mrb[35].mxu1  ;;  %v13944_v57 = vpop.f32.mrb[49].mxu0 }
 0x1c9   : > { %v13945_v18 = vadd.f32 %v13944_v57, %v13943_v37  ;;  %v13946_v38 = vpop.f32.mrb[50].mxu0 }
 0x1ca   : > { %v13947_v35 = vpop.f32.mrb[51].mxu0 }
 0x1cb   : > { %v16461_v58 = vadd.f32 %v13945_v18, %v1816_v7  ;;  %v13948_v4 = vadd.f32 %v13947_v35, %v13946_v38  ;;  %v17358_v18 = vld [vmem:[#allocation9 + $0x110] sm:$0xff]  }
 0x1cc   : > { %v17359_v38 = vld [vmem:[#allocation9 + $0xd0] sm:$0xff]   ;;  %14491 = vmatprep.subr.bf16.mxu1 %v17358_v18 }
 0x1cd   : > { %v18996_v10 = vpop.f32.mrb[36].mxu1  ;;  %v16462_v19 = vadd.f32 %v16461_v58, %v2323_v23  ;;  %v16469_v55 = vadd.f32 %v13948_v4, %v1819_v54  ;;  %14492 = vmatpush3.bf16.msra.mxu1 %v17359_v38  ;;  %v17360_v38 = vld [vmem:[#allocation9 + $0x118] sm:$0xff]  }
 0x1ce   : > { %v19003_v5 = vpop.f32.mrb[37].mxu1  ;;  %14493 = vmatprep.subr.bf16.mxu1 %v17360_v38 }
 0x1cf   : > { %v19005_v63 = vpop.f32.mrb[38].mxu1  ;;  %v2408_v17 = vadd.f32 %v16462_v19, %v19001_v42  ;;  %v16470_v20 = vadd.f32 %v16469_v55, %v2326_v31  ;;  %v13949_v32 = vpop.f32.mrb[52].mxu0 }
 0x1d0   : > { %v19007_v47 = vpop.f32.mrb[39].mxu1  ;;  %v13950_v36 = vpop.f32.mrb[53].mxu0 }
 0x1d1   : > { %v2424_v15 = vmax.f32 %v2408_v17, 0.0  ;;  %v2409_v44 = vadd.f32 %v16470_v20, %v19001_v42  ;;  %v13951_v7 = vadd.f32 %v13950_v36, %v13949_v32  ;;  %v13952_v60 = vpop.f32.mrb[54].mxu0 }
 0x1d2   : > { %v13953_v11 = vpop.f32.mrb[55].mxu0 }
 0x1d3   : > { %v2565_v54 = vmul.f32 %v18320_v12, %v2424_v15  ;;  %v2425_v45 = vmax.f32 %v2409_v44, 0.0  ;;  %v16457_v53 = vadd.f32 %v13951_v7, %v18940_v16  ;;  %v13954_v13 = vadd.f32 %v13953_v11, %v13952_v60  ;;  %v2661_v16 = vld [vmem:[#allocation3 + $0x10] sm:$0x80] }
 0x1d5   : > { %v19011_v56 = vpop.f32.mrb[40].mxu1  ;;  %v2440_v33 = vpack.c.bf16 %v2425_v45, %v2424_v15  ;;  %v2457_v31 = vmul.f32 %v18260_v25, %v2425_v45  ;;  %v19022_v37 = vpack.c.bf16 %v2425_v45, %v2565_v54  ;;  %v16458_v57 = vadd.f32 %v16457_v53, %v15769_v26 }
 0x1d6   : > { %v19013_v3 = vpop.f32.mrb[41].mxu1  ;;  %v16465_v35 = vadd.f32 %v13954_v13, %v18946_v1  ;;  %v2552_v1 = vld [vmem:[#allocation3 + $0x18] sm:$0xff] }
 0x1d7   : > { %v19017_v61 = vpop.f32.mrb[42].mxu1  ;;  %2448 = vst [vmem:[#allocation3 + $0x20] sm:$0xff] %v2440_v33  ;;  %v2472_v58 = vpack.c.bf16 %v2457_v31, %v2424_v15  ;;  %v2590_v4 = vshll.u32 %v19022_v37, 16  ;;  %v2410_v19 = vadd.f32 %v16458_v57, %v19001_v42  ;;  %v13955_v55 = vpop.f32.mrb[56].mxu0  ;;  %4481 = vmatprep.mubr.bf16.mxu0 %v2440_v33  ;;  %4827 = vmatprep.mubr.bf16.mxu1 %v2440_v33 }
 0x1d8   : > { %v19019_v23 = vpop.f32.mrb[43].mxu1  ;;  %v16466_v46 = vadd.f32 %v16465_v35, %v15770_v21  ;;  %v13956_v22 = vpop.f32.mrb[57].mxu0  ;;  %v17361_v35 = vld [vmem:[#allocation9 + $0xd8] sm:$0xff]  }
 0x1d9   : > { %v2481_v17 = vshrl.u32 %v2472_v58, 16  ;;  %v2484_v20 = vshll.u32 %v2472_v58, 16  ;;  %v2592_v26 = vrot.slane %v2590_v4, 1  ;;  %v2426_v32 = vmax.f32 %v2410_v19, 0.0  ;;  %v13958_v36 = vpop.f32.mrb[58].mxu0  ;;  %14494 = vmatpush3.bf16.msra.mxu1 %v17361_v35 }
 0x1da   : > { %v2411_v15 = vadd.f32 %v16466_v46, %v19001_v42  ;;  %v13957_v7 = vadd.f32 %v13956_v22, %v13955_v55  ;;  %v13959_v60 = vpop.f32.mrb[59].mxu0  ;;  %v17347_v22 = vld [vmem:[#allocation9 + $0x148] sm:$0xff]  }
 0x1db   : > { %v19032_v54 = vrot.slane %v2481_v17, 7  ;;  %v2662_v21 = vsel %vm18469_vm6, %v2592_v26, %v2661_v16  ;;  %v2567_v45 = vmul.f32 %v18266_v29, %v2426_v32  ;;  %v13960_v31 = vadd.f32 %v13959_v60, %v13958_v36 }
 0x1dc   : > { %2663 = vst [vmem:[#allocation3 + $0x10] sm:$0x80] %v2662_v21  ;;  %v2427_v13 = vmax.f32 %v2411_v15, 0.0  ;;  %v16477_v33 = vadd.f32 %v13957_v7, %v18958_v0  ;;  %v2593_v17 = vshrl.u32 %v19022_v37, 16 }
 0x1dd   : > { %v19027_v44 = vpop.f32.mrb[44].mxu1  ;;  %v2486_v18 = vor.u32 %v2484_v20, %v19032_v54  ;;  %v16485_v46 = vadd.f32 %v13960_v31, %v18964_v34 }
 0x1de   : > { %v19030_v11 = vpop.f32.mrb[45].mxu1  ;;  %v2441_v58 = vpack.c.bf16 %v2427_v13, %v2426_v32  ;;  %v2459_v4 = vmul.f32 %v18263_v27, %v2427_v13  ;;  %v19044_v19 = vpack.c.bf16 %v2427_v13, %v2567_v45  ;;  %v16478_v16 = vadd.f32 %v16477_v33, %v19003_v5 }
 0x1df   : > { %v19037_v53 = vpop.f32.mrb[46].mxu1  ;;  %v2553_v55 = vsel %vm18365_vm0, %v2486_v18, %v2552_v1  ;;  %v13961_v0 = vpop.f32.mrb[60].mxu0  ;;  %v16486_v5 = vadd.f32 %v16485_v46, %v19007_v47  ;;  %v2595_v34 = vor.u32 %v2593_v17, %v2592_v26  ;;  %v17348_v18 = vld [vmem:[#allocation9 + $0x150] sm:$0xff]  }
 0x1e0   : > { %v19040_v57 = vpop.f32.mrb[47].mxu1  ;;  %2554 = vst [vmem:[#allocation3 + $0x18] sm:$0xff] %v2553_v55  ;;  %2449 = vst [vmem:[#allocation3 + $0x38] sm:$0xff] %v2441_v58  ;;  %v2473_v20 = vpack.c.bf16 %v2459_v4, %v2426_v32  ;;  %v2597_v36 = vshll.u32 %v19044_v19, 16  ;;  %v2412_v15 = vadd.f32 %v16478_v16, %v19001_v42  ;;  %v13962_v7 = vpop.f32.mrb[61].mxu0  ;;  %4482 = vmatmul.mubr.bf16.vlgmr.msra.gmra.mrb[144].mxu0 %v2553_v55  ;;  %4828 = vmatmul.mubr.bf16.gmra.mrb[100].mxu1 %v2553_v55  ;;  %v17362_v16 = vld [vmem:[#allocation9 + $0x120] sm:$0xff]  }
 0x1e1   : > { %v13963_v1 = vadd.f32 %v13962_v7, %v13961_v0  ;;  %v13964_v60 = vpop.f32.mrb[62].mxu0  ;;  %4489 = vmatprep.mubr.bf16.mxu0 %v2441_v58  ;;  %4835 = vmatprep.mubr.bf16.mxu1 %v2441_v58  ;;  %v2413_v32 = vadd.f32 %v16486_v5, %v19001_v42  ;;  %v17349_v7 = vld [vmem:[#allocation9 + $0x158] sm:$0xff]  }
 0x1e2   : > { %v2488_v21 = vshrl.u32 %v2473_v20, 16  ;;  %v2599_v45 = vrot.slane %v2597_v36, 1  ;;  %v2428_v13 = vmax.f32 %v2412_v15, 0.0  ;;  %v13965_v37 = vpop.f32.mrb[63].mxu0  ;;  %15880 = vmatpush3.bf16.msra.mxu0 %v18908_v28  ;;  %v2491_v38 = vshll.u32 %v2473_v20, 16  ;;  %v17363_v36 = vld [vmem:[#allocation9 + $0xe0] sm:$0xff]   ;;  %14495 = vmatprep.subr.bf16.mxu1 %v17362_v16 }
 0x1e3   : > { %v16473_v33 = vadd.f32 %v13963_v1, %v18954_v24  ;;  %v13966_v31 = vadd.f32 %v13965_v37, %v13964_v60  ;;  %15881 = vmatprep.subr.bf16.mxu0 %v17347_v22  ;;  %v2429_v4 = vmax.f32 %v2413_v32, 0.0  ;;  %14496 = vmatpush3.bf16.msra.mxu1 %v17363_v36 }
 0x1e4   : > { %v19057_v47 = vrot.slane %v2488_v21, 7  ;;  %v19060_v58 = vsel %vm821_vm3, %v2595_v34, %v2599_v45  ;;  %v2569_v26 = vmul.f32 %v18278_v41, %v2428_v13 }
 0x1e5   : > { %2664 = vst [vmem:[#allocation3 + $0x28] sm:$0xff] %v19060_v58  ;;  %v16474_v28 = vadd.f32 %v16473_v33, %v18996_v10  ;;  %v16481_v35 = vadd.f32 %v13966_v31, %v18961_v9  ;;  %v2442_v55 = vpack.c.bf16 %v2429_v4, %v2428_v13  ;;  %v2461_v46 = vmul.f32 %v18275_v39, %v2429_v4 }
 0x1e6   : > { %v2493_v24 = vor.u32 %v2491_v38, %v19057_v47  ;;  %15882 = vmatpush3.bf16.msra.mxu0 %v17347_v22  ;;  %v19068_v0 = vpack.c.bf16 %v2429_v4, %v2569_v26  ;;  %v2601_v22 = vshrl.u32 %v19044_v19, 16  ;;  %v17350_v26 = vld [vmem:[#allocation9 + $0x160] sm:$0xff]  }
 0x1e7   : > { %v2414_v17 = vadd.f32 %v16474_v28, %v19001_v42  ;;  %v13967_v20 = vpop.f32.mrb[64].mxu0  ;;  %15883 = vmatprep.subr.bf16.mxu0 %v17348_v18  ;;  %v16482_v10 = vadd.f32 %v16481_v35, %v19005_v63  ;;  %2450 = vst [vmem:[#allocation3 + $0x50] sm:$0xff] %v2442_v55  ;;  %v2474_v5 = vpack.c.bf16 %v2461_v46, %v2428_v13 }
 0x1e8   : > { %v2494_v15 = vsel %vm587_vm5, %v19032_v54, %v2493_v24  ;;  %v13968_v9 = vpop.f32.mrb[65].mxu0  ;;  %v2605_v1 = vshll.u32 %v19068_v0, 16  ;;  %v2603_v63 = vor.u32 %v2601_v22, %v2599_v45 }
 0x1e9   : > { %2555 = vst [vmem:[#allocation3 + $0x30] sm:$0xff] %v2494_v15  ;;  %v2430_v60 = vmax.f32 %v2414_v17, 0.0  ;;  %v13970_v34 = vpop.f32.mrb[66].mxu0  ;;  %4490 = vmatmul.mubr.bf16.gmra.mrb[148].mxu0 %v2494_v15  ;;  %4836 = vmatmul.mubr.bf16.gmra.mrb[104].mxu1 %v2494_v15  ;;  %v2415_v21 = vadd.f32 %v16482_v10, %v19001_v42  ;;  %v13969_v37 = vadd.f32 %v13968_v9, %v13967_v20  ;;  %v2496_v32 = vshrl.u32 %v2474_v5, 16  ;;  %v17366_v9 = vld [vmem:[#allocation9 + $0x128] sm:$0xff]  }
 0x1ea   : > { %v13971_v54 = vpop.f32.mrb[67].mxu0  ;;  %4497 = vmatprep.mubr.bf16.mxu0 %v2442_v55  ;;  %4843 = vmatprep.mubr.bf16.mxu1 %v2442_v55  ;;  %v2607_v33 = vrot.slane %v2605_v1, 1  ;;  %v2499_v28 = vshll.u32 %v2474_v5, 16  ;;  %v2609_v17 = vshrl.u32 %v19068_v0, 16  ;;  %v17351_v1 = vld [vmem:[#allocation9 + $0x168] sm:$0xff]  }
 0x1eb   : > { %v2571_v31 = vmul.f32 %v18509_v30, %v2430_v60  ;;  %15884 = vmatpush3.bf16.msra.mxu0 %v17348_v18  ;;  %v2431_v19 = vmax.f32 %v2415_v21, 0.0  ;;  %v16493_v13 = vadd.f32 %v13969_v37, %v18974_v49  ;;  %v13972_v38 = vadd.f32 %v13971_v54, %v13970_v34  ;;  %14497 = vmatprep.subr.bf16.mxu1 %v17366_v9 }
 0x1ec   : > { %15885 = vmatprep.subr.bf16.mxu0 %v17349_v7  ;;  %v2498_v4 = vrot.slane %v2496_v32, 7  ;;  %v19080_v35 = vsel %vm821_vm3, %v2603_v63, %v2607_v33  ;;  %v2611_v0 = vor.u32 %v2609_v17, %v2607_v33 }
 0x1ed   : > { %2665 = vst [vmem:[#allocation3 + $0x40] sm:$0xff] %v19080_v35  ;;  %v2443_v45 = vpack.c.bf16 %v2431_v19, %v2430_v60  ;;  %v2463_v16 = vmul.f32 %v18281_v43, %v2431_v19  ;;  %v19084_v24 = vpack.c.bf16 %v2431_v19, %v2571_v31  ;;  %v16494_v18 = vadd.f32 %v16493_v13, %v19013_v3  ;;  %v17370_v19 = vld [vmem:[#allocation9 + $0x130] sm:$0xff]  }
 0x1ee   : > { %v2501_v55 = vor.u32 %v2499_v28, %v2498_v4  ;;  %v16501_v49 = vadd.f32 %v13972_v38, %v18980_v8  ;;  %v17352_v28 = vld [vmem:[#allocation9 + $0x170] sm:$0xff]  }
 0x1ef   : > { %v13973_v46 = vpop.f32.mrb[68].mxu0  ;;  %15886 = vmatpush3.bf16.msra.mxu0 %v17349_v7  ;;  %2451 = vst [vmem:[#allocation3 + $0x68] sm:$0xff] %v2443_v45  ;;  %v2475_v20 = vpack.c.bf16 %v2463_v16, %v2430_v60  ;;  %v2613_v36 = vshll.u32 %v19084_v24, 16  ;;  %v2416_v15 = vadd.f32 %v16494_v18, %v19001_v42  ;;  %v17367_v7 = vld [vmem:[#allocation9 + $0xe8] sm:$0xff]  }
 0x1f0   : > { %v13974_v10 = vpop.f32.mrb[69].mxu0  ;;  %15887 = vmatprep.subr.bf16.mxu0 %v17350_v26  ;;  %v2502_v22 = vsel %vm587_vm5, %v19057_v47, %v2501_v55  ;;  %v16502_v3 = vadd.f32 %v16501_v49, %v19019_v23  ;;  %14498 = vmatpush3.bf16.msra.mxu1 %v17367_v7  ;;  %v21615_v7 = vld [vmem:[#allocation30_spill] sm:$0xff] }
 0x1f1   : > { %v13975_v5 = vadd.f32 %v13974_v10, %v13973_v46  ;;  %v13976_v8 = vpop.f32.mrb[70].mxu0  ;;  %2556 = vst [vmem:[#allocation3 + $0x48] sm:$0xff] %v2502_v22  ;;  %v2504_v34 = vshrl.u32 %v2475_v20, 16  ;;  %v2615_v60 = vrot.slane %v2613_v36, 1  ;;  %v2432_v21 = vmax.f32 %v2416_v15, 0.0  ;;  %4498 = vmatmul.mubr.bf16.gmra.mrb[152].mxu0 %v2502_v22  ;;  %4844 = vmatmul.mubr.bf16.gmra.mrb[108].mxu1 %v2502_v22  ;;  %v17353_v22 = vld [vmem:[#allocation9 + $0x178] sm:$0xff]  }
 0x1f2   : > { %v13977_v37 = vpop.f32.mrb[71].mxu0  ;;  %v2417_v54 = vadd.f32 %v16502_v3, %v19001_v42  ;;  %4505 = vmatprep.mubr.bf16.mxu0 %v2443_v45  ;;  %4851 = vmatprep.mubr.bf16.mxu1 %v2443_v45  ;;  %v2507_v47 = vshll.u32 %v2475_v20, 16  ;;  %v17371_v45 = vld [vmem:[#allocation9 + $0xf0] sm:$0xff]  }
 0x1f3   : > { %v16489_v63 = vadd.f32 %v13975_v5, %v18970_v6  ;;  %v13978_v32 = vadd.f32 %v13977_v37, %v13976_v8  ;;  %v19096_v23 = vrot.slane %v2504_v34, 7  ;;  %v19099_v31 = vsel %vm821_vm3, %v2611_v0, %v2615_v60  ;;  %15888 = vmatpush3.bf16.msra.mxu0 %v17350_v26  ;;  %14499 = vmatprep.subr.bf16.mxu1 %v17370_v19  ;;  %v19114_v37 = vld [vmem:[#allocation9 + $0x80] sm:$0xff]  }
 0x1f4   : > { %v2573_v33 = vmul.f32 %v18527_v14, %v2432_v21  ;;  %2666 = vst [vmem:[#allocation3 + $0x58] sm:$0xff] %v19099_v31  ;;  %v2433_v13 = vmax.f32 %v2417_v54, 0.0  ;;  %15889 = vmatprep.subr.bf16.mxu0 %v17351_v1  ;;  %14500 = vmatpush3.bf16.msra.mxu1 %v17371_v45 }
 0x1f5   : > { %v16490_v38 = vadd.f32 %v16489_v63, %v19011_v56  ;;  %v16497_v6 = vadd.f32 %v13978_v32, %v18977_v48  ;;  %v2509_v16 = vor.u32 %v2507_v47, %v19096_v23  ;;  %v2617_v48 = vshrl.u32 %v19084_v24, 16  ;;  %v21616_v47 = vld [vmem:[#allocation22_spill] sm:$0xff] }
 0x1f6   : > { %v2444_v18 = vpack.c.bf16 %v2433_v13, %v2432_v21  ;;  %v2465_v55 = vmul.f32 %v18286_v50, %v2433_v13  ;;  %v2585_v26 = vpack.c.bf16 %v2433_v13, %v2573_v33 }
 0x1f7   : > { %v2418_v49 = vadd.f32 %v16490_v38, %v19001_v42  ;;  %v13979_v46 = vpop.f32.mrb[72].mxu0  ;;  %v2510_v17 = vsel %vm587_vm5, %v2498_v4, %v2509_v16  ;;  %v16498_v56 = vadd.f32 %v16497_v6, %v19017_v61  ;;  %15890 = vmatpush3.bf16.msra.mxu0 %v17351_v1  ;;  %v2619_v61 = vor.u32 %v2617_v48, %v2615_v60 }
 0x1f8   : > { %v13980_v20 = vpop.f32.mrb[73].mxu0  ;;  %2557 = vst [vmem:[#allocation3 + $0x60] sm:$0xff] %v2510_v17  ;;  %2452 = vst [vmem:[#allocation3 + $0x80] sm:$0xff] %v2444_v18  ;;  %v2476_v36 = vpack.c.bf16 %v2465_v55, %v2432_v21  ;;  %v2621_v15 = vshll.u32 %v2585_v26, 16  ;;  %15891 = vmatprep.subr.bf16.mxu0 %v17352_v28  ;;  %v2625_v45 = vshrl.u32 %v2585_v26, 16 }
 0x1f9   : > { %v2434_v10 = vmax.f32 %v2418_v49, 0.0  ;;  %v13982_v9 = vpop.f32.mrb[74].mxu0  ;;  %v2419_v3 = vadd.f32 %v16498_v56, %v19001_v42  ;;  %v13981_v5 = vadd.f32 %v13980_v20, %v13979_v46  ;;  %4506 = vmatmul.mubr.bf16.gmra.mrb[156].mxu0 %v2510_v17  ;;  %4852 = vmatmul.mubr.bf16.gmra.mrb[112].mxu1 %v2510_v17  ;;  %v17375_v46 = vld [vmem:[#allocation9 + $0xf8] sm:$0xff]  }
 0x1fa   : > { %v13983_v8 = vpop.f32.mrb[75].mxu0  ;;  %v2512_v4 = vshrl.u32 %v2476_v36, 16  ;;  %v2623_v1 = vrot.slane %v2621_v15, 1  ;;  %4513 = vmatprep.mubr.bf16.mxu0 %v2444_v18  ;;  %4859 = vmatprep.mubr.bf16.mxu1 %v2444_v18  ;;  %v2515_v63 = vshll.u32 %v2476_v36, 16 }
 0x1fb   : > { %v2575_v0 = vmul.f32 %v21615_v7, %v2434_v10  ;;  %v2435_v24 = vmax.f32 %v2419_v3, 0.0  ;;  %v16509_v34 = vadd.f32 %v13981_v5, %v18988_v59  ;;  %v13984_v21 = vadd.f32 %v13983_v8, %v13982_v9  ;;  %15892 = vmatpush3.bf16.msra.mxu0 %v17352_v28  ;;  %v17374_v28 = vld [vmem:[#allocation9 + $0x138] sm:$0xff]   ;;  %v21617_v5 = vld [vmem:[#allocation31_spill] sm:$0xff] }
 0x1fc   : > { %v2514_v54 = vrot.slane %v2512_v4, 7  ;;  %v19117_v32 = vsel %vm821_vm3, %v2619_v61, %v2623_v1  ;;  %15893 = vmatprep.subr.bf16.mxu0 %v17353_v22  ;;  %14501 = vmatprep.subr.bf16.mxu1 %v17374_v28 }
 0x1fd   : > { %2667 = vst [vmem:[#allocation3 + $0x70] sm:$0xff] %v19117_v32  ;;  %v2445_v60 = vpack.c.bf16 %v2435_v24, %v2434_v10  ;;  %v2467_v33 = vmul.f32 %v21616_v47, %v2435_v24  ;;  %v19121_v19 = vpack.c.bf16 %v2435_v24, %v2575_v0  ;;  %v16510_v13 = vadd.f32 %v16509_v34, %v19030_v11  ;;  %v21618_v24 = vld [vmem:[#allocation23_spill] sm:$0xff] }
 0x1fe   : > { %v2517_v59 = vor.u32 %v2515_v63, %v2514_v54  ;;  %v16517_v38 = vadd.f32 %v13984_v21, %v18994_v52  ;;  %v2627_v52 = vor.u32 %v2625_v45, %v2623_v1  ;;  %14502 = vmatpush3.bf16.msra.mxu1 %v17375_v46 }
 0x1ff   : > { %v13985_v6 = vpop.f32.mrb[76].mxu0  ;;  %2453 = vst [vmem:[#allocation3 + $0x98] sm:$0xff] %v2445_v60  ;;  %v2477_v16 = vpack.c.bf16 %v2467_v33, %v2434_v10  ;;  %v2629_v18 = vshll.u32 %v19121_v19, 16  ;;  %v2420_v55 = vadd.f32 %v16510_v13, %v19001_v42  ;;  %15894 = vmatpush3.bf16.msra.mxu0 %v17353_v22 }
 0x200   : > { %v13986_v49 = vpop.f32.mrb[77].mxu0  ;;  %v2518_v17 = vsel %vm587_vm5, %v19096_v23, %v2517_v59  ;;  %v16518_v11 = vadd.f32 %v16517_v38, %v19040_v57  ;;  %15911 = vmatprep.subr.bf16.mxu0 %v19114_v37  ;;  %v2633_v38 = vshrl.u32 %v19121_v19, 16 }
 0x201   : > { %v13987_v56 = vadd.f32 %v13986_v49, %v13985_v6  ;;  %v13988_v20 = vpop.f32.mrb[78].mxu0  ;;  %2558 = vst [vmem:[#allocation3 + $0x78] sm:$0xff] %v2518_v17  ;;  %v2520_v26 = vshrl.u32 %v2477_v16, 16  ;;  %v2631_v48 = vrot.slane %v2629_v18, 1  ;;  %v2436_v36 = vmax.f32 %v2420_v55, 0.0  ;;  %4514 = vmatmul.mubr.bf16.gmra.mrb[160].mxu0 %v2518_v17  ;;  %4860 = vmatmul.mubr.bf16.gmra.mrb[116].mxu1 %v2518_v17 }
 0x202   : > { %v13989_v15 = vpop.f32.mrb[79].mxu0  ;;  %v2421_v10 = vadd.f32 %v16518_v11, %v19001_v42  ;;  %4521 = vmatprep.mubr.bf16.mxu0 %v2445_v60  ;;  %4867 = vmatprep.mubr.bf16.mxu1 %v2445_v60  ;;  %v2523_v22 = vshll.u32 %v2477_v16, 16 }
 0x203   : > { %v16505_v9 = vadd.f32 %v13987_v56, %v18984_v2  ;;  %v13990_v23 = vadd.f32 %v13989_v15, %v13988_v20  ;;  %v2522_v57 = vrot.slane %v2520_v26, 7  ;;  %v19134_v3 = vsel %vm821_vm3, %v2627_v52, %v2631_v48  ;;  %v21620_v52 = vld [vmem:[#allocation24_spill] sm:$0xff] }
 0x204   : > { %v2577_v8 = vmul.f32 %v21617_v5, %v2436_v36  ;;  %2668 = vst [vmem:[#allocation3 + $0x88] sm:$0xff] %v19134_v3  ;;  %v2437_v61 = vmax.f32 %v2421_v10, 0.0  ;;  %v2635_v55 = vor.u32 %v2633_v38, %v2631_v48  ;;  %v628_v10 = vld [vmem:[#allocation3 + $0x188] sm:$0x80]  ;;  %v2671_v38 = vld [vmem:[#allocation3 + $0xd0] sm:$0xff] }
 0x205   : > { %v16506_v4 = vadd.f32 %v16505_v9, %v19027_v44  ;;  %v16513_v1 = vadd.f32 %v13990_v23, %v18991_v40  ;;  %v2525_v0 = vor.u32 %v2523_v22, %v2522_v57  ;;  %v631_v9 = vld [vmem:[#allocation3 + $0x190] sm:$0x80] }
 0x206   : > { %v2446_v2 = vpack.c.bf16 %v2437_v61, %v2436_v36  ;;  %v2469_v34 = vmul.f32 %v21618_v24, %v2437_v61  ;;  %v2587_v21 = vpack.c.bf16 %v2437_v61, %v2577_v8 }
 0x207   : > { %v2422_v63 = vadd.f32 %v16506_v4, %v19001_v42  ;;  %v14023_v60 = vpop.f32.mrb[80].mxu0  ;;  %v2526_v33 = vsel %vm587_vm5, %v2514_v54, %v2525_v0  ;;  %v16514_v13 = vadd.f32 %v16513_v1, %v19037_v53  ;;  %v21619_v53 = vld [vmem:[#allocation32_spill] sm:$0xff]  ;;  %v629_v4 = vsel %vm18469_vm6, 0, %v628_v10  ;;  %v625_v10 = vld [vmem:[#allocation3 + $0x180] sm:$0x80] }
 0x208   : > { %v14024_v59 = vpop.f32.mrb[81].mxu0  ;;  %2559 = vst [vmem:[#allocation3 + $0x90] sm:$0xff] %v2526_v33  ;;  %2454 = vst [vmem:[#allocation3 + $0xb0] sm:$0xff] %v2446_v2  ;;  %v2478_v44 = vpack.c.bf16 %v2469_v34, %v2436_v36  ;;  %v2637_v6 = vshll.u32 %v2587_v21, 16  ;;  %v2641_v23 = vshrl.u32 %v2587_v21, 16  ;;  %v632_v34 = vsel %vm18469_vm6, 0, %v631_v9 }
 0x209   : > { %v2438_v40 = vmax.f32 %v2422_v63, 0.0  ;;  %v14026_v28 = vpop.f32.mrb[82].mxu0  ;;  %v2423_v45 = vadd.f32 %v16514_v13, %v19001_v42  ;;  %4522 = vmatmul.mubr.bf16.gmra.mrb[164].mxu0 %v2526_v33  ;;  %4868 = vmatmul.mubr.bf16.gmra.mrb[120].mxu1 %v2526_v33  ;;  %v19146_v16 = vadd.f32 %v14024_v59, %v14023_v60  ;;  %630 = vst [vmem:[#allocation3 + $0x188] sm:$0x80] %v629_v4  ;;  %v2562_v21 = vld [vmem:[#allocation3 + $0xd8] sm:$0x1] }
 0x20a   : > { %v14027_v18 = vpop.f32.mrb[83].mxu0  ;;  %v2528_v54 = vshrl.u32 %v2478_v44, 16  ;;  %v2639_v49 = vrot.slane %v2637_v6, 1  ;;  %4529 = vmatprep.mubr.bf16.mxu0 %v2446_v2  ;;  %4875 = vmatprep.mubr.bf16.mxu1 %v2446_v2  ;;  %v2531_v56 = vshll.u32 %v2478_v44, 16  ;;  %633 = vst [vmem:[#allocation3 + $0x190] sm:$0x80] %v632_v34 }
 0x20b   : > { %v2579_v46 = vmul.f32 %v21619_v53, %v2438_v40  ;;  %v2439_v19 = vmax.f32 %v2423_v45, 0.0  ;;  %v19149_v17 = vadd.f32 %v14027_v18, %v14026_v28  ;;  %v19183_v4 = vld [vmem:[#allocation9 + $0x140] sm:$0xff]  }
 0x20c   : > { %v2530_v11 = vrot.slane %v2528_v54, 7  ;;  %v19152_v20 = vsel %vm821_vm3, %v2635_v55, %v2639_v49  ;;  %v2643_v63 = vor.u32 %v2641_v23, %v2639_v49  ;;  %v17365_v23 = vld [vmem:[#allocation9 + $0x88] sm:$0xff]   ;;  %15975 = vmatprep.subr.bf16.mxu1 %v19183_v4 }
 0x20d   : > { %2669 = vst [vmem:[#allocation3 + $0xa0] sm:$0xff] %v19152_v20  ;;  %v2447_v42 = vpack.c.bf16 %v2439_v19, %v2438_v40  ;;  %v2471_v26 = vmul.f32 %v21620_v52, %v2439_v19  ;;  %v2588_v48 = vpack.c.bf16 %v2439_v19, %v2579_v46 }
 0x20e   : > { %v2533_v36 = vor.u32 %v2531_v56, %v2530_v11 }
 0x20f   : > { %v14029_v15 = vpop.f32.mrb[84].mxu0  ;;  %2455 = vst [vmem:[#allocation3 + $0xc8] sm:$0xff] %v2447_v42  ;;  %v2479_v22 = vpack.c.bf16 %v2471_v26, %v2438_v40  ;;  %v2645_v8 = vshll.u32 %v2588_v48, 16  ;;  %v2649_v13 = vshrl.u32 %v2588_v48, 16 }
 0x210   : > { %v14030_v61 = vpop.f32.mrb[85].mxu0  ;;  %v2534_v1 = vsel %vm587_vm5, %v2522_v57, %v2533_v36 }
 0x211   : > { %v19159_v0 = vadd.f32 %v14030_v61, %v14029_v15  ;;  %v14032_v2 = vpop.f32.mrb[86].mxu0  ;;  %2560 = vst [vmem:[#allocation3 + $0xa8] sm:$0xff] %v2534_v1  ;;  %v2536_v60 = vshrl.u32 %v2479_v22, 16  ;;  %v2647_v33 = vrot.slane %v2645_v8, 1  ;;  %4530 = vmatmul.mubr.bf16.gmra.mrb[168].mxu0 %v2534_v1  ;;  %4876 = vmatmul.mubr.bf16.gmra.mrb[124].mxu1 %v2534_v1  ;;  %v2539_v6 = vshll.u32 %v2479_v22, 16 }
 0x212   : > { %v14033_v59 = vpop.f32.mrb[87].mxu0  ;;  %4537 = vmatprep.mubr.bf16.mxu0 %v2447_v42  ;;  %v626_v22 = vsel %vm18469_vm6, 0, %v625_v10 }
 0x213   : > { %v19163_v57 = vadd.f32 %v14033_v59, %v14032_v2  ;;  %v2538_v44 = vrot.slane %v2536_v60, 7  ;;  %v19166_v40 = vsel %vm821_vm3, %v2643_v63, %v2647_v33  ;;  %v2651_v28 = vor.u32 %v2649_v13, %v2647_v33  ;;  %627 = vst [vmem:[#allocation3 + $0x180] sm:$0x80] %v626_v22  ;;  %v17369_v59 = vld [vmem:[#allocation9 + $0x98] sm:$0xff]  }
 0x214   : > { %2670 = vst [vmem:[#allocation3 + $0xb8] sm:$0xff] %v19166_v40 }
 0x215   : > { %v2541_v45 = vor.u32 %v2539_v6, %v2538_v44  ;;  %v2563_v55 = vsel %vm18291_vm9, %v2538_v44, %v2562_v21  ;;  %v2672_v49 = vsel %vm18585_vm12, %v2651_v28, %v2671_v38  ;;  %v17368_v21 = vld [vmem:[#allocation9 + $0x90] sm:$0xff]  }
 0x216   : > { %2564 = vst [vmem:[#allocation3 + $0xd8] sm:$0x1] %v2563_v55  ;;  %2673 = vst [vmem:[#allocation3 + $0xd0] sm:$0xff] %v2672_v49 }
 0x217   : > { %v14035_v46 = vpop.f32.mrb[88].mxu0  ;;  %v2542_v19 = vsel %vm587_vm5, %v2530_v11, %v2541_v45 }
 0x218   : > { %v14036_v56 = vpop.f32.mrb[89].mxu0  ;;  %2561 = vst [vmem:[#allocation3 + $0xc0] sm:$0xff] %v2542_v19 }
 0x219   : > { %v19174_v42 = vadd.f32 %v14036_v56, %v14035_v46  ;;  %v14038_v26 = vpop.f32.mrb[90].mxu0  ;;  %4538 = vmatmul.mubr.bf16.gmra.mrb[172].mxu0 %v2542_v19  ;;  %v17372_v46 = vld [vmem:[#allocation9 + $0xa0] sm:$0xff]  }
 0x21a   : > { %v14039_v48 = vpop.f32.mrb[91].mxu0  ;;  %15895 = vmatprep.mubr.bf16.mxu0 %v19060_v58 }
 0x21b   : > { %v19177_v36 = vadd.f32 %v14039_v48, %v14038_v26  ;;  %v17373_v48 = vld [vmem:[#allocation9 + $0xa8] sm:$0xff]  }
 0x21f   : > { %v14041_v15 = vpop.f32.mrb[92].mxu0 }
 0x220   : > { %v14042_v9 = vpop.f32.mrb[93].mxu0 }
 0x221   : > { %v19181_v11 = vadd.f32 %v14042_v9, %v14041_v15  ;;  %v14044_v61 = vpop.f32.mrb[94].mxu0  ;;  %15896 = vmatmul.mubr.bf16.vlgmr.msra.gmra.mrb[176].mxu0 %v19080_v35 }
 0x222   : > { %v14045_v58 = vpop.f32.mrb[95].mxu0  ;;  %15899 = vmatprep.mubr.bf16.mxu0 %v19099_v31  ;;  %15912 = vmatpush3.bf16.msra.mxu0 %v19114_v37 }
 0x223   : > { %v19189_v63 = vadd.f32 %v14045_v58, %v14044_v61  ;;  %15913 = vmatprep.subr.bf16.mxu0 %v17365_v23 }
 0x225   : > { %v14183_v8 = vpop.f32.mrb[64].mxu1 }
 0x226   : > { %v14184_v1 = vpop.f32.mrb[65].mxu1  ;;  %15914 = vmatpush3.bf16.msra.mxu0 %v17365_v23 }
 0x227   : > { %v19186_v2 = vadd.f32 %v14184_v1, %v14183_v8  ;;  %v14186_v34 = vpop.f32.mrb[66].mxu1  ;;  %v14047_v13 = vpop.f32.mrb[96].mxu0  ;;  %15915 = vmatprep.subr.bf16.mxu0 %v17368_v21  ;;  %v17376_v1 = vld [vmem:[#allocation9 + $0xb0] sm:$0xff]  }
 0x228   : > { %v14187_v60 = vpop.f32.mrb[67].mxu1  ;;  %v14048_v35 = vpop.f32.mrb[97].mxu0 }
 0x229   : > { %v19193_v33 = vadd.f32 %v14187_v60, %v14186_v34  ;;  %v19195_v44 = vadd.f32 %v14048_v35, %v14047_v13  ;;  %v14050_v31 = vpop.f32.mrb[98].mxu0  ;;  %15900 = vmatmul.mubr.bf16.gmra.mrb[180].mxu0 %v19117_v32 }
 0x22a   : > { %v14051_v37 = vpop.f32.mrb[99].mxu0  ;;  %15903 = vmatprep.mubr.bf16.mxu0 %v19134_v3  ;;  %15916 = vmatpush3.bf16.msra.mxu0 %v17368_v21  ;;  %v17377_v21 = vld [vmem:[#allocation9 + $0xb8] sm:$0xff]  }
 0x22b   : > { %v19201_v55 = vadd.f32 %v14051_v37, %v14050_v31  ;;  %15917 = vmatprep.subr.bf16.mxu0 %v17369_v59 }
 0x22d   : > { %v14189_v38 = vpop.f32.mrb[68].mxu1 }
 0x22e   : > { %v14190_v6 = vpop.f32.mrb[69].mxu1  ;;  %15918 = vmatpush3.bf16.msra.mxu0 %v17369_v59 }
 0x22f   : > { %v19198_v28 = vadd.f32 %v14190_v6, %v14189_v38  ;;  %v14192_v45 = vpop.f32.mrb[70].mxu1  ;;  %v14053_v56 = vpop.f32.mrb[100].mxu0  ;;  %15919 = vmatprep.subr.bf16.mxu0 %v17372_v46 }
 0x230   : > { %v14193_v49 = vpop.f32.mrb[71].mxu1  ;;  %v14054_v26 = vpop.f32.mrb[101].mxu0 }
 0x231   : > { %v19203_v19 = vadd.f32 %v14193_v49, %v14192_v45  ;;  %v19205_v15 = vadd.f32 %v14054_v26, %v14053_v56  ;;  %v14056_v10 = vpop.f32.mrb[102].mxu0  ;;  %15904 = vmatmul.mubr.bf16.gmra.mrb[184].mxu0 %v19152_v20  ;;  %v17379_v45 = vld [vmem:[#allocation9 + $0x1c0] sm:$0xff]  }
 0x232   : > { %v14057_v3 = vpop.f32.mrb[103].mxu0  ;;  %15907 = vmatprep.mubr.bf16.mxu0 %v19166_v40  ;;  %15920 = vmatpush3.bf16.msra.mxu0 %v17372_v46 }
 0x233   : > { %v19211_v8 = vadd.f32 %v14057_v3, %v14056_v10  ;;  %15921 = vmatprep.subr.bf16.mxu0 %v17373_v48 }
 0x235   : > { %v14195_v32 = vpop.f32.mrb[72].mxu1 }
 0x236   : > { %v14196_v9 = vpop.f32.mrb[73].mxu1  ;;  %15922 = vmatpush3.bf16.msra.mxu0 %v17373_v48 }
 0x237   : > { %v19208_v23 = vadd.f32 %v14196_v9, %v14195_v32  ;;  %v14198_v22 = vpop.f32.mrb[74].mxu1  ;;  %v14059_v34 = vpop.f32.mrb[104].mxu0  ;;  %15923 = vmatprep.subr.bf16.mxu0 %v17376_v1 }
 0x238   : > { %v14199_v61 = vpop.f32.mrb[75].mxu1  ;;  %v14060_v60 = vpop.f32.mrb[105].mxu0 }
 0x239   : > { %v19213_v58 = vadd.f32 %v14199_v61, %v14198_v22  ;;  %v19215_v13 = vadd.f32 %v14060_v60, %v14059_v34  ;;  %v14062_v35 = vpop.f32.mrb[106].mxu0 }
 0x23a   : > { %v14063_v38 = vpop.f32.mrb[107].mxu0  ;;  %15924 = vmatpush3.bf16.msra.mxu0 %v17376_v1 }
 0x23b   : > { %v19219_v6 = vadd.f32 %v14063_v38, %v14062_v35  ;;  %15925 = vmatprep.subr.bf16.mxu0 %v17377_v21 }
 0x23d   : > { %v14201_v20 = vpop.f32.mrb[76].mxu1 }
 0x23e   : > { %v14202_v59 = vpop.f32.mrb[77].mxu1  ;;  %15926 = vmatpush3.bf16.msra.mxu0 %v17377_v21 }
 0x23f   : > { %v19217_v40 = vadd.f32 %v14202_v59, %v14201_v20  ;;  %v14204_v31 = vpop.f32.mrb[78].mxu1  ;;  %v14065_v46 = vpop.f32.mrb[108].mxu0  ;;  %14407 = vmatprep.subr.bf16.mxu0 %v17379_v45 }
 0x240   : > { %v14205_v37 = vpop.f32.mrb[79].mxu1  ;;  %v14066_v56 = vpop.f32.mrb[109].mxu0 }
 0x241   : > { %v19221_v49 = vadd.f32 %v14205_v37, %v14204_v31  ;;  %v19223_v26 = vadd.f32 %v14066_v56, %v14065_v46  ;;  %v14068_v48 = vpop.f32.mrb[110].mxu0 }
 0x242   : > { %v14069_v10 = vpop.f32.mrb[111].mxu0 }
 0x243   : > { %v19225_v3 = vadd.f32 %v14069_v10, %v14068_v48 }
 0x245   : > { %v14207_v32 = vpop.f32.mrb[80].mxu1 }
 0x246   : > { %v14208_v9 = vpop.f32.mrb[81].mxu1 }
 0x247   : > { %v19227_v22 = vadd.f32 %v14208_v9, %v14207_v32  ;;  %v14210_v61 = vpop.f32.mrb[82].mxu1  ;;  %v14103_v60 = vpop.f32.mrb[112].mxu0 }
 0x248   : > { %v14211_v1 = vpop.f32.mrb[83].mxu1  ;;  %v14104_v20 = vpop.f32.mrb[113].mxu0 }
 0x249   : > { %v19229_v34 = vadd.f32 %v14211_v1, %v14210_v61  ;;  %v14105_v35 = vadd.f32 %v14104_v20, %v14103_v60  ;;  %v14106_v21 = vpop.f32.mrb[114].mxu0 }
 0x24a   : > { %v14107_v38 = vpop.f32.mrb[115].mxu0 }
 0x24b   : > { %v16522_v37 = vadd.f32 %v14105_v35, %v19146_v16  ;;  %v14108_v45 = vadd.f32 %v14107_v38, %v14106_v21 }
 0x24d   : > { %v14213_v59 = vpop.f32.mrb[84].mxu1  ;;  %v16528_v32 = vadd.f32 %v14108_v45, %v19149_v17  ;;  %v16523_v9 = vadd.f32 %v16522_v37, %v19186_v2 }
 0x24e   : > { %v14214_v31 = vpop.f32.mrb[85].mxu1 }
 0x24f   : > { %v19232_v46 = vadd.f32 %v14214_v31, %v14213_v59  ;;  %v14216_v56 = vpop.f32.mrb[86].mxu1  ;;  %v14109_v61 = vpop.f32.mrb[116].mxu0  ;;  %v16529_v1 = vadd.f32 %v16528_v32, %v19193_v33 }
 0x250   : > { %v14217_v48 = vpop.f32.mrb[87].mxu1  ;;  %v14110_v60 = vpop.f32.mrb[117].mxu0 }
 0x251   : > { %v19235_v10 = vadd.f32 %v14217_v48, %v14216_v56  ;;  %v14111_v20 = vadd.f32 %v14110_v60, %v14109_v61  ;;  %v14112_v54 = vpop.f32.mrb[118].mxu0 }
 0x252   : > { %v14113_v52 = vpop.f32.mrb[119].mxu0 }
 0x253   : > { %v16519_v35 = vadd.f32 %v14111_v20, %v19159_v0  ;;  %v14114_v21 = vadd.f32 %v14113_v52, %v14112_v54 }
 0x255   : > { %v14219_v18 = vpop.f32.mrb[88].mxu1  ;;  %v16525_v31 = vadd.f32 %v14114_v21, %v19163_v57  ;;  %v16520_v2 = vadd.f32 %v16519_v35, %v19198_v28 }
 0x256   : > { %v14220_v16 = vpop.f32.mrb[89].mxu1 }
 0x257   : > { %v19240_v59 = vadd.f32 %v14220_v16, %v14219_v18  ;;  %v14222_v38 = vpop.f32.mrb[90].mxu1  ;;  %v14115_v33 = vpop.f32.mrb[120].mxu0  ;;  %v16526_v37 = vadd.f32 %v16525_v31, %v19203_v19 }
 0x258   : > { %v14223_v17 = vpop.f32.mrb[91].mxu1  ;;  %v14116_v56 = vpop.f32.mrb[121].mxu0 }
 0x259   : > { %v19243_v45 = vadd.f32 %v14223_v17, %v14222_v38  ;;  %v14117_v48 = vadd.f32 %v14116_v56, %v14115_v33  ;;  %v14118_v32 = vpop.f32.mrb[122].mxu0 }
 0x25a   : > { %v14119_v60 = vpop.f32.mrb[123].mxu0 }
 0x25b   : > { %v16534_v52 = vadd.f32 %v14117_v48, %v19174_v42  ;;  %v14120_v18 = vadd.f32 %v14119_v60, %v14118_v32 }
 0x25d   : > { %v14225_v61 = vpop.f32.mrb[92].mxu1  ;;  %v16540_v16 = vadd.f32 %v14120_v18, %v19177_v36  ;;  %v16535_v28 = vadd.f32 %v16534_v52, %v19208_v23  ;;  %v19261_v23 = vld [vmem:[%s21495_s2] ss:$0 sm:$0xff] }
 0x25e   : > { %v14226_v0 = vpop.f32.mrb[93].mxu1 }
 0x25f   : > { %v19248_v54 = vadd.f32 %v14226_v0, %v14225_v61  ;;  %v14228_v20 = vpop.f32.mrb[94].mxu1  ;;  %v14121_v19 = vpop.f32.mrb[124].mxu0  ;;  %v19255_v35 = vadd.f32 %v16540_v16, %v19213_v58 }
 0x260   : > { %v14229_v57 = vpop.f32.mrb[95].mxu1  ;;  %v14122_v38 = vpop.f32.mrb[125].mxu0 }
 0x261   : > { %v19251_v21 = vadd.f32 %v14229_v57, %v14228_v20  ;;  %v14123_v17 = vadd.f32 %v14122_v38, %v14121_v19  ;;  %v14124_v31 = vpop.f32.mrb[126].mxu0 }
 0x262   : > { %v14125_v42 = vpop.f32.mrb[127].mxu0 }
 0x263   : > { %v16531_v32 = vadd.f32 %v14123_v17, %v19181_v11  ;;  %v14126_v61 = vadd.f32 %v14125_v42, %v14124_v31 }
 0x265   : > { %v15865_v33 = vpop.f32.mrb[48].mxu1  ;;  %v16537_v18 = vadd.f32 %v14126_v61, %v19189_v63  ;;  %v16532_v57 = vadd.f32 %v16531_v32, %v19217_v40 }
 0x266   : > { %v16521_v56 = vadd.f32 %v16520_v2, %v15865_v33  ;;  %v3820_v48 = vpop.f32.mrb[49].mxu1 }
 0x267   : > { %v16524_v60 = vadd.f32 %v16523_v9, %v3820_v48  ;;  %v15866_v36 = vpop.f32.mrb[50].mxu1  ;;  %v14127_v16 = vpop.f32.mrb[128].mxu0  ;;  %v16538_v17 = vadd.f32 %v16537_v18, %v19221_v49 }
 0x268   : > { %v3901_v58 = vadd.f32 %v19261_v23, %v16521_v56  ;;  %v16527_v0 = vadd.f32 %v16526_v37, %v15866_v36  ;;  %v3823_v52 = vpop.f32.mrb[51].mxu1  ;;  %v14128_v37 = vpop.f32.mrb[129].mxu0 }
 0x269   : > { %v3899_v20 = vadd.f32 %v19261_v23, %v16524_v60  ;;  %v16530_v2 = vadd.f32 %v16529_v1, %v3823_v52  ;;  %v14129_v42 = vadd.f32 %v14128_v37, %v14127_v16  ;;  %v14130_v56 = vpop.f32.mrb[130].mxu0 }
 0x26a   : > { %v3917_v11 = vmax.f32 %v3901_v58, 0.0  ;;  %v3902_v9 = vadd.f32 %v19261_v23, %v16527_v0  ;;  %v14131_v60 = vpop.f32.mrb[131].mxu0 }
 0x26b   : > { %v3915_v19 = vmax.f32 %v3899_v20, 0.0  ;;  %v3900_v38 = vadd.f32 %v19261_v23, %v16530_v2  ;;  %v19278_v49 = vadd.f32 %v14129_v42, %v19195_v44  ;;  %v14132_v0 = vadd.f32 %v14131_v60, %v14130_v56 }
 0x26c   : > { %v4058_v31 = vmul.f32 %v18266_v29, %v3917_v11  ;;  %v3918_v33 = vmax.f32 %v3902_v9, 0.0 }
 0x26d   : > { %v4056_v63 = vmul.f32 %v18320_v12, %v3915_v19  ;;  %v3916_v1 = vmax.f32 %v3900_v38, 0.0  ;;  %v15869_v48 = vpop.f32.mrb[52].mxu1 }
 0x26e   : > { %v19272_v40 = vpack.c.bf16 %v3918_v33, %v3917_v11  ;;  %v3950_v32 = vmul.f32 %v18263_v27, %v3918_v33  ;;  %v19275_v61 = vpack.c.bf16 %v3918_v33, %v4058_v31  ;;  %v16533_v36 = vadd.f32 %v16532_v57, %v15869_v48  ;;  %v3836_v58 = vpop.f32.mrb[53].mxu1 }
 0x26f   : > { %v3931_v52 = vpack.c.bf16 %v3916_v1, %v3915_v19  ;;  %v3948_v18 = vmul.f32 %v18260_v25, %v3916_v1  ;;  %v15870_v20 = vpop.f32.mrb[54].mxu1  ;;  %v4072_v16 = vpack.c.bf16 %v3916_v1, %v4056_v63  ;;  %v16552_v31 = vadd.f32 %v14132_v0, %v19201_v55  ;;  %v14133_v29 = vpop.f32.mrb[132].mxu0  ;;  %v4152_v0 = vld [vmem:[#allocation3 + $0xd0] sm:$0x80] }
 0x270   : > { %3940 = vst [vmem:[#allocation3 + $0xf8] sm:$0xff] %v19272_v40  ;;  %v3964_v2 = vpack.c.bf16 %v3950_v32, %v3917_v11  ;;  %v4088_v9 = vshll.u32 %v19275_v61, 16  ;;  %v3839_v38 = vpop.f32.mrb[55].mxu1  ;;  %v3905_v37 = vadd.f32 %v19261_v23, %v16533_v36  ;;  %v16536_v44 = vadd.f32 %v16535_v28, %v3836_v58  ;;  %v14134_v27 = vpop.f32.mrb[133].mxu0 }
 0x271   : > { %3939 = vst [vmem:[#allocation3 + $0xe0] sm:$0xff] %v3931_v52  ;;  %v3963_v57 = vpack.c.bf16 %v3948_v18, %v3915_v19  ;;  %5777 = vmatprep.mubr.bf16.mxu1 %v3931_v52  ;;  %v4081_v56 = vshll.u32 %v4072_v16, 16  ;;  %v4084_v1 = vshrl.u32 %v4072_v16, 16  ;;  %v14135_v36 = vadd.f32 %v14134_v27, %v14133_v29  ;;  %v14136_v58 = vpop.f32.mrb[134].mxu0 }
 0x272   : > { %v3979_v33 = vshrl.u32 %v3964_v2, 16  ;;  %v3982_v42 = vshll.u32 %v3964_v2, 16  ;;  %v4090_v48 = vrot.slane %v4088_v9, 1  ;;  %v3921_v11 = vmax.f32 %v3905_v37, 0.0  ;;  %v14137_v16 = vpop.f32.mrb[135].mxu0 }
 0x273   : > { %v3972_v60 = vshrl.u32 %v3963_v57, 16  ;;  %v3975_v12 = vshll.u32 %v3963_v57, 16  ;;  %v4083_v63 = vrot.slane %v4081_v56, 1  ;;  %v3903_v55 = vadd.f32 %v19261_v23, %v16536_v44 }
 0x274   : > { %v19285_v32 = vrot.slane %v3979_v33, 7  ;;  %v4062_v28 = vmul.f32 %v18509_v30, %v3921_v11  ;;  %v16539_v52 = vadd.f32 %v16538_v17, %v15870_v20  ;;  %v16543_v44 = vadd.f32 %v14135_v36, %v19205_v15 }
 0x275   : > { %v3974_v19 = vrot.slane %v3972_v60, 7  ;;  %v15873_v18 = vpop.f32.mrb[56].mxu1  ;;  %v4086_v9 = vor.u32 %v4084_v1, %v4083_v63  ;;  %v4153_v57 = vsel %vm18469_vm6, %v4083_v63, %v4152_v0  ;;  %v19292_v37 = vmax.f32 %v3903_v55, 0.0  ;;  %v17382_v0 = vld [vmem:[#allocation9 + $0x148] sm:$0xff]  }
 0x276   : > { %v3984_v2 = vor.u32 %v3982_v42, %v19285_v32  ;;  %v3852_v33 = vpop.f32.mrb[57].mxu1  ;;  %4154 = vst [vmem:[#allocation3 + $0xd0] sm:$0x80] %v4153_v57  ;;  %v3906_v60 = vadd.f32 %v19261_v23, %v16539_v52  ;;  %v14138_v27 = vadd.f32 %v14137_v16, %v14136_v58  ;;  %v4092_v17 = vshrl.u32 %v19275_v61, 16  ;;  %v4043_v42 = vld [vmem:[#allocation3 + $0xd8] sm:$0xff] }
 0x277   : > { %v3977_v56 = vor.u32 %v3975_v12, %v3974_v19  ;;  %v19296_v29 = vpop.f32.mrb[58].mxu1  ;;  %v19303_v63 = vsel %vm821_vm3, %v4086_v9, %v4090_v48  ;;  %v16542_v1 = vadd.f32 %v19255_v35, %v3839_v38  ;;  %v4060_v36 = vmul.f32 %v18278_v41, %v19292_v37 }
 0x278   : > { %v19300_v20 = vsel %vm587_vm5, %v3974_v19, %v3984_v2  ;;  %v3855_v12 = vpop.f32.mrb[59].mxu1  ;;  %4155 = vst [vmem:[#allocation3 + $0xe8] sm:$0xff] %v19303_v63  ;;  %v3922_v55 = vmax.f32 %v3906_v60, 0.0  ;;  %v16549_v61 = vadd.f32 %v14138_v27, %v19211_v8  ;;  %v16544_v19 = vadd.f32 %v16543_v44, %v19232_v46  ;;  %v14139_v46 = vpop.f32.mrb[136].mxu0 }
 0x279   : > { %v4044_v15 = vsel %vm18365_vm0, %v3977_v56, %v4043_v42  ;;  %4046 = vst [vmem:[#allocation3 + $0xf0] sm:$0xff] %v19300_v20  ;;  %v3904_v35 = vadd.f32 %v19261_v23, %v16542_v1  ;;  %v16547_v38 = vadd.f32 %v19278_v49, %v19227_v22  ;;  %v16553_v58 = vadd.f32 %v16552_v31, %v19229_v34  ;;  %v14140_v16 = vpop.f32.mrb[137].mxu0 }
 0x27a   : > { %4045 = vst [vmem:[#allocation3 + $0xd8] sm:$0xff] %v4044_v15  ;;  %5778 = vmatmul.mubr.bf16.vlgmr.msra.gmra.mrb[128].mxu1 %v4044_v15  ;;  %v19318_v52 = vpack.c.bf16 %v3922_v55, %v3921_v11  ;;  %v3954_v2 = vmul.f32 %v18281_v43, %v3922_v55  ;;  %v19321_v8 = vpack.c.bf16 %v3922_v55, %v4062_v28  ;;  %v14142_v28 = vpop.f32.mrb[138].mxu0 }
 0x27b   : > { %v16545_v9 = vadd.f32 %v16544_v19, %v15873_v18  ;;  %5785 = vmatprep.mubr.bf16.mxu1 %v19272_v40  ;;  %v3920_v57 = vmax.f32 %v3904_v35, 0.0  ;;  %v16548_v56 = vadd.f32 %v16547_v38, %v3852_v33  ;;  %v16550_v44 = vadd.f32 %v16549_v61, %v19235_v10  ;;  %15976 = vmatpush3.bf16.msra.mxu1 %v19183_v4  ;;  %v17387_v40 = vld [vmem:[#allocation9 + $0x150] sm:$0xff]   ;;  %v14143_v4 = vpop.f32.mrb[139].mxu0 }
 0x27c   : > { %v16554_v60 = vadd.f32 %v16553_v58, %v3855_v12  ;;  %v4094_v22 = vor.u32 %v4092_v17, %v4090_v48  ;;  %3942 = vst [vmem:[#allocation3 + $0x128] sm:$0xff] %v19318_v52  ;;  %v3966_v34 = vpack.c.bf16 %v3954_v2, %v3921_v11  ;;  %v4104_v49 = vshll.u32 %v19321_v8, 16  ;;  %15977 = vmatprep.subr.bf16.mxu1 %v17382_v0  ;;  %v4183_v61 = vld [vmem:[#allocation3 + $0x10] sm:$0xff]  ;;  %v17781_v12 = vld [vmem:[#allocation3 + $0x40] sm:$0xff] }
 0x27d   : > { %v3909_v31 = vadd.f32 %v19261_v23, %v16545_v9  ;;  %v19329_v18 = vpop.f32.mrb[60].mxu1  ;;  %v3933_v33 = vpack.c.bf16 %v3920_v57, %v19292_v37  ;;  %v3952_v10 = vmul.f32 %v18275_v39, %v3920_v57  ;;  %v4074_v27 = vpack.c.bf16 %v3920_v57, %v4060_v36  ;;  %v19335_v17 = vld [vmem:[#allocation3 + $0xd0] sm:$0xff] }
 0x27e   : > { %v14141_v42 = vadd.f32 %v14140_v16, %v14139_v46  ;;  %v19333_v48 = vpop.f32.mrb[61].mxu1  ;;  %v3995_v11 = vshrl.u32 %v3966_v34, 16  ;;  %v3998_v1 = vshll.u32 %v3966_v34, 16  ;;  %15908 = vmatmul.mubr.bf16.gmra.mrb[188].mxu0 %v19335_v17  ;;  %v19343_v19 = vrot.slane %v4104_v49, 1  ;;  %v17392_v16 = vld [vmem:[#allocation9 + $0x158] sm:$0xff]  }
 0x27f   : > { %v19338_v15 = vmax.f32 %v3909_v31, 0.0  ;;  %v19341_v55 = vpop.f32.mrb[62].mxu1  ;;  %3941 = vst [vmem:[#allocation3 + $0x110] sm:$0xff] %v3933_v33  ;;  %v3965_v36 = vpack.c.bf16 %v3952_v10, %v19292_v37  ;;  %v4096_v35 = vshll.u32 %v4074_v27, 16  ;;  %15927 = vmatprep.mubr.bf16.mxu0 %v4183_v61  ;;  %15978 = vmatpush3.bf16.msra.mxu1 %v17382_v0  ;;  %v4100_v46 = vshrl.u32 %v4074_v27, 16 }
 0x280   : > { %v19347_v38 = vadd.f32 %v14141_v42, %v19215_v13  ;;  %v19349_v58 = vpop.f32.mrb[63].mxu1  ;;  %v19351_v2 = vrot.slane %v3995_v11, 7  ;;  %v3907_v57 = vadd.f32 %v19261_v23, %v16548_v56  ;;  %15979 = vmatprep.subr.bf16.mxu1 %v17387_v40  ;;  %v16551_v13 = vadd.f32 %v16550_v44, %v19296_v29  ;;  %v14145_v42 = vpop.f32.mrb[140].mxu0 }
 0x281   : > { %v4066_v9 = vmul.f32 %v21615_v7, %v19338_v15  ;;  %v3987_v34 = vshrl.u32 %v3965_v36, 16  ;;  %v3990_v37 = vshll.u32 %v3965_v36, 16  ;;  %v4098_v49 = vrot.slane %v4096_v35, 1  ;;  %v14146_v35 = vpop.f32.mrb[141].mxu0 }
 0x282   : > { %5786 = vmatmul.mubr.bf16.gmra.mrb[132].mxu1 %v19300_v20  ;;  %v4000_v31 = vor.u32 %v3998_v1, %v19351_v2  ;;  %v3923_v0 = vmax.f32 %v3907_v57, 0.0  ;;  %v14144_v10 = vadd.f32 %v14143_v4, %v14142_v28  ;;  %v3908_v27 = vadd.f32 %v19261_v23, %v16554_v60  ;;  %v19369_v28 = vpop.f32.mrb[142].mxu0 }
 0x283   : > { %5793 = vmatprep.mubr.bf16.mxu1 %v3933_v33  ;;  %v3989_v11 = vrot.slane %v3987_v34, 7  ;;  %v19361_v56 = vsel %vm821_vm3, %v4094_v22, %v4098_v49  ;;  %v4102_v61 = vor.u32 %v4100_v46, %v4098_v49  ;;  %v3910_v36 = vadd.f32 %v19261_v23, %v16551_v13  ;;  %15980 = vmatpush3.bf16.msra.mxu1 %v17387_v40  ;;  %v17380_v33 = vld [vmem:[#allocation9 + $0x180] sm:$0xff]   ;;  %v14149_v57 = vpop.f32.mrb[143].mxu0 }
 0x284   : > { %4156 = vst [vmem:[#allocation3 + $0x100] sm:$0xff] %v19361_v56  ;;  %v4064_v29 = vmul.f32 %v18527_v14, %v3923_v0  ;;  %v19367_v20 = vadd.f32 %v14144_v10, %v19219_v6  ;;  %v3924_v44 = vmax.f32 %v3908_v27, 0.0  ;;  %v14147_v60 = vadd.f32 %v14146_v35, %v14145_v42  ;;  %15981 = vmatprep.subr.bf16.mxu1 %v17392_v16  ;;  %v17381_v6 = vld [vmem:[#allocation9 + $0x1c8] sm:$0xff]   ;;  %v17397_v27 = vld [vmem:[#allocation9 + $0x160] sm:$0xff]  }
 0x285   : > { %v19371_v22 = vpop.f32.mrb[96].mxu1  ;;  %v3992_v4 = vor.u32 %v3990_v37, %v3989_v11  ;;  %v19374_v1 = vsel %vm587_vm5, %v3989_v11, %v4000_v31  ;;  %v19378_v40 = vsel %vm821_vm3, %v4102_v61, %v19343_v19  ;;  %v3926_v46 = vmax.f32 %v3910_v36, 0.0  ;;  %v17780_v10 = vld [vmem:[#allocation3 + $0x28] sm:$0xff] }
 0x286   : > { %v19380_v34 = vpop.f32.mrb[97].mxu1  ;;  %4048 = vst [vmem:[#allocation3 + $0x120] sm:$0xff] %v19374_v1  ;;  %4157 = vst [vmem:[#allocation3 + $0x118] sm:$0xff] %v19378_v40  ;;  %v19384_v49 = vpack.c.bf16 %v3924_v44, %v3923_v0  ;;  %v3956_v37 = vmul.f32 %v18286_v50, %v3924_v44  ;;  %v4076_v13 = vpack.c.bf16 %v3924_v44, %v4064_v29  ;;  %15928 = vmatmul.mubr.bf16.vlgmr.msra.gmra.mrb[176].mxu0 %v17780_v10 }
 0x287   : > { %v16555_v31 = vadd.f32 %v14147_v60, %v19223_v26  ;;  %v19388_v42 = vpop.f32.mrb[98].mxu1  ;;  %v3993_v11 = vsel %vm587_vm5, %v19285_v32, %v3992_v4  ;;  %v19393_v61 = vpack.c.bf16 %v3926_v46, %v19338_v15  ;;  %v3958_v36 = vmul.f32 %v21616_v47, %v3926_v46  ;;  %15931 = vmatprep.mubr.bf16.mxu0 %v17781_v12  ;;  %v17383_v32 = vld [vmem:[#allocation9 + $0x188] sm:$0xff]   ;;  %v17384_v4 = vld [vmem:[#allocation9 + $0x1d0] sm:$0xff]  }
 0x288   : > { %v19396_v35 = vpack.c.bf16 %v3926_v46, %v4066_v9  ;;  %v19398_v29 = vpop.f32.mrb[99].mxu1  ;;  %4047 = vst [vmem:[#allocation3 + $0x108] sm:$0xff] %v3993_v11  ;;  %3943 = vst [vmem:[#allocation3 + $0x140] sm:$0xff] %v19384_v49  ;;  %v3967_v26 = vpack.c.bf16 %v3956_v37, %v3923_v0  ;;  %v4112_v44 = vshll.u32 %v4076_v13, 16  ;;  %14408 = vmatpush3.bf16.msra.mxu0 %v17380_v33  ;;  %15982 = vmatpush3.bf16.msra.mxu1 %v17392_v16 }
 0x289   : > { %v16556_v60 = vadd.f32 %v16555_v31, %v19248_v54  ;;  %v21623_v10 = vshrl.u32 %v19321_v8, 16  ;;  %3944 = vst [vmem:[#allocation3 + $0x158] sm:$0xff] %v19393_v61  ;;  %v3968_v12 = vpack.c.bf16 %v3958_v36, %v19338_v15  ;;  %v16559_v0 = vadd.f32 %v19347_v38, %v19240_v59  ;;  %14409 = vmatprep.subr.bf16.mxu0 %v17381_v6  ;;  %v17399_v54 = vld [vmem:[#allocation9 + $0x168] sm:$0xff]  }
 0x28a   : > { %v4120_v46 = vshll.u32 %v19396_v35, 16  ;;  %5794 = vmatmul.mubr.bf16.gmra.mrb[136].mxu1 %v3993_v11  ;;  %v4003_v33 = vshrl.u32 %v3967_v26, 16  ;;  %v4114_v37 = vrot.slane %v4112_v44, 1  ;;  %v4116_v31 = vshrl.u32 %v4076_v13, 16  ;;  %15983 = vmatprep.subr.bf16.mxu1 %v17397_v27  ;;  %v17385_v13 = vld [vmem:[#allocation9 + $0x190] sm:$0xff]  }
 0x28b   : > { %v4110_v9 = vor.u32 %v21623_v10, %v19343_v19  ;;  %v16557_v16 = vadd.f32 %v16556_v60, %v19329_v18  ;;  %5801 = vmatprep.mubr.bf16.mxu1 %v19318_v52  ;;  %v4011_v8 = vshrl.u32 %v3968_v12, 16  ;;  %v4006_v15 = vshll.u32 %v3967_v26, 16 }
 0x28c   : > { %v19412_v19 = vrot.slane %v4120_v46, 1  ;;  %v16560_v36 = vadd.f32 %v16559_v0, %v19333_v48  ;;  %v4005_v10 = vrot.slane %v4003_v33, 7  ;;  %v4118_v38 = vor.u32 %v4116_v31, %v4114_v37  ;;  %14410 = vmatpush3.bf16.msra.mxu0 %v17383_v32  ;;  %15984 = vmatpush3.bf16.msra.mxu1 %v17397_v27  ;;  %v17386_v48 = vld [vmem:[#allocation9 + $0x1d8] sm:$0xff]  }
 0x28d   : > { %v19416_v59 = vsel %vm821_vm3, %v4110_v9, %v4114_v37  ;;  %v3913_v6 = vadd.f32 %v19261_v23, %v16557_v16  ;;  %v19419_v18 = vrot.slane %v4011_v8, 7  ;;  %v4014_v52 = vshll.u32 %v3968_v12, 16  ;;  %14411 = vmatprep.subr.bf16.mxu0 %v17384_v4  ;;  %15985 = vmatprep.subr.bf16.mxu1 %v17399_v54  ;;  %v17782_v32 = vld [vmem:[#allocation3 + $0x58] sm:$0xff]  ;;  %v17400_v9 = vld [vmem:[#allocation9 + $0x170] sm:$0xff]   ;;  %v17389_v37 = vld [vmem:[#allocation9 + $0x1e0] sm:$0xff]  }
 0x28e   : > { %4158 = vst [vmem:[#allocation3 + $0x130] sm:$0xff] %v19416_v59  ;;  %v3911_v11 = vadd.f32 %v19261_v23, %v16560_v36  ;;  %v14150_v26 = vadd.f32 %v14149_v57, %v19369_v28  ;;  %v4008_v44 = vor.u32 %v4006_v15, %v4005_v10  ;;  %v19426_v60 = vsel %vm821_vm3, %v4118_v38, %v19412_v19  ;;  %v17783_v57 = vld [vmem:[#allocation3 + $0x70] sm:$0xff]  ;;  %v17388_v4 = vld [vmem:[#allocation9 + $0x198] sm:$0xff]   ;;  %v17391_v8 = vld [vmem:[#allocation9 + $0x1e8] sm:$0xff]  }
 0x28f   : > { %v16565_v27 = vadd.f32 %v19367_v20, %v19243_v45  ;;  %15932 = vmatmul.mubr.bf16.gmra.mrb[180].mxu0 %v17782_v32  ;;  %v4016_v12 = vor.u32 %v4014_v52, %v19419_v18  ;;  %4159 = vst [vmem:[#allocation3 + $0x148] sm:$0xff] %v19426_v60  ;;  %v19435_v0 = vadd.f32 %v19380_v34, %v19371_v22  ;;  %v3929_v20 = vmax.f32 %v3913_v6, 0.0  ;;  %v17401_v31 = vld [vmem:[#allocation9 + $0x178] sm:$0xff]   ;;  %v17784_v38 = vld [vmem:[#allocation3 + $0x88] sm:$0xff] }
 0x290   : > { %v3927_v46 = vmax.f32 %v3911_v11, 0.0  ;;  %v16561_v28 = vadd.f32 %v14150_v26, %v19225_v3  ;;  %15935 = vmatprep.mubr.bf16.mxu0 %v17783_v57  ;;  %v4009_v45 = vsel %vm587_vm5, %v19351_v2, %v4008_v44  ;;  %14412 = vmatpush3.bf16.msra.mxu0 %v17385_v13  ;;  %v19451_v34 = vadd.f32 %v19398_v29, %v19388_v42  ;;  %v19459_v42 = vld [vmem:[#allocation9 + $0x80] sm:$0xff]   ;;  %v17393_v52 = vld [vmem:[#allocation9 + $0x1a8] sm:$0xff]   ;;  %v21624_v26 = vld [vmem:[#allocation24_spill] sm:$0xff] }
 0x291   : > { %v16566_v33 = vadd.f32 %v16565_v27, %v19349_v58  ;;  %15986 = vmatpush3.bf16.msra.mxu1 %v17399_v54  ;;  %v19441_v16 = vsel %vm587_vm5, %v4005_v10, %v4016_v12  ;;  %4049 = vst [vmem:[#allocation3 + $0x138] sm:$0xff] %v4009_v45  ;;  %14413 = vmatprep.subr.bf16.mxu0 %v17386_v48  ;;  %v17390_v58 = vld [vmem:[#allocation9 + $0x1a0] sm:$0xff]   ;;  %v4124_v6 = vshrl.u32 %v19396_v35, 16  ;;  %v17394_v27 = vld [vmem:[#allocation9 + $0x1f0] sm:$0xff]  }
 0x292   : > { %v16562_v3 = vadd.f32 %v16561_v28, %v19251_v21  ;;  %5802 = vmatmul.mubr.bf16.gmra.mrb[140].mxu1 %v19374_v1  ;;  %4050 = vst [vmem:[#allocation3 + $0x150] sm:$0xff] %v19441_v16  ;;  %v4068_v2 = vmul.f32 %v21617_v5, %v3927_v46  ;;  %15987 = vmatprep.subr.bf16.mxu1 %v17400_v9  ;;  %v17785_v29 = vld [vmem:[#allocation3 + $0xa0] sm:$0xff]  ;;  %v17395_v35 = vld [vmem:[#allocation9 + $0x1b0] sm:$0xff]  }
 0x293   : > { %v3912_v22 = vadd.f32 %v19261_v23, %v16566_v33  ;;  %5809 = vmatprep.mubr.bf16.mxu1 %v19384_v49  ;;  %v4070_v1 = vmul.f32 %v21619_v53, %v3929_v20  ;;  %v4126_v32 = vor.u32 %v4124_v6, %v19412_v19  ;;  %v4162_v33 = vld [vmem:[#allocation3 + $0x190] sm:$0xff]  ;;  %v4982_v19 = vld [vmem:[#allocation3 + $0x38] sm:$0xff] }
 0x294   : > { %v16563_v54 = vadd.f32 %v16562_v3, %v19341_v55  ;;  %14414 = vmatpush3.bf16.msra.mxu0 %v17388_v4  ;;  %v4053_v4 = vld [vmem:[#allocation3 + $0x198] sm:$0x1] }
 0x295   : > { %v3928_v21 = vmax.f32 %v3912_v22, 0.0  ;;  %15988 = vmatpush3.bf16.msra.mxu1 %v17400_v9  ;;  %14415 = vmatprep.subr.bf16.mxu0 %v17389_v37 }
 0x296   : > { %v3914_v15 = vadd.f32 %v19261_v23, %v16563_v54  ;;  %15989 = vmatprep.subr.bf16.mxu1 %v17401_v31  ;;  %v17786_v54 = vld [vmem:[#allocation3 + $0xb8] sm:$0xff] }
 0x297   : > { %v19456_v36 = vpack.c.bf16 %v3928_v21, %v3927_v46  ;;  %v3960_v49 = vmul.f32 %v21618_v24, %v3928_v21  ;;  %v4078_v10 = vpack.c.bf16 %v3928_v21, %v4068_v2  ;;  %15936 = vmatmul.mubr.bf16.gmra.mrb[184].mxu0 %v17784_v38  ;;  %v17402_v38 = vld [vmem:[#allocation9 + $0x200] sm:$0xff]  }
 0x298   : > { %v3930_v55 = vmax.f32 %v3914_v15, 0.0  ;;  %15939 = vmatprep.mubr.bf16.mxu0 %v17785_v29  ;;  %14416 = vmatpush3.bf16.msra.mxu0 %v17390_v58  ;;  %v17396_v58 = vld [vmem:[#allocation9 + $0x1f8] sm:$0xff]  }
 0x299   : > { %3945 = vst [vmem:[#allocation3 + $0x170] sm:$0xff] %v19456_v36  ;;  %v3969_v13 = vpack.c.bf16 %v3960_v49, %v3927_v46  ;;  %v4128_v23 = vshll.u32 %v4078_v10, 16  ;;  %15990 = vmatpush3.bf16.msra.mxu1 %v17401_v31  ;;  %14417 = vmatprep.subr.bf16.mxu0 %v17391_v8  ;;  %v4132_v57 = vshrl.u32 %v4078_v10, 16  ;;  %v17398_v10 = vld [vmem:[#allocation9 + $0x1b8] sm:$0xff]  }
 0x29a   : > { %v19463_v11 = vpack.c.bf16 %v3930_v55, %v3929_v20  ;;  %v3962_v48 = vmul.f32 %v21624_v26, %v3930_v55  ;;  %v4079_v44 = vpack.c.bf16 %v3930_v55, %v4070_v1  ;;  %5810 = vmatmul.mubr.bf16.gmra.mrb[144].mxu1 %v4009_v45  ;;  %16007 = vmatprep.subr.bf16.mxu1 %v19459_v42 }
 0x29b   : > { %v4019_v9 = vshrl.u32 %v3969_v13, 16  ;;  %v4130_v12 = vrot.slane %v4128_v23, 1  ;;  %5817 = vmatprep.mubr.bf16.mxu1 %v19393_v61  ;;  %v4022_v31 = vshll.u32 %v3969_v13, 16 }
 0x29c   : > { %3946 = vst [vmem:[#allocation3 + $0x188] sm:$0xff] %v19463_v11  ;;  %v3970_v46 = vpack.c.bf16 %v3962_v48, %v3929_v20  ;;  %v4136_v28 = vshll.u32 %v4079_v44, 16  ;;  %14418 = vmatpush3.bf16.msra.mxu0 %v17393_v52  ;;  %v4140_v22 = vshrl.u32 %v4079_v44, 16  ;;  %v4981_v52 = vld [vmem:[#allocation3 + $0x30] sm:$0xff]  ;;  %v17404_v48 = vld [vmem:[#allocation9 + $0x208] sm:$0xff]  }
 0x29d   : > { %v4021_v37 = vrot.slane %v4019_v9, 7  ;;  %v19471_v45 = vsel %vm821_vm3, %v4126_v32, %v4130_v12  ;;  %v4134_v61 = vor.u32 %v4132_v57, %v4130_v12  ;;  %14419 = vmatprep.subr.bf16.mxu0 %v17394_v27  ;;  %v4985_v44 = vld [vmem:[#allocation3 + $0x50] sm:$0xff]  ;;  %v4984_v32 = vld [vmem:[#allocation3 + $0x48] sm:$0xff]  ;;  %v17411_v9 = vld [vmem:[#allocation9 + $0x220] sm:$0xff]  }
 0x29e   : > { %v4027_v3 = vshrl.u32 %v3970_v46, 16  ;;  %v4138_v2 = vrot.slane %v4136_v28, 1  ;;  %4160 = vst [vmem:[#allocation3 + $0x160] sm:$0xff] %v19471_v45  ;;  %v4030_v8 = vshll.u32 %v3970_v46, 16  ;;  %v17407_v27 = vld [vmem:[#allocation9 + $0x210] sm:$0xff]   ;;  %v17413_v12 = vld [vmem:[#allocation9 + $0x228] sm:$0xff]  }
 0x29f   : > { %v4024_v20 = vor.u32 %v4022_v31, %v4021_v37  ;;  %15940 = vmatmul.mubr.bf16.gmra.mrb[188].mxu0 %v17786_v54 }
 0x2a0   : > { %v4029_v21 = vrot.slane %v4027_v3, 7  ;;  %v4142_v1 = vor.u32 %v4140_v22, %v4138_v2  ;;  %v19475_v15 = vsel %vm821_vm3, %v4134_v61, %v4138_v2  ;;  %5230 = vmatprep.mubr.bf16.mxu0 %v4982_v19  ;;  %14420 = vmatpush3.bf16.msra.mxu0 %v17395_v35  ;;  %v4987_v35 = vld [vmem:[#allocation3 + $0x60] sm:$0xff]  ;;  %v17415_v61 = vld [vmem:[#allocation9 + $0x230] sm:$0xff]  }
 0x2a1   : > { %v4025_v49 = vsel %vm587_vm5, %v19419_v18, %v4024_v20  ;;  %4161 = vst [vmem:[#allocation3 + $0x178] sm:$0xff] %v19475_v15  ;;  %14421 = vmatprep.subr.bf16.mxu0 %v17396_v58 }
 0x2a2   : > { %v4032_v55 = vor.u32 %v4030_v8, %v4029_v21  ;;  %v4054_v6 = vsel %vm18291_vm9, %v4029_v21, %v4053_v4  ;;  %v19484_v23 = vsel %vm18585_vm12, %v4142_v1, %v4162_v33  ;;  %4051 = vst [vmem:[#allocation3 + $0x168] sm:$0xff] %v4025_v49  ;;  %5818 = vmatmul.mubr.bf16.gmra.mrb[148].mxu1 %v19441_v16  ;;  %v17409_v16 = vld [vmem:[#allocation9 + $0x218] sm:$0xff]   ;;  %v17405_v33 = vld [vmem:[#allocation9 + $0x88] sm:$0xff]  }
 0x2a3   : > { %4055 = vst [vmem:[#allocation3 + $0x198] sm:$0x1] %v4054_v6  ;;  %4164 = vst [vmem:[#allocation3 + $0x190] sm:$0xff] %v19484_v23  ;;  %5825 = vmatprep.mubr.bf16.mxu1 %v19456_v36  ;;  %v4988_v36 = vld [vmem:[#allocation3 + $0x68] sm:$0xff]  ;;  %v17417_v21 = vld [vmem:[#allocation9 + $0x238] sm:$0xff]  }
 0x2a4   : > { %v4033_v18 = vsel %vm587_vm5, %v4021_v37, %v4032_v55  ;;  %14422 = vmatpush3.bf16.msra.mxu0 %v17398_v10  ;;  %v4990_v8 = vld [vmem:[#allocation3 + $0x78] sm:$0xff]  ;;  %v17420_v55 = vld [vmem:[#allocation9 + $0x40] sm:$0xff]  }
 0x2a5   : > { %4052 = vst [vmem:[#allocation3 + $0x180] sm:$0xff] %v4033_v18  ;;  %15943 = vmatprep.subr.bf16.mxu0 %v17402_v38 }
 0x2a7   : > { %5231 = vmatmul.mubr.bf16.vlgmr.msra.gmra.mrb[192].mxu0 %v4981_v52 }
 0x2a8   : > { %5238 = vmatprep.mubr.bf16.mxu0 %v4985_v44  ;;  %15944 = vmatpush3.bf16.msra.mxu0 %v17402_v38  ;;  %v13373_v44 = vld [vmem:[%s18227_s6 + $0x100] sm:$0xff] }
 0x2a9   : > { %15945 = vmatprep.subr.bf16.mxu0 %v17404_v48 }
 0x2aa   : > { %5826 = vmatmul.mubr.bf16.gmra.mrb[152].mxu1 %v4025_v49  ;;  %v4994_v49 = vld [vmem:[#allocation3 + $0x98] sm:$0xff] }
 0x2ab   : > { %5833 = vmatprep.mubr.bf16.mxu1 %v19463_v11  ;;  %v4991_v11 = vld [vmem:[#allocation3 + $0x80] sm:$0xff] }
 0x2ac   : > { %15946 = vmatpush3.bf16.msra.mxu0 %v17404_v48  ;;  %v6759_v48 = vld [vmem:[#allocation2 + $0x1d0] sm:$0x1] }
 0x2ad   : > { %15947 = vmatprep.subr.bf16.mxu0 %v17407_v27 }
 0x2af   : > { %5239 = vmatmul.mubr.bf16.gmra.mrb[196].mxu0 %v4984_v32 }
 0x2b0   : > { %5246 = vmatprep.mubr.bf16.mxu0 %v4988_v36  ;;  %15948 = vmatpush3.bf16.msra.mxu0 %v17407_v27  ;;  %v13374_v27 = vld [vmem:[%s18227_s6 + $0x108] sm:$0xff]  ;;  %v6760_v36 = vsel %vm18291_vm9, 0, %v6759_v48 }
 0x2b1   : > { %15949 = vmatprep.subr.bf16.mxu0 %v17409_v16  ;;  %6761 = vst [vmem:[#allocation2 + $0x1d0] sm:$0x1] %v6760_v36 }
 0x2b2   : > { %5834 = vmatmul.mubr.bf16.gmra.mrb[156].mxu1 %v4033_v18 }
 0x2b3   : > { %15991 = vmatprep.mubr.bf16.mxu1 %v19303_v63  ;;  %v14263_v46 = vpop.f32.mrb[144].mxu0  ;;  %v14349_v28 = vpop.f32.mrb[100].mxu1  ;;  %v17406_v63 = vld [vmem:[#allocation9 + $0x90] sm:$0xff]  }
 0x2b4   : > { %15950 = vmatpush3.bf16.msra.mxu0 %v17409_v16  ;;  %v14264_v57 = vpop.f32.mrb[145].mxu0  ;;  %v14350_v4 = vpop.f32.mrb[101].mxu1 }
 0x2b5   : > { %15951 = vmatprep.subr.bf16.mxu0 %v17411_v9  ;;  %v14265_v37 = vadd.f32 %v14264_v57, %v14263_v46  ;;  %v14351_v31 = vadd.f32 %v14350_v4, %v14349_v28  ;;  %v14266_v19 = vpop.f32.mrb[146].mxu0  ;;  %v14352_v3 = vpop.f32.mrb[102].mxu1  ;;  %v17410_v28 = vld [vmem:[#allocation9 + $0xa0] sm:$0xff]  }
 0x2b6   : > { %v14267_v2 = vpop.f32.mrb[147].mxu0  ;;  %v14353_v22 = vpop.f32.mrb[103].mxu1 }
 0x2b7   : > { %5247 = vmatmul.mubr.bf16.gmra.mrb[200].mxu0 %v4987_v35  ;;  %v14268_v58 = vadd.f32 %v14267_v2, %v14266_v19  ;;  %v14354_v20 = vadd.f32 %v14353_v22, %v14352_v3  ;;  %v19496_v54 = vadd.f32 %v19435_v0, %v14265_v37  ;;  %v4993_v3 = vld [vmem:[#allocation3 + $0x90] sm:$0xff]  ;;  %v17412_v22 = vld [vmem:[#allocation9 + $0xa8] sm:$0xff]  }
 0x2b8   : > { %5254 = vmatprep.mubr.bf16.mxu0 %v4991_v11  ;;  %15952 = vmatpush3.bf16.msra.mxu0 %v17411_v9  ;;  %v19509_v9 = vmax.f32 %v13373_v44, 0.0  ;;  %v6756_v11 = vld [vmem:[#allocation2 + $0x1c8] sm:$0x1]  ;;  %v4997_v2 = vld [vmem:[#allocation3 + $0xb0] sm:$0xff] }
 0x2b9   : > { %15953 = vmatprep.subr.bf16.mxu0 %v17413_v12  ;;  %v19499_v1 = vadd.f32 %v19451_v34, %v14268_v58  ;;  %v6757_v37 = vsel %vm18291_vm9, 0, %v6756_v11  ;;  %v17414_v44 = vld [vmem:[#allocation9 + $0xb0] sm:$0xff]   ;;  %v21627_v11 = vld [vmem:[#allocation15_spill] sm:$0xff] }
 0x2ba   : > { %15992 = vmatmul.mubr.bf16.vlgmr.msra.gmra.mrb[160].mxu1 %v19361_v56  ;;  %6758 = vst [vmem:[#allocation2 + $0x1c8] sm:$0x1] %v6757_v37 }
 0x2bb   : > { %15995 = vmatprep.mubr.bf16.mxu1 %v19378_v40  ;;  %16008 = vmatpush3.bf16.msra.mxu1 %v19459_v42  ;;  %v17408_v40 = vld [vmem:[#allocation9 + $0x98] sm:$0xff]  }
 0x2bc   : > { %16009 = vmatprep.subr.bf16.mxu1 %v17405_v33  ;;  %15954 = vmatpush3.bf16.msra.mxu0 %v17413_v12  ;;  %v14269_v10 = vpop.f32.mrb[148].mxu0  ;;  %v14355_v38 = vpop.f32.mrb[104].mxu1  ;;  %v19511_v12 = vmax.f32 %v13374_v27, 0.0 }
 0x2bd   : > { %15955 = vmatprep.subr.bf16.mxu0 %v17415_v61  ;;  %v14270_v0 = vpop.f32.mrb[149].mxu0  ;;  %v14356_v42 = vpop.f32.mrb[105].mxu1 }
 0x2be   : > { %v14271_v6 = vadd.f32 %v14270_v0, %v14269_v10  ;;  %v19501_v18 = vadd.f32 %v14356_v42, %v14355_v38  ;;  %v14272_v34 = vpop.f32.mrb[150].mxu0  ;;  %v14358_v52 = vpop.f32.mrb[106].mxu1  ;;  %v6835_v4 = vpack.c.bf16 %v19511_v12, %v19509_v9 }
 0x2bf   : > { %16010 = vmatpush3.bf16.msra.mxu1 %v17405_v33  ;;  %5255 = vmatmul.mubr.bf16.gmra.mrb[204].mxu0 %v4990_v8  ;;  %v14273_v16 = vpop.f32.mrb[151].mxu0  ;;  %v14359_v32 = vpop.f32.mrb[107].mxu1  ;;  %v6852_v33 = vmul.f32 %v18260_v25, %v19511_v12  ;;  %v13375_v8 = vld [vmem:[%s18227_s6 + $0x110] sm:$0xff] }
 0x2c0   : > { %16011 = vmatprep.subr.bf16.mxu1 %v17406_v63  ;;  %5262 = vmatprep.mubr.bf16.mxu0 %v4994_v49  ;;  %v14274_v35 = vadd.f32 %v14273_v16, %v14272_v34  ;;  %v14360_v46 = vadd.f32 %v14359_v32, %v14358_v52  ;;  %v19513_v57 = vadd.f32 %v14351_v31, %v14271_v6  ;;  %v19527_v38 = vmax.f32 %v13375_v8, 0.0 }
 0x2c1   : > { %15956 = vmatpush3.bf16.msra.mxu0 %v17415_v61  ;;  %6843 = vst [vmem:[#allocation2 + $0x1d0] sm:$0xff] %v6835_v4  ;;  %v6867_v31 = vpack.c.bf16 %v6852_v33, %v19509_v9  ;;  %v6947_v36 = vld [vmem:[#allocation2 + $0x1c8] sm:$0xff] }
 0x2c2   : > { %15996 = vmatmul.mubr.bf16.gmra.mrb[164].mxu1 %v19416_v59  ;;  %15957 = vmatprep.subr.bf16.mxu0 %v17417_v21  ;;  %v19521_v19 = vadd.f32 %v14354_v20, %v14274_v35  ;;  %v13376_v20 = vld [vmem:[%s18227_s6 + $0x118] sm:$0xff]  ;;  %v4996_v33 = vld [vmem:[#allocation3 + $0xa8] sm:$0xff] }
 0x2c3   : > { %15999 = vmatprep.mubr.bf16.mxu1 %v19426_v60  ;;  %16012 = vmatpush3.bf16.msra.mxu1 %v17406_v63  ;;  %v6876_v58 = vshrl.u32 %v6867_v31, 16  ;;  %v19532_v34 = vmax.f32 %v13376_v20, 0.0 }
 0x2c4   : > { %16013 = vmatprep.subr.bf16.mxu1 %v17408_v40  ;;  %v14275_v63 = vpop.f32.mrb[152].mxu0  ;;  %v14361_v61 = vpop.f32.mrb[108].mxu1 }
 0x2c5   : > { %15958 = vmatpush3.bf16.msra.mxu0 %v17417_v21  ;;  %v6879_v21 = vshll.u32 %v6867_v31, 16  ;;  %v14276_v49 = vpop.f32.mrb[153].mxu0  ;;  %v14362_v10 = vpop.f32.mrb[109].mxu1  ;;  %v19530_v6 = vrot.slane %v6876_v58, 7  ;;  %v6836_v35 = vpack.c.bf16 %v19532_v34, %v19527_v38  ;;  %v6854_v4 = vmul.f32 %v21627_v11, %v19532_v34  ;;  %v19546_v31 = vld [vmem:[#allocation3 + $0xc8] sm:$0xff]  ;;  %v13377_v58 = vld [vmem:[%s18227_s6 + $0x120] sm:$0xff] }
 0x2c6   : > { %14567 = vmatprep.subr.bf16.mxu0 %v17420_v55  ;;  %v14363_v0 = vadd.f32 %v14362_v10, %v14361_v61  ;;  %v14278_v42 = vpop.f32.mrb[154].mxu0  ;;  %v14364_v55 = vpop.f32.mrb[110].mxu1  ;;  %v19553_v10 = vmax.f32 %v13377_v58, 0.0  ;;  %v5003_v58 = vld [vmem:[#allocation3 + $0xe0] sm:$0xff] }
 0x2c7   : > { %16014 = vmatpush3.bf16.msra.mxu1 %v17408_v40  ;;  %5263 = vmatmul.mubr.bf16.gmra.mrb[208].mxu0 %v4993_v3  ;;  %v14277_v40 = vadd.f32 %v14276_v49, %v14275_v63  ;;  %v14279_v52 = vpop.f32.mrb[155].mxu0  ;;  %v14365_v48 = vpop.f32.mrb[111].mxu1  ;;  %v6881_v32 = vor.u32 %v6879_v21, %v19530_v6  ;;  %6844 = vst [vmem:[#allocation2 + $0x1e8] sm:$0xff] %v6836_v35 }
 0x2c8   : > { %16015 = vmatprep.subr.bf16.mxu1 %v17410_v28  ;;  %5270 = vmatprep.mubr.bf16.mxu0 %v4997_v2  ;;  %v14280_v27 = vadd.f32 %v14279_v52, %v14278_v42  ;;  %v14366_v16 = vadd.f32 %v14365_v48, %v14364_v55  ;;  %v17416_v2 = vld [vmem:[#allocation9 + $0xb8] sm:$0xff]   ;;  %v6868_v63 = vpack.c.bf16 %v6854_v4, %v19527_v38 }
 0x2c9   : > { %v6948_v37 = vsel %vm18365_vm0, %v6881_v32, %v6947_v36  ;;  %v17418_v32 = vld [vmem:[#allocation9 + $0x1c0] sm:$0xff]  }
 0x2ca   : > { %16000 = vmatmul.mubr.bf16.gmra.mrb[168].mxu1 %v19471_v45  ;;  %v19544_v3 = vadd.f32 %v14360_v46, %v14280_v27  ;;  %6949 = vst [vmem:[#allocation2 + $0x1c8] sm:$0xff] %v6948_v37  ;;  %v6883_v46 = vshrl.u32 %v6868_v63, 16  ;;  %v6886_v49 = vshll.u32 %v6868_v63, 16 }
 0x2cb   : > { %16003 = vmatprep.mubr.bf16.mxu1 %v19475_v15  ;;  %16016 = vmatpush3.bf16.msra.mxu1 %v17410_v28  ;;  %v19540_v28 = vadd.f32 %v19501_v18, %v14277_v40 }
 0x2cc   : > { %16017 = vmatprep.subr.bf16.mxu1 %v17412_v22  ;;  %21629 = vst [vmem:[#allocation35_spill] sm:$0xff] %v19544_v3  ;;  %v14281_v18 = vpop.f32.mrb[156].mxu0  ;;  %v14367_v61 = vpop.f32.mrb[112].mxu1  ;;  %v6885_v36 = vrot.slane %v6883_v46, 7 }
 0x2cd   : > { %21628 = vst [vmem:[#allocation34_spill] sm:$0xff] %v19540_v28  ;;  %v14282_v21 = vpop.f32.mrb[157].mxu0  ;;  %v14368_v8 = vpop.f32.mrb[113].mxu1 }
 0x2ce   : > { %v14283_v40 = vadd.f32 %v14282_v21, %v14281_v18  ;;  %v14369_v42 = vadd.f32 %v14368_v8, %v14367_v61  ;;  %v14284_v55 = vpop.f32.mrb[158].mxu0  ;;  %v14370_v52 = vpop.f32.mrb[114].mxu1  ;;  %v6888_v63 = vor.u32 %v6886_v49, %v6885_v36  ;;  %v17419_v18 = vld [vmem:[#allocation9 + $0x180] sm:$0xff]  }
 0x2cf   : > { %16018 = vmatpush3.bf16.msra.mxu1 %v17412_v22  ;;  %5271 = vmatmul.mubr.bf16.gmra.mrb[212].mxu0 %v4996_v33  ;;  %v13378_v22 = vld [vmem:[%s18227_s6 + $0x128] sm:$0xff]  ;;  %v14285_v48 = vpop.f32.mrb[159].mxu0  ;;  %v14371_v27 = vpop.f32.mrb[115].mxu1 }
 0x2d0   : > { %16019 = vmatprep.subr.bf16.mxu1 %v17414_v44  ;;  %5278 = vmatprep.mubr.bf16.mxu0 %v19546_v31  ;;  %v19555_v20 = vmax.f32 %v13378_v22, 0.0  ;;  %v14286_v4 = vadd.f32 %v14285_v48, %v14284_v55  ;;  %v14372_v33 = vadd.f32 %v14371_v27, %v14370_v52  ;;  %v19562_v37 = vadd.f32 %v14363_v0, %v14283_v40  ;;  %v17421_v22 = vld [vmem:[#allocation9 + $0x1c8] sm:$0xff]   ;;  %v13379_v40 = vld [vmem:[%s18227_s6 + $0x130] sm:$0xff]  ;;  %v13380_v48 = vld [vmem:[%s18227_s6 + $0x138] sm:$0xff] }
 0x2d1   : > { %v6889_v0 = vsel %vm587_vm5, %v19530_v6, %v6888_v63  ;;  %v17423_v6 = vld [vmem:[#allocation9 + $0x188] sm:$0xff]   ;;  %v19579_v63 = vmax.f32 %v13380_v48, 0.0 }
 0x2d2   : > { %16004 = vmatmul.mubr.bf16.gmra.mrb[172].mxu1 %v19484_v23  ;;  %v6837_v23 = vpack.c.bf16 %v19555_v20, %v19553_v10  ;;  %v6856_v35 = vmul.f32 %v18275_v39, %v19555_v20  ;;  %21630 = vst [vmem:[#allocation36_spill] sm:$0xff] %v19562_v37  ;;  %v19567_v61 = vadd.f32 %v14366_v16, %v14286_v4  ;;  %6950 = vst [vmem:[#allocation2 + $0x1e0] sm:$0xff] %v6889_v0  ;;  %v17787_v16 = vld [vmem:[#allocation3 + $0xe8] sm:$0xff]  ;;  %v17425_v0 = vld [vmem:[#allocation9 + $0x1d0] sm:$0xff]  }
 0x2d3   : > { %16020 = vmatpush3.bf16.msra.mxu1 %v17414_v44  ;;  %16023 = vmatprep.mubr.bf16.mxu1 %v19335_v17  ;;  %v19565_v17 = vld [vmem:[#allocation3 + $0xc0] sm:$0xff]  ;;  %v19577_v4 = vmax.f32 %v13379_v40, 0.0 }
 0x2d4   : > { %16021 = vmatprep.subr.bf16.mxu1 %v17416_v2  ;;  %6845 = vst [vmem:[#allocation2 + $0x200] sm:$0xff] %v6837_v23  ;;  %v6869_v44 = vpack.c.bf16 %v6856_v35, %v19553_v10  ;;  %21631 = vst [vmem:[#allocation37_spill] sm:$0xff] %v19567_v61  ;;  %v14287_v46 = vpop.f32.mrb[160].mxu0  ;;  %v14373_v49 = vpop.f32.mrb[116].mxu1  ;;  %v17433_v61 = vld [vmem:[#allocation9 + $0x1e0] sm:$0xff]  }
 0x2d5   : > { %v14374_v55 = vpop.f32.mrb[117].mxu1 }
 0x2d6   : > { %v6891_v21 = vshrl.u32 %v6869_v44, 16  ;;  %v6894_v8 = vshll.u32 %v6869_v44, 16  ;;  %v14376_v35 = vpop.f32.mrb[118].mxu1 }
 0x2d7   : > { %16022 = vmatpush3.bf16.msra.mxu1 %v17416_v2  ;;  %5279 = vmatmul.mubr.bf16.gmra.mrb[216].mxu0 %v19565_v17  ;;  %v14288_v2 = vpop.f32.mrb[161].mxu0 }
 0x2d8   : > { %14647 = vmatprep.subr.bf16.mxu1 %v17418_v32  ;;  %5286 = vmatprep.mubr.bf16.mxu0 %v5003_v58  ;;  %v19573_v52 = vrot.slane %v6891_v21, 7  ;;  %v14289_v27 = vadd.f32 %v14288_v2, %v14287_v46  ;;  %v14375_v32 = vadd.f32 %v14374_v55, %v14373_v49  ;;  %v14290_v23 = vpop.f32.mrb[162].mxu0  ;;  %v14377_v58 = vpop.f32.mrb[119].mxu1  ;;  %v6838_v2 = vpack.c.bf16 %v19579_v63, %v19577_v4  ;;  %v5002_v55 = vld [vmem:[#allocation3 + $0xd8] sm:$0xff] }
 0x2d9   : > { %v14291_v44 = vpop.f32.mrb[163].mxu0  ;;  %v14378_v49 = vadd.f32 %v14377_v58, %v14376_v35 }
 0x2da   : > { %16024 = vmatmul.mubr.bf16.vlgmr.msra.gmra.mrb[160].mxu1 %v17787_v16  ;;  %v6896_v21 = vor.u32 %v6894_v8, %v19573_v52  ;;  %v19582_v16 = vadd.f32 %v14369_v42, %v14289_v27  ;;  %v14292_v46 = vadd.f32 %v14291_v44, %v14290_v23  ;;  %6846 = vst [vmem:[#allocation2 + $0x218] sm:$0xff] %v6838_v2  ;;  %v4983_v42 = vld [vmem:[#allocation3 + $0x40] sm:$0xff]  ;;  %v17429_v8 = vld [vmem:[#allocation9 + $0x1d8] sm:$0xff]  }
 0x2db   : > { %16027 = vmatprep.mubr.bf16.mxu1 %v19361_v56  ;;  %14648 = vmatpush3.bf16.msra.mxu1 %v17419_v18  ;;  %v6858_v18 = vmul.f32 %v18281_v43, %v19579_v63  ;;  %v13381_v23 = vld [vmem:[%s18227_s6 + $0x140] sm:$0xff] }
 0x2dc   : > { %14649 = vmatprep.subr.bf16.mxu1 %v17421_v22  ;;  %21632 = vst [vmem:[#allocation38_spill] sm:$0xff] %v19582_v16  ;;  %v6897_v56 = vsel %vm587_vm5, %v6885_v36, %v6896_v21  ;;  %v19589_v40 = vadd.f32 %v14372_v33, %v14292_v46  ;;  %v17427_v22 = vld [vmem:[#allocation9 + $0x190] sm:$0xff]   ;;  %v14293_v36 = vpop.f32.mrb[164].mxu0  ;;  %v14379_v27 = vpop.f32.mrb[120].mxu1  ;;  %v17788_v33 = vld [vmem:[#allocation3 + $0x118] sm:$0xff]  ;;  %v13382_v21 = vld [vmem:[%s18227_s6 + $0x148] sm:$0xff] }
 0x2dd   : > { %6951 = vst [vmem:[#allocation2 + $0x1f8] sm:$0xff] %v6897_v56  ;;  %v6870_v48 = vpack.c.bf16 %v6858_v18, %v19577_v4  ;;  %v14294_v35 = vpop.f32.mrb[165].mxu0  ;;  %v14380_v44 = vpop.f32.mrb[121].mxu1  ;;  %v19595_v18 = vmax.f32 %v13381_v23, 0.0 }
 0x2de   : > { %21633 = vst [vmem:[#allocation39_spill] sm:$0xff] %v19589_v40  ;;  %v14295_v46 = vadd.f32 %v14294_v35, %v14293_v36  ;;  %v14381_v2 = vadd.f32 %v14380_v44, %v14379_v27  ;;  %v14296_v56 = vpop.f32.mrb[166].mxu0  ;;  %v17422_v35 = vld [vmem:[#allocation9] sm:$0xff]  }
 0x2df   : > { %14650 = vmatpush3.bf16.msra.mxu1 %v17423_v6  ;;  %5287 = vmatmul.mubr.bf16.gmra.mrb[220].mxu0 %v5002_v55  ;;  %v6899_v58 = vshrl.u32 %v6870_v48, 16  ;;  %v6902_v6 = vshll.u32 %v6870_v48, 16  ;;  %v14382_v55 = vpop.f32.mrb[122].mxu1  ;;  %v14297_v40 = vpop.f32.mrb[167].mxu0 }
 0x2e0   : > { %14651 = vmatprep.subr.bf16.mxu1 %v17425_v0  ;;  %15959 = vmatprep.mubr.bf16.mxu0 %v4983_v42  ;;  %v17431_v0 = vld [vmem:[#allocation9 + $0x198] sm:$0xff]   ;;  %v19597_v42 = vmax.f32 %v13382_v21, 0.0  ;;  %v14383_v16 = vpop.f32.mrb[123].mxu1  ;;  %v19601_v48 = vadd.f32 %v14375_v32, %v14295_v46  ;;  %v14298_v36 = vadd.f32 %v14297_v40, %v14296_v56  ;;  %v17435_v32 = vld [vmem:[#allocation9 + $0x1a0] sm:$0xff]   ;;  %v17437_v40 = vld [vmem:[#allocation9 + $0x1e8] sm:$0xff]  }
 0x2e1   : > { %v14384_v27 = vadd.f32 %v14383_v16, %v14382_v55  ;;  %v4989_v16 = vld [vmem:[#allocation3 + $0x70] sm:$0xff]  ;;  %v17426_v56 = vld [vmem:[#allocation9 + $0x8] sm:$0xff]  }
 0x2e2   : > { %16028 = vmatmul.mubr.bf16.gmra.mrb[164].mxu1 %v17788_v33  ;;  %v19599_v33 = vrot.slane %v6899_v58, 7  ;;  %21634 = vst [vmem:[#allocation40_spill] sm:$0xff] %v19601_v48  ;;  %v6860_v44 = vmul.f32 %v18286_v50, %v19597_v42  ;;  %v19608_v21 = vadd.f32 %v14378_v49, %v14298_v36  ;;  %v13383_v55 = vld [vmem:[%s18227_s6 + $0x150] sm:$0xff] }
 0x2e3   : > { %16031 = vmatprep.mubr.bf16.mxu1 %v19416_v59  ;;  %14652 = vmatpush3.bf16.msra.mxu1 %v17427_v22  ;;  %v6839_v59 = vpack.c.bf16 %v19597_v42, %v19595_v18  ;;  %v17424_v22 = vld [vmem:[#allocation9 + $0x48] sm:$0xff]  }
 0x2e4   : > { %14653 = vmatprep.subr.bf16.mxu1 %v17429_v8  ;;  %v6904_v23 = vor.u32 %v6902_v6, %v19599_v33  ;;  %21635 = vst [vmem:[#allocation41_spill] sm:$0xff] %v19608_v21  ;;  %v4986_v8 = vld [vmem:[#allocation3 + $0x58] sm:$0xff]  ;;  %v6871_v6 = vpack.c.bf16 %v6860_v44, %v19595_v18  ;;  %v14299_v46 = vpop.f32.mrb[168].mxu0  ;;  %v14385_v49 = vpop.f32.mrb[124].mxu1 }
 0x2e5   : > { %6847 = vst [vmem:[#allocation2 + $0x230] sm:$0xff] %v6839_v59  ;;  %v14300_v36 = vpop.f32.mrb[169].mxu0  ;;  %v14386_v21 = vpop.f32.mrb[125].mxu1  ;;  %v17428_v59 = vld [vmem:[#allocation9 + $0x50] sm:$0xff]  }
 0x2e6   : > { %v6905_v58 = vsel %vm587_vm5, %v19573_v52, %v6904_v23  ;;  %v14301_v48 = vadd.f32 %v14300_v36, %v14299_v46  ;;  %v14387_v52 = vadd.f32 %v14386_v21, %v14385_v49  ;;  %v14302_v23 = vpop.f32.mrb[170].mxu0  ;;  %v14388_v44 = vpop.f32.mrb[126].mxu1  ;;  %v17430_v46 = vld [vmem:[#allocation9 + $0x10] sm:$0xff]  }
 0x2e7   : > { %14654 = vmatpush3.bf16.msra.mxu1 %v17431_v0  ;;  %15960 = vmatmul.mubr.bf16.vlgmr.msra.gmra.mrb[176].mxu0 %v4986_v8  ;;  %6952 = vst [vmem:[#allocation2 + $0x210] sm:$0xff] %v6905_v58  ;;  %v13384_v0 = vld [vmem:[%s18227_s6 + $0x158] sm:$0xff]  ;;  %v6910_v8 = vshll.u32 %v6871_v6, 16  ;;  %v14303_v37 = vpop.f32.mrb[171].mxu0  ;;  %v14389_v3 = vpop.f32.mrb[127].mxu1 }
 0x2e8   : > { %14655 = vmatprep.subr.bf16.mxu1 %v17433_v61  ;;  %15963 = vmatprep.mubr.bf16.mxu0 %v4989_v16  ;;  %v6907_v61 = vshrl.u32 %v6871_v6, 16  ;;  %v19617_v16 = vmax.f32 %v13383_v55, 0.0  ;;  %v19619_v58 = vmax.f32 %v13384_v0, 0.0  ;;  %v14304_v21 = vadd.f32 %v14303_v37, %v14302_v23  ;;  %v4992_v0 = vld [vmem:[#allocation3 + $0x88] sm:$0xff]  ;;  %v17434_v37 = vld [vmem:[#allocation9 + $0x18] sm:$0xff]  }
 0x2e9   : > { %14568 = vmatpush3.bf16.msra.mxu0 %v17422_v35  ;;  %v17439_v35 = vld [vmem:[#allocation9 + $0x1a8] sm:$0xff]   ;;  %v14390_v6 = vadd.f32 %v14389_v3, %v14388_v44  ;;  %v4995_v3 = vld [vmem:[#allocation3 + $0xa0] sm:$0xff] }
 0x2ea   : > { %14569 = vmatprep.subr.bf16.mxu0 %v17424_v22  ;;  %16032 = vmatmul.mubr.bf16.gmra.mrb[168].mxu1 %v19426_v60  ;;  %v17441_v22 = vld [vmem:[#allocation9 + $0x1f0] sm:$0xff]   ;;  %v19621_v28 = vrot.slane %v6907_v61, 7  ;;  %v19623_v60 = vadd.f32 %v14381_v2, %v14301_v48  ;;  %v6862_v55 = vmul.f32 %v21616_v47, %v19619_v58  ;;  %v17445_v48 = vld [vmem:[#allocation9 + $0x1f8] sm:$0xff]   ;;  %v13385_v61 = vld [vmem:[%s18227_s6 + $0x160] sm:$0xff] }
 0x2eb   : > { %16035 = vmatprep.mubr.bf16.mxu1 %v19471_v45  ;;  %14656 = vmatpush3.bf16.msra.mxu1 %v17435_v32  ;;  %v6840_v45 = vpack.c.bf16 %v19619_v58, %v19617_v16  ;;  %v17432_v32 = vld [vmem:[#allocation9 + $0x58] sm:$0xff]   ;;  %v17443_v2 = vld [vmem:[#allocation9 + $0x1b0] sm:$0xff]   ;;  %v17436_v44 = vld [vmem:[#allocation9 + $0x60] sm:$0xff]  }
 0x2ec   : > { %14657 = vmatprep.subr.bf16.mxu1 %v17437_v40  ;;  %21636 = vst [vmem:[#allocation42_spill] sm:$0xff] %v19623_v60  ;;  %v6912_v49 = vor.u32 %v6910_v8, %v19621_v28  ;;  %v19630_v40 = vadd.f32 %v14384_v27, %v14304_v21  ;;  %v6872_v36 = vpack.c.bf16 %v6862_v55, %v19617_v16  ;;  %v14305_v27 = vpop.f32.mrb[172].mxu0  ;;  %v13386_v8 = vld [vmem:[%s18227_s6 + $0x168] sm:$0xff]  ;;  %v19638_v21 = vmax.f32 %v13385_v61, 0.0  ;;  %v17438_v61 = vld [vmem:[#allocation9 + $0x20] sm:$0xff]  }
 0x2ed   : > { %14570 = vmatpush3.bf16.msra.mxu0 %v17426_v56  ;;  %6848 = vst [vmem:[#allocation2 + $0x248] sm:$0xff] %v6840_v45  ;;  %v14306_v23 = vpop.f32.mrb[173].mxu0  ;;  %v19640_v45 = vmax.f32 %v13386_v8, 0.0  ;;  %v4998_v8 = vld [vmem:[#allocation3 + $0xb8] sm:$0xff]  ;;  %v17485_v60 = vld [vmem:[#allocation7 + $0x28] sm:$0xff]  }
 0x2ee   : > { %14571 = vmatprep.subr.bf16.mxu0 %v17428_v59  ;;  %21637 = vst [vmem:[#allocation43_spill] sm:$0xff] %v19630_v40  ;;  %v6913_v56 = vsel %vm587_vm5, %v19599_v33, %v6912_v49  ;;  %v6278_v59 = vld [vmem:[#allocation3 + $0xf8] sm:$0xff]  ;;  %v14307_v33 = vadd.f32 %v14306_v23, %v14305_v27  ;;  %v14308_v49 = vpop.f32.mrb[174].mxu0  ;;  %v17440_v27 = vld [vmem:[#allocation9 + $0x68] sm:$0xff]   ;;  %v5001_v23 = vld [vmem:[#allocation3 + $0xd0] sm:$0xff] }
 0x2ef   : > { %14658 = vmatpush3.bf16.msra.mxu1 %v17439_v35  ;;  %15964 = vmatmul.mubr.bf16.gmra.mrb[180].mxu0 %v4992_v0  ;;  %6953 = vst [vmem:[#allocation2 + $0x228] sm:$0xff] %v6913_v56  ;;  %v6915_v35 = vshrl.u32 %v6872_v36, 16  ;;  %v14309_v55 = vpop.f32.mrb[175].mxu0  ;;  %v17449_v0 = vld [vmem:[#allocation9 + $0x200] sm:$0xff]   ;;  %v19854_v40 = vld [vmem:[#allocation2 + $0x1c8] sm:$0xff] }
 0x2f0   : > { %14659 = vmatprep.subr.bf16.mxu1 %v17441_v22  ;;  %15967 = vmatprep.mubr.bf16.mxu0 %v4995_v3  ;;  %v6918_v22 = vshll.u32 %v6872_v36, 16  ;;  %v19646_v56 = vadd.f32 %v14387_v52, %v14307_v33  ;;  %v14310_v36 = vadd.f32 %v14309_v55, %v14308_v49  ;;  %v6281_v49 = vld [vmem:[#allocation3 + $0x110] sm:$0xff] }
 0x2f1   : > { %14572 = vmatpush3.bf16.msra.mxu0 %v17430_v46  ;;  %v17447_v46 = vld [vmem:[#allocation9 + $0x1b8] sm:$0xff]   ;;  %v6917_v3 = vrot.slane %v6915_v35, 7  ;;  %v17451_v35 = vld [vmem:[#allocation9 + $0x208] sm:$0xff]  }
 0x2f2   : > { %14573 = vmatprep.subr.bf16.mxu0 %v17432_v32  ;;  %16036 = vmatmul.mubr.bf16.gmra.mrb[172].mxu1 %v19475_v15  ;;  %v6841_v32 = vpack.c.bf16 %v19640_v45, %v19638_v21  ;;  %v6864_v15 = vmul.f32 %v21618_v24, %v19640_v45  ;;  %21638 = vst [vmem:[#allocation44_spill] sm:$0xff] %v19646_v56  ;;  %v17462_v56 = vld [vmem:[#allocation9 + $0x230] sm:$0xff]  }
 0x2f3   : > { %14660 = vmatpush3.bf16.msra.mxu1 %v17443_v2  ;;  %6525 = vmatprep.mubr.bf16.mxu1 %v6278_v59  ;;  %v6920_v2 = vor.u32 %v6918_v22, %v6917_v3  ;;  %v6277_v22 = vld [vmem:[#allocation3 + $0xf0] sm:$0xff] }
 0x2f4   : > { %14661 = vmatprep.subr.bf16.mxu1 %v17445_v48  ;;  %6849 = vst [vmem:[#allocation2 + $0x260] sm:$0xff] %v6841_v32  ;;  %v6873_v59 = vpack.c.bf16 %v6864_v15, %v19638_v21  ;;  %v19649_v48 = vadd.f32 %v14390_v6, %v14310_v36  ;;  %v17444_v6 = vld [vmem:[#allocation9 + $0x70] sm:$0xff]   ;;  %v17448_v15 = vld [vmem:[#allocation9 + $0x78] sm:$0xff]  }
 0x2f5   : > { %14574 = vmatpush3.bf16.msra.mxu0 %v17434_v37  ;;  %v19653_v52 = vsel %vm587_vm5, %v19621_v28, %v6920_v2  ;;  %v17452_v28 = vld [vmem:[#allocation9 + $0x210] sm:$0xff]  }
 0x2f6   : > { %14575 = vmatprep.subr.bf16.mxu0 %v17436_v44  ;;  %21639 = vst [vmem:[#allocation45_spill] sm:$0xff] %v19649_v48  ;;  %v6923_v37 = vshrl.u32 %v6873_v59, 16  ;;  %v6926_v33 = vshll.u32 %v6873_v59, 16  ;;  %v17442_v44 = vld [vmem:[#allocation9 + $0x28] sm:$0xff]   ;;  %6954 = vst [vmem:[#allocation2 + $0x240] sm:$0xff] %v19653_v52  ;;  %v17446_v32 = vld [vmem:[#allocation9 + $0x30] sm:$0xff]  }
 0x2f7   : > { %14662 = vmatpush3.bf16.msra.mxu1 %v17447_v46  ;;  %15968 = vmatmul.mubr.bf16.gmra.mrb[184].mxu0 %v4998_v8  ;;  %v13387_v2 = vld [vmem:[%s18227_s6 + $0x170] sm:$0xff]  ;;  %v13388_v59 = vld [vmem:[%s18227_s6 + $0x178] sm:$0xff] }
 0x2f8   : > { %16039 = vmatprep.subr.bf16.mxu1 %v17449_v0  ;;  %15971 = vmatprep.mubr.bf16.mxu0 %v5001_v23  ;;  %v19656_v46 = vrot.slane %v6923_v37, 7  ;;  %v19664_v8 = vmax.f32 %v13387_v2, 0.0  ;;  %v19666_v23 = vmax.f32 %v13388_v59, 0.0  ;;  %v17450_v37 = vld [vmem:[#allocation9 + $0x38] sm:$0xff]   ;;  %v17459_v59 = vld [vmem:[#allocation9 + $0x228] sm:$0xff]  }
 0x2f9   : > { %14576 = vmatpush3.bf16.msra.mxu0 %v17438_v61  ;;  %v5004_v61 = vld [vmem:[#allocation3 + $0xe8] sm:$0xff]  ;;  %v6762_v2 = vld [vmem:[#allocation2 + $0x1d8] sm:$0x1] }
 0x2fa   : > { %14577 = vmatprep.subr.bf16.mxu0 %v17440_v27  ;;  %6526 = vmatmul.mubr.bf16.vlgmr.msra.gmra.mrb[176].mxu1 %v6277_v22  ;;  %v6928_v55 = vor.u32 %v6926_v33, %v19656_v46  ;;  %v6964_v27 = vmul.f32 %v18278_v41, %v19553_v10  ;;  %v17454_v33 = vld [vmem:[#allocation7 + $0x100] sm:$0xff]   ;;  %v19671_v10 = vpack.c.bf16 %v19666_v23, %v19664_v8  ;;  %v21640_v22 = vld [vmem:[#allocation16_spill] sm:$0xff] }
 0x2fb   : > { %6533 = vmatprep.mubr.bf16.mxu1 %v6281_v49  ;;  %16040 = vmatpush3.bf16.msra.mxu1 %v17449_v0  ;;  %v17453_v0 = vld [vmem:[#allocation9 + $0x218] sm:$0xff]   ;;  %v17456_v49 = vld [vmem:[#allocation9 + $0x220] sm:$0xff]  }
 0x2fc   : > { %16041 = vmatprep.subr.bf16.mxu1 %v17451_v35  ;;  %v6929_v36 = vsel %vm587_vm5, %v6917_v3, %v6928_v55  ;;  %v6280_v3 = vld [vmem:[#allocation3 + $0x108] sm:$0xff]  ;;  %6850 = vst [vmem:[#allocation2 + $0x278] sm:$0xff] %v19671_v10 }
 0x2fd   : > { %14578 = vmatpush3.bf16.msra.mxu0 %v17442_v44  ;;  %6955 = vst [vmem:[#allocation2 + $0x258] sm:$0xff] %v6929_v36  ;;  %v6866_v44 = vmul.f32 %v21624_v26, %v19666_v23 }
 0x2fe   : > { %14579 = vmatprep.subr.bf16.mxu0 %v17444_v6  ;;  %v6962_v6 = vmul.f32 %v21640_v22, %v19527_v38  ;;  %v21641_v38 = vld [vmem:[#allocation25_spill] sm:$0xff] }
 0x2ff   : > { %16042 = vmatpush3.bf16.msra.mxu1 %v17451_v35  ;;  %15972 = vmatmul.mubr.bf16.gmra.mrb[188].mxu0 %v5004_v61  ;;  %v6284_v35 = vld [vmem:[#allocation3 + $0x128] sm:$0xff]  ;;  %v6874_v55 = vpack.c.bf16 %v6866_v44, %v19664_v8  ;;  %v6968_v44 = vmul.f32 %v18527_v14, %v19595_v18 }
 0x300   : > { %16043 = vmatprep.subr.bf16.mxu1 %v17452_v28  ;;  %6115 = vmatprep.mubr.bf16.mxu0 %v19546_v31  ;;  %v19678_v31 = vpack.c.bf16 %v19555_v20, %v6964_v27  ;;  %v6960_v20 = vmul.f32 %v21641_v38, %v19509_v9  ;;  %v6977_v27 = vpack.c.bf16 %v19532_v34, %v6962_v6  ;;  %v6287_v6 = vld [vmem:[#allocation3 + $0x140] sm:$0xff] }
 0x301   : > { %14580 = vmatpush3.bf16.msra.mxu0 %v17446_v32  ;;  %v17455_v32 = vld [vmem:[#allocation7 + $0xc0] sm:$0xff]   ;;  %v6931_v36 = vshrl.u32 %v6874_v55, 16  ;;  %v6934_v61 = vshll.u32 %v6874_v55, 16  ;;  %v17460_v55 = vld [vmem:[#allocation7 + $0x110] sm:$0xff]  }
 0x302   : > { %14581 = vmatprep.subr.bf16.mxu0 %v17448_v15  ;;  %6534 = vmatmul.mubr.bf16.gmra.mrb[180].mxu1 %v6280_v3  ;;  %v17457_v15 = vld [vmem:[#allocation7 + $0x108] sm:$0xff]   ;;  %v6976_v9 = vpack.c.bf16 %v19511_v12, %v6960_v20  ;;  %v6992_v34 = vshll.u32 %v6977_v27, 16  ;;  %v17461_v12 = vld [vmem:[#allocation7 + $0xd0] sm:$0xff]   ;;  %v19700_v20 = vpack.c.bf16 %v19597_v42, %v6968_v44  ;;  %v17790_v42 = vld [vmem:[#allocation3 + $0xd8] sm:$0xff] }
 0x303   : > { %6541 = vmatprep.mubr.bf16.mxu1 %v6284_v35  ;;  %16044 = vmatpush3.bf16.msra.mxu1 %v17452_v28  ;;  %v7000_v28 = vshll.u32 %v19678_v31, 16  ;;  %v19687_v3 = vrot.slane %v6931_v36, 7  ;;  %v17789_v35 = vld [vmem:[#allocation3 + $0xe0] sm:$0xff]  ;;  %v6286_v44 = vld [vmem:[#allocation3 + $0x138] sm:$0xff] }
 0x304   : > { %16045 = vmatprep.subr.bf16.mxu1 %v17453_v0  ;;  %v6994_v48 = vrot.slane %v6992_v34, 1  ;;  %v6972_v34 = vmul.f32 %v21617_v5, %v19638_v21  ;;  %v6974_v21 = vmul.f32 %v21619_v53, %v19664_v8  ;;  %v7020_v8 = vshrl.u32 %v19700_v20, 16 }
 0x305   : > { %14582 = vmatpush3.bf16.msra.mxu0 %v17450_v37  ;;  %v6763_v37 = vsel %vm18291_vm9, 0, %v6762_v2  ;;  %v6936_v36 = vor.u32 %v6934_v61, %v19687_v3  ;;  %v7002_v2 = vrot.slane %v7000_v28, 1  ;;  %v17463_v61 = vld [vmem:[#allocation7 + $0x118] sm:$0xff]  }
 0x306   : > { %14727 = vmatprep.subr.bf16.mxu0 %v17454_v33  ;;  %v17458_v33 = vld [vmem:[#allocation7 + $0xc8] sm:$0xff]   ;;  %6764 = vst [vmem:[#allocation2 + $0x1d8] sm:$0x1] %v6763_v37  ;;  %v7004_v37 = vshrl.u32 %v19678_v31, 16 }
 0x307   : > { %16046 = vmatpush3.bf16.msra.mxu1 %v17453_v0  ;;  %v6283_v0 = vld [vmem:[#allocation3 + $0x120] sm:$0xff]  ;;  %v19697_v18 = vsel %vm587_vm5, %v19656_v46, %v6936_v36  ;;  %v6966_v46 = vmul.f32 %v18509_v30, %v19577_v4 }
 0x308   : > { %6116 = vmatmul.mubr.bf16.vlgmr.msra.gmra.mrb[224].mxu0 %v19565_v17  ;;  %16047 = vmatprep.subr.bf16.mxu1 %v17456_v49  ;;  %v6996_v17 = vshrl.u32 %v6977_v27, 16  ;;  %6956 = vst [vmem:[#allocation2 + $0x270] sm:$0xff] %v19697_v18 }
 0x309   : > { %6123 = vmatprep.mubr.bf16.mxu0 %v17789_v35  ;;  %14728 = vmatpush3.bf16.msra.mxu0 %v17455_v32  ;;  %v6985_v35 = vshll.u32 %v6976_v9, 16  ;;  %v6988_v32 = vshrl.u32 %v6976_v9, 16  ;;  %v7016_v9 = vshll.u32 %v19700_v20, 16  ;;  %v6979_v31 = vpack.c.bf16 %v19579_v63, %v6966_v46  ;;  %v6293_v20 = vld [vmem:[#allocation3 + $0x170] sm:$0xff] }
 0x30a   : > { %6542 = vmatmul.mubr.bf16.gmra.mrb[184].mxu1 %v6283_v0  ;;  %14729 = vmatprep.subr.bf16.mxu0 %v17457_v15  ;;  %v17467_v0 = vld [vmem:[#allocation9 + $0x238] sm:$0xff]   ;;  %v6982_v63 = vpack.c.bf16 %v19640_v45, %v6972_v34  ;;  %v6970_v46 = vmul.f32 %v21615_v7, %v19617_v16 }
 0x30b   : > { %6549 = vmatprep.mubr.bf16.mxu1 %v6287_v6  ;;  %16048 = vmatpush3.bf16.msra.mxu1 %v17456_v49  ;;  %v19703_v15 = vrot.slane %v6985_v35, 1  ;;  %v6998_v49 = vor.u32 %v6996_v17, %v6994_v48  ;;  %v6290_v17 = vld [vmem:[#allocation3 + $0x158] sm:$0xff]  ;;  %v17465_v6 = vld [vmem:[#allocation7 + $0x120] sm:$0xff]   ;;  %v7008_v36 = vshll.u32 %v6979_v31, 16  ;;  %v7012_v35 = vshrl.u32 %v6979_v31, 16 }
 0x30c   : > { %16049 = vmatprep.subr.bf16.mxu1 %v17459_v59  ;;  %v6981_v16 = vpack.c.bf16 %v19619_v58, %v6970_v46 }
 0x30d   : > { %14730 = vmatpush3.bf16.msra.mxu0 %v17458_v33  ;;  %v6990_v28 = vor.u32 %v6988_v32, %v19703_v15  ;;  %v19707_v27 = vsel %vm821_vm3, %v6998_v49, %v7002_v2  ;;  %v17791_v33 = vld [vmem:[#allocation3 + $0xf8] sm:$0xff]  ;;  %v17473_v32 = vld [vmem:[#allocation7 + $0x40] sm:$0xff]   ;;  %v7010_v49 = vrot.slane %v7008_v36, 1 }
 0x30e   : > { %14731 = vmatprep.subr.bf16.mxu0 %v17460_v55  ;;  %7060 = vst [vmem:[#allocation2 + $0x1f0] sm:$0xff] %v19707_v27  ;;  %v7006_v55 = vor.u32 %v7004_v37, %v7002_v2  ;;  %v17792_v37 = vld [vmem:[#allocation3 + $0xf0] sm:$0xff]  ;;  %v13389_v36 = vld [vmem:[%s18227_s6 + $0x180] sm:$0xff] }
 0x30f   : > { %16050 = vmatpush3.bf16.msra.mxu1 %v17459_v59  ;;  %v17464_v59 = vld [vmem:[#allocation7 + $0xd8] sm:$0xff]   ;;  %v19717_v4 = vsel %vm821_vm3, %v6990_v28, %v6994_v48  ;;  %v17466_v48 = vld [vmem:[#allocation7 + $0xe0] sm:$0xff]   ;;  %v6983_v28 = vpack.c.bf16 %v19666_v23, %v6974_v21  ;;  %v7014_v2 = vor.u32 %v7012_v35, %v7010_v49  ;;  %v17469_v23 = vld [vmem:[#allocation7 + $0xe8] sm:$0xff]   ;;  %v7086_v58 = vmax.f32 %v13389_v36, 0.0 }
 0x310   : > { %6124 = vmatmul.mubr.bf16.gmra.mrb[228].mxu0 %v17790_v42  ;;  %16051 = vmatprep.subr.bf16.mxu1 %v17462_v56  ;;  %7059 = vst [vmem:[#allocation2 + $0x1d8] sm:$0xff] %v19717_v4  ;;  %v17793_v42 = vld [vmem:[#allocation3 + $0x110] sm:$0xff] }
 0x311   : > { %6131 = vmatprep.mubr.bf16.mxu0 %v17791_v33  ;;  %14732 = vmatpush3.bf16.msra.mxu0 %v17461_v12  ;;  %v7018_v12 = vrot.slane %v7016_v9, 1  ;;  %v7040_v45 = vshll.u32 %v6983_v28, 16  ;;  %v6289_v33 = vld [vmem:[#allocation3 + $0x150] sm:$0xff]  ;;  %v7044_v34 = vshrl.u32 %v6983_v28, 16  ;;  %v7036_v28 = vshrl.u32 %v6982_v63, 16 }
 0x312   : > { %6550 = vmatmul.mubr.bf16.gmra.mrb[188].mxu1 %v6286_v44  ;;  %14733 = vmatprep.subr.bf16.mxu0 %v17463_v61  ;;  %v17468_v61 = vld [vmem:[#allocation7 + $0x128] sm:$0xff]   ;;  %v17471_v35 = vld [vmem:[#allocation7 + $0xf0] sm:$0xff]  }
 0x313   : > { %6557 = vmatprep.mubr.bf16.mxu1 %v6290_v17  ;;  %16052 = vmatpush3.bf16.msra.mxu1 %v17462_v56  ;;  %v19726_v56 = vsel %vm821_vm3, %v7006_v55, %v7010_v49  ;;  %v19733_v44 = vsel %vm821_vm3, %v7014_v2, %v7018_v12  ;;  %v7042_v9 = vrot.slane %v7040_v45, 1  ;;  %v7022_v31 = vor.u32 %v7020_v8, %v7018_v12  ;;  %v7066_v49 = vld [vmem:[#allocation2 + $0x280] sm:$0xff]  ;;  %v17794_v8 = vld [vmem:[#allocation3 + $0x108] sm:$0xff] }
 0x314   : > { %16053 = vmatprep.subr.bf16.mxu1 %v17467_v0  ;;  %7061 = vst [vmem:[#allocation2 + $0x208] sm:$0xff] %v19726_v56  ;;  %7062 = vst [vmem:[#allocation2 + $0x220] sm:$0xff] %v19733_v44  ;;  %v7024_v17 = vshll.u32 %v6981_v16, 16  ;;  %v7227_v45 = vmul.f32 %v21641_v38, %v7086_v58  ;;  %v17493_v38 = vld [vmem:[#allocation7 + $0x148] sm:$0xff]  }
 0x315   : > { %14734 = vmatpush3.bf16.msra.mxu0 %v17464_v59  ;;  %v17470_v59 = vld [vmem:[#allocation7 + $0x130] sm:$0xff]   ;;  %v7046_v55 = vor.u32 %v7044_v34, %v7042_v9 }
 0x316   : > { %14735 = vmatprep.subr.bf16.mxu0 %v17465_v6  ;;  %v7028_v6 = vshrl.u32 %v6981_v16, 16  ;;  %v7026_v21 = vrot.slane %v7024_v17, 1  ;;  %v6957_v16 = vld [vmem:[#allocation2 + $0x288] sm:$0x1] }
 0x317   : > { %16054 = vmatpush3.bf16.msra.mxu1 %v17467_v0  ;;  %v7032_v0 = vshll.u32 %v6982_v63, 16  ;;  %v7067_v12 = vsel %vm18585_vm12, %v7046_v55, %v7066_v49  ;;  %v7056_v49 = vld [vmem:[#allocation2 + $0x1c0] sm:$0x80] }
 0x318   : > { %6132 = vmatmul.mubr.bf16.gmra.mrb[232].mxu0 %v17792_v37  ;;  %14807 = vmatprep.subr.bf16.mxu1 %v17473_v32  ;;  %v19740_v2 = vsel %vm821_vm3, %v7022_v31, %v7026_v21  ;;  %v7030_v46 = vor.u32 %v7028_v6, %v7026_v21  ;;  %7068 = vst [vmem:[#allocation2 + $0x280] sm:$0xff] %v7067_v12 }
 0x319   : > { %6139 = vmatprep.mubr.bf16.mxu0 %v17793_v42  ;;  %14736 = vmatpush3.bf16.msra.mxu0 %v17466_v48  ;;  %v7034_v32 = vrot.slane %v7032_v0, 1  ;;  %v17472_v48 = vld [vmem:[#allocation7 + $0x138] sm:$0xff]   ;;  %7063 = vst [vmem:[#allocation2 + $0x238] sm:$0xff] %v19740_v2  ;;  %v17795_v42 = vld [vmem:[#allocation3 + $0x128] sm:$0xff]  ;;  %v6958_v31 = vsel %vm18291_vm9, %v19687_v3, %v6957_v16  ;;  %v7057_v12 = vsel %vm18469_vm6, %v19703_v15, %v7056_v49 }
 0x31a   : > { %6558 = vmatmul.mubr.bf16.gmra.mrb[192].mxu1 %v6289_v33  ;;  %14737 = vmatprep.subr.bf16.mxu0 %v17468_v61  ;;  %v13390_v61 = vld [vmem:[%s18227_s6 + $0x188] sm:$0xff]  ;;  %6959 = vst [vmem:[#allocation2 + $0x288] sm:$0x1] %v6958_v31  ;;  %7058 = vst [vmem:[#allocation2 + $0x1c0] sm:$0x80] %v7057_v12  ;;  %v6298_v49 = vld [vmem:[#allocation3 + $0x198] sm:$0xff] }
 0x31b   : > { %6565 = vmatprep.mubr.bf16.mxu1 %v6293_v20  ;;  %v7087_v37 = vmax.f32 %v13390_v61, 0.0  ;;  %v6292_v33 = vld [vmem:[#allocation3 + $0x168] sm:$0xff]  ;;  %v19747_v0 = vsel %vm821_vm3, %v7030_v46, %v7034_v32  ;;  %v7038_v63 = vor.u32 %v7036_v28, %v7034_v32  ;;  %v17796_v46 = vld [vmem:[#allocation3 + $0x120] sm:$0xff] }
 0x31c   : > { %21642 = vst [vmem:[#allocation46_spill] sm:$0xff] %v19747_v0  ;;  %v6296_v20 = vld [vmem:[#allocation3 + $0x188] sm:$0xff]  ;;  %7064 = vst [vmem:[#allocation2 + $0x250] sm:$0xff] %v19747_v0  ;;  %v19922_v0 = vld [vmem:[#allocation2 + $0x218] sm:$0xff] }
 0x31d   : > { %14738 = vmatpush3.bf16.msra.mxu0 %v17469_v23  ;;  %v17474_v23 = vld [vmem:[#allocation7 + $0xf8] sm:$0xff]   ;;  %v19752_v34 = vpack.c.bf16 %v7087_v37, %v7227_v45  ;;  %v7119_v17 = vmul.f32 %v18260_v25, %v7087_v37  ;;  %v19759_v6 = vsel %vm821_vm3, %v7038_v63, %v7042_v9  ;;  %v19761_v55 = vpack.c.bf16 %v7087_v37, %v7086_v58  ;;  %v17797_v37 = vld [vmem:[#allocation3 + $0x140] sm:$0xff]  ;;  %v19783_v16 = vld [vmem:[#allocation2 + $0x8] sm:$0xff] }
 0x31e   : > { %14739 = vmatprep.subr.bf16.mxu0 %v17470_v59  ;;  %v19749_v59 = vld [vmem:[#allocation7 + $0x140] sm:$0xff]   ;;  %21643 = vst [vmem:[#allocation47_spill] sm:$0xff] %v19759_v6  ;;  %7065 = vst [vmem:[#allocation2 + $0x268] sm:$0xff] %v19759_v6  ;;  %v13392_v9 = vld [vmem:[%s18227_s6 + $0x198] sm:$0xff] }
 0x31f   : > { %v7252_v36 = vshll.u32 %v19752_v34, 16  ;;  %7110 = vst [vmem:[#allocation2 + $0x290] sm:$0xff] %v19761_v55  ;;  %v19770_v61 = vmax.f32 %v13392_v9, 0.0  ;;  %v6295_v45 = vld [vmem:[#allocation3 + $0x180] sm:$0xff]  ;;  %v17799_v9 = vld [vmem:[#allocation3 + $0x138] sm:$0xff]  ;;  %v13403_v6 = vld [vmem:[%s18227_s6 + $0x1f0] sm:$0xff] }
 0x320   : > { %6140 = vmatmul.mubr.bf16.gmra.mrb[236].mxu0 %v17794_v8  ;;  %v13391_v8 = vld [vmem:[%s18227_s6 + $0x190] sm:$0xff] }
 0x321   : > { %6147 = vmatprep.mubr.bf16.mxu0 %v17795_v42  ;;  %14740 = vmatpush3.bf16.msra.mxu0 %v17471_v35  ;;  %v7134_v35 = vpack.c.bf16 %v7119_v17, %v7086_v58  ;;  %v19767_v3 = vrot.slane %v7252_v36, 1  ;;  %v19779_v42 = vmax.f32 %v13391_v8, 0.0  ;;  %v7214_v63 = vld [vmem:[#allocation2 + $0x288] sm:$0xff]  ;;  %v6279_v8 = vld [vmem:[#allocation3 + $0x100] sm:$0xff] }
 0x322   : > { %6566 = vmatmul.mubr.bf16.gmra.mrb[196].mxu1 %v6292_v33  ;;  %14741 = vmatprep.subr.bf16.mxu0 %v17472_v48  ;;  %v7323_v48 = vld [vmem:[#allocation2 + $0x280] sm:$0x80]  ;;  %v7121_v33 = vmul.f32 %v21627_v11, %v19770_v61 }
 0x323   : > { %6573 = vmatprep.mubr.bf16.mxu1 %v6296_v20  ;;  %v7143_v32 = vshrl.u32 %v7134_v35, 16  ;;  %v7146_v21 = vshll.u32 %v7134_v35, 16  ;;  %v7324_v58 = vsel %vm18469_vm6, %v19767_v3, %v7323_v48  ;;  %v19788_v15 = vpack.c.bf16 %v19770_v61, %v19779_v42  ;;  %v13394_v35 = vld [vmem:[%s18227_s6 + $0x1a8] sm:$0xff]  ;;  %v17800_v48 = vld [vmem:[#allocation3 + $0x158] sm:$0xff] }
 0x324   : > { %7325 = vst [vmem:[#allocation2 + $0x280] sm:$0x80] %v7324_v58  ;;  %v7135_v20 = vpack.c.bf16 %v7121_v33, %v19779_v42  ;;  %v13393_v58 = vld [vmem:[%s18227_s6 + $0x1a0] sm:$0xff] }
 0x325   : > { %14742 = vmatpush3.bf16.msra.mxu0 %v17474_v23  ;;  %v7145_v28 = vrot.slane %v7143_v32, 7  ;;  %21644 = vst [vmem:[#allocation48_spill] sm:$0xff] %v19788_v15  ;;  %7111 = vst [vmem:[#allocation2 + $0x2a8] sm:$0xff] %v19788_v15  ;;  %v19888_v15 = vld [vmem:[#allocation2 + $0x200] sm:$0xff] }
 0x326   : > { %16071 = vmatprep.subr.bf16.mxu0 %v19749_v59  ;;  %v7150_v17 = vshrl.u32 %v7135_v20, 16  ;;  %v7153_v36 = vshll.u32 %v7135_v20, 16 }
 0x327   : > { %v7148_v23 = vor.u32 %v7146_v21, %v7145_v28  ;;  %v19798_v21 = vmax.f32 %v13394_v35, 0.0 }
 0x328   : > { %6148 = vmatmul.mubr.bf16.gmra.mrb[240].mxu0 %v17796_v46  ;;  %v7152_v32 = vrot.slane %v7150_v17, 7  ;;  %v13396_v17 = vld [vmem:[%s18227_s6 + $0x1b8] sm:$0xff] }
 0x329   : > { %6155 = vmatprep.mubr.bf16.mxu0 %v17797_v37  ;;  %v19793_v31 = vsel %vm18365_vm0, %v7148_v23, %v7214_v63  ;;  %v7123_v12 = vmul.f32 %v18275_v39, %v19798_v21  ;;  %v19803_v37 = vmax.f32 %v13393_v58, 0.0  ;;  %v19816_v35 = vmax.f32 %v13396_v17, 0.0  ;;  %v6282_v58 = vld [vmem:[#allocation3 + $0x118] sm:$0xff]  ;;  %v17477_v17 = vld [vmem:[#allocation7 + $0x8] sm:$0xff]  }
 0x32a   : > { %6574 = vmatmul.mubr.bf16.gmra.mrb[200].mxu1 %v6295_v45  ;;  %21645 = vst [vmem:[#allocation49_spill] sm:$0xff] %v19793_v31  ;;  %7216 = vst [vmem:[#allocation2 + $0x288] sm:$0xff] %v19793_v31  ;;  %v7155_v46 = vor.u32 %v7153_v36, %v7152_v32  ;;  %v17475_v36 = vld [vmem:[#allocation7] sm:$0xff]  }
 0x32b   : > { %6581 = vmatprep.mubr.bf16.mxu1 %v19783_v16  ;;  %v19811_v33 = vpack.c.bf16 %v19798_v21, %v19803_v37  ;;  %v7136_v23 = vpack.c.bf16 %v7123_v12, %v19803_v37  ;;  %v7125_v12 = vmul.f32 %v18281_v43, %v19816_v35  ;;  %v17479_v43 = vld [vmem:[#allocation7 + $0x10] sm:$0xff]  }
 0x32c   : > { %v19806_v45 = vsel %vm587_vm5, %v7145_v28, %v7155_v46  ;;  %v17476_v28 = vld [vmem:[#allocation7 + $0x48] sm:$0xff]   ;;  %v17802_v46 = vld [vmem:[#allocation3 + $0x170] sm:$0xff] }
 0x32d   : > { %21646 = vst [vmem:[#allocation50_spill] sm:$0xff] %v19806_v45  ;;  %7217 = vst [vmem:[#allocation2 + $0x2a0] sm:$0xff] %v19806_v45  ;;  %v7158_v63 = vshrl.u32 %v7136_v23, 16  ;;  %v7161_v20 = vshll.u32 %v7136_v23, 16  ;;  %v6285_v23 = vld [vmem:[#allocation3 + $0x130] sm:$0xff]  ;;  %v13401_v45 = vld [vmem:[%s18227_s6 + $0x1e0] sm:$0xff] }
 0x32e   : > { %21647 = vst [vmem:[#allocation51_spill] sm:$0xff] %v19811_v33  ;;  %7112 = vst [vmem:[#allocation2 + $0x2c0] sm:$0xff] %v19811_v33 }
 0x330   : > { %6156 = vmatmul.mubr.bf16.gmra.mrb[244].mxu0 %v17799_v9  ;;  %v17801_v9 = vld [vmem:[#allocation3 + $0x150] sm:$0xff] }
 0x331   : > { %6163 = vmatprep.mubr.bf16.mxu0 %v17800_v48  ;;  %v7160_v48 = vrot.slane %v7158_v63, 7  ;;  %v17478_v63 = vld [vmem:[#allocation7 + $0x50] sm:$0xff]  }
 0x332   : > { %6582 = vmatmul.mubr.bf16.gmra.mrb[204].mxu1 %v6298_v49  ;;  %v13395_v49 = vld [vmem:[%s18227_s6 + $0x1b0] sm:$0xff] }
 0x333   : > { %16055 = vmatprep.mubr.bf16.mxu1 %v6279_v8  ;;  %v19819_v8 = vmax.f32 %v13395_v49, 0.0  ;;  %v7163_v39 = vor.u32 %v7161_v20, %v7160_v48  ;;  %v19829_v20 = vmax.f32 %v13398_v51, 0.0 }
 0x335   : > { %v7127_v51 = vmul.f32 %v18286_v50, %v19829_v20  ;;  %v13400_v50 = vld [vmem:[%s18227_s6 + $0x1d8] sm:$0xff] }
 0x336   : > { %v19852_v29 = vmax.f32 %v13400_v50, 0.0 }
 0x338   : > { %6164 = vmatmul.mubr.bf16.gmra.mrb[248].mxu0 %v17801_v9  ;;  %v7137_v9 = vpack.c.bf16 %v7125_v12, %v19819_v8  ;;  %v17480_v12 = vld [vmem:[#allocation7 + $0x58] sm:$0xff]  }
 0x339   : > { %6171 = vmatprep.mubr.bf16.mxu0 %v17802_v46  ;;  %v19825_v46 = vsel %vm587_vm5, %v7152_v32, %v7163_v39  ;;  %v6288_v39 = vld [vmem:[#allocation3 + $0x148] sm:$0xff]  ;;  %v19837_v32 = vpack.c.bf16 %v19816_v35, %v19819_v8 }
 0x33a   : > { %16056 = vmatmul.mubr.bf16.vlgmr.msra.gmra.mrb[160].mxu1 %v6282_v58  ;;  %21648 = vst [vmem:[#allocation52_spill] sm:$0xff] %v19825_v46  ;;  %7218 = vst [vmem:[#allocation2 + $0x2b8] sm:$0xff] %v19825_v46  ;;  %v7166_v49 = vshrl.u32 %v7137_v9, 16  ;;  %v7169_v25 = vshll.u32 %v7137_v9, 16  ;;  %v6291_v9 = vld [vmem:[#allocation3 + $0x160] sm:$0xff] }
 0x33b   : > { %16059 = vmatprep.mubr.bf16.mxu1 %v6285_v23  ;;  %14808 = vmatpush3.bf16.msra.mxu1 %v17475_v36  ;;  %v17803_v36 = vld [vmem:[#allocation3 + $0x168] sm:$0xff]  ;;  %v13397_v23 = vld [vmem:[%s18227_s6 + $0x1c0] sm:$0xff]  ;;  %21649 = vst [vmem:[#allocation53_spill] sm:$0xff] %v19837_v32  ;;  %7113 = vst [vmem:[#allocation2 + $0x2d8] sm:$0xff] %v19837_v32 }
 0x33c   : > { %14809 = vmatprep.subr.bf16.mxu1 %v17476_v28  ;;  %v7168_v58 = vrot.slane %v7166_v49, 7  ;;  %v19832_v28 = vld [vmem:[#allocation2 + $0x1d0] sm:$0xff]  ;;  %v19839_v49 = vmax.f32 %v13397_v23, 0.0 }
 0x33e   : > { %v7138_v11 = vpack.c.bf16 %v7127_v51, %v19839_v49  ;;  %v6294_v51 = vld [vmem:[#allocation3 + $0x178] sm:$0xff] }
 0x33f   : > { %14810 = vmatpush3.bf16.msra.mxu1 %v17477_v17  ;;  %v7171_v17 = vor.u32 %v7169_v25, %v7168_v58  ;;  %v17482_v25 = vld [vmem:[#allocation7 + $0x60] sm:$0xff]  }
 0x340   : > { %6172 = vmatmul.mubr.bf16.gmra.mrb[252].mxu0 %v17803_v36  ;;  %14811 = vmatprep.subr.bf16.mxu1 %v17478_v63  ;;  %v17481_v63 = vld [vmem:[#allocation7 + $0x18] sm:$0xff]   ;;  %v7174_v23 = vshrl.u32 %v7138_v11, 16 }
 0x341   : > { %7635 = vmatprep.mubr.bf16.mxu0 %v19832_v28  ;;  %v19845_v36 = vsel %vm587_vm5, %v7160_v48, %v7171_v17  ;;  %v17484_v48 = vld [vmem:[#allocation7 + $0x68] sm:$0xff]  }
 0x342   : > { %16060 = vmatmul.mubr.bf16.gmra.mrb[164].mxu1 %v6288_v39  ;;  %21650 = vst [vmem:[#allocation54_spill] sm:$0xff] %v19845_v36  ;;  %7219 = vst [vmem:[#allocation2 + $0x2d0] sm:$0xff] %v19845_v36  ;;  %v17483_v39 = vld [vmem:[#allocation7 + $0x20] sm:$0xff]   ;;  %v19858_v17 = vld [vmem:[#allocation2 + $0x1e8] sm:$0xff] }
 0x343   : > { %16063 = vmatprep.mubr.bf16.mxu1 %v6291_v9  ;;  %14812 = vmatpush3.bf16.msra.mxu1 %v17479_v43  ;;  %v19850_v9 = vrot.slane %v7174_v23, 7  ;;  %v7177_v43 = vshll.u32 %v7138_v11, 16  ;;  %v6297_v23 = vld [vmem:[#allocation3 + $0x190] sm:$0xff] }
 0x344   : > { %14813 = vmatprep.subr.bf16.mxu1 %v17480_v12  ;;  %v13399_v12 = vld [vmem:[%s18227_s6 + $0x1d0] sm:$0xff] }
 0x345   : > { %v7179_v50 = vor.u32 %v7177_v43, %v19850_v9  ;;  %v19867_v11 = vmax.f32 %v13399_v12, 0.0  ;;  %v17496_v36 = vld [vmem:[#allocation7 + $0x150] sm:$0xff]  }
 0x346   : > { %v17486_v12 = vld [vmem:[#allocation7 + $0x70] sm:$0xff]  }
 0x347   : > { %14814 = vmatpush3.bf16.msra.mxu1 %v17481_v63  ;;  %v19864_v63 = vpack.c.bf16 %v19829_v20, %v19839_v49 }
 0x348   : > { %7636 = vmatmul.mubr.bf16.vlgmr.msra.gmra.mrb[0].mxu0 %v19854_v40  ;;  %14815 = vmatprep.subr.bf16.mxu1 %v17482_v25  ;;  %v7129_v25 = vmul.f32 %v21616_v47, %v19852_v29 }
 0x349   : > { %7643 = vmatprep.mubr.bf16.mxu0 %v19858_v17  ;;  %16072 = vmatpush3.bf16.msra.mxu0 %v19749_v59  ;;  %21651 = vst [vmem:[#allocation55_spill] sm:$0xff] %v19864_v63  ;;  %7114 = vst [vmem:[#allocation2 + $0x2f0] sm:$0xff] %v19864_v63  ;;  %v19873_v59 = vsel %vm587_vm5, %v7168_v58, %v7179_v50  ;;  %v17487_v63 = vld [vmem:[#allocation7 + $0x30] sm:$0xff]  }
 0x34a   : > { %16064 = vmatmul.mubr.bf16.gmra.mrb[168].mxu1 %v6294_v51  ;;  %16073 = vmatprep.subr.bf16.mxu0 %v17493_v38  ;;  %21652 = vst [vmem:[#allocation56_spill] sm:$0xff] %v19873_v59  ;;  %v7139_v43 = vpack.c.bf16 %v7129_v25, %v19867_v11  ;;  %7220 = vst [vmem:[#allocation2 + $0x2e8] sm:$0xff] %v19873_v59  ;;  %v19884_v25 = vld [vmem:[#allocation2 + $0x1e0] sm:$0xff]  ;;  %v17489_v59 = vld [vmem:[#allocation7 + $0x78] sm:$0xff]  }
 0x34b   : > { %16067 = vmatprep.mubr.bf16.mxu1 %v6297_v23  ;;  %14816 = vmatpush3.bf16.msra.mxu1 %v17483_v39  ;;  %v17497_v23 = vld [vmem:[#allocation7 + $0x158] sm:$0xff]   ;;  %v13402_v39 = vld [vmem:[%s18227_s6 + $0x1e8] sm:$0xff] }
 0x34c   : > { %14817 = vmatprep.subr.bf16.mxu1 %v17484_v48  ;;  %v7182_v51 = vshrl.u32 %v7139_v43, 16  ;;  %v7185_v58 = vshll.u32 %v7139_v43, 16  ;;  %v19880_v50 = vmax.f32 %v13402_v39, 0.0 }
 0x34d   : > { %v14503_v47 = vpop.f32.mrb[128].mxu1  ;;  %16074 = vmatpush3.bf16.msra.mxu0 %v17493_v38 }
 0x34e   : > { %v14504_v32 = vpop.f32.mrb[129].mxu1  ;;  %16075 = vmatprep.subr.bf16.mxu0 %v17496_v36  ;;  %v19878_v33 = vrot.slane %v7182_v51, 7  ;;  %v7131_v43 = vmul.f32 %v21618_v24, %v19880_v50 }
 0x34f   : > { %v14506_v46 = vpop.f32.mrb[130].mxu1  ;;  %14818 = vmatpush3.bf16.msra.mxu1 %v17485_v60  ;;  %v19882_v48 = vadd.f32 %v14504_v32, %v14503_v47  ;;  %v19893_v60 = vpack.c.bf16 %v19852_v29, %v19867_v11  ;;  %v19896_v32 = vmax.f32 %v13401_v45, 0.0 }
 0x350   : > { %7644 = vmatmul.mubr.bf16.gmra.mrb[4].mxu0 %v19884_v25  ;;  %v14507_v38 = vpop.f32.mrb[131].mxu1  ;;  %14819 = vmatprep.subr.bf16.mxu1 %v17486_v12  ;;  %v7187_v47 = vor.u32 %v7185_v58, %v19878_v33  ;;  %v17500_v12 = vld [vmem:[#allocation7 + $0x160] sm:$0xff]  }
 0x351   : > { %21653 = vst [vmem:[#allocation57_spill] sm:$0xff] %v19882_v48  ;;  %7651 = vmatprep.mubr.bf16.mxu0 %v19888_v15  ;;  %16076 = vmatpush3.bf16.msra.mxu0 %v17496_v36  ;;  %21654 = vst [vmem:[#allocation58_spill] sm:$0xff] %v19893_v60  ;;  %v19901_v51 = vadd.f32 %v14507_v38, %v14506_v46  ;;  %v17490_v36 = vld [vmem:[#allocation7 + $0x38] sm:$0xff]   ;;  %v7140_v39 = vpack.c.bf16 %v7131_v43, %v19896_v32  ;;  %v17491_v58 = vld [vmem:[#allocation7 + $0x100] sm:$0xff]  }
 0x352   : > { %16068 = vmatmul.mubr.bf16.gmra.mrb[172].mxu1 %v19783_v16  ;;  %16077 = vmatprep.subr.bf16.mxu0 %v17497_v23  ;;  %7115 = vst [vmem:[#allocation2 + $0x308] sm:$0xff] %v19893_v60  ;;  %v19907_v45 = vsel %vm587_vm5, %v19850_v9, %v7187_v47  ;;  %v17492_v60 = vld [vmem:[#allocation7 + $0xc0] sm:$0xff]   ;;  %v19918_v43 = vld [vmem:[#allocation2 + $0x1f8] sm:$0xff] }
 0x353   : > { %21655 = vst [vmem:[#allocation59_spill] sm:$0xff] %v19901_v51  ;;  %14820 = vmatpush3.bf16.msra.mxu1 %v17487_v63  ;;  %7973 = vmatprep.mubr.bf16.mxu1 %v19783_v16  ;;  %21656 = vst [vmem:[#allocation60_spill] sm:$0xff] %v19907_v45  ;;  %v7190_v46 = vshrl.u32 %v7140_v39, 16  ;;  %v17501_v63 = vld [vmem:[#allocation7 + $0x168] sm:$0xff]   ;;  %v13404_v51 = vld [vmem:[%s18227_s6 + $0x1f8] sm:$0xff]  ;;  %v7193_v9 = vshll.u32 %v7140_v39, 16 }
 0x354   : > { %14821 = vmatprep.subr.bf16.mxu1 %v17489_v59  ;;  %7221 = vst [vmem:[#allocation2 + $0x300] sm:$0xff] %v19907_v45  ;;  %v19914_v47 = vmax.f32 %v13404_v51, 0.0  ;;  %v17494_v45 = vld [vmem:[#allocation7 + $0x108] sm:$0xff]   ;;  %v19930_v51 = vmax.f32 %v13403_v6, 0.0 }
 0x355   : > { %v14509_v24 = vpop.f32.mrb[132].mxu1  ;;  %16078 = vmatpush3.bf16.msra.mxu0 %v17497_v23  ;;  %v19912_v31 = vrot.slane %v7190_v46, 7 }
 0x356   : > { %v14510_v38 = vpop.f32.mrb[133].mxu1  ;;  %16079 = vmatprep.subr.bf16.mxu0 %v17500_v12  ;;  %v7133_v39 = vmul.f32 %v21624_v26, %v19914_v47  ;;  %v17505_v26 = vld [vmem:[#allocation7 + $0x178] sm:$0xff]  }
 0x357   : > { %v14512_v48 = vpop.f32.mrb[134].mxu1  ;;  %14822 = vmatpush3.bf16.msra.mxu1 %v17490_v36  ;;  %v19916_v59 = vadd.f32 %v14510_v38, %v14509_v24  ;;  %v19927_v36 = vpack.c.bf16 %v19880_v50, %v19896_v32  ;;  %v7195_v24 = vor.u32 %v7193_v9, %v19912_v31  ;;  %v7231_v38 = vmul.f32 %v18278_v41, %v19803_v37 }
 0x358   : > { %7652 = vmatmul.mubr.bf16.gmra.mrb[8].mxu0 %v19918_v43  ;;  %v14513_v23 = vpop.f32.mrb[135].mxu1  ;;  %14967 = vmatprep.subr.bf16.mxu1 %v17491_v58  ;;  %v17504_v58 = vld [vmem:[#allocation7 + $0x170] sm:$0xff]   ;;  %v7141_v9 = vpack.c.bf16 %v7133_v39, %v19930_v51 }
 0x359   : > { %21657 = vst [vmem:[#allocation61_spill] sm:$0xff] %v19916_v59  ;;  %7659 = vmatprep.mubr.bf16.mxu0 %v19922_v0  ;;  %16080 = vmatpush3.bf16.msra.mxu0 %v17500_v12  ;;  %21658 = vst [vmem:[#allocation62_spill] sm:$0xff] %v19927_v36  ;;  %v19935_v46 = vadd.f32 %v14513_v23, %v14512_v48  ;;  %v17495_v12 = vld [vmem:[#allocation7 + $0xc8] sm:$0xff]   ;;  %v19943_v6 = vsel %vm587_vm5, %v19878_v33, %v7195_v24 }
 0x35a   : > { %7974 = vmatmul.mubr.bf16.vlgmr.msra.gmra.mrb[208].mxu1 %v19783_v16  ;;  %16081 = vmatprep.subr.bf16.mxu0 %v17501_v63  ;;  %7116 = vst [vmem:[#allocation2 + $0x320] sm:$0xff] %v19927_v36  ;;  %21660 = vst [vmem:[#allocation64_spill] sm:$0xff] %v19943_v6  ;;  %v17498_v16 = vld [vmem:[#allocation7 + $0x110] sm:$0xff]   ;;  %v19951_v33 = vpack.c.bf16 %v19914_v47, %v19930_v51  ;;  %v7201_v24 = vshll.u32 %v7141_v9, 16  ;;  %v19954_v41 = vpack.c.bf16 %v19798_v21, %v7231_v38  ;;  %v17502_v36 = vld [vmem:[#allocation7 + $0x118] sm:$0xff]  }
 0x35b   : > { %21659 = vst [vmem:[#allocation63_spill] sm:$0xff] %v19935_v46  ;;  %14968 = vmatpush3.bf16.msra.mxu1 %v17492_v60  ;;  %7981 = vmatprep.mubr.bf16.mxu1 %v19832_v28  ;;  %7222 = vst [vmem:[#allocation2 + $0x318] sm:$0xff] %v19943_v6  ;;  %v6768_v60 = vld [vmem:[#allocation2 + $0x338] sm:$0x80]  ;;  %v7198_v28 = vshrl.u32 %v7141_v9, 16  ;;  %v19960_v6 = vld [vmem:[#allocation2 + $0x210] sm:$0xff]  ;;  %v7229_v9 = vmul.f32 %v21640_v22, %v19779_v42 }
 0x35c   : > { %14969 = vmatprep.subr.bf16.mxu1 %v17494_v45  ;;  %v6769_v37 = vsel %vm18469_vm6, 0, %v6768_v60  ;;  %v17499_v45 = vld [vmem:[#allocation7 + $0xd0] sm:$0xff]  }
 0x35d   : > { %v14515_v48 = vpop.f32.mrb[136].mxu1  ;;  %16082 = vmatpush3.bf16.msra.mxu0 %v17501_v63  ;;  %6770 = vst [vmem:[#allocation2 + $0x338] sm:$0x80] %v6769_v37  ;;  %v19956_v63 = vrot.slane %v7198_v28, 7  ;;  %v6765_v46 = vld [vmem:[#allocation2 + $0x330] sm:$0x80]  ;;  %v7244_v42 = vpack.c.bf16 %v19770_v61, %v7229_v9 }
 0x35e   : > { %v14516_v23 = vpop.f32.mrb[137].mxu1  ;;  %16083 = vmatprep.subr.bf16.mxu0 %v17504_v58  ;;  %7117 = vst [vmem:[#allocation2 + $0x338] sm:$0xff] %v19951_v33  ;;  %v19966_v21 = vld [vmem:[#allocation2 + $0x230] sm:$0xff]  ;;  %v7267_v28 = vshll.u32 %v19954_v41, 16  ;;  %v17506_v37 = vld [vmem:[#allocation7 + $0x120] sm:$0xff]   ;;  %v19998_v9 = vld [vmem:[#allocation2 + $0x248] sm:$0xff] }
 0x35f   : > { %v14518_v39 = vpop.f32.mrb[138].mxu1  ;;  %14970 = vmatpush3.bf16.msra.mxu1 %v17495_v12  ;;  %v19958_v59 = vadd.f32 %v14516_v23, %v14515_v48  ;;  %v6766_v12 = vsel %vm18469_vm6, 0, %v6765_v46  ;;  %v7203_v38 = vor.u32 %v7201_v24, %v19956_v63  ;;  %v7235_v46 = vmul.f32 %v18527_v14, %v19839_v49  ;;  %v17507_v61 = vld [vmem:[#allocation7 + $0xe0] sm:$0xff]  }
 0x360   : > { %7660 = vmatmul.mubr.bf16.gmra.mrb[12].mxu0 %v19960_v6  ;;  %v14519_v60 = vpop.f32.mrb[139].mxu1  ;;  %14971 = vmatprep.subr.bf16.mxu1 %v17498_v16  ;;  %6767 = vst [vmem:[#allocation2 + $0x330] sm:$0x80] %v6766_v12  ;;  %v19975_v16 = vld [vmem:[#allocation7 + $0x80] sm:$0xff]  }
 0x361   : > { %7667 = vmatprep.mubr.bf16.mxu0 %v19966_v21  ;;  %16084 = vmatpush3.bf16.msra.mxu0 %v17504_v58  ;;  %v19972_v48 = vadd.f32 %v14519_v60, %v14518_v39  ;;  %v17503_v58 = vld [vmem:[#allocation7 + $0xd8] sm:$0xff]   ;;  %v19983_v23 = vsel %vm587_vm5, %v19912_v31, %v7203_v38  ;;  %v7263_v39 = vshrl.u32 %v7244_v42, 16  ;;  %v19991_v31 = vpack.c.bf16 %v19829_v20, %v7235_v46  ;;  %v19995_v38 = vld [vmem:[#allocation2 + $0x228] sm:$0xff] }
 0x362   : > { %7982 = vmatmul.mubr.bf16.gmra.mrb[212].mxu1 %v19854_v40  ;;  %16085 = vmatprep.subr.bf16.mxu0 %v17505_v26  ;;  %v7255_v40 = vshrl.u32 %v19752_v34, 16  ;;  %7223 = vst [vmem:[#allocation2 + $0x330] sm:$0xff] %v19983_v23  ;;  %v7269_v34 = vrot.slane %v7267_v28, 1 }
 0x363   : > { %7989 = vmatprep.mubr.bf16.mxu1 %v19858_v17  ;;  %14972 = vmatpush3.bf16.msra.mxu1 %v17499_v45  ;;  %v7259_v17 = vshll.u32 %v7244_v42, 16  ;;  %v7283_v42 = vshll.u32 %v19991_v31, 16 }
 0x364   : > { %14973 = vmatprep.subr.bf16.mxu1 %v17502_v36  ;;  %v7257_v49 = vor.u32 %v7255_v40, %v19767_v3  ;;  %v17510_v3 = vld [vmem:[#allocation7 + $0x128] sm:$0xff]  }
 0x365   : > { %v14521_v24 = vpop.f32.mrb[140].mxu1  ;;  %16086 = vmatpush3.bf16.msra.mxu0 %v17505_v26  ;;  %v7261_v36 = vrot.slane %v7259_v17, 1  ;;  %v17511_v40 = vld [vmem:[#allocation7 + $0xe8] sm:$0xff]  }
 0x366   : > { %v14522_v45 = vpop.f32.mrb[141].mxu1  ;;  %16103 = vmatprep.subr.bf16.mxu0 %v19975_v16 }
 0x367   : > { %v14524_v60 = vpop.f32.mrb[142].mxu1  ;;  %14974 = vmatpush3.bf16.msra.mxu1 %v17503_v58  ;;  %v19993_v12 = vadd.f32 %v14522_v45, %v14521_v24  ;;  %v20002_v20 = vsel %vm821_vm3, %v7257_v49, %v7261_v36  ;;  %v7265_v46 = vor.u32 %v7263_v39, %v7261_v36  ;;  %v7233_v58 = vmul.f32 %v18509_v30, %v19819_v8 }
 0x368   : > { %7668 = vmatmul.mubr.bf16.gmra.mrb[16].mxu0 %v19995_v38  ;;  %v14525_v26 = vpop.f32.mrb[143].mxu1  ;;  %14975 = vmatprep.subr.bf16.mxu1 %v17506_v37  ;;  %7326 = vst [vmem:[#allocation2 + $0x298] sm:$0xff] %v20002_v20  ;;  %v7239_v37 = vmul.f32 %v21617_v5, %v19896_v32  ;;  %v7271_v49 = vshrl.u32 %v19954_v41, 16  ;;  %v17515_v32 = vld [vmem:[#allocation7 + $0xf0] sm:$0xff]   ;;  %v17824_v5 = vld [vmem:[#allocation2 + $0x268] sm:$0xff] }
 0x369   : > { %7675 = vmatprep.mubr.bf16.mxu0 %v19998_v9  ;;  %v20006_v28 = vadd.f32 %v14525_v26, %v14524_v60  ;;  %v20015_v24 = vsel %vm821_vm3, %v7265_v46, %v7269_v34  ;;  %v7246_v8 = vpack.c.bf16 %v19816_v35, %v7233_v58  ;;  %v7285_v26 = vrot.slane %v7283_v42, 1  ;;  %v20024_v58 = vld [vmem:[#allocation2 + $0x260] sm:$0xff] }
 0x36a   : > { %7990 = vmatmul.mubr.bf16.gmra.mrb[216].mxu1 %v19884_v25  ;;  %v17514_v25 = vld [vmem:[#allocation7 + $0x130] sm:$0xff]   ;;  %7327 = vst [vmem:[#allocation2 + $0x2b0] sm:$0xff] %v20015_v24  ;;  %v7273_v39 = vor.u32 %v7271_v49, %v7269_v34  ;;  %v7249_v46 = vpack.c.bf16 %v19880_v50, %v7239_v37  ;;  %v7237_v42 = vmul.f32 %v21615_v7, %v19867_v11 }
 0x36b   : > { %7997 = vmatprep.mubr.bf16.mxu1 %v19888_v15  ;;  %14976 = vmatpush3.bf16.msra.mxu1 %v17507_v61  ;;  %v7275_v45 = vshll.u32 %v7246_v8, 16  ;;  %v7279_v15 = vshrl.u32 %v7246_v8, 16 }
 0x36c   : > { %14977 = vmatprep.subr.bf16.mxu1 %v17510_v3  ;;  %v17518_v3 = vld [vmem:[#allocation7 + $0x138] sm:$0xff]   ;;  %v7299_v50 = vshll.u32 %v7249_v46, 16  ;;  %v7248_v49 = vpack.c.bf16 %v19852_v29, %v7237_v42 }
 0x36d   : > { %v14527_v17 = vpop.f32.mrb[144].mxu1  ;;  %v7277_v35 = vrot.slane %v7275_v45, 1 }
 0x36e   : > { %v14528_v60 = vpop.f32.mrb[145].mxu1  ;;  %v7295_v45 = vshrl.u32 %v7248_v49, 16 }
 0x36f   : > { %v20020_v61 = vadd.f32 %v14528_v60, %v14527_v17  ;;  %v14530_v36 = vpop.f32.mrb[146].mxu1  ;;  %14978 = vmatpush3.bf16.msra.mxu1 %v17511_v40  ;;  %v20030_v8 = vsel %vm821_vm3, %v7273_v39, %v7277_v35  ;;  %v7281_v40 = vor.u32 %v7279_v15, %v7277_v35  ;;  %v20042_v17 = vld [vmem:[#allocation7 + $0x140] sm:$0xff]   ;;  %v7291_v39 = vshll.u32 %v7248_v49, 16  ;;  %v20047_v35 = vld [vmem:[#allocation2 + $0x258] sm:$0xff] }
 0x370   : > { %7676 = vmatmul.mubr.bf16.gmra.mrb[20].mxu0 %v19653_v52  ;;  %v14531_v41 = vpop.f32.mrb[147].mxu1  ;;  %14979 = vmatprep.subr.bf16.mxu1 %v17514_v25  ;;  %7328 = vst [vmem:[#allocation2 + $0x2c8] sm:$0xff] %v20030_v8  ;;  %v17519_v52 = vld [vmem:[#allocation7 + $0xf8] sm:$0xff]   ;;  %v7287_v25 = vshrl.u32 %v19991_v31, 16  ;;  %v7303_v49 = vshrl.u32 %v7249_v46, 16 }
 0x371   : > { %7683 = vmatprep.mubr.bf16.mxu0 %v20024_v58  ;;  %v20027_v34 = vadd.f32 %v14531_v41, %v14530_v36  ;;  %v20038_v37 = vsel %vm821_vm3, %v7281_v40, %v7285_v26  ;;  %v7301_v36 = vrot.slane %v7299_v50, 1  ;;  %v6771_v40 = vld [vmem:[#allocation2 + $0x340] sm:$0x80] }
 0x372   : > { %7998 = vmatmul.mubr.bf16.gmra.mrb[220].mxu1 %v19918_v43  ;;  %7329 = vst [vmem:[#allocation2 + $0x2e0] sm:$0xff] %v20038_v37  ;;  %v7289_v43 = vor.u32 %v7287_v25, %v7285_v26 }
 0x373   : > { %8005 = vmatprep.mubr.bf16.mxu1 %v19922_v0  ;;  %14980 = vmatpush3.bf16.msra.mxu1 %v17515_v32  ;;  %v7293_v32 = vrot.slane %v7291_v39, 1 }
 0x374   : > { %14981 = vmatprep.subr.bf16.mxu1 %v17518_v3  ;;  %v7241_v3 = vmul.f32 %v21619_v53, %v19930_v51 }
 0x375   : > { %v14533_v11 = vpop.f32.mrb[148].mxu1  ;;  %v20055_v26 = vsel %vm821_vm3, %v7289_v43, %v7293_v32  ;;  %v7297_v41 = vor.u32 %v7295_v45, %v7293_v32  ;;  %v7305_v43 = vor.u32 %v7303_v49, %v7301_v36 }
 0x376   : > { %v14534_v0 = vpop.f32.mrb[149].mxu1  ;;  %7330 = vst [vmem:[#allocation2 + $0x2f8] sm:$0xff] %v20055_v26  ;;  %v7250_v50 = vpack.c.bf16 %v19914_v47, %v7241_v3 }
 0x377   : > { %v20045_v15 = vadd.f32 %v14534_v0, %v14533_v11  ;;  %v14536_v60 = vpop.f32.mrb[150].mxu1  ;;  %14982 = vmatpush3.bf16.msra.mxu1 %v17519_v52  ;;  %v20063_v52 = vsel %vm821_vm3, %v7297_v41, %v7301_v36 }
 0x378   : > { %7684 = vmatmul.mubr.bf16.gmra.mrb[24].mxu0 %v20047_v35  ;;  %v14537_v29 = vpop.f32.mrb[151].mxu1  ;;  %16167 = vmatprep.subr.bf16.mxu1 %v20042_v17  ;;  %7331 = vst [vmem:[#allocation2 + $0x310] sm:$0xff] %v20063_v52  ;;  %v7307_v39 = vshll.u32 %v7250_v50, 16  ;;  %v7311_v45 = vshrl.u32 %v7250_v50, 16 }
 0x379   : > { %7691 = vmatprep.mubr.bf16.mxu0 %v19671_v10  ;;  %v20052_v31 = vadd.f32 %v14537_v29, %v14536_v60  ;;  %v6772_v10 = vsel %vm18469_vm6, 0, %v6771_v40 }
 0x37a   : > { %8006 = vmatmul.mubr.bf16.gmra.mrb[224].mxu1 %v19960_v6  ;;  %v14423_v42 = vpop.f32.mrb[192].mxu0  ;;  %6773 = vst [vmem:[#allocation2 + $0x340] sm:$0x80] %v6772_v10  ;;  %v7309_v47 = vrot.slane %v7307_v39, 1 }
 0x37b   : > { %8013 = vmatprep.mubr.bf16.mxu1 %v19966_v21  ;;  %v14424_v25 = vpop.f32.mrb[193].mxu0 }
 0x37c   : > { %v14425_v51 = vadd.f32 %v14424_v25, %v14423_v42  ;;  %v14426_v6 = vpop.f32.mrb[194].mxu0  ;;  %v20082_v40 = vsel %vm821_vm3, %v7305_v43, %v7309_v47  ;;  %v7313_v42 = vor.u32 %v7311_v45, %v7309_v47 }
 0x37d   : > { %v14539_v11 = vpop.f32.mrb[152].mxu1  ;;  %v14427_v21 = vpop.f32.mrb[195].mxu0  ;;  %7332 = vst [vmem:[#allocation2 + $0x328] sm:$0xff] %v20082_v40 }
 0x37e   : > { %v14540_v0 = vpop.f32.mrb[153].mxu1  ;;  %v14428_v60 = vadd.f32 %v14427_v21, %v14426_v6  ;;  %v20072_v41 = vadd.f32 %v19496_v54, %v14425_v51  ;;  %v17509_v51 = vld [vmem:[#allocation7 + $0x88] sm:$0xff]  }
 0x37f   : > { %v20069_v32 = vadd.f32 %v14540_v0, %v14539_v11  ;;  %v14542_v29 = vpop.f32.mrb[154].mxu1  ;;  %v17512_v0 = vld [vmem:[#allocation7 + $0x90] sm:$0xff]  }
 0x380   : > { %7692 = vmatmul.mubr.bf16.gmra.mrb[28].mxu0 %v19697_v18  ;;  %v14543_v46 = vpop.f32.mrb[155].mxu1  ;;  %v20079_v36 = vadd.f32 %v19499_v1, %v14428_v60  ;;  %v17817_v60 = vld [vmem:[#allocation2 + $0x240] sm:$0xff] }
 0x381   : > { %16087 = vmatprep.mubr.bf16.mxu0 %v19717_v4  ;;  %v20076_v3 = vadd.f32 %v14543_v46, %v14542_v29  ;;  %v7333_v18 = vld [vmem:[#allocation2 + $0x340] sm:$0xff] }
 0x382   : > { %8014 = vmatmul.mubr.bf16.gmra.mrb[228].mxu1 %v19995_v38  ;;  %v14429_v54 = vpop.f32.mrb[196].mxu0  ;;  %v20089_v4 = vsel %vm18585_vm12, %v7313_v42, %v7333_v18  ;;  %v21661_v42 = vld [vmem:[#allocation34_spill] sm:$0xff] }
 0x383   : > { %8021 = vmatprep.mubr.bf16.mxu1 %v19998_v9  ;;  %v14430_v10 = vpop.f32.mrb[197].mxu0  ;;  %7335 = vst [vmem:[#allocation2 + $0x340] sm:$0xff] %v20089_v4 }
 0x384   : > { %v14431_v50 = vadd.f32 %v14430_v10, %v14429_v54  ;;  %v14432_v1 = vpop.f32.mrb[198].mxu0 }
 0x385   : > { %v14545_v49 = vpop.f32.mrb[156].mxu1  ;;  %v14433_v25 = vpop.f32.mrb[199].mxu0 }
 0x386   : > { %v14546_v6 = vpop.f32.mrb[157].mxu1  ;;  %v14434_v38 = vadd.f32 %v14433_v25, %v14432_v1  ;;  %v20095_v9 = vadd.f32 %v19513_v57, %v14431_v50 }
 0x387   : > { %v20092_v11 = vadd.f32 %v14546_v6, %v14545_v49  ;;  %v14548_v43 = vpop.f32.mrb[158].mxu1  ;;  %v21663_v6 = vld [vmem:[#allocation36_spill] sm:$0xff] }
 0x388   : > { %16088 = vmatmul.mubr.bf16.vlgmr.msra.gmra.mrb[32].mxu0 %v19707_v27  ;;  %v14549_v39 = vpop.f32.mrb[159].mxu1  ;;  %v20103_v21 = vadd.f32 %v19521_v19, %v14434_v38  ;;  %v21662_v19 = vld [vmem:[#allocation35_spill] sm:$0xff]  ;;  %v21664_v38 = vld [vmem:[#allocation46_spill] sm:$0xff] }
 0x389   : > { %16104 = vmatpush3.bf16.msra.mxu0 %v19975_v16  ;;  %16091 = vmatprep.mubr.bf16.mxu0 %v19726_v56  ;;  %v20100_v45 = vadd.f32 %v14549_v39, %v14548_v43  ;;  %v17513_v16 = vld [vmem:[#allocation7 + $0x98] sm:$0xff]   ;;  %v17526_v43 = vld [vmem:[#allocation7 + $0x148] sm:$0xff]  }
 0x38a   : > { %16105 = vmatprep.subr.bf16.mxu0 %v17509_v51  ;;  %8022 = vmatmul.mubr.bf16.gmra.mrb[232].mxu1 %v17817_v60  ;;  %v14435_v29 = vpop.f32.mrb[200].mxu0  ;;  %v21665_v39 = vld [vmem:[#allocation47_spill] sm:$0xff]  ;;  %v21667_v60 = vld [vmem:[#allocation49_spill] sm:$0xff] }
 0x38b   : > { %8029 = vmatprep.mubr.bf16.mxu1 %v20024_v58  ;;  %v14436_v57 = vpop.f32.mrb[201].mxu0  ;;  %v17516_v58 = vld [vmem:[#allocation7 + $0xa0] sm:$0xff]  }
 0x38c   : > { %v14437_v47 = vadd.f32 %v14436_v57, %v14435_v29  ;;  %v14438_v27 = vpop.f32.mrb[202].mxu0  ;;  %v21668_v57 = vld [vmem:[#allocation48_spill] sm:$0xff] }
 0x38d   : > { %16106 = vmatpush3.bf16.msra.mxu0 %v17509_v51  ;;  %v14439_v46 = vpop.f32.mrb[203].mxu0 }
 0x38e   : > { %16107 = vmatprep.subr.bf16.mxu0 %v17512_v0  ;;  %v14440_v56 = vadd.f32 %v14439_v46, %v14438_v27  ;;  %v20107_v54 = vadd.f32 %v21661_v42, %v14437_v47  ;;  %v17531_v27 = vld [vmem:[#allocation7 + $0x150] sm:$0xff]  }
 0x390   : > { %16092 = vmatmul.mubr.bf16.gmra.mrb[36].mxu0 %v19733_v44  ;;  %v20112_v18 = vadd.f32 %v21662_v19, %v14440_v56  ;;  %v17517_v44 = vld [vmem:[#allocation7 + $0xa8] sm:$0xff]   ;;  %v7410_v56 = vld [vmem:[#allocation2 + $0x280] sm:$0xff]  ;;  %v17521_v19 = vld [vmem:[#allocation7 + $0xb8] sm:$0xff]  }
 0x391   : > { %16108 = vmatpush3.bf16.msra.mxu0 %v17512_v0  ;;  %16095 = vmatprep.mubr.bf16.mxu0 %v19740_v2 }
 0x392   : > { %16109 = vmatprep.subr.bf16.mxu0 %v17513_v16  ;;  %8030 = vmatmul.mubr.bf16.gmra.mrb[236].mxu1 %v20047_v35  ;;  %v14441_v10 = vpop.f32.mrb[204].mxu0  ;;  %v21666_v35 = vld [vmem:[#allocation37_spill] sm:$0xff] }
 0x393   : > { %9126 = vmatprep.mubr.bf16.mxu1 %v19761_v55  ;;  %v14442_v50 = vpop.f32.mrb[205].mxu0  ;;  %v17520_v55 = vld [vmem:[#allocation7 + $0xb0] sm:$0xff]  }
 0x394   : > { %v14443_v1 = vadd.f32 %v14442_v50, %v14441_v10  ;;  %v14444_v49 = vpop.f32.mrb[206].mxu0  ;;  %v21669_v50 = vld [vmem:[#allocation38_spill] sm:$0xff] }
 0x395   : > { %16110 = vmatpush3.bf16.msra.mxu0 %v17513_v16  ;;  %v14445_v25 = vpop.f32.mrb[207].mxu0 }
 0x396   : > { %16111 = vmatprep.subr.bf16.mxu0 %v17516_v58  ;;  %v14446_v51 = vadd.f32 %v14445_v25, %v14444_v49  ;;  %v20117_v2 = vadd.f32 %v21663_v6, %v14443_v1  ;;  %v21670_v49 = vld [vmem:[#allocation39_spill] sm:$0xff] }
 0x398   : > { %16096 = vmatmul.mubr.bf16.gmra.mrb[40].mxu0 %v21664_v38  ;;  %v20122_v0 = vadd.f32 %v21666_v35, %v14446_v51  ;;  %v21671_v51 = vld [vmem:[#allocation50_spill] sm:$0xff]  ;;  %v21672_v38 = vld [vmem:[#allocation51_spill] sm:$0xff] }
 0x399   : > { %16112 = vmatpush3.bf16.msra.mxu0 %v17516_v58  ;;  %16099 = vmatprep.mubr.bf16.mxu0 %v21665_v39  ;;  %v7338_v58 = vld [vmem:[#allocation2 + $0x1c0] sm:$0xff] }
 0x39a   : > { %16113 = vmatprep.subr.bf16.mxu0 %v17517_v44  ;;  %9127 = vmatmul.mubr.bf16.vlgmr.msra.gmra.mrb[240].mxu1 %v21667_v60  ;;  %v14447_v29 = vpop.f32.mrb[208].mxu0  ;;  %v17541_v39 = vld [vmem:[#allocation7 + $0x160] sm:$0xff]  }
 0x39b   : > { %16168 = vmatpush3.bf16.msra.mxu1 %v20042_v17  ;;  %9134 = vmatprep.mubr.bf16.mxu1 %v21668_v57  ;;  %v14448_v47 = vpop.f32.mrb[209].mxu0  ;;  %v17536_v17 = vld [vmem:[#allocation7 + $0x158] sm:$0xff]   ;;  %v17525_v57 = vld [vmem:[#allocation7 + $0x1c8] sm:$0xff]  }
 0x39c   : > { %16169 = vmatprep.subr.bf16.mxu1 %v17526_v43  ;;  %v14449_v46 = vadd.f32 %v14448_v47, %v14447_v29  ;;  %v14450_v16 = vpop.f32.mrb[210].mxu0  ;;  %v17524_v29 = vld [vmem:[#allocation7 + $0x180] sm:$0xff]  }
 0x39d   : > { %16114 = vmatpush3.bf16.msra.mxu0 %v17517_v44  ;;  %v14451_v42 = vpop.f32.mrb[211].mxu0  ;;  %v17523_v44 = vld [vmem:[#allocation7 + $0x1c0] sm:$0xff]  }
 0x39e   : > { %16115 = vmatprep.subr.bf16.mxu0 %v17520_v55  ;;  %v14452_v10 = vadd.f32 %v14451_v42, %v14450_v16  ;;  %v20128_v1 = vadd.f32 %v21669_v50, %v14449_v46  ;;  %v21673_v46 = vld [vmem:[#allocation40_spill] sm:$0xff]  ;;  %v17543_v42 = vld [vmem:[#allocation7 + $0x168] sm:$0xff]  }
 0x39f   : > { %16170 = vmatpush3.bf16.msra.mxu1 %v17526_v43 }
 0x3a0   : > { %16100 = vmatmul.mubr.bf16.gmra.mrb[44].mxu0 %v7410_v56  ;;  %16171 = vmatprep.subr.bf16.mxu1 %v17531_v27  ;;  %v20131_v25 = vadd.f32 %v21670_v49, %v14452_v10  ;;  %v17818_v56 = vld [vmem:[#allocation2 + $0x1d8] sm:$0xff]  ;;  %v21675_v49 = vld [vmem:[#allocation52_spill] sm:$0xff] }
 0x3a1   : > { %16116 = vmatpush3.bf16.msra.mxu0 %v17520_v55  ;;  %16119 = vmatprep.mubr.bf16.mxu0 %v7338_v58  ;;  %v17819_v58 = vld [vmem:[#allocation2 + $0x1f0] sm:$0xff]  ;;  %v21674_v10 = vld [vmem:[#allocation41_spill] sm:$0xff] }
 0x3a2   : > { %16117 = vmatprep.subr.bf16.mxu0 %v17521_v19  ;;  %9135 = vmatmul.mubr.bf16.gmra.mrb[244].mxu1 %v21671_v51  ;;  %v14453_v6 = vpop.f32.mrb[212].mxu0 }
 0x3a3   : > { %9142 = vmatprep.mubr.bf16.mxu1 %v21672_v38  ;;  %16172 = vmatpush3.bf16.msra.mxu1 %v17531_v27  ;;  %v14454_v43 = vpop.f32.mrb[213].mxu0  ;;  %v17527_v27 = vld [vmem:[#allocation7 + $0x188] sm:$0xff]  }
 0x3a4   : > { %16173 = vmatprep.subr.bf16.mxu1 %v17536_v17  ;;  %v14455_v35 = vadd.f32 %v14454_v43, %v14453_v6  ;;  %v14456_v60 = vpop.f32.mrb[214].mxu0  ;;  %v17544_v6 = vld [vmem:[#allocation7 + $0x170] sm:$0xff]  }
 0x3a5   : > { %16118 = vmatpush3.bf16.msra.mxu0 %v17521_v19  ;;  %v14457_v55 = vpop.f32.mrb[215].mxu0  ;;  %v17528_v19 = vld [vmem:[#allocation7 + $0x1d0] sm:$0xff]  }
 0x3a6   : > { %14887 = vmatprep.subr.bf16.mxu0 %v17523_v44  ;;  %v14458_v47 = vadd.f32 %v14457_v55, %v14456_v60  ;;  %v20136_v16 = vadd.f32 %v21673_v46, %v14455_v35  ;;  %v17529_v35 = vld [vmem:[#allocation7 + $0x190] sm:$0xff]   ;;  %v17820_v46 = vld [vmem:[#allocation2 + $0x208] sm:$0xff] }
 0x3a7   : > { %16174 = vmatpush3.bf16.msra.mxu1 %v17536_v17  ;;  %v21676_v17 = vld [vmem:[#allocation53_spill] sm:$0xff] }
 0x3a8   : > { %16120 = vmatmul.mubr.bf16.vlgmr.msra.gmra.mrb[32].mxu0 %v17818_v56  ;;  %16175 = vmatprep.subr.bf16.mxu1 %v17541_v39  ;;  %v20139_v50 = vadd.f32 %v21674_v10, %v14458_v47  ;;  %v17545_v56 = vld [vmem:[#allocation7 + $0x178] sm:$0xff]   ;;  %v21678_v10 = vld [vmem:[#allocation43_spill] sm:$0xff] }
 0x3a9   : > { %14888 = vmatpush3.bf16.msra.mxu0 %v17524_v29  ;;  %16123 = vmatprep.mubr.bf16.mxu0 %v17819_v58  ;;  %v17530_v29 = vld [vmem:[#allocation7 + $0x1d8] sm:$0xff]   ;;  %v17821_v58 = vld [vmem:[#allocation2 + $0x220] sm:$0xff] }
 0x3aa   : > { %14889 = vmatprep.subr.bf16.mxu0 %v17525_v57  ;;  %9143 = vmatmul.mubr.bf16.gmra.mrb[248].mxu1 %v21675_v49  ;;  %v14459_v44 = vpop.f32.mrb[216].mxu0  ;;  %v21677_v57 = vld [vmem:[#allocation42_spill] sm:$0xff] }
 0x3ab   : > { %9150 = vmatprep.mubr.bf16.mxu1 %v21676_v17  ;;  %16176 = vmatpush3.bf16.msra.mxu1 %v17541_v39  ;;  %v14460_v51 = vpop.f32.mrb[217].mxu0  ;;  %v17532_v39 = vld [vmem:[#allocation7 + $0x198] sm:$0xff]  }
 0x3ac   : > { %16177 = vmatprep.subr.bf16.mxu1 %v17543_v42  ;;  %v14461_v38 = vadd.f32 %v14460_v51, %v14459_v44  ;;  %v14462_v43 = vpop.f32.mrb[218].mxu0  ;;  %v20151_v51 = vld [vmem:[#allocation7 + $0x80] sm:$0xff]  }
 0x3ad   : > { %14890 = vmatpush3.bf16.msra.mxu0 %v17527_v27  ;;  %v14463_v60 = vpop.f32.mrb[219].mxu0  ;;  %v17533_v27 = vld [vmem:[#allocation7 + $0x1e0] sm:$0xff]  }
 0x3ae   : > { %14891 = vmatprep.subr.bf16.mxu0 %v17528_v19  ;;  %v14464_v55 = vadd.f32 %v14463_v60, %v14462_v43  ;;  %v20144_v47 = vadd.f32 %v21677_v57, %v14461_v38  ;;  %v21679_v19 = vld [vmem:[#allocation54_spill] sm:$0xff] }
 0x3af   : > { %16178 = vmatpush3.bf16.msra.mxu1 %v17543_v42  ;;  %v21680_v42 = vld [vmem:[#allocation55_spill] sm:$0xff] }
 0x3b0   : > { %16124 = vmatmul.mubr.bf16.gmra.mrb[36].mxu0 %v17820_v46  ;;  %16179 = vmatprep.subr.bf16.mxu1 %v17544_v6  ;;  %v20147_v49 = vadd.f32 %v21678_v10, %v14464_v55  ;;  %v17535_v55 = vld [vmem:[#allocation7 + $0x1e8] sm:$0xff]   ;;  %v17823_v10 = vld [vmem:[#allocation2 + $0x250] sm:$0xff] }
 0x3b1   : > { %14892 = vmatpush3.bf16.msra.mxu0 %v17529_v35  ;;  %16127 = vmatprep.mubr.bf16.mxu0 %v17821_v58  ;;  %v17534_v35 = vld [vmem:[#allocation7 + $0x1a0] sm:$0xff]   ;;  %v17822_v58 = vld [vmem:[#allocation2 + $0x238] sm:$0xff] }
 0x3b2   : > { %14893 = vmatprep.subr.bf16.mxu0 %v17530_v29  ;;  %9151 = vmatmul.mubr.bf16.gmra.mrb[252].mxu1 %v21679_v19  ;;  %v14465_v44 = vpop.f32.mrb[220].mxu0  ;;  %v21681_v29 = vld [vmem:[#allocation44_spill] sm:$0xff]  ;;  %v21682_v19 = vld [vmem:[#allocation45_spill] sm:$0xff] }
 0x3b3   : > { %9158 = vmatprep.mubr.bf16.mxu1 %v21680_v42  ;;  %16180 = vmatpush3.bf16.msra.mxu1 %v17544_v6  ;;  %v14466_v17 = vpop.f32.mrb[221].mxu0  ;;  %v17537_v6 = vld [vmem:[#allocation7 + $0x1a8] sm:$0xff]  }
 0x3b4   : > { %16181 = vmatprep.subr.bf16.mxu1 %v17545_v56  ;;  %v14467_v38 = vadd.f32 %v14466_v17, %v14465_v44  ;;  %v14468_v43 = vpop.f32.mrb[222].mxu0  ;;  %v21683_v44 = vld [vmem:[#allocation56_spill] sm:$0xff]  ;;  %v21684_v17 = vld [vmem:[#allocation58_spill] sm:$0xff] }
 0x3b5   : > { %14894 = vmatpush3.bf16.msra.mxu0 %v17532_v39  ;;  %v14469_v60 = vpop.f32.mrb[223].mxu0 }
 0x3b6   : > { %14895 = vmatprep.subr.bf16.mxu0 %v17533_v27  ;;  %v14470_v57 = vadd.f32 %v14469_v60, %v14468_v43  ;;  %v20154_v46 = vadd.f32 %v21681_v29, %v14467_v38  ;;  %v17538_v27 = vld [vmem:[#allocation7 + $0x1f0] sm:$0xff]  }
 0x3b7   : > { %16182 = vmatpush3.bf16.msra.mxu1 %v17545_v56  ;;  %v20164_v56 = vld [vmem:[%s21497_s4] ss:$0 sm:$0xff] }
 0x3b8   : > { %16128 = vmatmul.mubr.bf16.gmra.mrb[40].mxu0 %v17822_v58  ;;  %16199 = vmatprep.subr.bf16.mxu1 %v20151_v51  ;;  %v20158_v39 = vadd.f32 %v21682_v19, %v14470_v57  ;;  %v17539_v57 = vld [vmem:[#allocation7 + $0x1b0] sm:$0xff]   ;;  %v4165_v58 = vld [vmem:[%s18227_s6] sm:$0xff] }
 0x3b9   : > { %14896 = vmatpush3.bf16.msra.mxu0 %v17534_v35  ;;  %16131 = vmatprep.mubr.bf16.mxu0 %v17823_v10  ;;  %v4167_v35 = vld [vmem:[%s18227_s6 + $0x10] sm:$0xff] }
 0x3ba   : > { %14897 = vmatprep.subr.bf16.mxu0 %v17535_v55  ;;  %9159 = vmatmul.mubr.bf16.gmra.mrb[0].mxu1 %v21683_v44  ;;  %v15961_v42 = vpop.f32.mrb[176].mxu0  ;;  %v17540_v44 = vld [vmem:[#allocation7 + $0x1f8] sm:$0xff]  }
 0x3bb   : > { %9166 = vmatprep.mubr.bf16.mxu1 %v21684_v17  ;;  %v16569_v38 = vadd.f32 %v20095_v9, %v15961_v42  ;;  %v5329_v43 = vpop.f32.mrb[177].mxu0  ;;  %v8136_v17 = vld [vmem:[#allocation2 + $0x1e8] sm:$0xff]  ;;  %v4168_v42 = vld [vmem:[%s18227_s6 + $0x18] sm:$0xff] }
 0x3bc   : > { %v16572_v60 = vadd.f32 %v20072_v41, %v5329_v43  ;;  %v15962_v55 = vpop.f32.mrb[178].mxu0 }
 0x3bd   : > { %14898 = vmatpush3.bf16.msra.mxu0 %v17537_v6  ;;  %v5416_v29 = vadd.f32 %v16569_v38, %v20164_v56  ;;  %v16575_v10 = vadd.f32 %v20103_v21, %v15962_v55  ;;  %v5332_v19 = vpop.f32.mrb[179].mxu0  ;;  %v4166_v6 = vld [vmem:[%s18227_s6 + $0x8] sm:$0xff]  ;;  %v17542_v21 = vld [vmem:[#allocation7 + $0x1b8] sm:$0xff]  }
 0x3be   : > { %14899 = vmatprep.subr.bf16.mxu0 %v17538_v27  ;;  %v5414_v9 = vadd.f32 %v16572_v60, %v20164_v56  ;;  %v16578_v13 = vadd.f32 %v20079_v36, %v5332_v19  ;;  %v21685_v27 = vld [vmem:[#allocation60_spill] sm:$0xff]  ;;  %v21686_v60 = vld [vmem:[#allocation62_spill] sm:$0xff] }
 0x3bf   : > { %v5432_v41 = vadd.f32 %v5416_v29, %v4167_v35  ;;  %v5417_v43 = vadd.f32 %v16575_v10, %v20164_v56  ;;  %v4171_v29 = vld [vmem:[%s18227_s6 + $0x30] sm:$0xff]  ;;  %v8135_v19 = vld [vmem:[#allocation2 + $0x1e0] sm:$0xff] }
 0x3c0   : > { %16132 = vmatmul.mubr.bf16.gmra.mrb[44].mxu0 %v17824_v5  ;;  %v5430_v38 = vadd.f32 %v5414_v9, %v4165_v58  ;;  %v5415_v53 = vadd.f32 %v16578_v13, %v20164_v56  ;;  %v17546_v5 = vld [vmem:[#allocation7 + $0x200] sm:$0xff]  }
 0x3c1   : > { %14900 = vmatpush3.bf16.msra.mxu0 %v17539_v57  ;;  %8383 = vmatprep.mubr.bf16.mxu0 %v8136_v17  ;;  %5448 = vst [vmem:[%s20181_s30 + $0x10] sm:$0xff] %v5432_v41  ;;  %v5433_v36 = vadd.f32 %v5417_v43, %v4168_v42  ;;  %v4169_v17 = vld [vmem:[%s18227_s6 + $0x20] sm:$0xff]  ;;  %v4172_v43 = vld [vmem:[%s18227_s6 + $0x38] sm:$0xff] }
 0x3c2   : > { %14901 = vmatprep.subr.bf16.mxu0 %v17540_v44  ;;  %9167 = vmatmul.mubr.bf16.gmra.mrb[4].mxu1 %v21685_v27  ;;  %5446 = vst [vmem:[%s20181_s30] sm:$0xff] %v5430_v38  ;;  %v5431_v13 = vadd.f32 %v5415_v53, %v4166_v6  ;;  %v15965_v35 = vpop.f32.mrb[180].mxu0  ;;  %v8139_v42 = vld [vmem:[#allocation2 + $0x200] sm:$0xff] }
 0x3c3   : > { %9174 = vmatprep.mubr.bf16.mxu1 %v21686_v60  ;;  %5449 = vst [vmem:[%s20181_s30 + $0x18] sm:$0xff] %v5433_v36  ;;  %v16581_v55 = vadd.f32 %v20117_v2, %v15965_v35  ;;  %v5345_v57 = vpop.f32.mrb[181].mxu0  ;;  %v17548_v2 = vld [vmem:[#allocation7 + $0x208] sm:$0xff]   ;;  %v17551_v35 = vld [vmem:[#allocation7 + $0x210] sm:$0xff]  }
 0x3c4   : > { %5447 = vst [vmem:[%s20181_s30 + $0x8] sm:$0xff] %v5431_v13  ;;  %v16584_v58 = vadd.f32 %v20107_v54, %v5345_v57  ;;  %v15966_v10 = vpop.f32.mrb[182].mxu0  ;;  %v21687_v13 = vld [vmem:[#allocation64_spill] sm:$0xff] }
 0x3c5   : > { %14902 = vmatpush3.bf16.msra.mxu0 %v17542_v21  ;;  %v5420_v44 = vadd.f32 %v16581_v55, %v20164_v56  ;;  %v16587_v53 = vadd.f32 %v20122_v0, %v15966_v10  ;;  %v5348_v9 = vpop.f32.mrb[183].mxu0  ;;  %v4170_v21 = vld [vmem:[%s18227_s6 + $0x28] sm:$0xff]  ;;  %v8138_v10 = vld [vmem:[#allocation2 + $0x1f8] sm:$0xff] }
 0x3c6   : > { %16135 = vmatprep.subr.bf16.mxu0 %v17546_v5  ;;  %v5418_v41 = vadd.f32 %v16584_v58, %v20164_v56  ;;  %v16590_v54 = vadd.f32 %v20112_v18, %v5348_v9  ;;  %v8142_v9 = vld [vmem:[#allocation2 + $0x218] sm:$0xff] }
 0x3c7   : > { %v5436_v6 = vadd.f32 %v5420_v44, %v4171_v29  ;;  %v5421_v38 = vadd.f32 %v16587_v53, %v20164_v56  ;;  %v4175_v29 = vld [vmem:[%s18227_s6 + $0x50] sm:$0xff] }
 0x3c8   : > { %8384 = vmatmul.mubr.bf16.vlgmr.msra.gmra.mrb[48].mxu0 %v8135_v19  ;;  %v5434_v36 = vadd.f32 %v5418_v41, %v4169_v17  ;;  %v5419_v0 = vadd.f32 %v16590_v54, %v20164_v56  ;;  %v4173_v17 = vld [vmem:[%s18227_s6 + $0x40] sm:$0xff] }
 0x3c9   : > { %8391 = vmatprep.mubr.bf16.mxu0 %v8139_v42  ;;  %16136 = vmatpush3.bf16.msra.mxu0 %v17546_v5  ;;  %5452 = vst [vmem:[%s20181_s30 + $0x30] sm:$0xff] %v5436_v6  ;;  %v5437_v27 = vadd.f32 %v5421_v38, %v4172_v43  ;;  %v4176_v43 = vld [vmem:[%s18227_s6 + $0x58] sm:$0xff] }
 0x3ca   : > { %9175 = vmatmul.mubr.bf16.gmra.mrb[8].mxu1 %v21687_v13  ;;  %16137 = vmatprep.subr.bf16.mxu0 %v17548_v2  ;;  %5450 = vst [vmem:[%s20181_s30 + $0x20] sm:$0xff] %v5434_v36  ;;  %v5435_v18 = vadd.f32 %v5419_v0, %v4170_v21  ;;  %v15969_v60 = vpop.f32.mrb[184].mxu0  ;;  %v4174_v21 = vld [vmem:[%s18227_s6 + $0x48] sm:$0xff]  ;;  %v17555_v13 = vld [vmem:[#allocation7 + $0x220] sm:$0xff]  }
 0x3cb   : > { %9182 = vmatprep.mubr.bf16.mxu1 %v19951_v33  ;;  %5453 = vst [vmem:[%s20181_s30 + $0x38] sm:$0xff] %v5437_v27  ;;  %v16593_v55 = vadd.f32 %v20136_v16, %v15969_v60  ;;  %v5361_v57 = vpop.f32.mrb[185].mxu0  ;;  %v17553_v16 = vld [vmem:[#allocation7 + $0x218] sm:$0xff]  }
 0x3cc   : > { %5451 = vst [vmem:[%s20181_s30 + $0x28] sm:$0xff] %v5435_v18  ;;  %v16596_v5 = vadd.f32 %v20128_v1, %v5361_v57  ;;  %v15970_v58 = vpop.f32.mrb[186].mxu0 }
 0x3cd   : > { %v14663_v19 = vpop.f32.mrb[176].mxu1  ;;  %16138 = vmatpush3.bf16.msra.mxu0 %v17548_v2  ;;  %v5424_v44 = vadd.f32 %v16593_v55, %v20164_v56  ;;  %v16599_v53 = vadd.f32 %v20139_v50, %v15970_v58  ;;  %v5364_v33 = vpop.f32.mrb[187].mxu0  ;;  %v8141_v58 = vld [vmem:[#allocation2 + $0x210] sm:$0xff] }
 0x3ce   : > { %v14664_v42 = vpop.f32.mrb[177].mxu1  ;;  %16139 = vmatprep.subr.bf16.mxu0 %v17551_v35  ;;  %v5422_v41 = vadd.f32 %v16596_v5, %v20164_v56  ;;  %v16602_v1 = vadd.f32 %v20131_v25, %v5364_v33 }
 0x3cf   : > { %v20216_v54 = vadd.f32 %v14664_v42, %v14663_v19  ;;  %v14666_v2 = vpop.f32.mrb[178].mxu1  ;;  %v5440_v6 = vadd.f32 %v5424_v44, %v4175_v29  ;;  %v5425_v38 = vadd.f32 %v16599_v53, %v20164_v56  ;;  %v4179_v29 = vld [vmem:[%s18227_s6 + $0x70] sm:$0xff]  ;;  %v4177_v19 = vld [vmem:[%s18227_s6 + $0x60] sm:$0xff] }
 0x3d0   : > { %8392 = vmatmul.mubr.bf16.gmra.mrb[52].mxu0 %v8138_v10  ;;  %v14667_v50 = vpop.f32.mrb[179].mxu1  ;;  %v5438_v36 = vadd.f32 %v5422_v41, %v4173_v17  ;;  %v5423_v0 = vadd.f32 %v16602_v1, %v20164_v56  ;;  %v8145_v17 = vld [vmem:[#allocation2 + $0x230] sm:$0xff]  ;;  %v4178_v1 = vld [vmem:[%s18227_s6 + $0x68] sm:$0xff] }
 0x3d1   : > { %8399 = vmatprep.mubr.bf16.mxu0 %v8142_v9  ;;  %v20221_v27 = vadd.f32 %v14667_v50, %v14666_v2  ;;  %16140 = vmatpush3.bf16.msra.mxu0 %v17551_v35  ;;  %5456 = vst [vmem:[%s20181_s30 + $0x50] sm:$0xff] %v5440_v6  ;;  %v5441_v25 = vadd.f32 %v5425_v38, %v4176_v43  ;;  %v4180_v9 = vld [vmem:[%s18227_s6 + $0x78] sm:$0xff]  ;;  %v17549_v2 = vld [vmem:[#allocation7 + $0x88] sm:$0xff]  }
 0x3d2   : > { %9183 = vmatmul.mubr.bf16.gmra.mrb[12].mxu1 %v19983_v23  ;;  %16141 = vmatprep.subr.bf16.mxu0 %v17553_v16  ;;  %5454 = vst [vmem:[%s20181_s30 + $0x40] sm:$0xff] %v5438_v36  ;;  %v5439_v18 = vadd.f32 %v5423_v0, %v4174_v21  ;;  %v15973_v60 = vpop.f32.mrb[188].mxu0  ;;  %v7224_v6 = vld [vmem:[#allocation2 + $0x348] sm:$0x1]  ;;  %v17559_v36 = vld [vmem:[#allocation7 + $0x230] sm:$0xff]  }
 0x3d3   : > { %16183 = vmatprep.mubr.bf16.mxu1 %v20002_v20  ;;  %5457 = vst [vmem:[%s20181_s30 + $0x58] sm:$0xff] %v5441_v25  ;;  %v16605_v55 = vadd.f32 %v20154_v46, %v15973_v60  ;;  %v5377_v57 = vpop.f32.mrb[189].mxu0  ;;  %v17557_v46 = vld [vmem:[#allocation7 + $0x228] sm:$0xff]   ;;  %v7225_v25 = vsel %vm18291_vm9, %v19956_v63, %v7224_v6  ;;  %v8147_v6 = vld [vmem:[#allocation2 + $0x240] sm:$0xff] }
 0x3d4   : > { %5455 = vst [vmem:[%s20181_s30 + $0x48] sm:$0xff] %v5439_v18  ;;  %v16608_v35 = vadd.f32 %v20144_v47, %v5377_v57  ;;  %v15974_v5 = vpop.f32.mrb[190].mxu0  ;;  %7226 = vst [vmem:[#allocation2 + $0x348] sm:$0x1] %v7225_v25  ;;  %v8148_v63 = vld [vmem:[#allocation2 + $0x248] sm:$0xff] }
 0x3d5   : > { %v14669_v23 = vpop.f32.mrb[180].mxu1  ;;  %16142 = vmatpush3.bf16.msra.mxu0 %v17553_v16  ;;  %v5428_v10 = vadd.f32 %v16605_v55, %v20164_v56  ;;  %v16611_v44 = vadd.f32 %v20158_v39, %v15974_v5  ;;  %v5380_v20 = vpop.f32.mrb[191].mxu0  ;;  %v17550_v55 = vld [vmem:[#allocation7 + $0x90] sm:$0xff]   ;;  %v17681_v0 = vld [vmem:[#allocation9 + $0x1a8] sm:$0xff]  }
 0x3d6   : > { %v14670_v53 = vpop.f32.mrb[181].mxu1  ;;  %16143 = vmatprep.subr.bf16.mxu0 %v17555_v13  ;;  %v5426_v33 = vadd.f32 %v16608_v35, %v20164_v56  ;;  %v16614_v47 = vadd.f32 %v20147_v49, %v5380_v20 }
 0x3d7   : > { %v20238_v42 = vadd.f32 %v14670_v53, %v14669_v23  ;;  %v14672_v16 = vpop.f32.mrb[182].mxu1  ;;  %v5444_v41 = vadd.f32 %v5428_v10, %v4179_v29  ;;  %v5429_v43 = vadd.f32 %v16611_v44, %v20164_v56  ;;  %v8144_v29 = vld [vmem:[#allocation2 + $0x228] sm:$0xff]  ;;  %v17561_v23 = vld [vmem:[#allocation7 + $0x238] sm:$0xff]  }
 0x3d8   : > { %8400 = vmatmul.mubr.bf16.gmra.mrb[56].mxu0 %v8141_v58  ;;  %v14673_v39 = vpop.f32.mrb[183].mxu1  ;;  %v5442_v38 = vadd.f32 %v5426_v33, %v4177_v19  ;;  %v5427_v21 = vadd.f32 %v16614_v47, %v20164_v56  ;;  %v21689_v10 = vld [vmem:[#allocation57_spill] sm:$0xff]  ;;  %v21690_v53 = vld [vmem:[#allocation59_spill] sm:$0xff]  ;;  %v17564_v47 = vld [vmem:[#allocation7 + $0x40] sm:$0xff]  }
 0x3d9   : > { %8407 = vmatprep.mubr.bf16.mxu0 %v8145_v17  ;;  %v20243_v50 = vadd.f32 %v14673_v39, %v14672_v16  ;;  %16144 = vmatpush3.bf16.msra.mxu0 %v17555_v13  ;;  %5460 = vst [vmem:[%s20181_s30 + $0x70] sm:$0xff] %v5444_v41  ;;  %v5445_v49 = vadd.f32 %v5429_v43, %v4180_v9  ;;  %v17552_v17 = vld [vmem:[#allocation7 + $0x98] sm:$0xff]  }
 0x3da   : > { %16184 = vmatmul.mubr.bf16.vlgmr.msra.gmra.mrb[16].mxu1 %v20015_v24  ;;  %16145 = vmatprep.subr.bf16.mxu0 %v17557_v46  ;;  %5458 = vst [vmem:[%s20181_s30 + $0x60] sm:$0xff] %v5442_v38  ;;  %v5443_v18 = vadd.f32 %v5427_v21, %v4178_v1  ;;  %v17554_v1 = vld [vmem:[#allocation7 + $0xa0] sm:$0xff]  }
 0x3db   : > { %v14583_v60 = vpop.f32.mrb[224].mxu0  ;;  %16200 = vmatpush3.bf16.msra.mxu1 %v20151_v51  ;;  %16187 = vmatprep.mubr.bf16.mxu1 %v20030_v8  ;;  %5461 = vst [vmem:[%s20181_s30 + $0x78] sm:$0xff] %v5445_v49  ;;  %v8151_v21 = vld [vmem:[#allocation2 + $0x260] sm:$0xff]  ;;  %v21691_v49 = vld [vmem:[#allocation61_spill] sm:$0xff] }
 0x3dc   : > { %v14584_v13 = vpop.f32.mrb[225].mxu0  ;;  %16201 = vmatprep.subr.bf16.mxu1 %v17549_v2  ;;  %5459 = vst [vmem:[%s20181_s30 + $0x68] sm:$0xff] %v5443_v18 }
 0x3dd   : > { %v14585_v24 = vadd.f32 %v14584_v13, %v14583_v60  ;;  %v14586_v57 = vpop.f32.mrb[226].mxu0  ;;  %v14675_v35 = vpop.f32.mrb[184].mxu1  ;;  %16146 = vmatpush3.bf16.msra.mxu0 %v17557_v46  ;;  %v17556_v60 = vld [vmem:[#allocation7 + $0xa8] sm:$0xff]  }
 0x3de   : > { %v14587_v5 = vpop.f32.mrb[227].mxu0  ;;  %v14676_v58 = vpop.f32.mrb[185].mxu1  ;;  %16147 = vmatprep.subr.bf16.mxu0 %v17559_v36  ;;  %v21692_v13 = vld [vmem:[#allocation63_spill] sm:$0xff] }
 0x3df   : > { %v16618_v51 = vadd.f32 %v14585_v24, %v21689_v10  ;;  %v14588_v19 = vadd.f32 %v14587_v5, %v14586_v57  ;;  %v20256_v8 = vadd.f32 %v14676_v58, %v14675_v35  ;;  %v14678_v44 = vpop.f32.mrb[186].mxu1  ;;  %16202 = vmatpush3.bf16.msra.mxu1 %v17549_v2  ;;  %v8150_v10 = vld [vmem:[#allocation2 + $0x258] sm:$0xff] }
 0x3e0   : > { %8408 = vmatmul.mubr.bf16.gmra.mrb[60].mxu0 %v8144_v29  ;;  %v14679_v20 = vpop.f32.mrb[187].mxu1  ;;  %16203 = vmatprep.subr.bf16.mxu1 %v17550_v55 }
 0x3e1   : > { %v16624_v33 = vadd.f32 %v14588_v19, %v21690_v53  ;;  %8415 = vmatprep.mubr.bf16.mxu0 %v8148_v63  ;;  %v20259_v46 = vadd.f32 %v14679_v20, %v14678_v44  ;;  %16148 = vmatpush3.bf16.msra.mxu0 %v17559_v36  ;;  %v20262_v9 = vadd.f32 %v16618_v51, %v20216_v54  ;;  %v17558_v63 = vld [vmem:[#allocation7 + $0xb0] sm:$0xff]   ;;  %v20283_v44 = vld [vmem:[#allocation2 + $0x278] sm:$0xff] }
 0x3e2   : > { %16188 = vmatmul.mubr.bf16.gmra.mrb[20].mxu1 %v20038_v37  ;;  %16149 = vmatprep.subr.bf16.mxu0 %v17561_v23  ;;  %v17560_v53 = vld [vmem:[#allocation7 + $0xb8] sm:$0xff]  }
 0x3e3   : > { %v14589_v16 = vpop.f32.mrb[228].mxu0  ;;  %16204 = vmatpush3.bf16.msra.mxu1 %v17550_v55  ;;  %16191 = vmatprep.mubr.bf16.mxu1 %v20055_v26  ;;  %v20267_v41 = vadd.f32 %v16624_v33, %v20221_v27  ;;  %v20288_v33 = vld [vmem:[#allocation2 + $0x280] sm:$0xff] }
 0x3e4   : > { %v14590_v43 = vpop.f32.mrb[229].mxu0  ;;  %16205 = vmatprep.subr.bf16.mxu1 %v17552_v17 }
 0x3e5   : > { %v14591_v39 = vadd.f32 %v14590_v43, %v14589_v16  ;;  %v14592_v2 = vpop.f32.mrb[230].mxu0  ;;  %v14681_v38 = vpop.f32.mrb[188].mxu1  ;;  %16150 = vmatpush3.bf16.msra.mxu0 %v17561_v23 }
 0x3e6   : > { %v14593_v54 = vpop.f32.mrb[231].mxu0  ;;  %v14682_v37 = vpop.f32.mrb[189].mxu1  ;;  %15047 = vmatprep.subr.bf16.mxu0 %v17564_v47 }
 0x3e7   : > { %v16615_v36 = vadd.f32 %v14591_v39, %v21691_v49  ;;  %v14594_v25 = vadd.f32 %v14593_v54, %v14592_v2  ;;  %v20270_v18 = vadd.f32 %v14682_v37, %v14681_v38  ;;  %v14684_v26 = vpop.f32.mrb[190].mxu1  ;;  %16206 = vmatpush3.bf16.msra.mxu1 %v17552_v17  ;;  %v17562_v2 = vld [vmem:[#allocation7 + $0x1c0] sm:$0xff]   ;;  %v20302_v38 = vld [vmem:[#allocation2 + $0x270] sm:$0xff] }
 0x3e8   : > { %8416 = vmatmul.mubr.bf16.gmra.mrb[64].mxu0 %v8147_v6  ;;  %v14685_v27 = vpop.f32.mrb[191].mxu1  ;;  %16207 = vmatprep.subr.bf16.mxu1 %v17554_v1 }
 0x3e9   : > { %v16621_v55 = vadd.f32 %v14594_v25, %v21692_v13  ;;  %8423 = vmatprep.mubr.bf16.mxu0 %v8151_v21  ;;  %v20273_v24 = vadd.f32 %v14685_v27, %v14684_v26  ;;  %v20276_v57 = vadd.f32 %v16615_v36, %v20238_v42  ;;  %v17565_v27 = vld [vmem:[#allocation7 + $0x1c8] sm:$0xff]  }
 0x3ea   : > { %16192 = vmatmul.mubr.bf16.gmra.mrb[24].mxu1 %v20063_v52 }
 0x3eb   : > { %v14595_v29 = vpop.f32.mrb[232].mxu0  ;;  %16208 = vmatpush3.bf16.msra.mxu1 %v17554_v1  ;;  %16195 = vmatprep.mubr.bf16.mxu1 %v20082_v40  ;;  %v20281_v35 = vadd.f32 %v16621_v55, %v20243_v50 }
 0x3ec   : > { %v14596_v5 = vpop.f32.mrb[233].mxu0  ;;  %16209 = vmatprep.subr.bf16.mxu1 %v17556_v60 }
 0x3ed   : > { %v14597_v58 = vadd.f32 %v14596_v5, %v14595_v29  ;;  %v14598_v23 = vpop.f32.mrb[234].mxu0  ;;  %v14687_v51 = vpop.f32.mrb[192].mxu1  ;;  %v17567_v5 = vld [vmem:[#allocation7 + $0x188] sm:$0xff]  }
 0x3ee   : > { %v14599_v19 = vpop.f32.mrb[235].mxu0  ;;  %v14688_v42 = vpop.f32.mrb[193].mxu1 }
 0x3ef   : > { %v16630_v52 = vadd.f32 %v14597_v58, %v19958_v59  ;;  %v14600_v20 = vadd.f32 %v14599_v19, %v14598_v23  ;;  %v20286_v17 = vadd.f32 %v14688_v42, %v14687_v51  ;;  %v14690_v40 = vpop.f32.mrb[194].mxu1  ;;  %16210 = vmatpush3.bf16.msra.mxu1 %v17556_v60  ;;  %v8156_v19 = vld [vmem:[#allocation2 + $0x288] sm:$0xff] }
 0x3f0   : > { %8424 = vmatmul.mubr.bf16.gmra.mrb[68].mxu0 %v8150_v10  ;;  %v14691_v50 = vpop.f32.mrb[195].mxu1  ;;  %16211 = vmatprep.subr.bf16.mxu1 %v17558_v63 }
 0x3f1   : > { %v16636_v47 = vadd.f32 %v14600_v20, %v19972_v48  ;;  %8431 = vmatprep.mubr.bf16.mxu0 %v20283_v44  ;;  %v20292_v16 = vadd.f32 %v14691_v50, %v14690_v40  ;;  %v20295_v43 = vadd.f32 %v16630_v52, %v20256_v8  ;;  %v8157_v8 = vld [vmem:[#allocation2 + $0x290] sm:$0xff] }
 0x3f2   : > { %16196 = vmatmul.mubr.bf16.gmra.mrb[28].mxu1 %v20089_v4  ;;  %v8137_v52 = vld [vmem:[#allocation2 + $0x1f0] sm:$0xff] }
 0x3f3   : > { %v14601_v59 = vpop.f32.mrb[236].mxu0  ;;  %16212 = vmatpush3.bf16.msra.mxu1 %v17558_v63  ;;  %16215 = vmatprep.mubr.bf16.mxu1 %v20288_v33  ;;  %v20300_v1 = vadd.f32 %v16636_v47, %v20259_v46  ;;  %v17563_v46 = vld [vmem:[#allocation7 + $0x180] sm:$0xff]   ;;  %v17826_v63 = vld [vmem:[#allocation2 + $0x2b0] sm:$0xff] }
 0x3f4   : > { %v14602_v39 = vpop.f32.mrb[237].mxu0  ;;  %16213 = vmatprep.subr.bf16.mxu1 %v17560_v53 }
 0x3f5   : > { %v14603_v48 = vadd.f32 %v14602_v39, %v14601_v59  ;;  %v14604_v6 = vpop.f32.mrb[238].mxu0  ;;  %v14693_v54 = vpop.f32.mrb[196].mxu1  ;;  %v17571_v59 = vld [vmem:[#allocation7 + $0x190] sm:$0xff]   ;;  %v17573_v39 = vld [vmem:[#allocation7 + $0x1d8] sm:$0xff]  }
 0x3f6   : > { %v14605_v21 = vpop.f32.mrb[239].mxu0  ;;  %v14694_v37 = vpop.f32.mrb[197].mxu1 }
 0x3f7   : > { %v16627_v4 = vadd.f32 %v14603_v48, %v19993_v12  ;;  %v14606_v49 = vadd.f32 %v14605_v21, %v14604_v6  ;;  %v20305_v36 = vadd.f32 %v14694_v37, %v14693_v54  ;;  %v14696_v25 = vpop.f32.mrb[198].mxu1  ;;  %16214 = vmatpush3.bf16.msra.mxu1 %v17560_v53  ;;  %v20314_v12 = vld [vmem:[#allocation2 + $0x298] sm:$0xff]  ;;  %v17827_v54 = vld [vmem:[#allocation2 + $0x2c8] sm:$0xff] }
 0x3f8   : > { %8432 = vmatmul.mubr.bf16.gmra.mrb[72].mxu0 %v20302_v38  ;;  %v14697_v26 = vpop.f32.mrb[199].mxu1  ;;  %15127 = vmatprep.subr.bf16.mxu1 %v17562_v2  ;;  %v17575_v21 = vld [vmem:[#allocation7 + $0x198] sm:$0xff]  }
 0x3f9   : > { %v16633_v60 = vadd.f32 %v14606_v49, %v20006_v28  ;;  %8439 = vmatprep.mubr.bf16.mxu0 %v8157_v8  ;;  %v20309_v13 = vadd.f32 %v14697_v26, %v14696_v25  ;;  %v20312_v55 = vadd.f32 %v16627_v4, %v20270_v18  ;;  %v17569_v28 = vld [vmem:[#allocation7 + $0x1d0] sm:$0xff]   ;;  %v17828_v8 = vld [vmem:[#allocation2 + $0x2e0] sm:$0xff] }
 0x3fa   : > { %16216 = vmatmul.mubr.bf16.vlgmr.msra.gmra.mrb[16].mxu1 %v20314_v12  ;;  %v17577_v49 = vld [vmem:[#allocation7 + $0x1e0] sm:$0xff]  }
 0x3fb   : > { %v14607_v29 = vpop.f32.mrb[240].mxu0  ;;  %15128 = vmatpush3.bf16.msra.mxu1 %v17563_v46  ;;  %16219 = vmatprep.mubr.bf16.mxu1 %v17826_v63  ;;  %v20318_v58 = vadd.f32 %v16633_v60, %v20273_v24  ;;  %v8140_v46 = vld [vmem:[#allocation2 + $0x208] sm:$0xff]  ;;  %v17566_v26 = vld [vmem:[#allocation7] sm:$0xff]  }
 0x3fc   : > { %v14608_v23 = vpop.f32.mrb[241].mxu0  ;;  %15129 = vmatprep.subr.bf16.mxu1 %v17565_v27  ;;  %v17568_v60 = vld [vmem:[#allocation7 + $0x48] sm:$0xff]  }
 0x3fd   : > { %v14609_v10 = vadd.f32 %v14608_v23, %v14607_v29  ;;  %v14610_v51 = vpop.f32.mrb[242].mxu0  ;;  %v14699_v18 = vpop.f32.mrb[200].mxu1  ;;  %v8143_v29 = vld [vmem:[#allocation2 + $0x220] sm:$0xff] }
 0x3fe   : > { %v14611_v42 = vpop.f32.mrb[243].mxu0  ;;  %v14700_v20 = vpop.f32.mrb[201].mxu1 }
 0x3ff   : > { %v16642_v40 = vadd.f32 %v14609_v10, %v20020_v61  ;;  %v14612_v50 = vadd.f32 %v14611_v42, %v14610_v51  ;;  %v20321_v53 = vadd.f32 %v14700_v20, %v14699_v18  ;;  %v14702_v47 = vpop.f32.mrb[202].mxu1  ;;  %15130 = vmatpush3.bf16.msra.mxu1 %v17567_v5  ;;  %v17570_v42 = vld [vmem:[#allocation7 + $0x8] sm:$0xff]  }
 0x400   : > { %8440 = vmatmul.mubr.bf16.gmra.mrb[76].mxu0 %v8156_v19  ;;  %v14703_v24 = vpop.f32.mrb[203].mxu1  ;;  %15131 = vmatprep.subr.bf16.mxu1 %v17569_v28  ;;  %v17581_v19 = vld [vmem:[#allocation7 + $0x1e8] sm:$0xff]  }
 0x401   : > { %v16648_v2 = vadd.f32 %v14612_v50, %v20027_v34  ;;  %16151 = vmatprep.mubr.bf16.mxu0 %v8137_v52  ;;  %v20324_v48 = vadd.f32 %v14703_v24, %v14702_v47  ;;  %v20327_v6 = vadd.f32 %v16642_v40, %v20286_v17  ;;  %v17829_v40 = vld [vmem:[#allocation2 + $0x2f8] sm:$0xff]  ;;  %v17583_v47 = vld [vmem:[#allocation7 + $0x1a8] sm:$0xff]  }
 0x402   : > { %16220 = vmatmul.mubr.bf16.gmra.mrb[20].mxu1 %v17827_v54 }
 0x403   : > { %v14613_v61 = vpop.f32.mrb[244].mxu0  ;;  %15132 = vmatpush3.bf16.msra.mxu1 %v17571_v59  ;;  %16223 = vmatprep.mubr.bf16.mxu1 %v17828_v8  ;;  %v20330_v37 = vadd.f32 %v16648_v2, %v20292_v16  ;;  %v17579_v16 = vld [vmem:[#allocation7 + $0x1a0] sm:$0xff]   ;;  %v17830_v59 = vld [vmem:[#allocation2 + $0x310] sm:$0xff] }
 0x404   : > { %v14614_v4 = vpop.f32.mrb[245].mxu0  ;;  %15133 = vmatprep.subr.bf16.mxu1 %v17573_v39  ;;  %v17585_v39 = vld [vmem:[#allocation7 + $0x1f0] sm:$0xff]  }
 0x405   : > { %v14615_v34 = vadd.f32 %v14614_v4, %v14613_v61  ;;  %v14616_v25 = vpop.f32.mrb[246].mxu0  ;;  %v14705_v27 = vpop.f32.mrb[204].mxu1  ;;  %v17574_v61 = vld [vmem:[#allocation7 + $0x10] sm:$0xff]   ;;  %v17576_v4 = vld [vmem:[#allocation7 + $0x58] sm:$0xff]  }
 0x406   : > { %v14617_v17 = vpop.f32.mrb[247].mxu0  ;;  %v14706_v5 = vpop.f32.mrb[205].mxu1 }
 0x407   : > { %v16639_v63 = vadd.f32 %v14615_v34, %v20045_v15  ;;  %v14618_v23 = vadd.f32 %v14617_v17, %v14616_v25  ;;  %v20333_v28 = vadd.f32 %v14706_v5, %v14705_v27  ;;  %v14708_v10 = vpop.f32.mrb[206].mxu1  ;;  %15134 = vmatpush3.bf16.msra.mxu1 %v17575_v21  ;;  %v17572_v15 = vld [vmem:[#allocation7 + $0x50] sm:$0xff]   ;;  %v13269_v5 = vld [vmem:[%s18227_s6 + $0x80] sm:$0xff] }
 0x408   : > { %16152 = vmatmul.mubr.bf16.vlgmr.msra.gmra.mrb[32].mxu0 %v8140_v46  ;;  %v14709_v51 = vpop.f32.mrb[207].mxu1  ;;  %15135 = vmatprep.subr.bf16.mxu1 %v17577_v49  ;;  %v8149_v34 = vld [vmem:[#allocation2 + $0x250] sm:$0xff] }
 0x409   : > { %v16645_v18 = vadd.f32 %v14618_v23, %v20052_v31  ;;  %15048 = vmatpush3.bf16.msra.mxu0 %v17566_v26  ;;  %16155 = vmatprep.mubr.bf16.mxu0 %v8143_v29  ;;  %v20336_v52 = vadd.f32 %v14709_v51, %v14708_v10  ;;  %v20339_v20 = vadd.f32 %v16639_v63, %v20305_v36  ;;  %v8146_v36 = vld [vmem:[#allocation2 + $0x238] sm:$0xff]  ;;  %v13271_v26 = vld [vmem:[%s18227_s6 + $0x90] sm:$0xff]  ;;  %v9627_v10 = vld [vmem:[#allocation2 + $0x2a8] sm:$0xff] }
 0x40a   : > { %15049 = vmatprep.subr.bf16.mxu0 %v17568_v60  ;;  %16224 = vmatmul.mubr.bf16.gmra.mrb[24].mxu1 %v17829_v40  ;;  %v17587_v60 = vld [vmem:[#allocation7 + $0x1b0] sm:$0xff]   ;;  %v17589_v23 = vld [vmem:[#allocation7 + $0x1f8] sm:$0xff]   ;;  %v17831_v40 = vld [vmem:[#allocation2 + $0x328] sm:$0xff] }
 0x40b   : > { %v14619_v50 = vpop.f32.mrb[248].mxu0  ;;  %15136 = vmatpush3.bf16.msra.mxu1 %v17579_v16  ;;  %16227 = vmatprep.mubr.bf16.mxu1 %v17830_v59  ;;  %v20342_v24 = vadd.f32 %v16645_v18, %v20309_v13  ;;  %v17578_v16 = vld [vmem:[#allocation7 + $0x18] sm:$0xff]  }
 0x40c   : > { %v14620_v31 = vpop.f32.mrb[249].mxu0  ;;  %15137 = vmatprep.subr.bf16.mxu1 %v17581_v19  ;;  %v13272_v51 = vld [vmem:[%s18227_s6 + $0x98] sm:$0xff] }
 0x40d   : > { %v14621_v2 = vadd.f32 %v14620_v31, %v14619_v50  ;;  %v14622_v54 = vpop.f32.mrb[250].mxu0  ;;  %15050 = vmatpush3.bf16.msra.mxu0 %v17570_v42  ;;  %v16057_v21 = vpop.f32.mrb[160].mxu1  ;;  %v17580_v42 = vld [vmem:[#allocation7 + $0x60] sm:$0xff]   ;;  %v17591_v31 = vld [vmem:[#allocation7 + $0x1b8] sm:$0xff]  }
 0x40e   : > { %v14623_v8 = vpop.f32.mrb[251].mxu0  ;;  %15051 = vmatprep.subr.bf16.mxu0 %v17572_v15  ;;  %v16617_v49 = vadd.f32 %v20276_v57, %v16057_v21  ;;  %v6624_v25 = vpop.f32.mrb[161].mxu1  ;;  %v13270_v15 = vld [vmem:[%s18227_s6 + $0x88] sm:$0xff]  ;;  %v17582_v21 = vld [vmem:[#allocation7 + $0x20] sm:$0xff]  }
 0x40f   : > { %v16654_v13 = vadd.f32 %v14621_v2, %v20069_v32  ;;  %v14624_v46 = vadd.f32 %v14623_v8, %v14622_v54  ;;  %v16620_v27 = vadd.f32 %v20262_v9, %v6624_v25  ;;  %v16058_v17 = vpop.f32.mrb[162].mxu1  ;;  %15138 = vmatpush3.bf16.msra.mxu1 %v17583_v47  ;;  %v17593_v54 = vld [vmem:[#allocation7 + $0x200] sm:$0xff]  }
 0x410   : > { %16156 = vmatmul.mubr.bf16.gmra.mrb[36].mxu0 %v8146_v36  ;;  %v6705_v29 = vadd.f32 %v16617_v49, %v20164_v56  ;;  %v16623_v63 = vadd.f32 %v20281_v35, %v16058_v17  ;;  %v6627_v57 = vpop.f32.mrb[163].mxu1  ;;  %15139 = vmatprep.subr.bf16.mxu1 %v17585_v39 }
 0x411   : > { %v16660_v32 = vadd.f32 %v14624_v46, %v20076_v3  ;;  %15052 = vmatpush3.bf16.msra.mxu0 %v17574_v61  ;;  %16159 = vmatprep.mubr.bf16.mxu0 %v8149_v34  ;;  %v6703_v9 = vadd.f32 %v16620_v27, %v20164_v56  ;;  %v16626_v19 = vadd.f32 %v20267_v41, %v6627_v57  ;;  %v8152_v61 = vld [vmem:[#allocation2 + $0x268] sm:$0xff]  ;;  %v9630_v57 = vld [vmem:[#allocation2 + $0x2c0] sm:$0xff] }
 0x412   : > { %15053 = vmatprep.subr.bf16.mxu0 %v17576_v4  ;;  %v6721_v18 = vadd.f32 %v13271_v26, %v6705_v29  ;;  %v6706_v35 = vadd.f32 %v16623_v63, %v20164_v56  ;;  %16228 = vmatmul.mubr.bf16.gmra.mrb[28].mxu1 %v17831_v40  ;;  %v20358_v50 = vadd.f32 %v16654_v13, %v20321_v53  ;;  %v13275_v26 = vld [vmem:[%s18227_s6 + $0xb0] sm:$0xff] }
 0x413   : > { %v14625_v3 = vpop.f32.mrb[252].mxu0  ;;  %v6719_v47 = vadd.f32 %v13269_v5, %v6703_v9  ;;  %v6704_v59 = vadd.f32 %v16626_v19, %v20164_v56  ;;  %15140 = vmatpush3.bf16.msra.mxu1 %v17587_v60  ;;  %9874 = vmatprep.mubr.bf16.mxu1 %v9627_v10  ;;  %v20362_v41 = vadd.f32 %v16660_v32, %v20324_v48  ;;  %v17584_v48 = vld [vmem:[#allocation7 + $0x68] sm:$0xff]   ;;  %v9626_v60 = vld [vmem:[#allocation2 + $0x2a0] sm:$0xff]  ;;  %v13276_v32 = vld [vmem:[%s18227_s6 + $0xb8] sm:$0xff] }
 0x414   : > { %v14626_v39 = vpop.f32.mrb[253].mxu0  ;;  %13359 = vst [vmem:[%s20181_s30 + $0x90] sm:$0xff] %v6721_v18  ;;  %v6722_v2 = vadd.f32 %v13272_v51, %v6706_v35  ;;  %15141 = vmatprep.subr.bf16.mxu1 %v17589_v23  ;;  %v13273_v5 = vld [vmem:[%s18227_s6 + $0xa0] sm:$0xff]  ;;  %v17586_v10 = vld [vmem:[#allocation7 + $0x28] sm:$0xff]   ;;  %v17596_v40 = vld [vmem:[#allocation7 + $0x210] sm:$0xff]  }
 0x415   : > { %v14627_v36 = vadd.f32 %v14626_v39, %v14625_v3  ;;  %v14628_v53 = vpop.f32.mrb[254].mxu0  ;;  %15054 = vmatpush3.bf16.msra.mxu0 %v17578_v16  ;;  %13357 = vst [vmem:[%s20181_s30 + $0x80] sm:$0xff] %v6719_v47  ;;  %v6720_v8 = vadd.f32 %v13270_v15, %v6704_v59  ;;  %v16061_v4 = vpop.f32.mrb[164].mxu1  ;;  %v13274_v19 = vld [vmem:[%s18227_s6 + $0xa8] sm:$0xff] }
 0x416   : > { %v14629_v49 = vpop.f32.mrb[255].mxu0  ;;  %15055 = vmatprep.subr.bf16.mxu0 %v17580_v42  ;;  %13360 = vst [vmem:[%s20181_s30 + $0x98] sm:$0xff] %v6722_v2  ;;  %v16629_v34 = vadd.f32 %v20312_v55, %v16061_v4  ;;  %v6640_v25 = vpop.f32.mrb[165].mxu1 }
 0x417   : > { %v16651_v13 = vadd.f32 %v14627_v36, %v20092_v11  ;;  %v14630_v46 = vadd.f32 %v14629_v49, %v14628_v53  ;;  %13358 = vst [vmem:[%s20181_s30 + $0x88] sm:$0xff] %v6720_v8  ;;  %v16632_v27 = vadd.f32 %v20295_v43, %v6640_v25  ;;  %v16062_v17 = vpop.f32.mrb[166].mxu1  ;;  %15142 = vmatpush3.bf16.msra.mxu1 %v17591_v31  ;;  %v17595_v11 = vld [vmem:[#allocation7 + $0x208] sm:$0xff]   ;;  %v13279_v36 = vld [vmem:[%s18227_s6 + $0xd0] sm:$0xff]  ;;  %v13277_v49 = vld [vmem:[%s18227_s6 + $0xc0] sm:$0xff] }
 0x418   : > { %16160 = vmatmul.mubr.bf16.gmra.mrb[40].mxu0 %v8152_v61  ;;  %v6709_v29 = vadd.f32 %v16629_v34, %v20164_v56  ;;  %v16635_v63 = vadd.f32 %v20318_v58, %v16062_v17  ;;  %v6643_v55 = vpop.f32.mrb[167].mxu1  ;;  %16231 = vmatprep.subr.bf16.mxu1 %v17593_v54  ;;  %v17588_v58 = vld [vmem:[#allocation7 + $0x70] sm:$0xff]   ;;  %v9633_v34 = vld [vmem:[#allocation2 + $0x2d8] sm:$0xff] }
 0x419   : > { %v16657_v23 = vadd.f32 %v14630_v46, %v20100_v45  ;;  %15056 = vmatpush3.bf16.msra.mxu0 %v17582_v21  ;;  %16163 = vmatprep.mubr.bf16.mxu0 %v20288_v33  ;;  %v6707_v43 = vadd.f32 %v16632_v27, %v20164_v56  ;;  %v16638_v16 = vadd.f32 %v20300_v1, %v6643_v55  ;;  %v9629_v21 = vld [vmem:[#allocation2 + $0x2b8] sm:$0xff] }
 0x41a   : > { %15057 = vmatprep.subr.bf16.mxu0 %v17584_v48  ;;  %v6725_v9 = vadd.f32 %v13275_v26, %v6709_v29  ;;  %v6710_v51 = vadd.f32 %v16635_v63, %v20164_v56  ;;  %9875 = vmatmul.mubr.bf16.vlgmr.msra.gmra.mrb[32].mxu1 %v9626_v60  ;;  %v20383_v45 = vadd.f32 %v16651_v13, %v20333_v28  ;;  %v17590_v28 = vld [vmem:[#allocation7 + $0x30] sm:$0xff]   ;;  %v17597_v25 = vld [vmem:[#allocation7 + $0x218] sm:$0xff]  }
 0x41b   : > { %v6723_v18 = vadd.f32 %v13273_v5, %v6707_v43  ;;  %v6708_v33 = vadd.f32 %v16638_v16, %v20164_v56  ;;  %16232 = vmatpush3.bf16.msra.mxu1 %v17593_v54  ;;  %9882 = vmatprep.mubr.bf16.mxu1 %v9630_v57  ;;  %v14743_v42 = vpop.f32.mrb[0].mxu0  ;;  %v20387_v1 = vadd.f32 %v16657_v23, %v20336_v52  ;;  %v17592_v52 = vld [vmem:[#allocation7 + $0x78] sm:$0xff]   ;;  %v13283_v43 = vld [vmem:[%s18227_s6 + $0xf0] sm:$0xff] }
 0x41c   : > { %13363 = vst [vmem:[%s20181_s30 + $0xb0] sm:$0xff] %v6725_v9  ;;  %v6726_v35 = vadd.f32 %v13276_v32, %v6710_v51  ;;  %16233 = vmatprep.subr.bf16.mxu1 %v17595_v11  ;;  %v14744_v15 = vpop.f32.mrb[1].mxu0  ;;  %v13280_v46 = vld [vmem:[%s18227_s6 + $0xd8] sm:$0xff]  ;;  %v9632_v9 = vld [vmem:[#allocation2 + $0x2d0] sm:$0xff]  ;;  %v17832_v51 = vld [vmem:[%s21497_s4] ss:$0 sm:$0xff] }
 0x41d   : > { %15058 = vmatpush3.bf16.msra.mxu0 %v17586_v10  ;;  %13361 = vst [vmem:[%s20181_s30 + $0xa0] sm:$0xff] %v6723_v18  ;;  %v6724_v3 = vadd.f32 %v13274_v19, %v6708_v33  ;;  %v16065_v47 = vpop.f32.mrb[168].mxu1  ;;  %v20391_v59 = vadd.f32 %v14744_v15, %v14743_v42  ;;  %v14746_v31 = vpop.f32.mrb[2].mxu0  ;;  %v9636_v42 = vld [vmem:[#allocation2 + $0x2f0] sm:$0xff] }
 0x41e   : > { %15059 = vmatprep.subr.bf16.mxu0 %v17588_v58  ;;  %13364 = vst [vmem:[%s20181_s30 + $0xb8] sm:$0xff] %v6726_v35  ;;  %v16641_v39 = vadd.f32 %v20339_v20, %v16065_v47  ;;  %v6656_v2 = vpop.f32.mrb[169].mxu1  ;;  %v14747_v54 = vpop.f32.mrb[3].mxu0  ;;  %v17833_v35 = vld [vmem:[#allocation2 + $0x290] sm:$0xff]  ;;  %v13282_v47 = vld [vmem:[%s18227_s6 + $0xe8] sm:$0xff] }
 0x41f   : > { %13362 = vst [vmem:[%s20181_s30 + $0xa8] sm:$0xff] %v6724_v3  ;;  %v16644_v53 = vadd.f32 %v20327_v6, %v6656_v2  ;;  %v16066_v61 = vpop.f32.mrb[170].mxu1  ;;  %16234 = vmatpush3.bf16.msra.mxu1 %v17595_v11  ;;  %v20398_v8 = vadd.f32 %v14747_v54, %v14746_v31  ;;  %v17594_v6 = vld [vmem:[#allocation7 + $0x38] sm:$0xff]   ;;  %v17600_v54 = vld [vmem:[#allocation7 + $0x230] sm:$0xff]  }
 0x420   : > { %16164 = vmatmul.mubr.bf16.gmra.mrb[44].mxu0 %v20314_v12  ;;  %v6713_v4 = vadd.f32 %v16641_v39, %v20164_v56  ;;  %v16647_v20 = vadd.f32 %v20342_v24, %v16066_v61  ;;  %v6659_v48 = vpop.f32.mrb[171].mxu1  ;;  %16235 = vmatprep.subr.bf16.mxu1 %v17596_v40  ;;  %v13278_v24 = vld [vmem:[%s18227_s6 + $0xc8] sm:$0xff] }
 0x421   : > { %15060 = vmatpush3.bf16.msra.mxu0 %v17590_v28  ;;  %9464 = vmatprep.mubr.bf16.mxu0 %v20283_v44  ;;  %v6711_v13 = vadd.f32 %v16644_v53, %v20164_v56  ;;  %v16650_v12 = vadd.f32 %v20330_v37, %v6659_v48  ;;  %v17598_v37 = vld [vmem:[#allocation7 + $0x220] sm:$0xff]   ;;  %v9635_v48 = vld [vmem:[#allocation2 + $0x2e8] sm:$0xff] }
 0x422   : > { %15061 = vmatprep.subr.bf16.mxu0 %v17592_v52  ;;  %v6729_v26 = vadd.f32 %v13279_v36, %v6713_v4  ;;  %v6714_v27 = vadd.f32 %v16647_v20, %v20164_v56  ;;  %9883 = vmatmul.mubr.bf16.gmra.mrb[36].mxu1 %v9629_v21 }
 0x423   : > { %v6727_v17 = vadd.f32 %v13277_v49, %v6711_v13  ;;  %v6712_v60 = vadd.f32 %v16650_v12, %v20164_v56  ;;  %9890 = vmatprep.mubr.bf16.mxu1 %v9633_v34  ;;  %16236 = vmatpush3.bf16.msra.mxu1 %v17596_v40  ;;  %v14749_v29 = vpop.f32.mrb[4].mxu0  ;;  %v13284_v40 = vld [vmem:[%s18227_s6 + $0xf8] sm:$0xff]  ;;  %v9639_v13 = vld [vmem:[#allocation2 + $0x308] sm:$0xff] }
 0x424   : > { %13367 = vst [vmem:[%s20181_s30 + $0xd0] sm:$0xff] %v6729_v26  ;;  %v6730_v44 = vadd.f32 %v13280_v46, %v6714_v27  ;;  %v14750_v5 = vpop.f32.mrb[5].mxu0  ;;  %16237 = vmatprep.subr.bf16.mxu1 %v17597_v25  ;;  %v17601_v46 = vld [vmem:[#allocation7 + $0x238] sm:$0xff]   ;;  %v17835_v12 = vld [vmem:[#allocation2 + $0x2a8] sm:$0xff] }
 0x425   : > { %15062 = vmatpush3.bf16.msra.mxu0 %v17594_v6  ;;  %13365 = vst [vmem:[%s20181_s30 + $0xc0] sm:$0xff] %v6727_v17  ;;  %v6728_v63 = vadd.f32 %v13278_v24, %v6712_v60  ;;  %v16069_v55 = vpop.f32.mrb[172].mxu1  ;;  %v20413_v57 = vadd.f32 %v14750_v5, %v14749_v29  ;;  %v14752_v11 = vpop.f32.mrb[6].mxu0 }
 0x426   : > { %13368 = vst [vmem:[%s20181_s30 + $0xd8] sm:$0xff] %v6730_v44  ;;  %v16653_v56 = vadd.f32 %v20383_v45, %v16069_v55  ;;  %v6672_v23 = vpop.f32.mrb[173].mxu1  ;;  %v14753_v10 = vpop.f32.mrb[7].mxu0  ;;  %v13281_v45 = vld [vmem:[%s18227_s6 + $0xe0] sm:$0xff] }
 0x427   : > { %13366 = vst [vmem:[%s20181_s30 + $0xc8] sm:$0xff] %v6728_v63  ;;  %v16656_v32 = vadd.f32 %v20358_v50, %v6672_v23  ;;  %v16070_v16 = vpop.f32.mrb[174].mxu1  ;;  %v20420_v58 = vadd.f32 %v14753_v10, %v14752_v11  ;;  %16238 = vmatpush3.bf16.msra.mxu1 %v17597_v25  ;;  %v17599_v50 = vld [vmem:[#allocation7 + $0x228] sm:$0xff]   ;;  %v17836_v23 = vld [vmem:[#allocation2 + $0x2a0] sm:$0xff] }
 0x428   : > { %9465 = vmatmul.mubr.bf16.vlgmr.msra.gmra.mrb[80].mxu0 %v20302_v38  ;;  %v6717_v19 = vadd.f32 %v17832_v51, %v16653_v56  ;;  %v16659_v18 = vadd.f32 %v20387_v1, %v16070_v16  ;;  %v6675_v33 = vpop.f32.mrb[175].mxu1  ;;  %16239 = vmatprep.subr.bf16.mxu1 %v17598_v37  ;;  %v17834_v25 = vld [vmem:[#allocation2 + $0x288] sm:$0xff]  ;;  %v9638_v56 = vld [vmem:[#allocation2 + $0x300] sm:$0xff] }
 0x429   : > { %9472 = vmatprep.mubr.bf16.mxu0 %v17833_v35  ;;  %v6715_v15 = vadd.f32 %v17832_v51, %v16656_v32  ;;  %v16662_v38 = vadd.f32 %v20362_v41, %v6675_v33 }
 0x42a   : > { %v6733_v28 = vadd.f32 %v13283_v43, %v6717_v19  ;;  %v6718_v3 = vadd.f32 %v17832_v51, %v16659_v18  ;;  %9891 = vmatmul.mubr.bf16.gmra.mrb[40].mxu1 %v9632_v9  ;;  %v17837_v43 = vld [vmem:[#allocation2 + $0x2c0] sm:$0xff] }
 0x42b   : > { %v6731_v31 = vadd.f32 %v13281_v45, %v6715_v15  ;;  %v6716_v52 = vadd.f32 %v17832_v51, %v16662_v38  ;;  %9898 = vmatprep.mubr.bf16.mxu1 %v9636_v42  ;;  %v14755_v1 = vpop.f32.mrb[8].mxu0  ;;  %16240 = vmatpush3.bf16.msra.mxu1 %v17598_v37 }
 0x42c   : > { %13371 = vst [vmem:[%s20181_s30 + $0xf0] sm:$0xff] %v6733_v28  ;;  %v6734_v39 = vadd.f32 %v13284_v40, %v6718_v3  ;;  %v14756_v2 = vpop.f32.mrb[9].mxu0  ;;  %16241 = vmatprep.subr.bf16.mxu1 %v17599_v50  ;;  %v9641_v40 = vld [vmem:[#allocation2 + $0x318] sm:$0xff] }
 0x42d   : > { %13369 = vst [vmem:[%s20181_s30 + $0xe0] sm:$0xff] %v6731_v31  ;;  %v6732_v36 = vadd.f32 %v13282_v47, %v6716_v52  ;;  %v14823_v53 = vpop.f32.mrb[208].mxu1  ;;  %v20433_v41 = vadd.f32 %v14756_v2, %v14755_v1  ;;  %v14758_v61 = vpop.f32.mrb[10].mxu0  ;;  %v17838_v28 = vld [vmem:[#allocation2 + $0x2b8] sm:$0xff] }
 0x42e   : > { %13372 = vst [vmem:[%s20181_s30 + $0xf8] sm:$0xff] %v6734_v39  ;;  %v14824_v21 = vpop.f32.mrb[209].mxu1  ;;  %v14759_v4 = vpop.f32.mrb[11].mxu0  ;;  %v9645_v3 = vld [vmem:[#allocation2 + $0x338] sm:$0xff] }
 0x42f   : > { %13370 = vst [vmem:[%s20181_s30 + $0xe8] sm:$0xff] %v6732_v36  ;;  %v14825_v49 = vadd.f32 %v14824_v21, %v14823_v53  ;;  %v14826_v20 = vpop.f32.mrb[210].mxu1  ;;  %v14760_v34 = vadd.f32 %v14759_v4, %v14758_v61  ;;  %16242 = vmatpush3.bf16.msra.mxu1 %v17599_v50  ;;  %v17839_v47 = vld [vmem:[#allocation2 + $0x2d8] sm:$0xff] }
 0x430   : > { %9473 = vmatmul.mubr.bf16.gmra.mrb[84].mxu0 %v17834_v25  ;;  %v14827_v6 = vpop.f32.mrb[211].mxu1  ;;  %16243 = vmatprep.subr.bf16.mxu1 %v17600_v54  ;;  %v17841_v25 = vld [vmem:[#allocation2 + $0x2f0] sm:$0xff] }
 0x431   : > { %9480 = vmatprep.mubr.bf16.mxu0 %v17835_v12  ;;  %v20438_v26 = vadd.f32 %v14825_v49, %v20391_v59  ;;  %v14828_v27 = vadd.f32 %v14827_v6, %v14826_v20  ;;  %v9644_v49 = vld [vmem:[#allocation2 + $0x330] sm:$0xff] }
 0x432   : > { %9899 = vmatmul.mubr.bf16.gmra.mrb[44].mxu1 %v9635_v48 }
 0x433   : > { %v20441_v24 = vadd.f32 %v14828_v27, %v20398_v8  ;;  %9906 = vmatprep.mubr.bf16.mxu1 %v9639_v13  ;;  %v14761_v17 = vpop.f32.mrb[12].mxu0  ;;  %16244 = vmatpush3.bf16.msra.mxu1 %v17600_v54  ;;  %v9642_v8 = vld [vmem:[#allocation2 + $0x320] sm:$0xff] }
 0x434   : > { %v14762_v60 = vpop.f32.mrb[13].mxu0  ;;  %16245 = vmatprep.subr.bf16.mxu1 %v17601_v46 }
 0x435   : > { %v14829_v29 = vpop.f32.mrb[212].mxu1  ;;  %v14763_v44 = vadd.f32 %v14762_v60, %v14761_v17  ;;  %v14764_v5 = vpop.f32.mrb[14].mxu0 }
 0x436   : > { %v14830_v37 = vpop.f32.mrb[213].mxu1  ;;  %v14765_v63 = vpop.f32.mrb[15].mxu0 }
 0x437   : > { %v14831_v55 = vadd.f32 %v14830_v37, %v14829_v29  ;;  %v14832_v11 = vpop.f32.mrb[214].mxu1  ;;  %v14766_v59 = vadd.f32 %v14765_v63, %v14764_v5  ;;  %16246 = vmatpush3.bf16.msra.mxu1 %v17601_v46  ;;  %v20462_v46 = vld [vmem:[#allocation2 + $0x8] sm:$0xff] }
 0x438   : > { %9481 = vmatmul.mubr.bf16.gmra.mrb[88].mxu0 %v17836_v23  ;;  %v14833_v10 = vpop.f32.mrb[215].mxu1  ;;  %v9647_v37 = vld [vmem:[#allocation2 + $0x348] sm:$0xff]  ;;  %v17604_v23 = vld [vmem:[#allocation9 + $0xc0] sm:$0xff]  }
 0x439   : > { %9488 = vmatprep.mubr.bf16.mxu0 %v17837_v43  ;;  %v20444_v32 = vadd.f32 %v14831_v55, %v20413_v57  ;;  %v14834_v16 = vadd.f32 %v14833_v10, %v14832_v11  ;;  %v17843_v10 = vld [vmem:[#allocation2 + $0x2e8] sm:$0xff]  ;;  %v9628_v43 = vld [vmem:[#allocation2 + $0x2b0] sm:$0xff] }
 0x43a   : > { %9907 = vmatmul.mubr.bf16.gmra.mrb[64].mxu1 %v9638_v56  ;;  %v17602_v56 = vld [vmem:[#allocation9 + $0x100] sm:$0xff]  }
 0x43b   : > { %v20447_v9 = vadd.f32 %v14834_v16, %v20420_v58  ;;  %9914 = vmatprep.mubr.bf16.mxu1 %v9642_v8  ;;  %v14767_v51 = vpop.f32.mrb[16].mxu0  ;;  %v17844_v16 = vld [vmem:[#allocation2 + $0x308] sm:$0xff]  ;;  %15207 = vmatprep.subr.bf16.mxu0 %v17602_v56  ;;  %v17613_v56 = vld [vmem:[#allocation9 + $0x18] sm:$0xff]  }
 0x43c   : > { %v14768_v19 = vpop.f32.mrb[17].mxu0  ;;  %15208 = vmatpush3.bf16.msra.mxu0 %v17604_v23 }
 0x43d   : > { %v14835_v45 = vpop.f32.mrb[216].mxu1  ;;  %v14769_v18 = vadd.f32 %v14768_v19, %v14767_v51  ;;  %v14770_v33 = vpop.f32.mrb[18].mxu0 }
 0x43e   : > { %v14836_v42 = vpop.f32.mrb[217].mxu1  ;;  %v14771_v50 = vpop.f32.mrb[19].mxu0 }
 0x43f   : > { %v14837_v35 = vadd.f32 %v14836_v42, %v14835_v45  ;;  %v14838_v15 = vpop.f32.mrb[218].mxu1  ;;  %v14772_v38 = vadd.f32 %v14771_v50, %v14770_v33 }
 0x440   : > { %9489 = vmatmul.mubr.bf16.gmra.mrb[92].mxu0 %v17838_v28  ;;  %v14839_v57 = vpop.f32.mrb[219].mxu1  ;;  %v9631_v28 = vld [vmem:[#allocation2 + $0x2c8] sm:$0xff] }
 0x441   : > { %9496 = vmatprep.mubr.bf16.mxu0 %v17839_v47  ;;  %v20450_v58 = vadd.f32 %v14837_v35, %v20433_v41  ;;  %v14840_v31 = vadd.f32 %v14839_v57, %v14838_v15  ;;  %v17840_v41 = vld [vmem:[#allocation2 + $0x2d0] sm:$0xff] }
 0x442   : > { %9915 = vmatmul.mubr.bf16.gmra.mrb[68].mxu1 %v9641_v40 }
 0x443   : > { %v20452_v52 = vadd.f32 %v14840_v31, %v14760_v34  ;;  %9922 = vmatprep.mubr.bf16.mxu1 %v9645_v3  ;;  %v14773_v1 = vpop.f32.mrb[20].mxu0  ;;  %v17605_v31 = vld [vmem:[#allocation9] sm:$0xff]  }
 0x444   : > { %v14774_v39 = vpop.f32.mrb[21].mxu0 }
 0x445   : > { %v14841_v2 = vpop.f32.mrb[220].mxu1  ;;  %v20454_v54 = vadd.f32 %v14774_v39, %v14773_v1  ;;  %v14776_v36 = vpop.f32.mrb[22].mxu0  ;;  %v17608_v1 = vld [vmem:[#allocation9 + $0x108] sm:$0xff]  }
 0x446   : > { %v14842_v53 = vpop.f32.mrb[221].mxu1  ;;  %v14777_v61 = vpop.f32.mrb[23].mxu0  ;;  %v17610_v39 = vld [vmem:[#allocation9 + $0xc8] sm:$0xff]   ;;  %15209 = vmatprep.subr.bf16.mxu0 %v17608_v1  ;;  %v6784_v1 = vld [vmem:[#allocation3 + $0x1d0] sm:$0x1] }
 0x447   : > { %v14843_v21 = vadd.f32 %v14842_v53, %v14841_v2  ;;  %v14844_v4 = vpop.f32.mrb[222].mxu1  ;;  %v20456_v20 = vadd.f32 %v14777_v61, %v14776_v36  ;;  %v9634_v36 = vld [vmem:[#allocation2 + $0x2e0] sm:$0xff]  ;;  %v17606_v53 = vld [vmem:[#allocation9 + $0x48] sm:$0xff]   ;;  %15210 = vmatpush3.bf16.msra.mxu0 %v17610_v39  ;;  %v6787_v39 = vld [vmem:[#allocation3 + $0x1d8] sm:$0x1] }
 0x448   : > { %9497 = vmatmul.mubr.bf16.gmra.mrb[96].mxu0 %v17840_v41  ;;  %v14845_v48 = vpop.f32.mrb[223].mxu1  ;;  %v17846_v61 = vld [vmem:[#allocation2 + $0x320] sm:$0xff]  ;;  %v17607_v41 = vld [vmem:[#allocation9 + $0x8] sm:$0xff]  }
 0x449   : > { %9504 = vmatprep.mubr.bf16.mxu0 %v17841_v25  ;;  %v20458_v34 = vadd.f32 %v14843_v21, %v14763_v44  ;;  %v14846_v6 = vadd.f32 %v14845_v48, %v14844_v4  ;;  %v17609_v48 = vld [vmem:[#allocation9 + $0x50] sm:$0xff]  }
 0x44a   : > { %9923 = vmatmul.mubr.bf16.gmra.mrb[72].mxu1 %v9644_v49 }
 0x44b   : > { %v20460_v13 = vadd.f32 %v14846_v6, %v14766_v59  ;;  %9930 = vmatprep.mubr.bf16.mxu1 %v20462_v46  ;;  %v14779_v12 = vpop.f32.mrb[24].mxu0  ;;  %v17603_v59 = vld [vmem:[#allocation9 + $0x40] sm:$0xff]  }
 0x44c   : > { %v14780_v27 = vpop.f32.mrb[25].mxu0  ;;  %15287 = vmatprep.subr.bf16.mxu1 %v17603_v59  ;;  %v17615_v59 = vld [vmem:[#allocation9 + $0x60] sm:$0xff]  }
 0x44d   : > { %v14847_v17 = vpop.f32.mrb[224].mxu1  ;;  %v20465_v60 = vadd.f32 %v14780_v27, %v14779_v12  ;;  %v14782_v29 = vpop.f32.mrb[26].mxu0 }
 0x44e   : > { %v14848_v5 = vpop.f32.mrb[225].mxu1  ;;  %v14783_v63 = vpop.f32.mrb[27].mxu0 }
 0x44f   : > { %v14849_v55 = vadd.f32 %v14848_v5, %v14847_v17  ;;  %v14850_v44 = vpop.f32.mrb[226].mxu1  ;;  %v20467_v11 = vadd.f32 %v14783_v63, %v14782_v29  ;;  %v9637_v17 = vld [vmem:[#allocation2 + $0x2f8] sm:$0xff] }
 0x450   : > { %9505 = vmatmul.mubr.bf16.gmra.mrb[100].mxu0 %v17843_v10  ;;  %v14851_v8 = vpop.f32.mrb[227].mxu1  ;;  %v17847_v29 = vld [vmem:[#allocation2 + $0x318] sm:$0xff] }
 0x451   : > { %9512 = vmatprep.mubr.bf16.mxu0 %v17844_v16  ;;  %v20469_v51 = vadd.f32 %v14849_v55, %v14769_v18  ;;  %v14852_v19 = vadd.f32 %v14851_v8, %v14850_v44  ;;  %v17612_v63 = vld [vmem:[#allocation9 + $0x58] sm:$0xff]   ;;  %v17614_v8 = vld [vmem:[#allocation9 + $0x110] sm:$0xff]  }
 0x452   : > { %9931 = vmatmul.mubr.bf16.gmra.mrb[76].mxu1 %v9647_v37  ;;  %v9640_v37 = vld [vmem:[#allocation2 + $0x310] sm:$0xff]  ;;  %15211 = vmatprep.subr.bf16.mxu0 %v17614_v8  ;;  %v17632_v8 = vld [vmem:[#allocation9 + $0x138] sm:$0xff]  }
 0x453   : > { %v20471_v45 = vadd.f32 %v14852_v19, %v14772_v38  ;;  %16247 = vmatprep.mubr.bf16.mxu1 %v9628_v43  ;;  %v14785_v33 = vpop.f32.mrb[28].mxu0  ;;  %v17845_v38 = vld [vmem:[#allocation2 + $0x300] sm:$0xff]  ;;  %v9643_v19 = vld [vmem:[#allocation2 + $0x328] sm:$0xff] }
 0x454   : > { %v14786_v42 = vpop.f32.mrb[29].mxu0 }
 0x455   : > { %v14853_v50 = vpop.f32.mrb[228].mxu1  ;;  %v20473_v35 = vadd.f32 %v14786_v42, %v14785_v33  ;;  %v14788_v15 = vpop.f32.mrb[30].mxu0  ;;  %v17616_v33 = vld [vmem:[#allocation9 + $0xd0] sm:$0xff]  }
 0x456   : > { %v14854_v40 = vpop.f32.mrb[229].mxu1  ;;  %v14789_v57 = vpop.f32.mrb[31].mxu0  ;;  %15212 = vmatpush3.bf16.msra.mxu0 %v17616_v33 }
 0x457   : > { %v14855_v3 = vadd.f32 %v14854_v40, %v14853_v50  ;;  %v14856_v18 = vpop.f32.mrb[230].mxu1  ;;  %v20475_v47 = vadd.f32 %v14789_v57, %v14788_v15  ;;  %v9646_v50 = vld [vmem:[#allocation2 + $0x340] sm:$0xff] }
 0x458   : > { %9513 = vmatmul.mubr.bf16.gmra.mrb[104].mxu0 %v17845_v38  ;;  %v14857_v2 = vpop.f32.mrb[231].mxu1 }
 0x459   : > { %9520 = vmatprep.mubr.bf16.mxu0 %v17846_v61  ;;  %v20478_v21 = vadd.f32 %v14855_v3, %v20454_v54  ;;  %v14858_v4 = vadd.f32 %v14857_v2, %v14856_v18  ;;  %v17611_v54 = vld [vmem:[#allocation9 + $0x10] sm:$0xff]   ;;  %v17619_v3 = vld [vmem:[#allocation9 + $0x28] sm:$0xff]   ;;  %v17621_v18 = vld [vmem:[#allocation9 + $0xd8] sm:$0xff]   ;;  %v6785_v2 = vsel %vm18291_vm9, 0, %v6784_v1 }
 0x45a   : > { %16248 = vmatmul.mubr.bf16.vlgmr.msra.gmra.mrb[16].mxu1 %v9631_v28  ;;  %v17620_v28 = vld [vmem:[#allocation9 + $0x118] sm:$0xff]   ;;  %6786 = vst [vmem:[#allocation3 + $0x1d0] sm:$0x1] %v6785_v2  ;;  %v17624_v61 = vld [vmem:[#allocation9 + $0x120] sm:$0xff]  }
 0x45b   : > { %v20481_v49 = vadd.f32 %v14858_v4, %v20456_v20  ;;  %16251 = vmatprep.mubr.bf16.mxu1 %v9634_v36  ;;  %15288 = vmatpush3.bf16.msra.mxu1 %v17605_v31  ;;  %v6781_v31 = vld [vmem:[#allocation3 + $0x1c8] sm:$0x1]  ;;  %v17622_v36 = vld [vmem:[#allocation9 + $0x70] sm:$0xff]  }
 0x45c   : > { %15289 = vmatprep.subr.bf16.mxu1 %v17606_v53  ;;  %15213 = vmatprep.subr.bf16.mxu0 %v17620_v28 }
 0x45d   : > { %v14859_v25 = vpop.f32.mrb[232].mxu1  ;;  %15214 = vmatpush3.bf16.msra.mxu0 %v17621_v18 }
 0x45e   : > { %v14860_v6 = vpop.f32.mrb[233].mxu1  ;;  %15215 = vmatprep.subr.bf16.mxu0 %v17624_v61 }
 0x45f   : > { %v14861_v12 = vadd.f32 %v14860_v6, %v14859_v25  ;;  %v14862_v27 = vpop.f32.mrb[234].mxu1  ;;  %15290 = vmatpush3.bf16.msra.mxu1 %v17607_v41  ;;  %v17625_v25 = vld [vmem:[#allocation9 + $0xe0] sm:$0xff]  }
 0x460   : > { %9521 = vmatmul.mubr.bf16.gmra.mrb[108].mxu0 %v17847_v29  ;;  %v14863_v5 = vpop.f32.mrb[235].mxu1  ;;  %15291 = vmatprep.subr.bf16.mxu1 %v17609_v48  ;;  %v17623_v48 = vld [vmem:[#allocation9 + $0x30] sm:$0xff]   ;;  %v17629_v29 = vld [vmem:[#allocation9 + $0xe8] sm:$0xff]  }
 0x461   : > { %v20484_v20 = vadd.f32 %v14861_v12, %v20465_v60  ;;  %v14864_v55 = vadd.f32 %v14863_v5, %v14862_v27  ;;  %v17617_v60 = vld [vmem:[#allocation9 + $0x20] sm:$0xff]   ;;  %v17626_v12 = vld [vmem:[#allocation9 + $0x78] sm:$0xff]   ;;  %15216 = vmatpush3.bf16.msra.mxu0 %v17625_v25 }
 0x462   : > { %16252 = vmatmul.mubr.bf16.gmra.mrb[20].mxu1 %v9637_v17  ;;  %v17628_v17 = vld [vmem:[#allocation9 + $0x128] sm:$0xff]   ;;  %v17636_v25 = vld [vmem:[#allocation9 + $0xc0] sm:$0xff]  }
 0x463   : > { %v20487_v44 = vadd.f32 %v14864_v55, %v20467_v11  ;;  %16255 = vmatprep.mubr.bf16.mxu1 %v9640_v37  ;;  %15292 = vmatpush3.bf16.msra.mxu1 %v17611_v54  ;;  %v17618_v11 = vld [vmem:[#allocation9 + $0x68] sm:$0xff]   ;;  %v17627_v54 = vld [vmem:[#allocation9 + $0x38] sm:$0xff]  }
 0x464   : > { %15293 = vmatprep.subr.bf16.mxu1 %v17612_v63  ;;  %15217 = vmatprep.subr.bf16.mxu0 %v17628_v17  ;;  %v17630_v63 = vld [vmem:[#allocation9 + $0x130] sm:$0xff]  }
 0x465   : > { %v14865_v23 = vpop.f32.mrb[236].mxu1  ;;  %15218 = vmatpush3.bf16.msra.mxu0 %v17629_v29 }
 0x466   : > { %v14866_v10 = vpop.f32.mrb[237].mxu1  ;;  %15219 = vmatprep.subr.bf16.mxu0 %v17630_v63 }
 0x467   : > { %v14867_v43 = vadd.f32 %v14866_v10, %v14865_v23  ;;  %v14868_v16 = vpop.f32.mrb[238].mxu1  ;;  %15294 = vmatpush3.bf16.msra.mxu1 %v17613_v56 }
 0x468   : > { %v14869_v42 = vpop.f32.mrb[239].mxu1  ;;  %15295 = vmatprep.subr.bf16.mxu1 %v17615_v59  ;;  %v17631_v59 = vld [vmem:[#allocation9 + $0xf0] sm:$0xff]  }
 0x469   : > { %v20490_v15 = vadd.f32 %v14867_v43, %v20473_v35  ;;  %v14870_v40 = vadd.f32 %v14869_v42, %v14868_v16  ;;  %v6782_v35 = vsel %vm18291_vm9, 0, %v6781_v31  ;;  %15220 = vmatpush3.bf16.msra.mxu0 %v17631_v59  ;;  %v17633_v43 = vld [vmem:[#allocation9 + $0xf8] sm:$0xff]  }
 0x46a   : > { %16256 = vmatmul.mubr.bf16.gmra.mrb[24].mxu1 %v9643_v19  ;;  %6783 = vst [vmem:[#allocation3 + $0x1c8] sm:$0x1] %v6782_v35  ;;  %15221 = vmatprep.subr.bf16.mxu0 %v17632_v8 }
 0x46b   : > { %v20493_v57 = vadd.f32 %v14870_v40, %v20475_v47  ;;  %16259 = vmatprep.mubr.bf16.mxu1 %v9646_v50  ;;  %15296 = vmatpush3.bf16.msra.mxu1 %v17617_v60  ;;  %v6788_v47 = vsel %vm18291_vm9, 0, %v6787_v39 }
 0x46c   : > { %15297 = vmatprep.subr.bf16.mxu1 %v17618_v11  ;;  %6789 = vst [vmem:[#allocation3 + $0x1d8] sm:$0x1] %v6788_v47  ;;  %v20524_v47 = vld [vmem:[#allocation9 + $0x140] sm:$0xff]  }
 0x46d   : > { %v14983_v38 = vpop.f32.mrb[240].mxu1  ;;  %15222 = vmatpush3.bf16.msra.mxu0 %v17633_v43 }
 0x46e   : > { %v14984_v53 = vpop.f32.mrb[241].mxu1  ;;  %16263 = vmatprep.subr.bf16.mxu0 %v20524_v47 }
 0x46f   : > { %v20501_v4 = vadd.f32 %v14984_v53, %v14983_v38  ;;  %v14986_v41 = vpop.f32.mrb[242].mxu1  ;;  %15298 = vmatpush3.bf16.msra.mxu1 %v17619_v3 }
 0x470   : > { %v14987_v6 = vpop.f32.mrb[243].mxu1  ;;  %15299 = vmatprep.subr.bf16.mxu1 %v17622_v36 }
 0x471   : > { %v20503_v27 = vadd.f32 %v14987_v6, %v14986_v41 }
 0x472   : > { %16260 = vmatmul.mubr.bf16.gmra.mrb[28].mxu1 %v20462_v46 }
 0x473   : > { %15300 = vmatpush3.bf16.msra.mxu1 %v17623_v48  ;;  %10971 = vmatprep.mubr.bf16.mxu1 %v20462_v46  ;;  %v17635_v48 = vld [vmem:[#allocation9 + $0x100] sm:$0xff]  }
 0x474   : > { %15301 = vmatprep.subr.bf16.mxu1 %v17626_v12 }
 0x475   : > { %v14989_v5 = vpop.f32.mrb[244].mxu1 }
 0x476   : > { %v14990_v37 = vpop.f32.mrb[245].mxu1 }
 0x477   : > { %v20507_v55 = vadd.f32 %v14990_v37, %v14989_v5  ;;  %v14992_v56 = vpop.f32.mrb[246].mxu1  ;;  %15302 = vmatpush3.bf16.msra.mxu1 %v17627_v54 }
 0x478   : > { %v14993_v23 = vpop.f32.mrb[247].mxu1  ;;  %15447 = vmatprep.subr.bf16.mxu1 %v17635_v48  ;;  %v17642_v48 = vld [vmem:[#allocation9 + $0x110] sm:$0xff]  }
 0x479   : > { %v20509_v10 = vadd.f32 %v14993_v23, %v14992_v56 }
 0x47a   : > { %10972 = vmatmul.mubr.bf16.vlgmr.msra.gmra.mrb[80].mxu1 %v20462_v46 }
 0x47b   : > { %15448 = vmatpush3.bf16.msra.mxu1 %v17636_v25  ;;  %v17643_v25 = vld [vmem:[#allocation9 + $0xd0] sm:$0xff]  }
 0x47d   : > { %v14995_v16 = vpop.f32.mrb[248].mxu1 }
 0x47e   : > { %v14996_v19 = vpop.f32.mrb[249].mxu1 }
 0x47f   : > { %v20512_v33 = vadd.f32 %v14996_v19, %v14995_v16  ;;  %v14998_v60 = vpop.f32.mrb[250].mxu1  ;;  %v17638_v16 = vld [vmem:[#allocation9 + $0x108] sm:$0xff]  }
 0x480   : > { %v14999_v42 = vpop.f32.mrb[251].mxu1  ;;  %v17639_v19 = vld [vmem:[#allocation9 + $0xc8] sm:$0xff]   ;;  %15449 = vmatprep.subr.bf16.mxu1 %v17638_v16 }
 0x481   : > { %v20514_v50 = vadd.f32 %v14999_v42, %v14998_v60  ;;  %15450 = vmatpush3.bf16.msra.mxu1 %v17639_v19 }
 0x482   : > { %15451 = vmatprep.subr.bf16.mxu1 %v17642_v48 }
 0x485   : > { %v15001_v11 = vpop.f32.mrb[252].mxu1  ;;  %15452 = vmatpush3.bf16.msra.mxu1 %v17643_v25 }
 0x486   : > { %v15002_v40 = vpop.f32.mrb[253].mxu1 }
 0x487   : > { %v20516_v28 = vadd.f32 %v15002_v40, %v15001_v11  ;;  %v15004_v3 = vpop.f32.mrb[254].mxu1 }
 0x488   : > { %v15005_v18 = vpop.f32.mrb[255].mxu1 }
 0x489   : > { %v20518_v31 = vadd.f32 %v15005_v18, %v15004_v3 }
 0x48d   : > { %v15007_v46 = vpop.f32.mrb[0].mxu1 }
 0x48e   : > { %v15008_v1 = vpop.f32.mrb[1].mxu1 }
 0x48f   : > { %v20520_v39 = vadd.f32 %v15008_v1, %v15007_v46  ;;  %v15010_v38 = vpop.f32.mrb[2].mxu1 }
 0x490   : > { %v15011_v35 = vpop.f32.mrb[3].mxu1 }
 0x491   : > { %v20522_v2 = vadd.f32 %v15011_v35, %v15010_v38 }
 0x495   : > { %v15013_v36 = vpop.f32.mrb[4].mxu1 }
 0x496   : > { %v15014_v53 = vpop.f32.mrb[5].mxu1 }
 0x497   : > { %v20527_v61 = vadd.f32 %v15014_v53, %v15013_v36  ;;  %v15016_v41 = vpop.f32.mrb[6].mxu1 }
 0x498   : > { %v15017_v6 = vpop.f32.mrb[7].mxu1 }
 0x499   : > { %v20529_v12 = vadd.f32 %v15017_v6, %v15016_v41 }
 0x49b   : > { %v14903_v17 = vpop.f32.mrb[48].mxu0 }
 0x49c   : > { %v14904_v54 = vpop.f32.mrb[49].mxu0 }
 0x49d   : > { %v14905_v29 = vadd.f32 %v14904_v54, %v14903_v17  ;;  %v14906_v5 = vpop.f32.mrb[50].mxu0  ;;  %v15019_v37 = vpop.f32.mrb[8].mxu1 }
 0x49e   : > { %v14907_v63 = vpop.f32.mrb[51].mxu0  ;;  %v15020_v56 = vpop.f32.mrb[9].mxu1 }
 0x49f   : > { %v14908_v59 = vadd.f32 %v14907_v63, %v14906_v5  ;;  %v20531_v23 = vadd.f32 %v15020_v56, %v15019_v37  ;;  %v15022_v8 = vpop.f32.mrb[10].mxu1  ;;  %v20534_v43 = vadd.f32 %v20438_v26, %v14905_v29 }
 0x4a0   : > { %v15023_v60 = vpop.f32.mrb[11].mxu1 }
 0x4a1   : > { %v20536_v42 = vadd.f32 %v15023_v60, %v15022_v8  ;;  %v20539_v11 = vadd.f32 %v20441_v24, %v14908_v59  ;;  %v17647_v8 = vld [vmem:[#allocation9 + $0xd8] sm:$0xff]  }
 0x4a3   : > { %21693 = vst [vmem:[#allocation34_spill] sm:$0xff] %v20536_v42  ;;  %v14909_v40 = vpop.f32.mrb[52].mxu0 }
 0x4a4   : > { %v14910_v3 = vpop.f32.mrb[53].mxu0 }
 0x4a5   : > { %v14911_v18 = vadd.f32 %v14910_v3, %v14909_v40  ;;  %v14912_v46 = vpop.f32.mrb[54].mxu0  ;;  %v15025_v1 = vpop.f32.mrb[12].mxu1 }
 0x4a6   : > { %v14913_v38 = vpop.f32.mrb[55].mxu0  ;;  %v15026_v35 = vpop.f32.mrb[13].mxu1 }
 0x4a7   : > { %v14914_v36 = vadd.f32 %v14913_v38, %v14912_v46  ;;  %v20541_v26 = vadd.f32 %v15026_v35, %v15025_v1  ;;  %v15028_v53 = vpop.f32.mrb[14].mxu1  ;;  %v20544_v41 = vadd.f32 %v20444_v32, %v14911_v18  ;;  %v17646_v32 = vld [vmem:[#allocation9 + $0x118] sm:$0xff]   ;;  %v17650_v1 = vld [vmem:[#allocation9 + $0x120] sm:$0xff]  }
 0x4a8   : > { %v15029_v24 = vpop.f32.mrb[15].mxu1  ;;  %15453 = vmatprep.subr.bf16.mxu1 %v17646_v32  ;;  %v17651_v38 = vld [vmem:[#allocation9 + $0xe0] sm:$0xff]  }
 0x4a9   : > { %21694 = vst [vmem:[#allocation35_spill] sm:$0xff] %v20541_v26  ;;  %v20546_v6 = vadd.f32 %v15029_v24, %v15028_v53  ;;  %v20549_v17 = vadd.f32 %v20447_v9, %v14914_v36  ;;  %15454 = vmatpush3.bf16.msra.mxu1 %v17647_v8 }
 0x4aa   : > { %15455 = vmatprep.subr.bf16.mxu1 %v17650_v1  ;;  %v17662_v1 = vld [vmem:[#allocation9 + $0x138] sm:$0xff]  }
 0x4ab   : > { %21695 = vst [vmem:[#allocation36_spill] sm:$0xff] %v20546_v6  ;;  %v14915_v54 = vpop.f32.mrb[56].mxu0 }
 0x4ac   : > { %v14916_v29 = vpop.f32.mrb[57].mxu0 }
 0x4ad   : > { %v14917_v5 = vadd.f32 %v14916_v29, %v14915_v54  ;;  %v14918_v37 = vpop.f32.mrb[58].mxu0  ;;  %15456 = vmatpush3.bf16.msra.mxu1 %v17651_v38  ;;  %v17655_v29 = vld [vmem:[#allocation9 + $0xe8] sm:$0xff]  }
 0x4ae   : > { %v14919_v63 = vpop.f32.mrb[59].mxu0 }
 0x4af   : > { %v14920_v56 = vadd.f32 %v14919_v63, %v14918_v37  ;;  %v20552_v59 = vadd.f32 %v20450_v58, %v14917_v5 }
 0x4b1   : > { %v20555_v16 = vadd.f32 %v20452_v52, %v14920_v56 }
 0x4b3   : > { %v14921_v9 = vpop.f32.mrb[60].mxu0 }
 0x4b4   : > { %v14922_v19 = vpop.f32.mrb[61].mxu0 }
 0x4b5   : > { %v14923_v60 = vadd.f32 %v14922_v19, %v14921_v9  ;;  %v14924_v40 = vpop.f32.mrb[62].mxu0 }
 0x4b6   : > { %v14925_v3 = vpop.f32.mrb[63].mxu0 }
 0x4b7   : > { %v14926_v18 = vadd.f32 %v14925_v3, %v14924_v40  ;;  %v20558_v46 = vadd.f32 %v20458_v34, %v14923_v60  ;;  %v17654_v34 = vld [vmem:[#allocation9 + $0x128] sm:$0xff]  }
 0x4b8   : > { %15457 = vmatprep.subr.bf16.mxu1 %v17654_v34 }
 0x4b9   : > { %v20561_v58 = vadd.f32 %v20460_v13, %v14926_v18  ;;  %15458 = vmatpush3.bf16.msra.mxu1 %v17655_v29 }
 0x4bb   : > { %v14927_v52 = vpop.f32.mrb[64].mxu0 }
 0x4bc   : > { %v14928_v35 = vpop.f32.mrb[65].mxu0 }
 0x4bd   : > { %v14929_v36 = vadd.f32 %v14928_v35, %v14927_v52  ;;  %v14930_v53 = vpop.f32.mrb[66].mxu0  ;;  %v17663_v35 = vld [vmem:[#allocation9 + $0xf8] sm:$0xff]  }
 0x4be   : > { %v14931_v48 = vpop.f32.mrb[67].mxu0 }
 0x4bf   : > { %v14932_v25 = vadd.f32 %v14931_v48, %v14930_v53  ;;  %v20564_v24 = vadd.f32 %v20469_v51, %v14929_v36  ;;  %v17658_v51 = vld [vmem:[#allocation9 + $0x130] sm:$0xff]  }
 0x4c0   : > { %15459 = vmatprep.subr.bf16.mxu1 %v17658_v51 }
 0x4c1   : > { %v20567_v54 = vadd.f32 %v20471_v45, %v14932_v25  ;;  %v17659_v45 = vld [vmem:[#allocation9 + $0xf0] sm:$0xff]  }
 0x4c2   : > { %15460 = vmatpush3.bf16.msra.mxu1 %v17659_v45 }
 0x4c3   : > { %v14933_v5 = vpop.f32.mrb[68].mxu0  ;;  %15461 = vmatprep.subr.bf16.mxu1 %v17662_v1 }
 0x4c4   : > { %v14934_v37 = vpop.f32.mrb[69].mxu0 }
 0x4c5   : > { %v14935_v13 = vadd.f32 %v14934_v37, %v14933_v5  ;;  %v14936_v63 = vpop.f32.mrb[70].mxu0  ;;  %v6796_v37 = vld [vmem:[#allocation3 + $0x340] sm:$0x80] }
 0x4c6   : > { %v14937_v56 = vpop.f32.mrb[71].mxu0  ;;  %15462 = vmatpush3.bf16.msra.mxu1 %v17663_v35 }
 0x4c7   : > { %v14938_v32 = vadd.f32 %v14937_v56, %v14936_v63  ;;  %v20570_v8 = vadd.f32 %v20478_v21, %v14935_v13 }
 0x4c9   : > { %v20573_v9 = vadd.f32 %v20481_v49, %v14938_v32 }
 0x4cb   : > { %v14939_v19 = vpop.f32.mrb[72].mxu0 }
 0x4cc   : > { %v14940_v60 = vpop.f32.mrb[73].mxu0 }
 0x4cd   : > { %v14941_v40 = vadd.f32 %v14940_v60, %v14939_v19  ;;  %v14942_v3 = vpop.f32.mrb[74].mxu0 }
 0x4ce   : > { %v14943_v18 = vpop.f32.mrb[75].mxu0 }
 0x4cf   : > { %v14944_v38 = vadd.f32 %v14943_v18, %v14942_v3  ;;  %v20576_v52 = vadd.f32 %v20484_v20, %v14941_v40  ;;  %v6793_v20 = vld [vmem:[#allocation3 + $0x338] sm:$0x80] }
 0x4d0   : > { %v6794_v13 = vsel %vm18469_vm6, 0, %v6793_v20 }
 0x4d1   : > { %v20579_v21 = vadd.f32 %v20487_v44, %v14944_v38  ;;  %v6797_v44 = vsel %vm18469_vm6, 0, %v6796_v37  ;;  %6795 = vst [vmem:[#allocation3 + $0x338] sm:$0x80] %v6794_v13 }
 0x4d2   : > { %6798 = vst [vmem:[#allocation3 + $0x340] sm:$0x80] %v6797_v44 }
 0x4d3   : > { %v14945_v49 = vpop.f32.mrb[76].mxu0 }
 0x4d4   : > { %v14946_v36 = vpop.f32.mrb[77].mxu0 }
 0x4d5   : > { %v14947_v53 = vadd.f32 %v14946_v36, %v14945_v49  ;;  %v14948_v48 = vpop.f32.mrb[78].mxu0  ;;  %v6790_v49 = vld [vmem:[#allocation3 + $0x330] sm:$0x80]  ;;  %v21696_v36 = vld [vmem:[#allocation25_spill] sm:$0xff] }
 0x4d6   : > { %v14949_v25 = vpop.f32.mrb[79].mxu0 }
 0x4d7   : > { %v14950_v34 = vadd.f32 %v14949_v25, %v14948_v48  ;;  %v20582_v29 = vadd.f32 %v20490_v15, %v14947_v53 }
 0x4d9   : > { %v20585_v5 = vadd.f32 %v20493_v57, %v14950_v34  ;;  %v20596_v57 = vld [vmem:[%s21495_s2] ss:$0 sm:$0xff] }
 0x4db   : > { %v16153_v63 = vpop.f32.mrb[32].mxu0 }
 0x4dc   : > { %v16665_v56 = vadd.f32 %v20544_v41, %v16153_v63  ;;  %v8482_v32 = vpop.f32.mrb[33].mxu0 }
 0x4dd   : > { %v16668_v15 = vadd.f32 %v20534_v43, %v8482_v32  ;;  %v16154_v51 = vpop.f32.mrb[34].mxu0 }
 0x4de   : > { %v8563_v19 = vadd.f32 %v20596_v57, %v16665_v56  ;;  %v16671_v45 = vadd.f32 %v20549_v17, %v16154_v51  ;;  %v8485_v60 = vpop.f32.mrb[35].mxu0  ;;  %v6791_v17 = vsel %vm18469_vm6, 0, %v6790_v49  ;;  %v21698_v56 = vld [vmem:[#allocation14_spill] sm:$0xff] }
 0x4df   : > { %v8561_v40 = vadd.f32 %v20596_v57, %v16668_v15  ;;  %v16674_v3 = vadd.f32 %v20539_v11, %v8485_v60  ;;  %v21697_v11 = vld [vmem:[#allocation15_spill] sm:$0xff]  ;;  %6792 = vst [vmem:[#allocation3 + $0x330] sm:$0x80] %v6791_v17 }
 0x4e0   : > { %v8579_v18 = vmax.f32 %v8563_v19, 0.0  ;;  %v8564_v41 = vadd.f32 %v20596_v57, %v16671_v45  ;;  %v20614_v45 = vld [vmem:[#allocation9 + $0x140] sm:$0xff]  }
 0x4e1   : > { %v8577_v1 = vmax.f32 %v8561_v40, 0.0  ;;  %v8562_v43 = vadd.f32 %v20596_v57, %v16674_v3  ;;  %21699 = vst [vmem:[#allocation46_spill] sm:$0xff] %v20614_v45  ;;  %16359 = vmatprep.subr.bf16.mxu1 %v20614_v45 }
 0x4e2   : > { %v8720_v38 = vmul.f32 %v21640_v22, %v8579_v18  ;;  %v8580_v35 = vmax.f32 %v8564_v41, 0.0 }
 0x4e3   : > { %v8718_v53 = vmul.f32 %v21696_v36, %v8577_v1  ;;  %v8578_v48 = vmax.f32 %v8562_v43, 0.0  ;;  %v16157_v25 = vpop.f32.mrb[36].mxu0 }
 0x4e4   : > { %v20608_v34 = vpack.c.bf16 %v8580_v35, %v8579_v18  ;;  %v8612_v20 = vmul.f32 %v21697_v11, %v8580_v35  ;;  %v8735_v37 = vpack.c.bf16 %v8580_v35, %v8720_v38  ;;  %v16677_v13 = vadd.f32 %v20558_v46, %v16157_v25  ;;  %v8498_v44 = vpop.f32.mrb[37].mxu0  ;;  %v17641_v11 = vld [vmem:[#allocation9 + $0x158] sm:$0xff]  }
 0x4e5   : > { %v8593_v63 = vpack.c.bf16 %v8578_v48, %v8577_v1  ;;  %v8610_v32 = vmul.f32 %v21698_v56, %v8578_v48  ;;  %v8734_v15 = vpack.c.bf16 %v8578_v48, %v8718_v53  ;;  %v16680_v51 = vadd.f32 %v20552_v59, %v8498_v44  ;;  %v16158_v19 = vpop.f32.mrb[38].mxu0  ;;  %v8814_v48 = vld [vmem:[#allocation3 + $0x1c0] sm:$0x80] }
 0x4e6   : > { %8602 = vst [vmem:[#allocation3 + $0x1e8] sm:$0xff] %v20608_v34  ;;  %v8626_v60 = vpack.c.bf16 %v8612_v20, %v8579_v18  ;;  %v8750_v40 = vshll.u32 %v8735_v37, 16  ;;  %v8567_v3 = vadd.f32 %v20596_v57, %v16677_v13  ;;  %v8501_v41 = vpop.f32.mrb[39].mxu0  ;;  %v8754_v43 = vshrl.u32 %v8735_v37, 16 }
 0x4e7   : > { %8601 = vst [vmem:[#allocation3 + $0x1d0] sm:$0xff] %v8593_v63  ;;  %v8625_v46 = vpack.c.bf16 %v8610_v32, %v8577_v1  ;;  %v8743_v38 = vshll.u32 %v8734_v15, 16  ;;  %v8565_v35 = vadd.f32 %v20596_v57, %v16680_v51  ;;  %10633 = vmatprep.mubr.bf16.mxu0 %v8593_v63  ;;  %10979 = vmatprep.mubr.bf16.mxu1 %v8593_v63  ;;  %v8746_v53 = vshrl.u32 %v8734_v15, 16 }
 0x4e8   : > { %v8641_v49 = vshrl.u32 %v8626_v60, 16  ;;  %v8752_v59 = vrot.slane %v8750_v40, 1  ;;  %v8583_v25 = vmax.f32 %v8567_v3, 0.0  ;;  %v8644_v18 = vshll.u32 %v8626_v60, 16 }
 0x4e9   : > { %v8634_v17 = vshrl.u32 %v8625_v46, 16  ;;  %v8745_v20 = vrot.slane %v8743_v38, 1  ;;  %v20620_v13 = vmax.f32 %v8565_v35, 0.0  ;;  %v8637_v44 = vshll.u32 %v8625_v46, 16  ;;  %v8705_v38 = vld [vmem:[#allocation3 + $0x1c8] sm:$0xff] }
 0x4ea   : > { %v20622_v37 = vrot.slane %v8641_v49, 7  ;;  %v20624_v1 = vor.u32 %v8754_v43, %v8752_v59  ;;  %v16683_v32 = vadd.f32 %v20561_v58, %v16158_v19  ;;  %v8724_v40 = vmul.f32 %v18509_v30, %v8583_v25 }
 0x4eb   : > { %v8636_v63 = vrot.slane %v8634_v17, 7  ;;  %v8748_v51 = vor.u32 %v8746_v53, %v8745_v20  ;;  %v8815_v15 = vsel %vm18469_vm6, %v8745_v20, %v8814_v48  ;;  %v16161_v3 = vpop.f32.mrb[40].mxu0  ;;  %v16686_v43 = vadd.f32 %v20555_v16, %v8501_v41  ;;  %v21700_v53 = vld [vmem:[#allocation18_spill] sm:$0xff] }
 0x4ec   : > { %v8646_v60 = vor.u32 %v8644_v18, %v20622_v37  ;;  %8816 = vst [vmem:[#allocation3 + $0x1c0] sm:$0x80] %v8815_v15  ;;  %v8568_v35 = vadd.f32 %v20596_v57, %v16683_v32  ;;  %v16689_v46 = vadd.f32 %v20570_v8, %v16161_v3  ;;  %v8514_v49 = vpop.f32.mrb[41].mxu0  ;;  %v8722_v48 = vmul.f32 %v21700_v53, %v20620_v13 }
 0x4ed   : > { %v8639_v58 = vor.u32 %v8637_v44, %v8636_v63  ;;  %v20635_v19 = vsel %vm821_vm3, %v8748_v51, %v8752_v59  ;;  %v16692_v17 = vadd.f32 %v20564_v24, %v8514_v49  ;;  %v16162_v20 = vpop.f32.mrb[42].mxu0  ;;  %v20640_v18 = vpop.f32.mrb[32].mxu1  ;;  %v8566_v8 = vadd.f32 %v20596_v57, %v16686_v43 }
 0x4ee   : > { %v20643_v15 = vsel %vm587_vm5, %v8636_v63, %v8646_v60  ;;  %8817 = vst [vmem:[#allocation3 + $0x1d8] sm:$0xff] %v20635_v19  ;;  %v8584_v16 = vmax.f32 %v8568_v35, 0.0  ;;  %v8571_v41 = vadd.f32 %v20596_v57, %v16689_v46  ;;  %v8517_v59 = vpop.f32.mrb[43].mxu0  ;;  %v20648_v44 = vpop.f32.mrb[33].mxu1  ;;  %v16695_v63 = vadd.f32 %v20573_v9, %v16162_v20  ;;  %v17637_v35 = vld [vmem:[#allocation9 + $0x148] sm:$0xff]  }
 0x4ef   : > { %v8706_v51 = vsel %vm18365_vm0, %v8639_v58, %v8705_v38  ;;  %8708 = vst [vmem:[#allocation3 + $0x1e0] sm:$0xff] %v20643_v15  ;;  %v8569_v24 = vadd.f32 %v20596_v57, %v16692_v17  ;;  %v16698_v3 = vadd.f32 %v20567_v54, %v8517_v59  ;;  %v20656_v60 = vpop.f32.mrb[34].mxu1  ;;  %v21702_v46 = vld [vmem:[#allocation19_spill] sm:$0xff]  ;;  %v8582_v53 = vmax.f32 %v8566_v8, 0.0  ;;  %v21703_v8 = vld [vmem:[#allocation17_spill] sm:$0xff] }
 0x4f0   : > { %8707 = vst [vmem:[#allocation3 + $0x1c8] sm:$0xff] %v8706_v51  ;;  %v20658_v43 = vpack.c.bf16 %v8584_v16, %v8583_v25  ;;  %v8616_v49 = vmul.f32 %v21702_v46, %v8584_v16  ;;  %v8737_v45 = vpack.c.bf16 %v8584_v16, %v8724_v40  ;;  %10634 = vmatmul.mubr.bf16.vlgmr.msra.gmra.mrb[112].mxu0 %v8706_v51  ;;  %v20661_v38 = vpop.f32.mrb[35].mxu1  ;;  %v8587_v58 = vmax.f32 %v8571_v41, 0.0 }
 0x4f1   : > { %10980 = vmatmul.mubr.bf16.gmra.mrb[84].mxu1 %v8706_v51  ;;  %v8585_v17 = vmax.f32 %v8569_v24, 0.0  ;;  %v8572_v9 = vadd.f32 %v20596_v57, %v16695_v63  ;;  %v8570_v54 = vadd.f32 %v20596_v57, %v16698_v3  ;;  %10641 = vmatprep.mubr.bf16.mxu0 %v20608_v34  ;;  %v8595_v16 = vpack.c.bf16 %v8582_v53, %v20620_v13 }
 0x4f2   : > { %10987 = vmatprep.mubr.bf16.mxu1 %v20608_v34  ;;  %8604 = vst [vmem:[#allocation3 + $0x218] sm:$0xff] %v20658_v43  ;;  %v8628_v20 = vpack.c.bf16 %v8616_v49, %v8583_v25  ;;  %v8766_v59 = vshll.u32 %v8737_v45, 16  ;;  %v8770_v40 = vshrl.u32 %v8737_v45, 16  ;;  %16264 = vmatpush3.bf16.msra.mxu0 %v20524_v47  ;;  %v8614_v41 = vmul.f32 %v21703_v8, %v8582_v53  ;;  %v17640_v34 = vld [vmem:[#allocation9 + $0x150] sm:$0xff]  }
 0x4f3   : > { %v8736_v51 = vpack.c.bf16 %v8582_v53, %v8722_v48  ;;  %v8728_v24 = vmul.f32 %v21615_v7, %v8587_v58  ;;  %v20673_v63 = vmul.f32 %v18527_v14, %v8585_v17  ;;  %v20675_v3 = vpop.f32.mrb[44].mxu0  ;;  %16265 = vmatprep.subr.bf16.mxu0 %v17637_v35  ;;  %8603 = vst [vmem:[#allocation3 + $0x200] sm:$0xff] %v8595_v16  ;;  %v8588_v45 = vmax.f32 %v8572_v9, 0.0 }
 0x4f4   : > { %v8657_v46 = vshrl.u32 %v8628_v20, 16  ;;  %v8660_v25 = vshll.u32 %v8628_v20, 16  ;;  %v8768_v49 = vrot.slane %v8766_v59, 1  ;;  %v8530_v32 = vpop.f32.mrb[45].mxu0  ;;  %v8627_v47 = vpack.c.bf16 %v8614_v41, %v20620_v13  ;;  %v21704_v20 = vld [vmem:[#allocation22_spill] sm:$0xff] }
 0x4f5   : > { %v8758_v62 = vshll.u32 %v8736_v51, 16  ;;  %v8762_v8 = vshrl.u32 %v8736_v51, 16  ;;  %v8586_v53 = vmax.f32 %v8570_v54, 0.0  ;;  %v20678_v48 = vpop.f32.mrb[46].mxu0  ;;  %v20680_v7 = vpop.f32.mrb[36].mxu1  ;;  %v20686_v6 = vpack.c.bf16 %v8588_v45, %v8587_v58 }
 0x4f6   : > { %v20682_v14 = vrot.slane %v8657_v46, 7  ;;  %v20684_v30 = vor.u32 %v8770_v40, %v8768_v49  ;;  %v8620_v59 = vmul.f32 %v21704_v20, %v8588_v45  ;;  %v8533_v56 = vpop.f32.mrb[47].mxu0  ;;  %v20689_v9 = vpop.f32.mrb[37].mxu1  ;;  %16266 = vmatpush3.bf16.msra.mxu0 %v17637_v35  ;;  %v8649_v13 = vshrl.u32 %v8627_v47, 16  ;;  %v21705_v20 = vld [vmem:[#allocation20_spill] sm:$0xff] }
 0x4f7   : > { %v8652_v41 = vshll.u32 %v8627_v47, 16  ;;  %v8760_v51 = vrot.slane %v8758_v62, 1  ;;  %v8739_v54 = vpack.c.bf16 %v8588_v45, %v8728_v24  ;;  %v20691_v26 = vpop.f32.mrb[38].mxu1  ;;  %16267 = vmatprep.subr.bf16.mxu0 %v17640_v34  ;;  %8606 = vst [vmem:[#allocation3 + $0x248] sm:$0xff] %v20686_v6  ;;  %v20695_v36 = vpack.c.bf16 %v8586_v53, %v8585_v17 }
 0x4f8   : > { %v8662_v46 = vor.u32 %v8660_v25, %v20682_v14  ;;  %v8630_v40 = vpack.c.bf16 %v8620_v59, %v8587_v58  ;;  %v8618_v22 = vmul.f32 %v21705_v20, %v8586_v53  ;;  %10642 = vmatmul.mubr.bf16.gmra.mrb[116].mxu0 %v20643_v15  ;;  %v20699_v35 = vpop.f32.mrb[39].mxu1  ;;  %v8651_v47 = vrot.slane %v8649_v13, 7 }
 0x4f9   : > { %v20703_v62 = vsel %vm821_vm3, %v20624_v1, %v8760_v51  ;;  %v8764_v24 = vor.u32 %v8762_v8, %v8760_v51  ;;  %v8782_v45 = vshll.u32 %v8739_v54, 16  ;;  %10988 = vmatmul.mubr.bf16.gmra.mrb[88].mxu1 %v20643_v15  ;;  %10649 = vmatprep.mubr.bf16.mxu0 %v8595_v16  ;;  %v8786_v59 = vshrl.u32 %v8739_v54, 16  ;;  %8605 = vst [vmem:[#allocation3 + $0x230] sm:$0xff] %v20695_v36  ;;  %v17644_v51 = vld [vmem:[#allocation9 + $0x160] sm:$0xff]  }
 0x4fa   : > { %8818 = vst [vmem:[#allocation3 + $0x1f0] sm:$0xff] %v20703_v62  ;;  %v8673_v58 = vshrl.u32 %v8630_v40, 16  ;;  %v8676_v25 = vshll.u32 %v8630_v40, 16  ;;  %v8629_v20 = vpack.c.bf16 %v8618_v22, %v8585_v17  ;;  %10995 = vmatprep.mubr.bf16.mxu1 %v8595_v16  ;;  %16268 = vmatpush3.bf16.msra.mxu0 %v17640_v34  ;;  %v8654_v13 = vor.u32 %v8652_v41, %v8651_v47 }
 0x4fb   : > { %v20709_v42 = vsel %vm587_vm5, %v8651_v47, %v8662_v46  ;;  %v20712_v1 = vsel %vm821_vm3, %v8764_v24, %v8768_v49  ;;  %v8784_v8 = vrot.slane %v8782_v45, 1  ;;  %v15063_v15 = vpop.f32.mrb[80].mxu0  ;;  %16269 = vmatprep.subr.bf16.mxu0 %v17641_v11  ;;  %v8738_v16 = vpack.c.bf16 %v8586_v53, %v20673_v63 }
 0x4fc   : > { %21706 = vst [vmem:[#allocation47_spill] sm:$0xff] %v20712_v1  ;;  %8710 = vst [vmem:[#allocation3 + $0x210] sm:$0xff] %v20709_v42  ;;  %v20716_v54 = vrot.slane %v8673_v58, 7  ;;  %v8665_v22 = vshrl.u32 %v8629_v20, 16  ;;  %v8668_v17 = vshll.u32 %v8629_v20, 16  ;;  %v15064_v34 = vpop.f32.mrb[81].mxu0  ;;  %v8655_v41 = vsel %vm587_vm5, %v20622_v37, %v8654_v13 }
 0x4fd   : > { %8819 = vst [vmem:[#allocation3 + $0x208] sm:$0xff] %v20712_v1  ;;  %v20721_v49 = vor.u32 %v8786_v59, %v8784_v8  ;;  %v16701_v46 = vadd.f32 %v20582_v29, %v20675_v3  ;;  %v16704_v40 = vadd.f32 %v20576_v52, %v8530_v32  ;;  %v15066_v47 = vpop.f32.mrb[82].mxu0  ;;  %v20726_v24 = vpop.f32.mrb[40].mxu1  ;;  %8709 = vst [vmem:[#allocation3 + $0x1f8] sm:$0xff] %v8655_v41  ;;  %v8774_v58 = vshll.u32 %v8738_v16, 16 }
 0x4fe   : > { %v8678_v45 = vor.u32 %v8676_v25, %v20716_v54  ;;  %v8667_v20 = vrot.slane %v8665_v22, 7  ;;  %v8778_v63 = vshrl.u32 %v8738_v16, 16  ;;  %v15067_v53 = vpop.f32.mrb[83].mxu0  ;;  %v20729_v1 = vpop.f32.mrb[41].mxu1  ;;  %16270 = vmatpush3.bf16.msra.mxu0 %v17641_v11  ;;  %v16707_v52 = vadd.f32 %v20585_v5, %v20678_v48  ;;  %v17645_v16 = vld [vmem:[#allocation9 + $0x168] sm:$0xff]  }
 0x4ff   : > { %v8575_v37 = vadd.f32 %v20596_v57, %v16701_v46  ;;  %v8573_v59 = vadd.f32 %v20596_v57, %v16704_v40  ;;  %v16710_v29 = vadd.f32 %v20579_v21, %v8533_v56  ;;  %v20736_v32 = vpop.f32.mrb[42].mxu1  ;;  %16271 = vmatprep.subr.bf16.mxu0 %v17644_v51  ;;  %v8776_v13 = vrot.slane %v8774_v58, 1 }
 0x500   : > { %v8670_v3 = vor.u32 %v8668_v17, %v8667_v20  ;;  %v20739_v25 = vsel %vm587_vm5, %v8667_v20, %v8678_v45  ;;  %v20743_v11 = vadd.f32 %v20648_v44, %v20640_v18  ;;  %10650 = vmatmul.mubr.bf16.gmra.mrb[120].mxu0 %v8655_v41  ;;  %v20745_v22 = vpop.f32.mrb[43].mxu1  ;;  %v8576_v56 = vadd.f32 %v20596_v57, %v16707_v52  ;;  %v21708_v45 = vld [vmem:[#allocation31_spill] sm:$0xff] }
 0x501   : > { %8712 = vst [vmem:[#allocation3 + $0x240] sm:$0xff] %v20739_v25  ;;  %v8591_v5 = vmax.f32 %v8575_v37, 0.0  ;;  %v8589_v21 = vmax.f32 %v8573_v59, 0.0  ;;  %v8574_v48 = vadd.f32 %v20596_v57, %v16710_v29  ;;  %10996 = vmatmul.mubr.bf16.gmra.mrb[92].mxu1 %v8655_v41  ;;  %10657 = vmatprep.mubr.bf16.mxu0 %v20658_v43  ;;  %v20757_v18 = vsel %vm821_vm3, %v20684_v30, %v8776_v13  ;;  %v21707_v41 = vld [vmem:[#allocation32_spill] sm:$0xff] }
 0x502   : > { %v20753_v17 = vsel %vm587_vm5, %v20682_v14, %v8670_v3  ;;  %v8780_v44 = vor.u32 %v8778_v63, %v8776_v13  ;;  %v20761_v46 = vadd.f32 %v20661_v38, %v20656_v60  ;;  %11003 = vmatprep.mubr.bf16.mxu1 %v20658_v43  ;;  %8820 = vst [vmem:[#allocation3 + $0x220] sm:$0xff] %v20757_v18  ;;  %v8592_v20 = vmax.f32 %v8576_v56, 0.0  ;;  %v17648_v59 = vld [vmem:[#allocation9 + $0x170] sm:$0xff]  }
 0x503   : > { %8711 = vst [vmem:[#allocation3 + $0x228] sm:$0xff] %v20753_v17  ;;  %v8732_v40 = vmul.f32 %v21707_v41, %v8591_v5  ;;  %v8730_v14 = vmul.f32 %v21708_v45, %v8589_v21  ;;  %v8590_v58 = vmax.f32 %v8574_v48, 0.0  ;;  %v15069_v37 = vpop.f32.mrb[84].mxu0  ;;  %16272 = vmatpush3.bf16.msra.mxu0 %v17644_v51  ;;  %v15065_v63 = vadd.f32 %v15064_v34, %v15063_v15  ;;  %v21709_v29 = vld [vmem:[#allocation24_spill] sm:$0xff]  ;;  %v21710_v15 = vld [vmem:[#allocation23_spill] sm:$0xff] }
 0x504   : > { %v20769_v30 = vsel %vm821_vm3, %v8780_v44, %v8784_v8  ;;  %v15068_v60 = vadd.f32 %v15067_v53, %v15066_v47  ;;  %v20773_v43 = vadd.f32 %v20689_v9, %v20680_v7  ;;  %v15070_v38 = vpop.f32.mrb[85].mxu0  ;;  %16273 = vmatprep.subr.bf16.mxu0 %v17645_v16  ;;  %v20776_v52 = vpack.c.bf16 %v8592_v20, %v8591_v5 }
 0x505   : > { %8821 = vst [vmem:[#allocation3 + $0x238] sm:$0xff] %v20769_v30  ;;  %v8624_v3 = vmul.f32 %v21709_v29, %v8592_v20  ;;  %v8741_v13 = vpack.c.bf16 %v8592_v20, %v8732_v40  ;;  %v20779_v51 = vpack.c.bf16 %v8590_v58, %v8589_v21  ;;  %v15072_v8 = vpop.f32.mrb[86].mxu0  ;;  %v15161_v56 = vpop.f32.mrb[44].mxu1  ;;  %v8622_v34 = vmul.f32 %v21710_v15, %v8590_v58  ;;  %v17649_v15 = vld [vmem:[#allocation9 + $0x178] sm:$0xff]  }
 0x506   : > { %v8740_v47 = vpack.c.bf16 %v8590_v58, %v8730_v14  ;;  %v20783_v7 = vadd.f32 %v15065_v63, %v20501_v4  ;;  %v20786_v9 = vadd.f32 %v15068_v60, %v20503_v27  ;;  %v15073_v53 = vpop.f32.mrb[87].mxu0  ;;  %v15162_v48 = vpop.f32.mrb[45].mxu1  ;;  %8608 = vst [vmem:[#allocation3 + $0x278] sm:$0xff] %v20776_v52  ;;  %v20792_v20 = vadd.f32 %v20699_v35, %v20691_v26  ;;  %v8715_v26 = vld [vmem:[#allocation3 + $0x288] sm:$0x1]  ;;  %v8824_v35 = vld [vmem:[#allocation3 + $0x280] sm:$0xff] }
 0x507   : > { %v8632_v44 = vpack.c.bf16 %v8624_v3, %v8591_v5  ;;  %v8798_v29 = vshll.u32 %v8741_v13, 16  ;;  %v8802_v40 = vshrl.u32 %v8741_v13, 16  ;;  %8607 = vst [vmem:[#allocation3 + $0x260] sm:$0xff] %v20779_v51  ;;  %v15164_v14 = vpop.f32.mrb[46].mxu1  ;;  %16274 = vmatpush3.bf16.msra.mxu0 %v17645_v16  ;;  %v8631_v4 = vpack.c.bf16 %v8622_v34, %v8589_v21 }
 0x508   : > { %v8790_v58 = vshll.u32 %v8740_v47, 16  ;;  %v8794_v63 = vshrl.u32 %v8740_v47, 16  ;;  %v15071_v27 = vadd.f32 %v15070_v38, %v15069_v37  ;;  %10658 = vmatmul.mubr.bf16.gmra.mrb[124].mxu0 %v20709_v42  ;;  %v15165_v60 = vpop.f32.mrb[47].mxu1  ;;  %16275 = vmatprep.subr.bf16.mxu0 %v17648_v59  ;;  %v15074_v45 = vadd.f32 %v15073_v53, %v15072_v8 }
 0x509   : > { %v8689_v5 = vshrl.u32 %v8632_v44, 16  ;;  %v8692_v3 = vshll.u32 %v8632_v44, 16  ;;  %v8800_v13 = vrot.slane %v8798_v29, 1  ;;  %11004 = vmatmul.mubr.bf16.gmra.mrb[48].mxu1 %v20709_v42  ;;  %10665 = vmatprep.mubr.bf16.mxu0 %v20695_v36  ;;  %v8681_v16 = vshrl.u32 %v8631_v4, 16 }
 0x50a   : > { %v8684_v21 = vshll.u32 %v8631_v4, 16  ;;  %v8792_v34 = vrot.slane %v8790_v58, 1  ;;  %v16711_v37 = vadd.f32 %v15071_v27, %v20507_v55  ;;  %11011 = vmatprep.mubr.bf16.mxu1 %v20695_v36  ;;  %v16717_v41 = vadd.f32 %v15074_v45, %v20509_v10  ;;  %v20808_v36 = vld [vmem:[#allocation9 + $0x80] sm:$0xff]  }
 0x50b   : > { %v8691_v38 = vrot.slane %v8689_v5, 7  ;;  %v8804_v47 = vor.u32 %v8802_v40, %v8800_v13  ;;  %v15157_v29 = vadd.f32 %v20729_v1, %v20726_v24  ;;  %v15075_v8 = vpop.f32.mrb[88].mxu0  ;;  %16276 = vmatpush3.bf16.msra.mxu0 %v17648_v59  ;;  %v8683_v42 = vrot.slane %v8681_v16, 7  ;;  %v17682_v1 = vld [vmem:[#allocation9 + $0x1f0] sm:$0xff]  }
 0x50c   : > { %v20804_v53 = vsel %vm821_vm3, %v20721_v49, %v8792_v34  ;;  %v8796_v44 = vor.u32 %v8794_v63, %v8792_v34  ;;  %v15160_v55 = vadd.f32 %v20745_v22, %v20736_v32  ;;  %v15076_v4 = vpop.f32.mrb[89].mxu0  ;;  %16277 = vmatprep.subr.bf16.mxu0 %v17649_v15  ;;  %v15163_v63 = vadd.f32 %v15162_v48, %v15161_v56 }
 0x50d   : > { %v8694_v40 = vor.u32 %v8692_v3, %v8691_v38  ;;  %v8716_v10 = vsel %vm18291_vm9, %v8691_v38, %v8715_v26  ;;  %v8825_v24 = vsel %vm18585_vm12, %v8804_v47, %v8824_v35  ;;  %8822 = vst [vmem:[#allocation3 + $0x250] sm:$0xff] %v20804_v53  ;;  %v15077_v45 = vadd.f32 %v15076_v4, %v15075_v8  ;;  %v15078_v49 = vpop.f32.mrb[90].mxu0  ;;  %v15167_v59 = vpop.f32.mrb[64].mxu1 }
 0x50e   : > { %8717 = vst [vmem:[#allocation3 + $0x288] sm:$0x1] %v8716_v10  ;;  %8826 = vst [vmem:[#allocation3 + $0x280] sm:$0xff] %v8825_v24  ;;  %v8686_v58 = vor.u32 %v8684_v21, %v8683_v42  ;;  %v20816_v32 = vsel %vm821_vm3, %v8796_v44, %v8800_v13  ;;  %v15079_v22 = vpop.f32.mrb[91].mxu0  ;;  %v15166_v27 = vadd.f32 %v15165_v60, %v15164_v14  ;;  %v15168_v5 = vpop.f32.mrb[65].mxu1 }
 0x50f   : > { %v20819_v3 = vsel %vm587_vm5, %v8683_v42, %v8694_v40  ;;  %8823 = vst [vmem:[#allocation3 + $0x268] sm:$0xff] %v20816_v32  ;;  %v16726_v26 = vadd.f32 %v15077_v45, %v20512_v33  ;;  %v15080_v35 = vadd.f32 %v15079_v22, %v15078_v49  ;;  %v15169_v16 = vadd.f32 %v15168_v5, %v15167_v59  ;;  %v15170_v34 = vpop.f32.mrb[66].mxu1 }
 0x510   : > { %16278 = vmatpush3.bf16.msra.mxu0 %v17649_v15  ;;  %v8687_v21 = vsel %vm587_vm5, %v20716_v54, %v8686_v58  ;;  %8714 = vst [vmem:[#allocation3 + $0x270] sm:$0xff] %v20819_v3  ;;  %v15171_v56 = vpop.f32.mrb[67].mxu1  ;;  %v20828_v48 = vadd.f32 %v16711_v37, %v20773_v43  ;;  %v20832_v14 = vadd.f32 %v20783_v7, %v20743_v11 }
 0x511   : > { %10666 = vmatmul.mubr.bf16.gmra.mrb[128].mxu0 %v20753_v17  ;;  %16295 = vmatprep.subr.bf16.mxu0 %v20808_v36  ;;  %8713 = vst [vmem:[#allocation3 + $0x258] sm:$0xff] %v8687_v21  ;;  %v16732_v33 = vadd.f32 %v15080_v35, %v20514_v50  ;;  %v15172_v54 = vadd.f32 %v15171_v56, %v15170_v34 }
 0x512   : > { %11012 = vmatmul.mubr.bf16.gmra.mrb[52].mxu1 %v20753_v17  ;;  %10673 = vmatprep.mubr.bf16.mxu0 %v20686_v6  ;;  %v20839_v15 = vadd.f32 %v16717_v41, %v20792_v20  ;;  %v20844_v43 = vadd.f32 %v20786_v9, %v20761_v46  ;;  %v20846_v11 = vadd.f32 %v16726_v26, %v15157_v29 }
 0x513   : > { %11019 = vmatprep.mubr.bf16.mxu1 %v20686_v6  ;;  %v15081_v7 = vpop.f32.mrb[92].mxu0  ;;  %v20848_v60 = vadd.f32 %v16732_v33, %v15160_v55 }
 0x514   : > { %v15082_v50 = vpop.f32.mrb[93].mxu0 }
 0x515   : > { %v15083_v13 = vadd.f32 %v15082_v50, %v15081_v7  ;;  %v15084_v17 = vpop.f32.mrb[94].mxu0  ;;  %v15173_v37 = vpop.f32.mrb[68].mxu1 }
 0x516   : > { %v15085_v38 = vpop.f32.mrb[95].mxu0  ;;  %v15174_v47 = vpop.f32.mrb[69].mxu1 }
 0x517   : > { %v16723_v41 = vadd.f32 %v15083_v13, %v20516_v28  ;;  %v15086_v20 = vadd.f32 %v15085_v38, %v15084_v17  ;;  %v15175_v8 = vadd.f32 %v15174_v47, %v15173_v37  ;;  %v15176_v6 = vpop.f32.mrb[70].mxu1 }
 0x518   : > { %v15177_v46 = vpop.f32.mrb[71].mxu1 }
 0x519   : > { %10674 = vmatmul.mubr.bf16.gmra.mrb[132].mxu0 %v20739_v25  ;;  %v16729_v9 = vadd.f32 %v15086_v20, %v20518_v31  ;;  %v15178_v29 = vadd.f32 %v15177_v46, %v15176_v6  ;;  %v20855_v42 = vadd.f32 %v16723_v41, %v15163_v63  ;;  %v17653_v46 = vld [vmem:[#allocation9 + $0x88] sm:$0xff]  }
 0x51a   : > { %11020 = vmatmul.mubr.bf16.gmra.mrb[56].mxu1 %v20739_v25  ;;  %10681 = vmatprep.mubr.bf16.mxu0 %v20779_v51 }
 0x51b   : > { %11027 = vmatprep.mubr.bf16.mxu1 %v20779_v51  ;;  %v15087_v44 = vpop.f32.mrb[96].mxu0  ;;  %v20858_v55 = vadd.f32 %v16729_v9, %v15166_v27 }
 0x51c   : > { %v15088_v28 = vpop.f32.mrb[97].mxu0 }
 0x51d   : > { %v15089_v4 = vadd.f32 %v15088_v28, %v15087_v44  ;;  %v15090_v40 = vpop.f32.mrb[98].mxu0  ;;  %v15179_v10 = vpop.f32.mrb[72].mxu1 }
 0x51e   : > { %v15091_v24 = vpop.f32.mrb[99].mxu0  ;;  %v15180_v45 = vpop.f32.mrb[73].mxu1 }
 0x51f   : > { %v16738_v31 = vadd.f32 %v15089_v4, %v20520_v39  ;;  %v15092_v49 = vadd.f32 %v15091_v24, %v15090_v40  ;;  %v15181_v25 = vadd.f32 %v15180_v45, %v15179_v10  ;;  %v15182_v59 = vpop.f32.mrb[74].mxu1  ;;  %v21712_v4 = vld [vmem:[#allocation34_spill] sm:$0xff]  ;;  %v17656_v45 = vld [vmem:[#allocation9 + $0x90] sm:$0xff]  }
 0x520   : > { %v15183_v58 = vpop.f32.mrb[75].mxu1 }
 0x521   : > { %10682 = vmatmul.mubr.bf16.gmra.mrb[136].mxu0 %v8687_v21  ;;  %v16744_v22 = vadd.f32 %v15092_v49, %v20522_v2  ;;  %v15184_v51 = vadd.f32 %v15183_v58, %v15182_v59  ;;  %v20863_v63 = vadd.f32 %v16738_v31, %v15169_v16 }
 0x522   : > { %11028 = vmatmul.mubr.bf16.gmra.mrb[60].mxu1 %v8687_v21  ;;  %10689 = vmatprep.mubr.bf16.mxu0 %v20776_v52 }
 0x523   : > { %v15093_v27 = vpop.f32.mrb[100].mxu0  ;;  %v20865_v5 = vadd.f32 %v16744_v22, %v15172_v54 }
 0x524   : > { %v15094_v26 = vpop.f32.mrb[101].mxu0 }
 0x525   : > { %v15095_v35 = vadd.f32 %v15094_v26, %v15093_v27  ;;  %v15096_v34 = vpop.f32.mrb[102].mxu0  ;;  %v15185_v39 = vpop.f32.mrb[76].mxu1  ;;  %v21714_v27 = vld [vmem:[#allocation16_spill] sm:$0xff] }
 0x526   : > { %v15097_v56 = vpop.f32.mrb[103].mxu0  ;;  %v15186_v33 = vpop.f32.mrb[77].mxu1 }
 0x527   : > { %v16735_v7 = vadd.f32 %v15095_v35, %v20527_v61  ;;  %v15098_v50 = vadd.f32 %v15097_v56, %v15096_v34  ;;  %v20868_v13 = vadd.f32 %v15186_v33, %v15185_v39  ;;  %v15188_v2 = vpop.f32.mrb[78].mxu1 }
 0x528   : > { %v15189_v52 = vpop.f32.mrb[79].mxu1 }
 0x529   : > { %10690 = vmatmul.mubr.bf16.gmra.mrb[140].mxu0 %v20819_v3  ;;  %v16741_v16 = vadd.f32 %v15098_v50, %v20529_v12  ;;  %v20873_v21 = vadd.f32 %v15189_v52, %v15188_v2  ;;  %v20875_v54 = vadd.f32 %v16735_v7, %v15175_v8  ;;  %v21716_v50 = vld [vmem:[#allocation15_spill] sm:$0xff] }
 0x52a   : > { %16279 = vmatprep.mubr.bf16.mxu0 %v20635_v19 }
 0x52b   : > { %v15099_v17 = vpop.f32.mrb[104].mxu0  ;;  %v20877_v37 = vadd.f32 %v16741_v16, %v15178_v29 }
 0x52c   : > { %v15100_v38 = vpop.f32.mrb[105].mxu0 }
 0x52d   : > { %v15101_v61 = vadd.f32 %v15100_v38, %v15099_v17  ;;  %v15102_v47 = vpop.f32.mrb[106].mxu0  ;;  %v16249_v41 = vpop.f32.mrb[16].mxu1  ;;  %v21717_v17 = vld [vmem:[#allocation35_spill] sm:$0xff] }
 0x52e   : > { %v15103_v20 = vpop.f32.mrb[107].mxu0  ;;  %v16713_v6 = vadd.f32 %v20828_v48, %v16249_v41  ;;  %v9973_v3 = vpop.f32.mrb[17].mxu1  ;;  %v21713_v48 = vld [vmem:[#allocation47_spill] sm:$0xff]  ;;  %v21718_v41 = vld [vmem:[#allocation14_spill] sm:$0xff] }
 0x52f   : > { %v16750_v12 = vadd.f32 %v15101_v61, %v20531_v23  ;;  %v15104_v9 = vadd.f32 %v15103_v20, %v15102_v47  ;;  %v16716_v19 = vadd.f32 %v20832_v14, %v9973_v3  ;;  %v16250_v44 = vpop.f32.mrb[18].mxu1  ;;  %v17657_v3 = vld [vmem:[#allocation9 + $0x98] sm:$0xff]  }
 0x530   : > { %v10054_v8 = vadd.f32 %v20596_v57, %v16713_v6  ;;  %v16719_v29 = vadd.f32 %v20839_v15, %v16250_v44  ;;  %v9976_v28 = vpop.f32.mrb[19].mxu1 }
 0x531   : > { %16280 = vmatmul.mubr.bf16.vlgmr.msra.gmra.mrb[144].mxu0 %v20703_v62  ;;  %v16756_v40 = vadd.f32 %v15104_v9, %v21712_v4  ;;  %v10052_v10 = vadd.f32 %v20596_v57, %v16716_v19  ;;  %v16722_v23 = vadd.f32 %v20844_v43, %v9976_v28  ;;  %v20891_v31 = vadd.f32 %v16750_v12, %v15181_v25  ;;  %v21715_v43 = vld [vmem:[#allocation25_spill] sm:$0xff]  ;;  %v21719_v19 = vld [vmem:[#allocation36_spill] sm:$0xff] }
 0x532   : > { %16283 = vmatprep.mubr.bf16.mxu0 %v21713_v48  ;;  %16296 = vmatpush3.bf16.msra.mxu0 %v20808_v36  ;;  %v10070_v24 = vmax.f32 %v10054_v8, 0.0  ;;  %v10055_v14 = vadd.f32 %v20596_v57, %v16719_v29 }
 0x533   : > { %16297 = vmatprep.subr.bf16.mxu0 %v17653_v46  ;;  %v15105_v49 = vpop.f32.mrb[108].mxu0  ;;  %v10068_v15 = vmax.f32 %v10052_v10, 0.0  ;;  %v10053_v59 = vadd.f32 %v20596_v57, %v16722_v23  ;;  %v20894_v58 = vadd.f32 %v16756_v40, %v15184_v51 }
 0x534   : > { %v15106_v22 = vpop.f32.mrb[109].mxu0  ;;  %v10211_v26 = vmul.f32 %v21714_v27, %v10070_v24  ;;  %v10071_v35 = vmax.f32 %v10055_v14, 0.0 }
 0x535   : > { %v15107_v36 = vadd.f32 %v15106_v22, %v15105_v49  ;;  %v15108_v34 = vpop.f32.mrb[110].mxu0  ;;  %v10209_v39 = vmul.f32 %v21715_v43, %v10068_v15  ;;  %v10069_v56 = vmax.f32 %v10053_v59, 0.0  ;;  %v16253_v33 = vpop.f32.mrb[20].mxu1 }
 0x536   : > { %16298 = vmatpush3.bf16.msra.mxu0 %v17653_v46  ;;  %v15109_v7 = vpop.f32.mrb[111].mxu0  ;;  %v20898_v25 = vpack.c.bf16 %v10071_v35, %v10070_v24  ;;  %v10103_v2 = vmul.f32 %v21716_v50, %v10071_v35  ;;  %v20901_v52 = vpack.c.bf16 %v10071_v35, %v10211_v26  ;;  %v16725_v51 = vadd.f32 %v20855_v42, %v16253_v33  ;;  %v9989_v16 = vpop.f32.mrb[21].mxu1 }
 0x537   : > { %16299 = vmatprep.subr.bf16.mxu0 %v17656_v45  ;;  %v20905_v38 = vadd.f32 %v15107_v36, %v21717_v17  ;;  %v15110_v61 = vadd.f32 %v15109_v7, %v15108_v34  ;;  %v10084_v47 = vpack.c.bf16 %v10069_v56, %v10068_v15  ;;  %v10101_v20 = vmul.f32 %v21718_v41, %v10069_v56  ;;  %v16254_v6 = vpop.f32.mrb[22].mxu1  ;;  %v10305_v36 = vld [vmem:[#allocation3 + $0x280] sm:$0x80]  ;;  %v21720_v34 = vld [vmem:[#allocation28_spill] sm:$0xff]  ;;  %v17661_v41 = vld [vmem:[#allocation9 + $0xa8] sm:$0xff]  }
 0x538   : > { %10093 = vst [vmem:[#allocation3 + $0x2a8] sm:$0xff] %v20898_v25  ;;  %v10117_v46 = vpack.c.bf16 %v10103_v2, %v10070_v24  ;;  %v10241_v12 = vshll.u32 %v20901_v52, 16  ;;  %v10225_v9 = vpack.c.bf16 %v10069_v56, %v10209_v39  ;;  %v9992_v42 = vpop.f32.mrb[23].mxu1  ;;  %v10058_v29 = vadd.f32 %v20596_v57, %v16725_v51 }
 0x539   : > { %16284 = vmatmul.mubr.bf16.gmra.mrb[148].mxu0 %v20757_v18  ;;  %v20912_v44 = vadd.f32 %v15110_v61, %v21719_v19  ;;  %10092 = vst [vmem:[#allocation3 + $0x290] sm:$0xff] %v10084_v47  ;;  %v10116_v8 = vpack.c.bf16 %v10101_v20, %v10068_v15  ;;  %v16728_v28 = vadd.f32 %v20846_v11, %v9989_v16  ;;  %v10245_v10 = vshrl.u32 %v20901_v52, 16  ;;  %v17660_v15 = vld [vmem:[#allocation9 + $0xa0] sm:$0xff]   ;;  %v17665_v52 = vld [vmem:[#allocation9 + $0xb8] sm:$0xff]  }
 0x53a   : > { %16287 = vmatprep.mubr.bf16.mxu0 %v20769_v30  ;;  %v10132_v4 = vshrl.u32 %v10117_v46, 16  ;;  %v10135_v40 = vshll.u32 %v10117_v46, 16  ;;  %v10234_v23 = vshll.u32 %v10225_v9, 16  ;;  %16300 = vmatpush3.bf16.msra.mxu0 %v17656_v45  ;;  %v20918_v24 = vrot.slane %v10241_v12, 1 }
 0x53b   : > { %11923 = vmatprep.mubr.bf16.mxu1 %v10084_v47  ;;  %v10125_v14 = vshrl.u32 %v10116_v8, 16  ;;  %v10128_v49 = vshll.u32 %v10116_v8, 16  ;;  %v10074_v59 = vmax.f32 %v10058_v29, 0.0  ;;  %16301 = vmatprep.subr.bf16.mxu0 %v17657_v3  ;;  %v10237_v11 = vshrl.u32 %v10225_v9, 16 }
 0x53c   : > { %v20920_v22 = vrot.slane %v10132_v4, 7  ;;  %v10236_v27 = vrot.slane %v10234_v23, 1  ;;  %v10056_v26 = vadd.f32 %v20596_v57, %v16728_v28  ;;  %v16731_v45 = vadd.f32 %v20858_v55, %v16254_v6  ;;  %v10196_v6 = vld [vmem:[#allocation3 + $0x288] sm:$0xff] }
 0x53d   : > { %v10127_v35 = vrot.slane %v10125_v14, 7  ;;  %v10215_v43 = vmul.f32 %v21720_v34, %v10074_v59  ;;  %v16734_v39 = vadd.f32 %v20848_v60, %v9992_v42  ;;  %v16257_v56 = vpop.f32.mrb[24].mxu1  ;;  %v16748_v23 = vadd.f32 %v20905_v38, %v20868_v13  ;;  %v17670_v14 = vld [vmem:[#allocation9 + $0x148] sm:$0xff]  }
 0x53e   : > { %v10137_v33 = vor.u32 %v10135_v40, %v20920_v22  ;;  %v10239_v7 = vor.u32 %v10237_v11, %v10236_v27  ;;  %v10306_v2 = vsel %vm18469_vm6, %v10236_v27, %v10305_v36  ;;  %v10072_v51 = vmax.f32 %v10056_v26, 0.0  ;;  %16302 = vmatpush3.bf16.msra.mxu0 %v17657_v3  ;;  %v10005_v16 = vpop.f32.mrb[25].mxu1  ;;  %v21722_v3 = vld [vmem:[#allocation18_spill] sm:$0xff]  ;;  %v21724_v27 = vld [vmem:[#allocation19_spill] sm:$0xff]  ;;  %v17664_v36 = vld [vmem:[#allocation9 + $0xb0] sm:$0xff]  }
 0x53f   : > { %v10130_v17 = vor.u32 %v10128_v49, %v10127_v35  ;;  %10307 = vst [vmem:[#allocation3 + $0x280] sm:$0x80] %v10306_v2  ;;  %v10059_v61 = vadd.f32 %v20596_v57, %v16731_v45  ;;  %v10057_v47 = vadd.f32 %v20596_v57, %v16734_v39  ;;  %v16737_v55 = vadd.f32 %v20875_v54, %v16257_v56  ;;  %v16258_v60 = vpop.f32.mrb[26].mxu1  ;;  %v21726_v56 = vld [vmem:[#allocation46_spill] sm:$0xff] }
 0x540   : > { %16303 = vmatprep.subr.bf16.mxu0 %v17660_v15  ;;  %v20933_v20 = vsel %vm587_vm5, %v10127_v35, %v10137_v33  ;;  %v20937_v46 = vsel %vm821_vm3, %v10239_v7, %v20918_v24  ;;  %v10213_v12 = vmul.f32 %v21722_v3, %v10072_v51  ;;  %v16740_v9 = vadd.f32 %v20863_v63, %v10005_v16  ;;  %v10008_v42 = vpop.f32.mrb[27].mxu1 }
 0x541   : > { %16288 = vmatmul.mubr.bf16.gmra.mrb[152].mxu0 %v20804_v53  ;;  %v20944_v54 = vsel %vm18365_vm0, %v10130_v17, %v10196_v6  ;;  %10199 = vst [vmem:[#allocation3 + $0x2a0] sm:$0xff] %v20933_v20  ;;  %10308 = vst [vmem:[#allocation3 + $0x298] sm:$0xff] %v20937_v46  ;;  %v10075_v8 = vmax.f32 %v10059_v61, 0.0  ;;  %v10073_v29 = vmax.f32 %v10057_v47, 0.0  ;;  %v10062_v28 = vadd.f32 %v20596_v57, %v16737_v55  ;;  %v17675_v17 = vld [vmem:[#allocation9 + $0x150] sm:$0xff]  }
 0x542   : > { %16291 = vmatprep.mubr.bf16.mxu0 %v20816_v32  ;;  %10198 = vst [vmem:[#allocation3 + $0x288] sm:$0xff] %v20944_v54  ;;  %v10060_v63 = vadd.f32 %v20596_v57, %v16740_v9  ;;  %v16743_v4 = vadd.f32 %v20877_v37, %v16258_v60  ;;  %16304 = vmatpush3.bf16.msra.mxu0 %v17660_v15  ;;  %v21725_v57 = vld [vmem:[#allocation17_spill] sm:$0xff] }
 0x543   : > { %v16746_v40 = vadd.f32 %v20865_v5, %v10008_v42  ;;  %v20956_v49 = vpack.c.bf16 %v10075_v8, %v10074_v59  ;;  %v10107_v11 = vmul.f32 %v21724_v27, %v10075_v8  ;;  %v20959_v26 = vpack.c.bf16 %v10075_v8, %v10215_v43  ;;  %16305 = vmatprep.subr.bf16.mxu0 %v17661_v41  ;;  %v20975_v43 = vld [vmem:[%s21495_s2] ss:$0 sm:$0xff] }
 0x544   : > { %v20961_v35 = vpack.c.bf16 %v10073_v29, %v10072_v51  ;;  %v10105_v34 = vmul.f32 %v21725_v57, %v10073_v29  ;;  %v10227_v37 = vpack.c.bf16 %v10073_v29, %v10213_v12  ;;  %v20964_v15 = vmax.f32 %v10062_v28, 0.0  ;;  %11924 = vmatmul.mubr.bf16.vlgmr.msra.gmra.mrb[96].mxu1 %v20944_v54  ;;  %v10336_v12 = vld [vmem:[#allocation3 + $0x1c0] sm:$0xff] }
 0x545   : > { %v20966_v5 = vmax.f32 %v10060_v63, 0.0  ;;  %10095 = vst [vmem:[#allocation3 + $0x2d8] sm:$0xff] %v20956_v49  ;;  %v10119_v13 = vpack.c.bf16 %v10107_v11, %v10074_v59  ;;  %v10257_v38 = vshll.u32 %v20959_v26, 16  ;;  %v10063_v45 = vadd.f32 %v20975_v43, %v16743_v4  ;;  %v16261_v39 = vpop.f32.mrb[28].mxu1  ;;  %11931 = vmatprep.mubr.bf16.mxu1 %v20898_v25  ;;  %16360 = vmatpush3.bf16.msra.mxu1 %v21726_v56  ;;  %v21727_v25 = vld [vmem:[#allocation30_spill] sm:$0xff] }
 0x546   : > { %10094 = vst [vmem:[#allocation3 + $0x2c0] sm:$0xff] %v20961_v35  ;;  %v10247_v59 = vor.u32 %v10245_v10, %v20918_v24  ;;  %v10118_v33 = vpack.c.bf16 %v10105_v34, %v10072_v51  ;;  %v10249_v7 = vshll.u32 %v10227_v37, 16  ;;  %v10253_v50 = vshrl.u32 %v10227_v37, 16  ;;  %16306 = vmatpush3.bf16.msra.mxu0 %v17661_v41  ;;  %v10021_v2 = vpop.f32.mrb[29].mxu1  ;;  %v20983_v16 = vld [vmem:[#allocation3 + $0x280] sm:$0xff]  ;;  %16361 = vmatprep.subr.bf16.mxu1 %v17670_v14  ;;  %v21728_v51 = vld [vmem:[#allocation29_spill] sm:$0xff] }
 0x547   : > { %v10148_v61 = vshrl.u32 %v10119_v13, 16  ;;  %v10151_v47 = vshll.u32 %v10119_v13, 16  ;;  %v10259_v55 = vrot.slane %v10257_v38, 1  ;;  %v10219_v60 = vmul.f32 %v21727_v25, %v20964_v15  ;;  %16307 = vmatprep.subr.bf16.mxu0 %v17664_v36  ;;  %v20987_v6 = vpop.f32.mrb[30].mxu1  ;;  %v21729_v57 = vld [vmem:[#allocation22_spill] sm:$0xff]  ;;  %v17680_v37 = vld [vmem:[#allocation9 + $0x158] sm:$0xff]  }
 0x548   : > { %v10140_v10 = vshrl.u32 %v10118_v33, 16  ;;  %v10251_v24 = vrot.slane %v10249_v7, 1  ;;  %v10217_v41 = vmul.f32 %v21728_v51, %v20966_v5  ;;  %v10079_v3 = vmax.f32 %v10063_v45, 0.0  ;;  %v20992_v9 = vpop.f32.mrb[31].mxu1 }
 0x549   : > { %16292 = vmatmul.mubr.bf16.gmra.mrb[156].mxu0 %v20983_v16  ;;  %v20994_v42 = vrot.slane %v10148_v61, 7  ;;  %v10143_v19 = vshll.u32 %v10118_v33, 16  ;;  %v10061_v8 = vadd.f32 %v20975_v43, %v16746_v40  ;;  %v16749_v29 = vadd.f32 %v16748_v23, %v16261_v39  ;;  %16362 = vmatpush3.bf16.msra.mxu1 %v17670_v14  ;;  %v17667_v14 = vld [vmem:[#allocation9 + $0x1c0] sm:$0xff]  }
 0x54a   : > { %16311 = vmatprep.mubr.bf16.mxu0 %v10336_v12  ;;  %v10142_v28 = vrot.slane %v10140_v10, 7  ;;  %v20998_v63 = vsel %vm821_vm3, %v10247_v59, %v10251_v24  ;;  %v10255_v4 = vor.u32 %v10253_v50, %v10251_v24  ;;  %v21001_v27 = vpack.c.bf16 %v10079_v3, %v20964_v15  ;;  %16308 = vmatpush3.bf16.msra.mxu0 %v17664_v36 }
 0x54b   : > { %16363 = vmatprep.subr.bf16.mxu1 %v17675_v17  ;;  %v10153_v11 = vor.u32 %v10151_v47, %v20994_v42  ;;  %10309 = vst [vmem:[#allocation3 + $0x2b0] sm:$0xff] %v20998_v63  ;;  %v10111_v34 = vmul.f32 %v21729_v57, %v10079_v3  ;;  %v21006_v40 = vpack.c.bf16 %v10079_v3, %v10219_v60  ;;  %v10077_v23 = vmax.f32 %v10061_v8, 0.0  ;;  %v17685_v60 = vld [vmem:[#allocation9 + $0x160] sm:$0xff]  }
 0x54c   : > { %16309 = vmatprep.subr.bf16.mxu0 %v17665_v52  ;;  %v10145_v13 = vor.u32 %v10143_v19, %v10142_v28  ;;  %v21009_v38 = vsel %vm821_vm3, %v10255_v4, %v10259_v55  ;;  %10097 = vst [vmem:[#allocation3 + $0x308] sm:$0xff] %v21001_v27  ;;  %v10066_v36 = vadd.f32 %v20975_v43, %v16749_v29  ;;  %v10261_v39 = vshrl.u32 %v20959_v26, 16  ;;  %v21730_v26 = vld [vmem:[#allocation20_spill] sm:$0xff]  ;;  %v17850_v29 = vld [vmem:[#allocation3 + $0x1d8] sm:$0xff] }
 0x54d   : > { %v16752_v45 = vadd.f32 %v20891_v31, %v10021_v2  ;;  %11932 = vmatmul.mubr.bf16.gmra.mrb[100].mxu1 %v20933_v20  ;;  %v21017_v56 = vsel %vm587_vm5, %v10142_v28, %v10153_v11  ;;  %10310 = vst [vmem:[#allocation3 + $0x2c8] sm:$0xff] %v21009_v38  ;;  %v10121_v59 = vpack.c.bf16 %v10111_v34, %v20964_v15  ;;  %v10273_v33 = vshll.u32 %v21006_v40, 16  ;;  %v15303_v7 = vpop.f32.mrb[80].mxu1  ;;  %v17668_v15 = vld [vmem:[#allocation9 + $0x180] sm:$0xff]   ;;  %v21731_v11 = vld [vmem:[#allocation32_spill] sm:$0xff]  ;;  %v17671_v34 = vld [vmem:[#allocation9 + $0x188] sm:$0xff]  }
 0x54e   : > { %11939 = vmatprep.mubr.bf16.mxu1 %v20961_v35  ;;  %16364 = vmatpush3.bf16.msra.mxu1 %v17675_v17  ;;  %v21025_v31 = vsel %vm587_vm5, %v20920_v22, %v10145_v13  ;;  %10201 = vst [vmem:[#allocation3 + $0x2d0] sm:$0xff] %v21017_v56  ;;  %v21029_v20 = vpack.c.bf16 %v10077_v23, %v20966_v5  ;;  %v15304_v61 = vpop.f32.mrb[81].mxu1  ;;  %v21033_v25 = vmax.f32 %v10066_v36, 0.0  ;;  %v17669_v22 = vld [vmem:[#allocation9 + $0x1c8] sm:$0xff]  }
 0x54f   : > { %v10109_v50 = vmul.f32 %v21730_v26, %v10077_v23  ;;  %v10229_v2 = vpack.c.bf16 %v10077_v23, %v10217_v41  ;;  %16310 = vmatpush3.bf16.msra.mxu0 %v17665_v52  ;;  %v10263_v47 = vor.u32 %v10261_v39, %v10259_v55  ;;  %10200 = vst [vmem:[#allocation3 + $0x2b8] sm:$0xff] %v21025_v31  ;;  %v10164_v17 = vshrl.u32 %v10121_v59, 16  ;;  %v15306_v10 = vpop.f32.mrb[82].mxu1  ;;  %v17687_v23 = vld [vmem:[#allocation9 + $0x168] sm:$0xff]  }
 0x550   : > { %15367 = vmatprep.subr.bf16.mxu0 %v17667_v14  ;;  %16365 = vmatprep.subr.bf16.mxu1 %v17680_v37  ;;  %v10167_v24 = vshll.u32 %v10121_v59, 16  ;;  %10096 = vst [vmem:[#allocation3 + $0x2f0] sm:$0xff] %v21029_v20  ;;  %v10064_v52 = vadd.f32 %v20975_v43, %v16752_v45  ;;  %v15307_v3 = vpop.f32.mrb[83].mxu1  ;;  %v21040_v12 = vrot.slane %v10273_v33, 1  ;;  %v16754_v8 = vadd.f32 %v20912_v44, %v20873_v21  ;;  %v17672_v44 = vld [vmem:[#allocation9 + $0x1d0] sm:$0xff]  }
 0x551   : > { %v10120_v51 = vpack.c.bf16 %v10109_v50, %v20966_v5  ;;  %v10265_v41 = vshll.u32 %v10229_v2, 16  ;;  %v21038_v55 = vrot.slane %v10164_v17, 7  ;;  %v10269_v19 = vshrl.u32 %v10229_v2, 16  ;;  %v17673_v2 = vld [vmem:[#allocation9 + $0x190] sm:$0xff]  }
 0x552   : > { %16312 = vmatmul.mubr.bf16.vlgmr.msra.gmra.mrb[144].mxu0 %v17850_v29  ;;  %16366 = vmatpush3.bf16.msra.mxu1 %v17680_v37  ;;  %v10223_v5 = vmul.f32 %v21731_v11, %v21033_v25  ;;  %v10080_v57 = vmax.f32 %v10064_v52, 0.0  ;;  %v16755_v36 = vadd.f32 %v16754_v8, %v20987_v6  ;;  %v16758_v21 = vadd.f32 %v20894_v58, %v20992_v9  ;;  %v17677_v8 = vld [vmem:[#allocation9 + $0x1e0] sm:$0xff]   ;;  %v10206_v11 = vld [vmem:[#allocation3 + $0x348] sm:$0x1] }
 0x553   : > { %v10156_v28 = vshrl.u32 %v10120_v51, 16  ;;  %v10267_v4 = vrot.slane %v10265_v41, 1  ;;  %16315 = vmatprep.mubr.bf16.mxu0 %v20703_v62  ;;  %15368 = vmatpush3.bf16.msra.mxu0 %v17668_v15  ;;  %v10169_v14 = vor.u32 %v10167_v24, %v21038_v55  ;;  %v10159_v13 = vshll.u32 %v10120_v51, 16  ;;  %v21732_v62 = vld [vmem:[#allocation31_spill] sm:$0xff] }
 0x554   : > { %15369 = vmatprep.subr.bf16.mxu0 %v17669_v22  ;;  %16367 = vmatprep.subr.bf16.mxu1 %v17685_v60  ;;  %v10221_v59 = vmul.f32 %v21732_v62, %v10080_v57  ;;  %v10067_v33 = vadd.f32 %v20975_v43, %v16755_v36  ;;  %v10065_v6 = vadd.f32 %v20975_v43, %v16758_v21  ;;  %v21733_v22 = vld [vmem:[#allocation24_spill] sm:$0xff]  ;;  %v21734_v41 = vld [vmem:[#allocation23_spill] sm:$0xff]  ;;  %v10277_v29 = vshrl.u32 %v21006_v40, 16  ;;  %v17678_v40 = vld [vmem:[#allocation9 + $0x1a0] sm:$0xff]  }
 0x555   : > { %v10158_v37 = vrot.slane %v10156_v28, 7  ;;  %v21052_v45 = vsel %vm821_vm3, %v10263_v47, %v10267_v4  ;;  %v10271_v39 = vor.u32 %v10269_v19, %v10267_v4  ;;  %11940 = vmatmul.mubr.bf16.gmra.mrb[104].mxu1 %v21025_v31  ;;  %v21060_v58 = vadd.f32 %v15304_v61, %v15303_v7  ;;  %v17674_v7 = vld [vmem:[#allocation9 + $0x1d8] sm:$0xff]   ;;  %v17688_v47 = vld [vmem:[#allocation9 + $0x170] sm:$0xff]  }
 0x556   : > { %10311 = vst [vmem:[#allocation3 + $0x2e0] sm:$0xff] %v21052_v45  ;;  %11947 = vmatprep.mubr.bf16.mxu1 %v20956_v49  ;;  %16368 = vmatpush3.bf16.msra.mxu1 %v17685_v60  ;;  %v10083_v43 = vmax.f32 %v10067_v33, 0.0  ;;  %v10081_v49 = vmax.f32 %v10065_v6, 0.0  ;;  %v21071_v15 = vadd.f32 %v15307_v3, %v15306_v10 }
 0x557   : > { %v10161_v9 = vor.u32 %v10159_v13, %v10158_v37  ;;  %v21063_v26 = vsel %vm587_vm5, %v10158_v37, %v10169_v14  ;;  %v21067_v50 = vsel %vm821_vm3, %v10271_v39, %v21040_v12  ;;  %15370 = vmatpush3.bf16.msra.mxu0 %v17671_v34  ;;  %16369 = vmatprep.subr.bf16.mxu1 %v17687_v23  ;;  %v10315_v14 = vld [vmem:[#allocation3 + $0x340] sm:$0xff]  ;;  %v17679_v37 = vld [vmem:[#allocation9 + $0x1e8] sm:$0xff]  }
 0x558   : > { %10203 = vst [vmem:[#allocation3 + $0x300] sm:$0xff] %v21063_v26  ;;  %10312 = vst [vmem:[#allocation3 + $0x2f8] sm:$0xff] %v21067_v50  ;;  %15371 = vmatprep.subr.bf16.mxu0 %v17672_v44  ;;  %v21079_v17 = vpack.c.bf16 %v10083_v43, %v21033_v25  ;;  %v10115_v60 = vmul.f32 %v21733_v22, %v10083_v43  ;;  %v10232_v24 = vpack.c.bf16 %v10083_v43, %v10223_v5  ;;  %v11134_v22 = vld [vmem:[#allocation3 + $0x1e8] sm:$0xff] }
 0x559   : > { %v21075_v61 = vsel %vm587_vm5, %v20994_v42, %v10161_v9  ;;  %v21082_v51 = vpack.c.bf16 %v10081_v49, %v10080_v57  ;;  %v10113_v10 = vmul.f32 %v21734_v41, %v10081_v49  ;;  %v10231_v52 = vpack.c.bf16 %v10081_v49, %v10221_v59  ;;  %v17676_v42 = vld [vmem:[#allocation9 + $0x198] sm:$0xff]   ;;  %v11133_v41 = vld [vmem:[#allocation3 + $0x1e0] sm:$0xff] }
 0x55a   : > { %10202 = vst [vmem:[#allocation3 + $0x2e8] sm:$0xff] %v21075_v61  ;;  %16316 = vmatmul.mubr.bf16.gmra.mrb[148].mxu0 %v21713_v48  ;;  %10099 = vst [vmem:[#allocation3 + $0x338] sm:$0xff] %v21079_v17  ;;  %v10123_v3 = vpack.c.bf16 %v10115_v60, %v21033_v25  ;;  %v10289_v19 = vshll.u32 %v10232_v24, 16  ;;  %16370 = vmatpush3.bf16.msra.mxu1 %v17687_v23  ;;  %v10293_v34 = vshrl.u32 %v10232_v24, 16  ;;  %v17690_v60 = vld [vmem:[#allocation9 + $0x200] sm:$0xff]   ;;  %v17692_v24 = vld [vmem:[#allocation9 + $0x208] sm:$0xff]  }
 0x55b   : > { %16319 = vmatprep.mubr.bf16.mxu0 %v20757_v18  ;;  %15372 = vmatpush3.bf16.msra.mxu0 %v17673_v2  ;;  %10098 = vst [vmem:[#allocation3 + $0x320] sm:$0xff] %v21082_v51  ;;  %v10122_v48 = vpack.c.bf16 %v10113_v10, %v10080_v57  ;;  %v10281_v28 = vshll.u32 %v10231_v52, 16  ;;  %v17689_v18 = vld [vmem:[#allocation9 + $0x178] sm:$0xff]   ;;  %v10279_v25 = vor.u32 %v10277_v29, %v21040_v12  ;;  %v10285_v23 = vshrl.u32 %v10231_v52, 16  ;;  %v21097_v12 = vld [vmem:[#allocation9 + $0x80] sm:$0xff]   ;;  %v11139_v29 = vld [vmem:[#allocation3 + $0x210] sm:$0xff] }
 0x55c   : > { %15373 = vmatprep.subr.bf16.mxu0 %v17674_v7  ;;  %16371 = vmatprep.subr.bf16.mxu1 %v17688_v47  ;;  %v10180_v4 = vshrl.u32 %v10123_v3, 16  ;;  %v10291_v5 = vrot.slane %v10289_v19, 1  ;;  %v10183_v21 = vshll.u32 %v10123_v3, 16  ;;  %v11137_v10 = vld [vmem:[#allocation3 + $0x200] sm:$0xff]  ;;  %v17697_v52 = vld [vmem:[#allocation9 + $0x218] sm:$0xff]  }
 0x55d   : > { %11948 = vmatmul.mubr.bf16.gmra.mrb[108].mxu1 %v21017_v56  ;;  %v10172_v13 = vshrl.u32 %v10122_v48, 16  ;;  %v10283_v36 = vrot.slane %v10281_v28, 1  ;;  %v10175_v62 = vshll.u32 %v10122_v48, 16  ;;  %v11140_v3 = vld [vmem:[#allocation3 + $0x218] sm:$0xff]  ;;  %v17699_v19 = vld [vmem:[#allocation9 + $0x220] sm:$0xff]   ;;  %v11143_v48 = vld [vmem:[#allocation3 + $0x230] sm:$0xff] }
 0x55e   : > { %11955 = vmatprep.mubr.bf16.mxu1 %v21029_v20  ;;  %v10182_v57 = vrot.slane %v10180_v4, 7  ;;  %v10295_v44 = vor.u32 %v10293_v34, %v10291_v5  ;;  %16372 = vmatpush3.bf16.msra.mxu1 %v17688_v47  ;;  %v17684_v47 = vld [vmem:[#allocation9 + $0x1f8] sm:$0xff]   ;;  %v17703_v28 = vld [vmem:[#allocation9 + $0x230] sm:$0xff]   ;;  %v11142_v4 = vld [vmem:[#allocation3 + $0x228] sm:$0xff] }
 0x55f   : > { %15374 = vmatpush3.bf16.msra.mxu0 %v17676_v42  ;;  %v10174_v39 = vrot.slane %v10172_v13, 7  ;;  %v21095_v59 = vsel %vm821_vm3, %v10279_v25, %v10283_v36  ;;  %v10287_v33 = vor.u32 %v10285_v23, %v10283_v36  ;;  %16373 = vmatprep.subr.bf16.mxu1 %v17689_v18  ;;  %v11136_v42 = vld [vmem:[#allocation3 + $0x1f8] sm:$0xff]  ;;  %v17708_v25 = vld [vmem:[#allocation9 + $0x40] sm:$0xff]   ;;  %v17700_v23 = vld [vmem:[#allocation9 + $0xa8] sm:$0xff]  }
 0x560   : > { %15375 = vmatprep.subr.bf16.mxu0 %v17677_v8  ;;  %v10185_v6 = vor.u32 %v10183_v21, %v10182_v57  ;;  %v10207_v9 = vsel %vm18291_vm9, %v10182_v57, %v10206_v11  ;;  %v21103_v2 = vsel %vm18585_vm12, %v10295_v44, %v10315_v14  ;;  %10313 = vst [vmem:[#allocation3 + $0x310] sm:$0xff] %v21095_v59  ;;  %v17701_v8 = vld [vmem:[#allocation9 + $0x228] sm:$0xff]   ;;  %v17705_v11 = vld [vmem:[#allocation9 + $0x238] sm:$0xff]   ;;  %v17698_v14 = vld [vmem:[#allocation9 + $0xa0] sm:$0xff]  }
 0x561   : > { %10208 = vst [vmem:[#allocation3 + $0x348] sm:$0x1] %v10207_v9  ;;  %10317 = vst [vmem:[#allocation3 + $0x340] sm:$0xff] %v21103_v2  ;;  %v10177_v43 = vor.u32 %v10175_v62, %v10174_v39  ;;  %v21109_v49 = vsel %vm821_vm3, %v10287_v33, %v10291_v5  ;;  %v11146_v5 = vld [vmem:[#allocation3 + $0x248] sm:$0xff]  ;;  %v17696_v34 = vld [vmem:[#allocation9 + $0x98] sm:$0xff]  }
 0x562   : > { %16320 = vmatmul.mubr.bf16.gmra.mrb[152].mxu0 %v20769_v30  ;;  %v10186_v7 = vsel %vm587_vm5, %v10174_v39, %v10185_v6  ;;  %10314 = vst [vmem:[#allocation3 + $0x328] sm:$0xff] %v21109_v49  ;;  %16374 = vmatpush3.bf16.msra.mxu1 %v17689_v18  ;;  %v17694_v18 = vld [vmem:[#allocation9 + $0x90] sm:$0xff]   ;;  %v11145_v13 = vld [vmem:[#allocation3 + $0x240] sm:$0xff]  ;;  %v11148_v57 = vld [vmem:[#allocation3 + $0x258] sm:$0xff] }
 0x563   : > { %16323 = vmatprep.mubr.bf16.mxu0 %v20804_v53  ;;  %15376 = vmatpush3.bf16.msra.mxu0 %v17678_v40  ;;  %v21116_v30 = vsel %vm587_vm5, %v21038_v55, %v10177_v43  ;;  %10205 = vst [vmem:[#allocation3 + $0x330] sm:$0xff] %v10186_v7  ;;  %v17683_v53 = vld [vmem:[#allocation9 + $0x1b0] sm:$0xff]   ;;  %v17686_v55 = vld [vmem:[#allocation9 + $0x1b8] sm:$0xff]   ;;  %v11149_v36 = vld [vmem:[#allocation3 + $0x260] sm:$0xff] }
 0x564   : > { %15377 = vmatprep.subr.bf16.mxu0 %v17679_v37  ;;  %16391 = vmatprep.subr.bf16.mxu1 %v21097_v12  ;;  %10204 = vst [vmem:[#allocation3 + $0x318] sm:$0xff] %v21116_v30  ;;  %v17702_v40 = vld [vmem:[#allocation9 + $0xb0] sm:$0xff]   ;;  %v21135_v21 = vld [vmem:[#allocation3 + $0x278] sm:$0xff]  ;;  %v17706_v37 = vld [vmem:[#allocation9 + $0x1c0] sm:$0xff]  }
 0x565   : > { %11956 = vmatmul.mubr.bf16.gmra.mrb[112].mxu1 %v21075_v61  ;;  %v17704_v44 = vld [vmem:[#allocation9 + $0xb8] sm:$0xff]   ;;  %v21140_v39 = vld [vmem:[#allocation3 + $0x270] sm:$0xff]  ;;  %v17707_v33 = vld [vmem:[#allocation9 + $0x180] sm:$0xff]  }
 0x566   : > { %11963 = vmatprep.mubr.bf16.mxu1 %v21001_v27  ;;  %v11155_v62 = vld [vmem:[#allocation3 + $0x290] sm:$0xff]  ;;  %v17711_v6 = vld [vmem:[#allocation9 + $0x188] sm:$0xff]  }
 0x567   : > { %15378 = vmatpush3.bf16.msra.mxu0 %v17681_v0  ;;  %v17713_v9 = vld [vmem:[#allocation9 + $0x1d0] sm:$0xff]  }
 0x568   : > { %15379 = vmatprep.subr.bf16.mxu0 %v17682_v1  ;;  %v11135_v43 = vld [vmem:[#allocation3 + $0x1f0] sm:$0xff]  ;;  %v17710_v1 = vld [vmem:[#allocation9] sm:$0xff]  }
 0x569   : > { %v17715_v0 = vld [vmem:[#allocation9 + $0x190] sm:$0xff]  }
 0x56a   : > { %16324 = vmatmul.mubr.bf16.gmra.mrb[156].mxu0 %v20816_v32  ;;  %v17695_v32 = vld [vmem:[#allocation9 + $0x210] sm:$0xff]  }
 0x56b   : > { %15380 = vmatpush3.bf16.msra.mxu0 %v17683_v53  ;;  %11381 = vmatprep.mubr.bf16.mxu0 %v11134_v22  ;;  %v17721_v53 = vld [vmem:[#allocation9 + $0x1e0] sm:$0xff]  }
 0x56c   : > { %15381 = vmatprep.subr.bf16.mxu0 %v17684_v47  ;;  %v11138_v47 = vld [vmem:[#allocation3 + $0x208] sm:$0xff]  ;;  %v11141_v22 = vld [vmem:[#allocation3 + $0x220] sm:$0xff] }
 0x56d   : > { %11964 = vmatmul.mubr.bf16.gmra.mrb[116].mxu1 %v21063_v26 }
 0x56e   : > { %11971 = vmatprep.mubr.bf16.mxu1 %v21082_v51 }
 0x56f   : > { %15382 = vmatpush3.bf16.msra.mxu0 %v17686_v55  ;;  %v17723_v55 = vld [vmem:[#allocation9 + $0x1a0] sm:$0xff]  }
 0x570   : > { %16327 = vmatprep.subr.bf16.mxu0 %v17690_v60 }
 0x572   : > { %11382 = vmatmul.mubr.bf16.vlgmr.msra.gmra.mrb[160].mxu0 %v11133_v41  ;;  %v17716_v41 = vld [vmem:[#allocation9 + $0x50] sm:$0xff]  }
 0x573   : > { %11389 = vmatprep.mubr.bf16.mxu0 %v11137_v10  ;;  %16328 = vmatpush3.bf16.msra.mxu0 %v17690_v60  ;;  %v17714_v60 = vld [vmem:[#allocation9 + $0x8] sm:$0xff]   ;;  %v17720_v10 = vld [vmem:[#allocation9 + $0x58] sm:$0xff]  }
 0x574   : > { %16329 = vmatprep.subr.bf16.mxu0 %v17692_v24 }
 0x575   : > { %11972 = vmatmul.mubr.bf16.gmra.mrb[120].mxu1 %v21116_v30 }
 0x576   : > { %11979 = vmatprep.mubr.bf16.mxu1 %v21079_v17  ;;  %v17693_v17 = vld [vmem:[#allocation9 + $0x88] sm:$0xff]  }
 0x577   : > { %16330 = vmatpush3.bf16.msra.mxu0 %v17692_v24  ;;  %v17725_v24 = vld [vmem:[#allocation9 + $0x1e8] sm:$0xff]  }
 0x578   : > { %16331 = vmatprep.subr.bf16.mxu0 %v17695_v32 }
 0x57a   : > { %11390 = vmatmul.mubr.bf16.gmra.mrb[164].mxu0 %v11136_v42  ;;  %v11147_v42 = vld [vmem:[#allocation3 + $0x250] sm:$0xff] }
 0x57b   : > { %11397 = vmatprep.mubr.bf16.mxu0 %v11140_v3  ;;  %16332 = vmatpush3.bf16.msra.mxu0 %v17695_v32  ;;  %v17729_v32 = vld [vmem:[#allocation9 + $0x1f0] sm:$0xff]  }
 0x57c   : > { %16333 = vmatprep.subr.bf16.mxu0 %v17697_v52  ;;  %v17731_v3 = vld [vmem:[#allocation9 + $0x1b0] sm:$0xff]  }
 0x57d   : > { %11980 = vmatmul.mubr.bf16.gmra.mrb[124].mxu1 %v10186_v7  ;;  %v17717_v7 = vld [vmem:[#allocation9 + $0x1d8] sm:$0xff]  }
 0x57e   : > { %16375 = vmatprep.mubr.bf16.mxu1 %v20937_v46 }
 0x57f   : > { %16334 = vmatpush3.bf16.msra.mxu0 %v17697_v52  ;;  %v11144_v52 = vld [vmem:[#allocation3 + $0x238] sm:$0xff] }
 0x580   : > { %16335 = vmatprep.subr.bf16.mxu0 %v17699_v19 }
 0x582   : > { %11398 = vmatmul.mubr.bf16.gmra.mrb[168].mxu0 %v11139_v29  ;;  %v17735_v29 = vld [vmem:[#allocation9 + $0x1b8] sm:$0xff]  }
 0x583   : > { %11405 = vmatprep.mubr.bf16.mxu0 %v11143_v48  ;;  %16336 = vmatpush3.bf16.msra.mxu0 %v17699_v19  ;;  %v17722_v19 = vld [vmem:[#allocation9 + $0x18] sm:$0xff]   ;;  %v17726_v48 = vld [vmem:[#allocation9 + $0x20] sm:$0xff]  }
 0x584   : > { %16337 = vmatprep.subr.bf16.mxu0 %v17701_v8 }
 0x585   : > { %16376 = vmatmul.mubr.bf16.vlgmr.msra.gmra.mrb[128].mxu1 %v20998_v63 }
 0x586   : > { %16379 = vmatprep.mubr.bf16.mxu1 %v21009_v38  ;;  %16392 = vmatpush3.bf16.msra.mxu1 %v21097_v12  ;;  %v17709_v12 = vld [vmem:[#allocation9 + $0x1c8] sm:$0xff]  }
 0x587   : > { %16393 = vmatprep.subr.bf16.mxu1 %v17693_v17  ;;  %16338 = vmatpush3.bf16.msra.mxu0 %v17701_v8  ;;  %v17733_v8 = vld [vmem:[#allocation9 + $0x1f8] sm:$0xff]  }
 0x588   : > { %16339 = vmatprep.subr.bf16.mxu0 %v17703_v28 }
 0x58a   : > { %11406 = vmatmul.mubr.bf16.gmra.mrb[172].mxu0 %v11142_v4  ;;  %16394 = vmatpush3.bf16.msra.mxu1 %v17693_v17  ;;  %v17728_v17 = vld [vmem:[#allocation9 + $0x68] sm:$0xff]  }
 0x58b   : > { %11413 = vmatprep.mubr.bf16.mxu0 %v11146_v5  ;;  %16395 = vmatprep.subr.bf16.mxu1 %v17694_v18  ;;  %v17730_v4 = vld [vmem:[#allocation9 + $0x28] sm:$0xff]  }
 0x58c   : > { %16340 = vmatpush3.bf16.msra.mxu0 %v17703_v28  ;;  %v17737_v28 = vld [vmem:[#allocation9 + $0x200] sm:$0xff]  }
 0x58d   : > { %16380 = vmatmul.mubr.bf16.gmra.mrb[132].mxu1 %v21052_v45  ;;  %16341 = vmatprep.subr.bf16.mxu0 %v17705_v11 }
 0x58e   : > { %16383 = vmatprep.mubr.bf16.mxu1 %v21067_v50  ;;  %16396 = vmatpush3.bf16.msra.mxu1 %v17694_v18  ;;  %v11150_v18 = vld [vmem:[#allocation3 + $0x268] sm:$0xff] }
 0x58f   : > { %16397 = vmatprep.subr.bf16.mxu1 %v17696_v34 }
 0x590   : > { %16342 = vmatpush3.bf16.msra.mxu0 %v17705_v11  ;;  %v17739_v11 = vld [vmem:[#allocation9 + $0x208] sm:$0xff]  }
 0x591   : > { %15527 = vmatprep.subr.bf16.mxu0 %v17708_v25  ;;  %v12423_v25 = vld [vmem:[#allocation3 + $0x2a0] sm:$0xff] }
 0x592   : > { %11414 = vmatmul.mubr.bf16.gmra.mrb[192].mxu0 %v11145_v13  ;;  %16398 = vmatpush3.bf16.msra.mxu1 %v17696_v34  ;;  %v17732_v34 = vld [vmem:[#allocation9 + $0x70] sm:$0xff]  }
 0x593   : > { %11421 = vmatprep.mubr.bf16.mxu0 %v11149_v36  ;;  %16399 = vmatprep.subr.bf16.mxu1 %v17698_v14  ;;  %v12427_v36 = vld [vmem:[#allocation3 + $0x2c0] sm:$0xff] }
 0x595   : > { %16384 = vmatmul.mubr.bf16.gmra.mrb[136].mxu1 %v21095_v59 }
 0x596   : > { %16387 = vmatprep.mubr.bf16.mxu1 %v21109_v49  ;;  %16400 = vmatpush3.bf16.msra.mxu1 %v17698_v14 }
 0x597   : > { %16401 = vmatprep.subr.bf16.mxu1 %v17700_v23 }
 0x59a   : > { %11422 = vmatmul.mubr.bf16.gmra.mrb[196].mxu0 %v11148_v57  ;;  %16402 = vmatpush3.bf16.msra.mxu1 %v17700_v23 }
 0x59b   : > { %11429 = vmatprep.mubr.bf16.mxu0 %v21135_v21  ;;  %16403 = vmatprep.subr.bf16.mxu1 %v17702_v40 }
 0x59d   : > { %16388 = vmatmul.mubr.bf16.gmra.mrb[140].mxu1 %v21103_v2  ;;  %v11154_v2 = vld [vmem:[#allocation3 + $0x288] sm:$0xff] }
 0x59e   : > { %16404 = vmatpush3.bf16.msra.mxu1 %v17702_v40  ;;  %16407 = vmatprep.mubr.bf16.mxu1 %v20983_v16 }
 0x59f   : > { %16405 = vmatprep.subr.bf16.mxu1 %v17704_v44 }
 0x5a2   : > { %11430 = vmatmul.mubr.bf16.gmra.mrb[200].mxu0 %v21140_v39  ;;  %16406 = vmatpush3.bf16.msra.mxu1 %v17704_v44 }
 0x5a3   : > { %11437 = vmatprep.mubr.bf16.mxu0 %v11155_v62  ;;  %15607 = vmatprep.subr.bf16.mxu1 %v17706_v37  ;;  %v17734_v62 = vld [vmem:[#allocation9 + $0x30] sm:$0xff]  }
 0x5a5   : > { %16408 = vmatmul.mubr.bf16.vlgmr.msra.gmra.mrb[128].mxu1 %v20937_v46  ;;  %v17719_v46 = vld [vmem:[#allocation9 + $0x198] sm:$0xff]  }
 0x5a6   : > { %16411 = vmatprep.mubr.bf16.mxu1 %v20998_v63  ;;  %15608 = vmatpush3.bf16.msra.mxu1 %v17707_v33  ;;  %v17712_v63 = vld [vmem:[#allocation9 + $0x48] sm:$0xff]  }
 0x5a7   : > { %15609 = vmatprep.subr.bf16.mxu1 %v17709_v12 }
 0x5aa   : > { %11438 = vmatmul.mubr.bf16.gmra.mrb[204].mxu0 %v11154_v2  ;;  %15610 = vmatpush3.bf16.msra.mxu1 %v17711_v6  ;;  %v17740_v2 = vld [vmem:[#allocation9 + $0x210] sm:$0xff]  }
 0x5ab   : > { %16343 = vmatprep.mubr.bf16.mxu0 %v11135_v43  ;;  %15611 = vmatprep.subr.bf16.mxu1 %v17713_v9  ;;  %v17736_v9 = vld [vmem:[#allocation9 + $0x78] sm:$0xff]  }
 0x5ac   : > { %v11156_v43 = vld [vmem:[#allocation3 + $0x298] sm:$0xff] }
 0x5ad   : > { %16412 = vmatmul.mubr.bf16.gmra.mrb[132].mxu1 %v21009_v38  ;;  %v17727_v38 = vld [vmem:[#allocation9 + $0x1a8] sm:$0xff]  }
 0x5ae   : > { %16415 = vmatprep.mubr.bf16.mxu1 %v21052_v45  ;;  %15612 = vmatpush3.bf16.msra.mxu1 %v17715_v0  ;;  %v17718_v45 = vld [vmem:[#allocation9 + $0x10] sm:$0xff]  }
 0x5af   : > { %15613 = vmatprep.subr.bf16.mxu1 %v17717_v7  ;;  %v17738_v7 = vld [vmem:[#allocation9 + $0x38] sm:$0xff]  }
 0x5b2   : > { %16344 = vmatmul.mubr.bf16.vlgmr.msra.gmra.mrb[144].mxu0 %v11138_v47  ;;  %15614 = vmatpush3.bf16.msra.mxu1 %v17719_v46  ;;  %v17741_v46 = vld [vmem:[#allocation9 + $0x218] sm:$0xff]  }
 0x5b3   : > { %16347 = vmatprep.mubr.bf16.mxu0 %v11141_v22  ;;  %15528 = vmatpush3.bf16.msra.mxu0 %v17710_v1  ;;  %v12430_v47 = vld [vmem:[#allocation3 + $0x2d8] sm:$0xff] }
 0x5b4   : > { %15529 = vmatprep.subr.bf16.mxu0 %v17712_v63  ;;  %15615 = vmatprep.subr.bf16.mxu1 %v17721_v53 }
 0x5b5   : > { %16416 = vmatmul.mubr.bf16.gmra.mrb[136].mxu1 %v21067_v50  ;;  %v17724_v50 = vld [vmem:[#allocation9 + $0x60] sm:$0xff]  }
 0x5b6   : > { %16419 = vmatprep.mubr.bf16.mxu1 %v21095_v59  ;;  %15616 = vmatpush3.bf16.msra.mxu1 %v17723_v55  ;;  %v12424_v59 = vld [vmem:[#allocation3 + $0x2a8] sm:$0xff] }
 0x5b7   : > { %15530 = vmatpush3.bf16.msra.mxu0 %v17714_v60  ;;  %15617 = vmatprep.subr.bf16.mxu1 %v17725_v24 }
 0x5b8   : > { %15531 = vmatprep.subr.bf16.mxu0 %v17716_v41 }
 0x5ba   : > { %16348 = vmatmul.mubr.bf16.gmra.mrb[148].mxu0 %v11144_v52  ;;  %15618 = vmatpush3.bf16.msra.mxu1 %v17727_v38 }
 0x5bb   : > { %16351 = vmatprep.mubr.bf16.mxu0 %v11147_v42  ;;  %15532 = vmatpush3.bf16.msra.mxu0 %v17718_v45  ;;  %v17851_v42 = vld [vmem:[#allocation3 + $0x290] sm:$0xff] }
 0x5bc   : > { %15533 = vmatprep.subr.bf16.mxu0 %v17720_v10  ;;  %15619 = vmatprep.subr.bf16.mxu1 %v17729_v32 }
 0x5bd   : > { %16420 = vmatmul.mubr.bf16.gmra.mrb[140].mxu1 %v21109_v49 }
 0x5be   : > { %15620 = vmatpush3.bf16.msra.mxu1 %v17731_v3  ;;  %12671 = vmatprep.mubr.bf16.mxu1 %v12424_v59  ;;  %v17743_v3 = vld [vmem:[#allocation9 + $0x228] sm:$0xff]  }
 0x5bf   : > { %15534 = vmatpush3.bf16.msra.mxu0 %v17722_v19  ;;  %15621 = vmatprep.subr.bf16.mxu1 %v17733_v8  ;;  %v12429_v8 = vld [vmem:[#allocation3 + $0x2d0] sm:$0xff] }
 0x5c0   : > { %15535 = vmatprep.subr.bf16.mxu0 %v17724_v50 }
 0x5c2   : > { %16352 = vmatmul.mubr.bf16.gmra.mrb[152].mxu0 %v11150_v18  ;;  %15622 = vmatpush3.bf16.msra.mxu1 %v17735_v29  ;;  %v12433_v29 = vld [vmem:[#allocation3 + $0x2f0] sm:$0xff] }
 0x5c3   : > { %16355 = vmatprep.mubr.bf16.mxu0 %v20983_v16  ;;  %15536 = vmatpush3.bf16.msra.mxu0 %v17726_v48  ;;  %v15223_v5 = vpop.f32.mrb[112].mxu0 }
 0x5c4   : > { %v15309_v49 = vpop.f32.mrb[84].mxu1  ;;  %15537 = vmatprep.subr.bf16.mxu0 %v17728_v17  ;;  %16423 = vmatprep.subr.bf16.mxu1 %v17737_v28  ;;  %v15224_v14 = vpop.f32.mrb[113].mxu0 }
 0x5c5   : > { %v15310_v13 = vpop.f32.mrb[85].mxu1  ;;  %12672 = vmatmul.mubr.bf16.vlgmr.msra.gmra.mrb[144].mxu1 %v12423_v25  ;;  %v15225_v23 = vadd.f32 %v15224_v14, %v15223_v5  ;;  %v15226_v57 = vpop.f32.mrb[114].mxu0 }
 0x5c6   : > { %v15311_v40 = vadd.f32 %v15310_v13, %v15309_v49  ;;  %v15312_v44 = vpop.f32.mrb[86].mxu1  ;;  %12679 = vmatprep.mubr.bf16.mxu1 %v12427_v36  ;;  %16424 = vmatpush3.bf16.msra.mxu1 %v17737_v28  ;;  %v15227_v16 = vpop.f32.mrb[115].mxu0  ;;  %v17852_v13 = vld [vmem:[#allocation3 + $0x2a8] sm:$0xff]  ;;  %v17745_v36 = vld [vmem:[#allocation9 + $0x238] sm:$0xff]  }
 0x5c7   : > { %15538 = vmatpush3.bf16.msra.mxu0 %v17730_v4  ;;  %v15313_v37 = vpop.f32.mrb[87].mxu1  ;;  %16425 = vmatprep.subr.bf16.mxu1 %v17739_v11  ;;  %v21152_v33 = vadd.f32 %v21060_v58, %v15225_v23  ;;  %v15228_v12 = vadd.f32 %v15227_v16, %v15226_v57  ;;  %v12426_v58 = vld [vmem:[#allocation3 + $0x2b8] sm:$0xff]  ;;  %v12436_v16 = vld [vmem:[#allocation3 + $0x308] sm:$0xff] }
 0x5c8   : > { %v15314_v6 = vadd.f32 %v15313_v37, %v15312_v44  ;;  %15539 = vmatprep.subr.bf16.mxu0 %v17732_v34 }
 0x5c9   : > { %v21155_v0 = vadd.f32 %v21071_v15, %v15228_v12 }
 0x5ca   : > { %16356 = vmatmul.mubr.bf16.gmra.mrb[156].mxu0 %v11156_v43  ;;  %16426 = vmatpush3.bf16.msra.mxu1 %v17739_v11 }
 0x5cb   : > { %15540 = vmatpush3.bf16.msra.mxu0 %v17734_v62  ;;  %12261 = vmatprep.mubr.bf16.mxu0 %v21135_v21  ;;  %v15229_v1 = vpop.f32.mrb[116].mxu0  ;;  %v17742_v21 = vld [vmem:[#allocation9 + $0x220] sm:$0xff]  }
 0x5cc   : > { %15541 = vmatprep.subr.bf16.mxu0 %v17736_v9  ;;  %16427 = vmatprep.subr.bf16.mxu1 %v17740_v2  ;;  %v15315_v63 = vpop.f32.mrb[88].mxu1  ;;  %v15230_v53 = vpop.f32.mrb[117].mxu0 }
 0x5cd   : > { %12680 = vmatmul.mubr.bf16.gmra.mrb[148].mxu1 %v12426_v58  ;;  %v15231_v22 = vadd.f32 %v15230_v53, %v15229_v1  ;;  %v15316_v55 = vpop.f32.mrb[89].mxu1  ;;  %v15232_v60 = vpop.f32.mrb[118].mxu0  ;;  %v17853_v58 = vld [vmem:[#allocation3 + $0x2a0] sm:$0xff] }
 0x5ce   : > { %12687 = vmatprep.mubr.bf16.mxu1 %v12430_v47  ;;  %16428 = vmatpush3.bf16.msra.mxu1 %v17740_v2  ;;  %v15317_v15 = vadd.f32 %v15316_v55, %v15315_v63  ;;  %v15318_v24 = vpop.f32.mrb[90].mxu1  ;;  %v15233_v41 = vpop.f32.mrb[119].mxu0  ;;  %v12435_v53 = vld [vmem:[#allocation3 + $0x300] sm:$0xff] }
 0x5cf   : > { %15542 = vmatpush3.bf16.msra.mxu0 %v17738_v7  ;;  %16429 = vmatprep.subr.bf16.mxu1 %v17741_v46  ;;  %v21158_v38 = vadd.f32 %v15311_v40, %v15231_v22  ;;  %v15234_v45 = vadd.f32 %v15233_v41, %v15232_v60  ;;  %v15319_v10 = vpop.f32.mrb[91].mxu1  ;;  %v12432_v40 = vld [vmem:[#allocation3 + $0x2e8] sm:$0xff]  ;;  %v12439_v55 = vld [vmem:[#allocation3 + $0x320] sm:$0xff] }
 0x5d0   : > { %v15320_v32 = vadd.f32 %v15319_v10, %v15318_v24 }
 0x5d1   : > { %v21160_v52 = vadd.f32 %v15314_v6, %v15234_v45 }
 0x5d2   : > { %12262 = vmatmul.mubr.bf16.vlgmr.msra.gmra.mrb[208].mxu0 %v21140_v39  ;;  %16430 = vmatpush3.bf16.msra.mxu1 %v17741_v46  ;;  %v17744_v39 = vld [vmem:[#allocation9 + $0x230] sm:$0xff]  }
 0x5d3   : > { %12269 = vmatprep.mubr.bf16.mxu0 %v17851_v42  ;;  %16431 = vmatprep.subr.bf16.mxu1 %v17742_v21  ;;  %v15235_v19 = vpop.f32.mrb[120].mxu0 }
 0x5d4   : > { %v15321_v50 = vpop.f32.mrb[92].mxu1  ;;  %v15236_v59 = vpop.f32.mrb[121].mxu0 }
 0x5d5   : > { %12688 = vmatmul.mubr.bf16.gmra.mrb[152].mxu1 %v12429_v8  ;;  %v15237_v48 = vadd.f32 %v15236_v59, %v15235_v19  ;;  %v15322_v17 = vpop.f32.mrb[93].mxu1  ;;  %v15238_v28 = vpop.f32.mrb[122].mxu0 }
 0x5d6   : > { %12695 = vmatprep.mubr.bf16.mxu1 %v12433_v29  ;;  %16432 = vmatpush3.bf16.msra.mxu1 %v17742_v21  ;;  %v15323_v18 = vadd.f32 %v15322_v17, %v15321_v50  ;;  %v15324_v4 = vpop.f32.mrb[94].mxu1  ;;  %v15239_v11 = vpop.f32.mrb[123].mxu0  ;;  %v12438_v50 = vld [vmem:[#allocation3 + $0x318] sm:$0xff] }
 0x5d7   : > { %16433 = vmatprep.subr.bf16.mxu1 %v17743_v3  ;;  %v21163_v5 = vadd.f32 %v15317_v15, %v15237_v48  ;;  %v15240_v49 = vadd.f32 %v15239_v11, %v15238_v28  ;;  %v15325_v34 = vpop.f32.mrb[95].mxu1  ;;  %v12442_v48 = vld [vmem:[#allocation3 + $0x338] sm:$0xff] }
 0x5d8   : > { %v15326_v25 = vadd.f32 %v15325_v34, %v15324_v4 }
 0x5d9   : > { %v21165_v14 = vadd.f32 %v15320_v32, %v15240_v49 }
 0x5da   : > { %12270 = vmatmul.mubr.bf16.gmra.mrb[212].mxu0 %v20944_v54  ;;  %16434 = vmatpush3.bf16.msra.mxu1 %v17743_v3 }
 0x5db   : > { %12277 = vmatprep.mubr.bf16.mxu0 %v17852_v13  ;;  %16435 = vmatprep.subr.bf16.mxu1 %v17744_v39  ;;  %v15241_v23 = vpop.f32.mrb[124].mxu0 }
 0x5dc   : > { %v15327_v57 = vpop.f32.mrb[48].mxu1  ;;  %v15242_v44 = vpop.f32.mrb[125].mxu0 }
 0x5dd   : > { %12696 = vmatmul.mubr.bf16.gmra.mrb[156].mxu1 %v12432_v40  ;;  %v15243_v37 = vadd.f32 %v15242_v44, %v15241_v23  ;;  %v15328_v62 = vpop.f32.mrb[49].mxu1  ;;  %v15244_v12 = vpop.f32.mrb[126].mxu0  ;;  %v12441_v23 = vld [vmem:[#allocation3 + $0x330] sm:$0xff] }
 0x5de   : > { %12703 = vmatprep.mubr.bf16.mxu1 %v12436_v16  ;;  %16436 = vmatpush3.bf16.msra.mxu1 %v17744_v39  ;;  %v15329_v6 = vadd.f32 %v15328_v62, %v15327_v57  ;;  %v15330_v9 = vpop.f32.mrb[50].mxu1  ;;  %v15245_v2 = vpop.f32.mrb[127].mxu0  ;;  %v17855_v62 = vld [vmem:[#allocation2 + $0x8] sm:$0xff] }
 0x5df   : > { %16437 = vmatprep.subr.bf16.mxu1 %v17745_v36  ;;  %v21168_v54 = vadd.f32 %v15323_v18, %v15243_v37  ;;  %v15246_v43 = vadd.f32 %v15245_v2, %v15244_v12  ;;  %v15331_v7 = vpop.f32.mrb[51].mxu1 }
 0x5e0   : > { %v15332_v46 = vadd.f32 %v15331_v7, %v15330_v9 }
 0x5e1   : > { %v21170_v1 = vadd.f32 %v15326_v25, %v15246_v43 }
 0x5e2   : > { %12278 = vmatmul.mubr.bf16.gmra.mrb[216].mxu0 %v17853_v58  ;;  %16438 = vmatpush3.bf16.msra.mxu1 %v17745_v36  ;;  %v12444_v58 = vld [vmem:[#allocation3 + $0x348] sm:$0xff] }
 0x5e3   : > { %12285 = vmatprep.mubr.bf16.mxu0 %v20961_v35  ;;  %v17854_v35 = vld [vmem:[#allocation3 + $0x2d8] sm:$0xff] }
 0x5e4   : > { %v15247_v63 = vpop.f32.mrb[128].mxu0 }
 0x5e5   : > { %v15333_v47 = vpop.f32.mrb[52].mxu1  ;;  %v15248_v22 = vpop.f32.mrb[129].mxu0  ;;  %12704 = vmatmul.mubr.bf16.gmra.mrb[176].mxu1 %v12435_v53  ;;  %v12425_v53 = vld [vmem:[#allocation3 + $0x2b0] sm:$0xff] }
 0x5e6   : > { %v15249_v60 = vadd.f32 %v15248_v22, %v15247_v63  ;;  %v15334_v15 = vpop.f32.mrb[53].mxu1  ;;  %v15250_v24 = vpop.f32.mrb[130].mxu0  ;;  %12711 = vmatprep.mubr.bf16.mxu1 %v12439_v55 }
 0x5e7   : > { %v15335_v41 = vadd.f32 %v15334_v15, %v15333_v47  ;;  %v15336_v21 = vpop.f32.mrb[54].mxu1  ;;  %v15251_v45 = vpop.f32.mrb[131].mxu0 }
 0x5e8   : > { %v21173_v10 = vadd.f32 %v15329_v6, %v15249_v60  ;;  %v15252_v32 = vadd.f32 %v15251_v45, %v15250_v24  ;;  %v15337_v42 = vpop.f32.mrb[55].mxu1  ;;  %v12440_v45 = vld [vmem:[#allocation3 + $0x328] sm:$0xff] }
 0x5e9   : > { %v15338_v3 = vadd.f32 %v15337_v42, %v15336_v21  ;;  %v12437_v21 = vld [vmem:[#allocation3 + $0x310] sm:$0xff] }
 0x5ea   : > { %v21175_v19 = vadd.f32 %v15332_v46, %v15252_v32  ;;  %12286 = vmatmul.mubr.bf16.gmra.mrb[220].mxu0 %v21025_v31  ;;  %v12443_v32 = vld [vmem:[#allocation3 + $0x340] sm:$0xff] }
 0x5eb   : > { %12293 = vmatprep.mubr.bf16.mxu0 %v17854_v35 }
 0x5ec   : > { %v15253_v8 = vpop.f32.mrb[132].mxu0 }
 0x5ed   : > { %v15339_v59 = vpop.f32.mrb[56].mxu1  ;;  %v15254_v29 = vpop.f32.mrb[133].mxu0  ;;  %12712 = vmatmul.mubr.bf16.gmra.mrb[180].mxu1 %v12438_v50 }
 0x5ee   : > { %v15255_v17 = vadd.f32 %v15254_v29, %v15253_v8  ;;  %v15340_v28 = vpop.f32.mrb[57].mxu1  ;;  %v15256_v18 = vpop.f32.mrb[134].mxu0  ;;  %12719 = vmatprep.mubr.bf16.mxu1 %v12442_v48 }
 0x5ef   : > { %v15341_v4 = vadd.f32 %v15340_v28, %v15339_v59  ;;  %v15342_v11 = vpop.f32.mrb[58].mxu1  ;;  %v15257_v39 = vpop.f32.mrb[135].mxu0 }
 0x5f0   : > { %v21178_v49 = vadd.f32 %v15335_v41, %v15255_v17  ;;  %v15258_v34 = vadd.f32 %v15257_v39, %v15256_v18  ;;  %v15343_v25 = vpop.f32.mrb[59].mxu1  ;;  %v12434_v41 = vld [vmem:[#allocation3 + $0x2f8] sm:$0xff] }
 0x5f1   : > { %v15344_v31 = vadd.f32 %v15343_v25, %v15342_v11 }
 0x5f2   : > { %v21180_v13 = vadd.f32 %v15338_v3, %v15258_v34  ;;  %12294 = vmatmul.mubr.bf16.gmra.mrb[176].mxu0 %v21017_v56 }
 0x5f3   : > { %12301 = vmatprep.mubr.bf16.mxu0 %v21029_v20 }
 0x5f4   : > { %v15259_v36 = vpop.f32.mrb[136].mxu0 }
 0x5f5   : > { %v15345_v40 = vpop.f32.mrb[60].mxu1  ;;  %v15260_v57 = vpop.f32.mrb[137].mxu0  ;;  %12720 = vmatmul.mubr.bf16.gmra.mrb[184].mxu1 %v12441_v23 }
 0x5f6   : > { %v15261_v44 = vadd.f32 %v15260_v57, %v15259_v36  ;;  %v15346_v16 = vpop.f32.mrb[61].mxu1  ;;  %v15262_v37 = vpop.f32.mrb[138].mxu0  ;;  %12727 = vmatprep.mubr.bf16.mxu1 %v17855_v62 }
 0x5f7   : > { %v15347_v12 = vadd.f32 %v15346_v16, %v15345_v40  ;;  %v15348_v6 = vpop.f32.mrb[62].mxu1  ;;  %v15263_v9 = vpop.f32.mrb[139].mxu0 }
 0x5f8   : > { %v21184_v2 = vadd.f32 %v15341_v4, %v15261_v44  ;;  %v15264_v43 = vadd.f32 %v15263_v9, %v15262_v37  ;;  %v15349_v7 = vpop.f32.mrb[63].mxu1 }
 0x5f9   : > { %v15350_v56 = vadd.f32 %v15349_v7, %v15348_v6 }
 0x5fa   : > { %v21186_v46 = vadd.f32 %v15344_v31, %v15264_v43  ;;  %12302 = vmatmul.mubr.bf16.gmra.mrb[180].mxu0 %v21075_v61  ;;  %v12428_v61 = vld [vmem:[#allocation3 + $0x2c8] sm:$0xff] }
 0x5fb   : > { %12309 = vmatprep.mubr.bf16.mxu0 %v21001_v27  ;;  %v12431_v27 = vld [vmem:[#allocation3 + $0x2e0] sm:$0xff] }
 0x5fc   : > { %v15265_v20 = vpop.f32.mrb[140].mxu0 }
 0x5fd   : > { %v15266_v63 = vpop.f32.mrb[141].mxu0  ;;  %12728 = vmatmul.mubr.bf16.gmra.mrb[188].mxu1 %v12444_v58 }
 0x5fe   : > { %v15267_v47 = vadd.f32 %v15266_v63, %v15265_v20  ;;  %v15268_v22 = vpop.f32.mrb[142].mxu0  ;;  %16439 = vmatprep.mubr.bf16.mxu1 %v12425_v53 }
 0x5ff   : > { %v15269_v55 = vpop.f32.mrb[143].mxu0 }
 0x600   : > { %v21190_v60 = vadd.f32 %v15347_v12, %v15267_v47  ;;  %v15270_v15 = vadd.f32 %v15269_v55, %v15268_v22 }
 0x602   : > { %v21192_v24 = vadd.f32 %v15350_v56, %v15270_v15  ;;  %12310 = vmatmul.mubr.bf16.gmra.mrb[184].mxu0 %v21063_v26 }
 0x603   : > { %12317 = vmatprep.mubr.bf16.mxu0 %v21082_v51 }
 0x605   : > { %16440 = vmatmul.mubr.bf16.vlgmr.msra.gmra.mrb[128].mxu1 %v12428_v61 }
 0x606   : > { %16443 = vmatprep.mubr.bf16.mxu1 %v12431_v27 }
 0x60a   : > { %12318 = vmatmul.mubr.bf16.gmra.mrb[188].mxu0 %v21116_v30 }
 0x60d   : > { %16444 = vmatmul.mubr.bf16.gmra.mrb[132].mxu1 %v12434_v41 }
 0x60e   : > { %16447 = vmatprep.mubr.bf16.mxu1 %v12437_v21 }
 0x615   : > { %16448 = vmatmul.mubr.bf16.gmra.mrb[136].mxu1 %v12440_v45 }
 0x616   : > { %16451 = vmatprep.mubr.bf16.mxu1 %v12443_v32 }
 0x617   : > { %v15463_v42 = vpop.f32.mrb[96].mxu1 }
 0x618   : > { %v15464_v3 = vpop.f32.mrb[97].mxu1 }
 0x619   : > { %v21197_v35 = vadd.f32 %v15464_v3, %v15463_v42  ;;  %v15466_v26 = vpop.f32.mrb[98].mxu1 }
 0x61a   : > { %v15467_v51 = vpop.f32.mrb[99].mxu1 }
 0x61b   : > { %v21199_v8 = vadd.f32 %v15467_v51, %v15466_v26 }
 0x61d   : > { %16452 = vmatmul.mubr.bf16.gmra.mrb[140].mxu1 %v17855_v62 }
 0x620   : > { %v15469_v50 = vpop.f32.mrb[100].mxu1 }
 0x621   : > { %v15470_v59 = vpop.f32.mrb[101].mxu1 }
 0x622   : > { %v21201_v30 = vadd.f32 %v15470_v59, %v15469_v50  ;;  %v15472_v29 = vpop.f32.mrb[102].mxu1 }
 0x623   : > { %v15473_v48 = vpop.f32.mrb[103].mxu1 }
 0x624   : > { %v21203_v17 = vadd.f32 %v15473_v48, %v15472_v29 }
 0x628   : > { %v15475_v28 = vpop.f32.mrb[104].mxu1 }
 0x629   : > { %v15476_v18 = vpop.f32.mrb[105].mxu1 }
 0x62a   : > { %v21205_v4 = vadd.f32 %v15476_v18, %v15475_v28  ;;  %v15478_v11 = vpop.f32.mrb[106].mxu1 }
 0x62b   : > { %v15479_v39 = vpop.f32.mrb[107].mxu1 }
 0x62c   : > { %v21207_v34 = vadd.f32 %v15479_v39, %v15478_v11 }
 0x630   : > { %v15481_v25 = vpop.f32.mrb[108].mxu1 }
 0x631   : > { %v15482_v31 = vpop.f32.mrb[109].mxu1 }
 0x632   : > { %v21209_v36 = vadd.f32 %v15482_v31, %v15481_v25  ;;  %v15484_v23 = vpop.f32.mrb[110].mxu1 }
 0x633   : > { %v15485_v40 = vpop.f32.mrb[111].mxu1 }
 0x634   : > { %v21211_v57 = vadd.f32 %v15485_v40, %v15484_v23 }
 0x638   : > { %v15487_v44 = vpop.f32.mrb[112].mxu1 }
 0x639   : > { %v15488_v16 = vpop.f32.mrb[113].mxu1 }
 0x63a   : > { %v21213_v37 = vadd.f32 %v15488_v16, %v15487_v44  ;;  %v15490_v62 = vpop.f32.mrb[114].mxu1 }
 0x63b   : > { %v15491_v12 = vpop.f32.mrb[115].mxu1 }
 0x63c   : > { %v21215_v6 = vadd.f32 %v15491_v12, %v15490_v62 }
 0x640   : > { %v15493_v9 = vpop.f32.mrb[116].mxu1 }
 0x641   : > { %v15494_v43 = vpop.f32.mrb[117].mxu1 }
 0x642   : > { %v21217_v7 = vadd.f32 %v15494_v43, %v15493_v9  ;;  %v15496_v56 = vpop.f32.mrb[118].mxu1 }
 0x643   : > { %v15497_v20 = vpop.f32.mrb[119].mxu1 }
 0x644   : > { %v21219_v58 = vadd.f32 %v15497_v20, %v15496_v56 }
 0x645   : > { %v15383_v63 = vpop.f32.mrb[160].mxu0 }
 0x646   : > { %v15384_v53 = vpop.f32.mrb[161].mxu0 }
 0x647   : > { %v15385_v47 = vadd.f32 %v15384_v53, %v15383_v63  ;;  %v15386_v22 = vpop.f32.mrb[162].mxu0 }
 0x648   : > { %v15387_v55 = vpop.f32.mrb[163].mxu0  ;;  %v15499_v15 = vpop.f32.mrb[120].mxu1 }
 0x649   : > { %v15388_v61 = vadd.f32 %v15387_v55, %v15386_v22  ;;  %v15500_v27 = vpop.f32.mrb[121].mxu1  ;;  %v21222_v41 = vadd.f32 %v21152_v33, %v15385_v47 }
 0x64a   : > { %v21224_v21 = vadd.f32 %v15500_v27, %v15499_v15  ;;  %v15502_v45 = vpop.f32.mrb[122].mxu1 }
 0x64b   : > { %v15503_v32 = vpop.f32.mrb[123].mxu1  ;;  %v21227_v42 = vadd.f32 %v21155_v0, %v15388_v61 }
 0x64c   : > { %v21229_v3 = vadd.f32 %v15503_v32, %v15502_v45 }
 0x64d   : > { %v15389_v26 = vpop.f32.mrb[164].mxu0 }
 0x64e   : > { %v15390_v51 = vpop.f32.mrb[165].mxu0 }
 0x64f   : > { %v15391_v50 = vadd.f32 %v15390_v51, %v15389_v26  ;;  %v15392_v59 = vpop.f32.mrb[166].mxu0 }
 0x650   : > { %v15393_v29 = vpop.f32.mrb[167].mxu0  ;;  %v15505_v48 = vpop.f32.mrb[124].mxu1 }
 0x651   : > { %v15394_v28 = vadd.f32 %v15393_v29, %v15392_v59  ;;  %v15506_v18 = vpop.f32.mrb[125].mxu1  ;;  %v16760_v33 = vadd.f32 %v21158_v38, %v15391_v50 }
 0x652   : > { %v21232_v11 = vadd.f32 %v15506_v18, %v15505_v48  ;;  %v15508_v39 = vpop.f32.mrb[126].mxu1 }
 0x653   : > { %v15509_v25 = vpop.f32.mrb[127].mxu1  ;;  %v16766_v31 = vadd.f32 %v21160_v52, %v15394_v28 }
 0x654   : > { %v21235_v0 = vadd.f32 %v15509_v25, %v15508_v39 }
 0x655   : > { %v15395_v23 = vpop.f32.mrb[168].mxu0 }
 0x656   : > { %v15396_v40 = vpop.f32.mrb[169].mxu0 }
 0x657   : > { %v15397_v44 = vadd.f32 %v15396_v40, %v15395_v23  ;;  %v15398_v16 = vpop.f32.mrb[170].mxu0 }
 0x658   : > { %v15399_v62 = vpop.f32.mrb[171].mxu0 }
 0x659   : > { %v15400_v12 = vadd.f32 %v15399_v62, %v15398_v16  ;;  %v21238_v9 = vadd.f32 %v21163_v5, %v15397_v44 }
 0x65b   : > { %v21241_v43 = vadd.f32 %v21165_v14, %v15400_v12 }
 0x65d   : > { %v15401_v38 = vpop.f32.mrb[172].mxu0 }
 0x65e   : > { %v15402_v56 = vpop.f32.mrb[173].mxu0 }
 0x65f   : > { %v15403_v20 = vadd.f32 %v15402_v56, %v15401_v38  ;;  %v15404_v63 = vpop.f32.mrb[174].mxu0 }
 0x660   : > { %v15405_v53 = vpop.f32.mrb[175].mxu0 }
 0x661   : > { %v15406_v52 = vadd.f32 %v15405_v53, %v15404_v63  ;;  %v16772_v47 = vadd.f32 %v21168_v54, %v15403_v20 }
 0x663   : > { %v21245_v22 = vadd.f32 %v21170_v1, %v15406_v52 }
 0x665   : > { %v15407_v55 = vpop.f32.mrb[192].mxu0 }
 0x666   : > { %v15408_v15 = vpop.f32.mrb[193].mxu0 }
 0x667   : > { %v15409_v61 = vadd.f32 %v15408_v15, %v15407_v55  ;;  %v15410_v27 = vpop.f32.mrb[194].mxu0  ;;  %v21276_v55 = vld [vmem:[%s21497_s4] ss:$0 sm:$0xff] }
 0x668   : > { %v15411_v5 = vpop.f32.mrb[195].mxu0  ;;  %v13549_v15 = vld [vmem:[%s18227_s6 + $0x100] sm:$0xff] }
 0x669   : > { %v15412_v45 = vadd.f32 %v15411_v5, %v15410_v27  ;;  %v21248_v14 = vadd.f32 %v21173_v10, %v15409_v61  ;;  %v13552_v27 = vld [vmem:[%s18227_s6 + $0x118] sm:$0xff] }
 0x66b   : > { %v21251_v32 = vadd.f32 %v21175_v19, %v15412_v45 }
 0x66d   : > { %v15413_v26 = vpop.f32.mrb[196].mxu0 }
 0x66e   : > { %v15414_v51 = vpop.f32.mrb[197].mxu0 }
 0x66f   : > { %v15415_v50 = vadd.f32 %v15414_v51, %v15413_v26  ;;  %v15416_v59 = vpop.f32.mrb[198].mxu0  ;;  %v13550_v26 = vld [vmem:[%s18227_s6 + $0x108] sm:$0xff] }
 0x670   : > { %v15417_v54 = vpop.f32.mrb[199].mxu0 }
 0x671   : > { %v15418_v29 = vadd.f32 %v15417_v54, %v15416_v59  ;;  %v21254_v1 = vadd.f32 %v21178_v49, %v15415_v50 }
 0x673   : > { %v21257_v48 = vadd.f32 %v21180_v13, %v15418_v29 }
 0x675   : > { %v15419_v28 = vpop.f32.mrb[200].mxu0 }
 0x676   : > { %v15420_v18 = vpop.f32.mrb[201].mxu0 }
 0x677   : > { %v15421_v39 = vadd.f32 %v15420_v18, %v15419_v28  ;;  %v15422_v10 = vpop.f32.mrb[202].mxu0 }
 0x678   : > { %v15423_v25 = vpop.f32.mrb[203].mxu0 }
 0x679   : > { %v15424_v19 = vadd.f32 %v15423_v25, %v15422_v10  ;;  %v21260_v23 = vadd.f32 %v21184_v2, %v15421_v39  ;;  %v13553_v25 = vld [vmem:[%s18227_s6 + $0x120] sm:$0xff] }
 0x67b   : > { %v21263_v40 = vadd.f32 %v21186_v46, %v15424_v19  ;;  %v13551_v46 = vld [vmem:[%s18227_s6 + $0x110] sm:$0xff] }
 0x67d   : > { %v15425_v44 = vpop.f32.mrb[204].mxu0 }
 0x67e   : > { %v15426_v49 = vpop.f32.mrb[205].mxu0 }
 0x67f   : > { %v15427_v16 = vadd.f32 %v15426_v49, %v15425_v44  ;;  %v15428_v62 = vpop.f32.mrb[206].mxu0 }
 0x680   : > { %v15429_v13 = vpop.f32.mrb[207].mxu0 }
 0x681   : > { %v15430_v12 = vadd.f32 %v15429_v13, %v15428_v62  ;;  %v21266_v38 = vadd.f32 %v21190_v60, %v15427_v16  ;;  %v13556_v16 = vld [vmem:[%s18227_s6 + $0x138] sm:$0xff] }
 0x683   : > { %v21269_v56 = vadd.f32 %v21192_v24, %v15430_v12 }
 0x685   : > { %v16345_v20 = vpop.f32.mrb[144].mxu0 }
 0x686   : > { %v16761_v2 = vadd.f32 %v16760_v33, %v16345_v20  ;;  %v11480_v63 = vpop.f32.mrb[145].mxu0 }
 0x687   : > { %v16764_v53 = vadd.f32 %v21222_v41, %v11480_v63  ;;  %v16346_v52 = vpop.f32.mrb[146].mxu0 }
 0x688   : > { %v11561_v60 = vadd.f32 %v21276_v55, %v16761_v2  ;;  %v16767_v24 = vadd.f32 %v16766_v31, %v16346_v52  ;;  %v11483_v61 = vpop.f32.mrb[147].mxu0 }
 0x689   : > { %v11559_v33 = vadd.f32 %v21276_v55, %v16764_v53  ;;  %v16770_v41 = vadd.f32 %v21227_v42, %v11483_v61  ;;  %v13555_v42 = vld [vmem:[%s18227_s6 + $0x130] sm:$0xff] }
 0x68a   : > { %v11577_v5 = vadd.f32 %v13551_v46, %v11561_v60  ;;  %v11562_v45 = vadd.f32 %v21276_v55, %v16767_v24  ;;  %v13557_v24 = vld [vmem:[%s18227_s6 + $0x140] sm:$0xff] }
 0x68b   : > { %v11575_v51 = vadd.f32 %v13549_v15, %v11559_v33  ;;  %v11560_v50 = vadd.f32 %v21276_v55, %v16770_v41 }
 0x68c   : > { %13639 = vst [vmem:[%s20181_s30 + $0x110] sm:$0xff] %v11577_v5  ;;  %v11578_v59 = vadd.f32 %v13552_v27, %v11562_v45  ;;  %v13560_v5 = vld [vmem:[%s18227_s6 + $0x158] sm:$0xff] }
 0x68d   : > { %13637 = vst [vmem:[%s20181_s30 + $0x100] sm:$0xff] %v11575_v51  ;;  %v11576_v31 = vadd.f32 %v13550_v26, %v11560_v50  ;;  %v16349_v54 = vpop.f32.mrb[148].mxu0  ;;  %v13558_v51 = vld [vmem:[%s18227_s6 + $0x148] sm:$0xff] }
 0x68e   : > { %13640 = vst [vmem:[%s20181_s30 + $0x118] sm:$0xff] %v11578_v59  ;;  %v16773_v29 = vadd.f32 %v16772_v47, %v16349_v54  ;;  %v11496_v28 = vpop.f32.mrb[149].mxu0 }
 0x68f   : > { %13638 = vst [vmem:[%s20181_s30 + $0x108] sm:$0xff] %v11576_v31  ;;  %v16776_v18 = vadd.f32 %v21238_v9, %v11496_v28  ;;  %v16350_v39 = vpop.f32.mrb[150].mxu0  ;;  %v13554_v9 = vld [vmem:[%s18227_s6 + $0x128] sm:$0xff] }
 0x690   : > { %v11565_v10 = vadd.f32 %v21276_v55, %v16773_v29  ;;  %v16779_v19 = vadd.f32 %v21245_v22, %v16350_v39  ;;  %v11499_v44 = vpop.f32.mrb[151].mxu0 }
 0x691   : > { %v11563_v49 = vadd.f32 %v21276_v55, %v16776_v18  ;;  %v16782_v47 = vadd.f32 %v21241_v43, %v11499_v44  ;;  %v13559_v43 = vld [vmem:[%s18227_s6 + $0x150] sm:$0xff] }
 0x692   : > { %v11581_v62 = vadd.f32 %v13555_v42, %v11565_v10  ;;  %v11566_v13 = vadd.f32 %v21276_v55, %v16779_v19  ;;  %v13563_v10 = vld [vmem:[%s18227_s6 + $0x170] sm:$0xff] }
 0x693   : > { %v11579_v12 = vadd.f32 %v13553_v25, %v11563_v49  ;;  %v11564_v20 = vadd.f32 %v21276_v55, %v16782_v47  ;;  %v13561_v49 = vld [vmem:[%s18227_s6 + $0x160] sm:$0xff] }
 0x694   : > { %13643 = vst [vmem:[%s20181_s30 + $0x130] sm:$0xff] %v11581_v62  ;;  %v11582_v2 = vadd.f32 %v13556_v16, %v11566_v13 }
 0x695   : > { %13641 = vst [vmem:[%s20181_s30 + $0x120] sm:$0xff] %v11579_v12  ;;  %v11580_v22 = vadd.f32 %v13554_v9, %v11564_v20  ;;  %v16353_v63 = vpop.f32.mrb[152].mxu0  ;;  %v13564_v9 = vld [vmem:[%s18227_s6 + $0x178] sm:$0xff] }
 0x696   : > { %13644 = vst [vmem:[%s20181_s30 + $0x138] sm:$0xff] %v11582_v2  ;;  %v16785_v46 = vadd.f32 %v21254_v1, %v16353_v63  ;;  %v11512_v53 = vpop.f32.mrb[153].mxu0  ;;  %v13562_v2 = vld [vmem:[%s18227_s6 + $0x168] sm:$0xff] }
 0x697   : > { %13642 = vst [vmem:[%s20181_s30 + $0x128] sm:$0xff] %v11580_v22  ;;  %v16788_v52 = vadd.f32 %v21248_v14, %v11512_v53  ;;  %v16354_v60 = vpop.f32.mrb[154].mxu0 }
 0x698   : > { %v11569_v15 = vadd.f32 %v21276_v55, %v16785_v46  ;;  %v16791_v61 = vadd.f32 %v21257_v48, %v16354_v60  ;;  %v11515_v33 = vpop.f32.mrb[155].mxu0  ;;  %v15623_v27 = vpop.f32.mrb[144].mxu1 }
 0x699   : > { %v11567_v41 = vadd.f32 %v21276_v55, %v16788_v52  ;;  %v16794_v1 = vadd.f32 %v21251_v32, %v11515_v33  ;;  %v15624_v45 = vpop.f32.mrb[145].mxu1 }
 0x69a   : > { %v11585_v26 = vadd.f32 %v13559_v43, %v11569_v15  ;;  %v11570_v14 = vadd.f32 %v21276_v55, %v16791_v61  ;;  %v15625_v50 = vadd.f32 %v15624_v45, %v15623_v27  ;;  %v15626_v59 = vpop.f32.mrb[146].mxu1 }
 0x69b   : > { %v11583_v31 = vadd.f32 %v13557_v24, %v11567_v41  ;;  %v11568_v48 = vadd.f32 %v21276_v55, %v16794_v1  ;;  %v15627_v54 = vpop.f32.mrb[147].mxu1 }
 0x69c   : > { %13647 = vst [vmem:[%s20181_s30 + $0x150] sm:$0xff] %v11585_v26  ;;  %v11586_v29 = vadd.f32 %v13560_v5, %v11570_v14  ;;  %v15628_v28 = vadd.f32 %v15627_v54, %v15626_v59 }
 0x69d   : > { %13645 = vst [vmem:[%s20181_s30 + $0x140] sm:$0xff] %v11583_v31  ;;  %v11584_v32 = vadd.f32 %v13558_v51, %v11568_v48  ;;  %v16357_v42 = vpop.f32.mrb[156].mxu0 }
 0x69e   : > { %13648 = vst [vmem:[%s20181_s30 + $0x158] sm:$0xff] %v11586_v29  ;;  %v16797_v18 = vadd.f32 %v21266_v38, %v16357_v42  ;;  %v11528_v39 = vpop.f32.mrb[157].mxu0 }
 0x69f   : > { %13646 = vst [vmem:[%s20181_s30 + $0x148] sm:$0xff] %v11584_v32  ;;  %v16800_v25 = vadd.f32 %v21260_v23, %v11528_v39  ;;  %v16358_v19 = vpop.f32.mrb[158].mxu0 }
 0x6a0   : > { %v11573_v44 = vadd.f32 %v21276_v55, %v16797_v18  ;;  %v16803_v16 = vadd.f32 %v21269_v56, %v16358_v19  ;;  %v11531_v47 = vpop.f32.mrb[159].mxu0  ;;  %v15629_v62 = vpop.f32.mrb[148].mxu1 }
 0x6a1   : > { %v11571_v13 = vadd.f32 %v21276_v55, %v16800_v25  ;;  %v16806_v38 = vadd.f32 %v21263_v40, %v11531_v47  ;;  %v15630_v12 = vpop.f32.mrb[149].mxu1 }
 0x6a2   : > { %v11589_v20 = vadd.f32 %v13563_v10, %v11573_v44  ;;  %v11574_v23 = vadd.f32 %v21276_v55, %v16803_v16  ;;  %v15631_v22 = vadd.f32 %v15630_v12, %v15629_v62  ;;  %v15632_v63 = vpop.f32.mrb[150].mxu1 }
 0x6a3   : > { %v11587_v46 = vadd.f32 %v13561_v49, %v11571_v13  ;;  %v11572_v56 = vadd.f32 %v21276_v55, %v16806_v38  ;;  %v15633_v53 = vpop.f32.mrb[151].mxu1 }
 0x6a4   : > { %13651 = vst [vmem:[%s20181_s30 + $0x170] sm:$0xff] %v11589_v20  ;;  %v11590_v43 = vadd.f32 %v13564_v9, %v11574_v23  ;;  %v15634_v52 = vadd.f32 %v15633_v53, %v15632_v63 }
 0x6a5   : > { %13649 = vst [vmem:[%s20181_s30 + $0x160] sm:$0xff] %v11587_v46  ;;  %v11588_v60 = vadd.f32 %v13562_v2, %v11572_v56  ;;  %v15543_v15 = vpop.f32.mrb[208].mxu0 }
 0x6a6   : > { %13652 = vst [vmem:[%s20181_s30 + $0x178] sm:$0xff] %v11590_v43  ;;  %v15544_v40 = vpop.f32.mrb[209].mxu0 }
 0x6a7   : > { %13650 = vst [vmem:[%s20181_s30 + $0x168] sm:$0xff] %v11588_v60  ;;  %v15545_v24 = vadd.f32 %v15544_v40, %v15543_v15  ;;  %v15546_v61 = vpop.f32.mrb[210].mxu0 }
 0x6a8   : > { %v15547_v33 = vpop.f32.mrb[211].mxu0  ;;  %v15635_v27 = vpop.f32.mrb[152].mxu1 }
 0x6a9   : > { %v16810_v41 = vadd.f32 %v15545_v24, %v21197_v35  ;;  %v15548_v5 = vadd.f32 %v15547_v33, %v15546_v61  ;;  %v15636_v1 = vpop.f32.mrb[153].mxu1 }
 0x6aa   : > { %v15637_v45 = vadd.f32 %v15636_v1, %v15635_v27  ;;  %v15638_v26 = vpop.f32.mrb[154].mxu1 }
 0x6ab   : > { %v16816_v14 = vadd.f32 %v15548_v5, %v21199_v8  ;;  %v15639_v51 = vpop.f32.mrb[155].mxu1  ;;  %v21339_v59 = vadd.f32 %v16810_v41, %v15625_v50 }
 0x6ac   : > { %v15640_v31 = vadd.f32 %v15639_v51, %v15638_v26 }
 0x6ad   : > { %v15549_v48 = vpop.f32.mrb[212].mxu0  ;;  %v21341_v54 = vadd.f32 %v16816_v14, %v15628_v28 }
 0x6ae   : > { %v15550_v29 = vpop.f32.mrb[213].mxu0 }
 0x6af   : > { %v15551_v32 = vadd.f32 %v15550_v29, %v15549_v48  ;;  %v15552_v42 = vpop.f32.mrb[214].mxu0 }
 0x6b0   : > { %v15553_v18 = vpop.f32.mrb[215].mxu0  ;;  %v15641_v39 = vpop.f32.mrb[156].mxu1 }
 0x6b1   : > { %v16807_v35 = vadd.f32 %v15551_v32, %v21201_v30  ;;  %v15554_v10 = vadd.f32 %v15553_v18, %v15552_v42  ;;  %v15642_v25 = vpop.f32.mrb[157].mxu1 }
 0x6b2   : > { %v15643_v19 = vadd.f32 %v15642_v25, %v15641_v39  ;;  %v15644_v44 = vpop.f32.mrb[158].mxu1 }
 0x6b3   : > { %v16813_v8 = vadd.f32 %v15554_v10, %v21203_v17  ;;  %v15645_v49 = vpop.f32.mrb[159].mxu1  ;;  %v21345_v50 = vadd.f32 %v16807_v35, %v15631_v22 }
 0x6b4   : > { %v15646_v16 = vadd.f32 %v15645_v49, %v15644_v44 }
 0x6b5   : > { %v15555_v47 = vpop.f32.mrb[216].mxu0  ;;  %v21347_v28 = vadd.f32 %v16813_v8, %v15634_v52 }
 0x6b6   : > { %v15556_v62 = vpop.f32.mrb[217].mxu0 }
 0x6b7   : > { %v15557_v13 = vadd.f32 %v15556_v62, %v15555_v47  ;;  %v15558_v9 = vpop.f32.mrb[218].mxu0 }
 0x6b8   : > { %v15559_v38 = vpop.f32.mrb[219].mxu0  ;;  %v15647_v12 = vpop.f32.mrb[176].mxu1 }
 0x6b9   : > { %v16822_v30 = vadd.f32 %v15557_v13, %v21205_v4  ;;  %v15560_v20 = vadd.f32 %v15559_v38, %v15558_v9  ;;  %v15648_v23 = vpop.f32.mrb[177].mxu1 }
 0x6ba   : > { %v15649_v2 = vadd.f32 %v15648_v23, %v15647_v12  ;;  %v15650_v63 = vpop.f32.mrb[178].mxu1 }
 0x6bb   : > { %v16828_v17 = vadd.f32 %v15560_v20, %v21207_v34  ;;  %v15651_v46 = vpop.f32.mrb[179].mxu1  ;;  %v21351_v22 = vadd.f32 %v16822_v30, %v15637_v45 }
 0x6bc   : > { %v15652_v56 = vadd.f32 %v15651_v46, %v15650_v63 }
 0x6bd   : > { %v15561_v53 = vpop.f32.mrb[220].mxu0  ;;  %v21353_v43 = vadd.f32 %v16828_v17, %v15640_v31 }
 0x6be   : > { %v15562_v52 = vpop.f32.mrb[221].mxu0 }
 0x6bf   : > { %v15563_v60 = vadd.f32 %v15562_v52, %v15561_v53  ;;  %v15564_v15 = vpop.f32.mrb[222].mxu0 }
 0x6c0   : > { %v15565_v40 = vpop.f32.mrb[223].mxu0  ;;  %v15653_v24 = vpop.f32.mrb[180].mxu1 }
 0x6c1   : > { %v16819_v4 = vadd.f32 %v15563_v60, %v21209_v36  ;;  %v15566_v61 = vadd.f32 %v15565_v40, %v15564_v15  ;;  %v15654_v33 = vpop.f32.mrb[181].mxu1 }
 0x6c2   : > { %v15655_v27 = vadd.f32 %v15654_v33, %v15653_v24  ;;  %v15656_v41 = vpop.f32.mrb[182].mxu1  ;;  %v13655_v24 = vld [vmem:[%s18227_s6 + $0x190] sm:$0xff] }
 0x6c3   : > { %v16825_v34 = vadd.f32 %v15566_v61, %v21211_v57  ;;  %v15657_v5 = vpop.f32.mrb[183].mxu1  ;;  %v21357_v1 = vadd.f32 %v16819_v4, %v15643_v19 }
 0x6c4   : > { %v15658_v45 = vadd.f32 %v15657_v5, %v15656_v41  ;;  %v13653_v41 = vld [vmem:[%s18227_s6 + $0x180] sm:$0xff] }
 0x6c5   : > { %v15567_v26 = vpop.f32.mrb[176].mxu0  ;;  %v21359_v14 = vadd.f32 %v16825_v34, %v15646_v16 }
 0x6c6   : > { %v15568_v51 = vpop.f32.mrb[177].mxu0 }
 0x6c7   : > { %v15569_v31 = vadd.f32 %v15568_v51, %v15567_v26  ;;  %v15570_v48 = vpop.f32.mrb[178].mxu0 }
 0x6c8   : > { %v15571_v29 = vpop.f32.mrb[179].mxu0  ;;  %v15659_v32 = vpop.f32.mrb[184].mxu1 }
 0x6c9   : > { %v16834_v36 = vadd.f32 %v15569_v31, %v21213_v37  ;;  %v15572_v42 = vadd.f32 %v15571_v29, %v15570_v48  ;;  %v15660_v18 = vpop.f32.mrb[185].mxu1 }
 0x6ca   : > { %v15661_v39 = vadd.f32 %v15660_v18, %v15659_v32  ;;  %v15662_v35 = vpop.f32.mrb[186].mxu1 }
 0x6cb   : > { %v16840_v57 = vadd.f32 %v15572_v42, %v21215_v6  ;;  %v15663_v10 = vpop.f32.mrb[187].mxu1  ;;  %v21363_v25 = vadd.f32 %v16834_v36, %v15649_v2 }
 0x6cc   : > { %v15664_v19 = vadd.f32 %v15663_v10, %v15662_v35 }
 0x6cd   : > { %v15573_v44 = vpop.f32.mrb[180].mxu0  ;;  %v21365_v8 = vadd.f32 %v16840_v57, %v15652_v56 }
 0x6ce   : > { %v15574_v49 = vpop.f32.mrb[181].mxu0 }
 0x6cf   : > { %v15575_v16 = vadd.f32 %v15574_v49, %v15573_v44  ;;  %v15576_v47 = vpop.f32.mrb[182].mxu0  ;;  %v13659_v49 = vld [vmem:[%s18227_s6 + $0x1b0] sm:$0xff] }
 0x6d0   : > { %v15577_v62 = vpop.f32.mrb[183].mxu0  ;;  %v15665_v13 = vpop.f32.mrb[188].mxu1 }
 0x6d1   : > { %v16831_v37 = vadd.f32 %v15575_v16, %v21217_v7  ;;  %v15578_v9 = vadd.f32 %v15577_v62, %v15576_v47  ;;  %v15666_v38 = vpop.f32.mrb[189].mxu1 }
 0x6d2   : > { %v15667_v12 = vadd.f32 %v15666_v38, %v15665_v13  ;;  %v15668_v30 = vpop.f32.mrb[190].mxu1 }
 0x6d3   : > { %v16837_v6 = vadd.f32 %v15578_v9, %v21219_v58  ;;  %v15669_v20 = vpop.f32.mrb[191].mxu1  ;;  %v21369_v23 = vadd.f32 %v16831_v37, %v15655_v27  ;;  %v13657_v37 = vld [vmem:[%s18227_s6 + $0x1a0] sm:$0xff] }
 0x6d4   : > { %v15670_v2 = vadd.f32 %v15669_v20, %v15668_v30  ;;  %v13660_v30 = vld [vmem:[%s18227_s6 + $0x1b8] sm:$0xff] }
 0x6d5   : > { %v15579_v63 = vpop.f32.mrb[184].mxu0  ;;  %v21371_v17 = vadd.f32 %v16837_v6, %v15658_v45 }
 0x6d6   : > { %v15580_v46 = vpop.f32.mrb[185].mxu0 }
 0x6d7   : > { %v15581_v56 = vadd.f32 %v15580_v46, %v15579_v63  ;;  %v15582_v53 = vpop.f32.mrb[186].mxu0 }
 0x6d8   : > { %v15583_v52 = vpop.f32.mrb[187].mxu0  ;;  %v16441_v7 = vpop.f32.mrb[128].mxu1 }
 0x6d9   : > { %v16846_v60 = vadd.f32 %v15581_v56, %v21224_v21  ;;  %v15584_v15 = vadd.f32 %v15583_v52, %v15582_v53  ;;  %v16809_v40 = vadd.f32 %v21345_v50, %v16441_v7  ;;  %v12770_v58 = vpop.f32.mrb[129].mxu1  ;;  %v13656_v50 = vld [vmem:[%s18227_s6 + $0x198] sm:$0xff]  ;;  %v13663_v7 = vld [vmem:[%s18227_s6 + $0x1d0] sm:$0xff] }
 0x6da   : > { %v16812_v4 = vadd.f32 %v21339_v59, %v12770_v58  ;;  %v16442_v61 = vpop.f32.mrb[130].mxu1 }
 0x6db   : > { %v16852_v33 = vadd.f32 %v15584_v15, %v21229_v3  ;;  %v12851_v27 = vadd.f32 %v21276_v55, %v16809_v40  ;;  %v16815_v34 = vadd.f32 %v21347_v28, %v16442_v61  ;;  %v12773_v5 = vpop.f32.mrb[131].mxu1  ;;  %v21381_v45 = vadd.f32 %v16846_v60, %v15661_v39  ;;  %v13654_v3 = vld [vmem:[%s18227_s6 + $0x188] sm:$0xff]  ;;  %v13661_v40 = vld [vmem:[%s18227_s6 + $0x1c0] sm:$0xff]  ;;  %v13664_v61 = vld [vmem:[%s18227_s6 + $0x1d8] sm:$0xff] }
 0x6dc   : > { %v12849_v21 = vadd.f32 %v21276_v55, %v16812_v4  ;;  %v16818_v26 = vadd.f32 %v21341_v54, %v12773_v5 }
 0x6dd   : > { %v15585_v51 = vpop.f32.mrb[188].mxu0  ;;  %v12867_v59 = vadd.f32 %v13655_v24, %v12851_v27  ;;  %v12852_v31 = vadd.f32 %v21276_v55, %v16815_v34  ;;  %v21388_v48 = vadd.f32 %v16852_v33, %v15664_v19 }
 0x6de   : > { %v15586_v29 = vpop.f32.mrb[189].mxu0  ;;  %v12865_v28 = vadd.f32 %v13653_v41, %v12849_v21  ;;  %v12850_v32 = vadd.f32 %v21276_v55, %v16818_v26 }
 0x6df   : > { %v15587_v36 = vadd.f32 %v15586_v29, %v15585_v51  ;;  %v15588_v42 = vpop.f32.mrb[190].mxu0  ;;  %13743 = vst [vmem:[%s20181_s30 + $0x190] sm:$0xff] %v12867_v59  ;;  %v12868_v18 = vadd.f32 %v13656_v50, %v12852_v31 }
 0x6e0   : > { %v15589_v54 = vpop.f32.mrb[191].mxu0  ;;  %13741 = vst [vmem:[%s20181_s30 + $0x180] sm:$0xff] %v12865_v28  ;;  %v12866_v39 = vadd.f32 %v13654_v3, %v12850_v32  ;;  %v16445_v35 = vpop.f32.mrb[132].mxu1  ;;  %v13665_v3 = vld [vmem:[%s18227_s6 + $0x1e0] sm:$0xff] }
 0x6e1   : > { %v16843_v57 = vadd.f32 %v15587_v36, %v21232_v11  ;;  %v15590_v10 = vadd.f32 %v15589_v54, %v15588_v42  ;;  %13744 = vst [vmem:[%s20181_s30 + $0x198] sm:$0xff] %v12868_v18  ;;  %v16821_v19 = vadd.f32 %v21357_v1, %v16445_v35  ;;  %v12786_v44 = vpop.f32.mrb[133].mxu1  ;;  %v13668_v36 = vld [vmem:[%s18227_s6 + $0x1f8] sm:$0xff]  ;;  %v13666_v54 = vld [vmem:[%s18227_s6 + $0x1e8] sm:$0xff] }
 0x6e2   : > { %13742 = vst [vmem:[%s20181_s30 + $0x188] sm:$0xff] %v12866_v39  ;;  %v16824_v16 = vadd.f32 %v21351_v22, %v12786_v44  ;;  %v16446_v47 = vpop.f32.mrb[134].mxu1 }
 0x6e3   : > { %v16849_v62 = vadd.f32 %v15590_v10, %v21235_v0  ;;  %v12855_v13 = vadd.f32 %v21276_v55, %v16821_v19  ;;  %v16827_v11 = vadd.f32 %v21359_v14, %v16446_v47  ;;  %v12789_v9 = vpop.f32.mrb[135].mxu1  ;;  %v16844_v38 = vadd.f32 %v16843_v57, %v15667_v12  ;;  %v13658_v0 = vld [vmem:[%s18227_s6 + $0x1a8] sm:$0xff] }
 0x6e4   : > { %v12853_v1 = vadd.f32 %v21276_v55, %v16824_v16  ;;  %v16830_v6 = vadd.f32 %v21353_v43, %v12789_v9 }
 0x6e5   : > { %v12871_v22 = vadd.f32 %v13659_v49, %v12855_v13  ;;  %v12856_v20 = vadd.f32 %v21276_v55, %v16827_v11  ;;  %v16850_v63 = vadd.f32 %v16849_v62, %v15670_v2 }
 0x6e6   : > { %v12869_v46 = vadd.f32 %v13657_v37, %v12853_v1  ;;  %v12854_v56 = vadd.f32 %v21276_v55, %v16830_v6 }
 0x6e7   : > { %13747 = vst [vmem:[%s20181_s30 + $0x1b0] sm:$0xff] %v12871_v22  ;;  %v12872_v14 = vadd.f32 %v13660_v30, %v12856_v20 }
 0x6e8   : > { %13745 = vst [vmem:[%s20181_s30 + $0x1a0] sm:$0xff] %v12869_v46  ;;  %v12870_v12 = vadd.f32 %v13658_v0, %v12854_v56  ;;  %v16449_v53 = vpop.f32.mrb[136].mxu1 }
 0x6e9   : > { %13748 = vst [vmem:[%s20181_s30 + $0x1b8] sm:$0xff] %v12872_v14  ;;  %v16833_v43 = vadd.f32 %v21369_v23, %v16449_v53  ;;  %v12802_v52 = vpop.f32.mrb[137].mxu1 }
 0x6ea   : > { %13746 = vst [vmem:[%s20181_s30 + $0x1a8] sm:$0xff] %v12870_v12  ;;  %v16836_v2 = vadd.f32 %v21363_v25, %v12802_v52  ;;  %v16450_v60 = vpop.f32.mrb[138].mxu1  ;;  %v13662_v25 = vld [vmem:[%s18227_s6 + $0x1c8] sm:$0xff] }
 0x6eb   : > { %v12859_v15 = vadd.f32 %v21276_v55, %v16833_v43  ;;  %v16839_v58 = vadd.f32 %v21371_v17, %v16450_v60  ;;  %v12805_v24 = vpop.f32.mrb[139].mxu1 }
 0x6ec   : > { %v12857_v4 = vadd.f32 %v21276_v55, %v16836_v2  ;;  %v16842_v23 = vadd.f32 %v21365_v8, %v12805_v24  ;;  %v13667_v8 = vld [vmem:[%s18227_s6 + $0x1f0] sm:$0xff]  ;;  %s17943_s6 = scalar_lea.vmem %s21447_s8, 8192 }
 0x6ed   : > { %v12875_v33 = vadd.f32 %v13663_v7, %v12859_v15  ;;  %v12860_v27 = vadd.f32 %v21276_v55, %v16839_v58  ;;  %p17944_p1 = scmp.ne.s32.totalorder %s21447_s8, %s17943_s6  ;;  %p17951_p13 = scmp.lt.s32.totalorder %s17949_s9, %s17943_s6 }
 0x6ee   : > { %v12873_v41 = vadd.f32 %v13661_v40, %v12857_v4  ;;  %v12858_v34 = vadd.f32 %v21276_v55, %v16842_v23 }
 0x6ef   : > { %13751 = vst [vmem:[%s20181_s30 + $0x1d0] sm:$0xff] %v12875_v33  ;;  %v12876_v5 = vadd.f32 %v13664_v61, %v12860_v27  ;;  %p17945_p2 = pnand %p17944_p1, %p18169_p4  ;;  %p17952_p3 = por %p17951_p13, %p17950_p8 }
 0x6f0   : > { %13749 = vst [vmem:[%s20181_s30 + $0x1c0] sm:$0xff] %v12873_v41  ;;  %v12874_v17 = vadd.f32 %v13662_v25, %v12858_v34  ;;  %v16453_v21 = vpop.f32.mrb[140].mxu1 }
 0x6f1   : > { %13752 = vst [vmem:[%s20181_s30 + $0x1d8] sm:$0xff] %v12876_v5  ;;  %v16845_v50 = vadd.f32 %v16844_v38, %v16453_v21  ;;  %v12818_v26 = vpop.f32.mrb[141].mxu1  ;;  %p17946_p6 = pneg %p17945_p2 }
 0x6f2   : > { %13750 = vst [vmem:[%s20181_s30 + $0x1c8] sm:$0xff] %v12874_v17  ;;  %v16848_v51 = vadd.f32 %v21381_v45, %v12818_v26  ;;  %v16454_v59 = vpop.f32.mrb[142].mxu1 }
 0x6f3   : > { %v12863_v31 = vadd.f32 %v21276_v55, %v16845_v50  ;;  %v16851_v29 = vadd.f32 %v16850_v63, %v16454_v59  ;;  %v12821_v28 = vpop.f32.mrb[143].mxu1  ;;  %p17953_p7 = pnand %p17952_p3, %p17946_p6 }
 0x6f4   : > { %v12861_v32 = vadd.f32 %v21276_v55, %v16848_v51  ;;  %v16854_v42 = vadd.f32 %v21388_v48, %v12821_v28 }
 0x6f5   : > { %v12879_v18 = vadd.f32 %v13667_v8, %v12863_v31  ;;  %v12864_v45 = vadd.f32 %v21276_v55, %v16851_v29 }
 0x6f6   : > { %v12877_v39 = vadd.f32 %v13665_v3, %v12861_v32  ;;  %v12862_v35 = vadd.f32 %v21276_v55, %v16854_v42 }
 0x6f7   : > { %13755 = vst [vmem:[%s20181_s30 + $0x1f0] sm:$0xff] %v12879_v18  ;;  %v12880_v57 = vadd.f32 %v13668_v36, %v12864_v45 }
 0x6f8   : > { %13753 = vst [vmem:[%s20181_s30 + $0x1e0] sm:$0xff] %v12877_v39  ;;  %v12878_v48 = vadd.f32 %v13666_v54, %v12862_v35 }
 0x6f9   : > { %13756 = vst [vmem:[%s20181_s30 + $0x1f8] sm:$0xff] %v12880_v57 }
 0x6fa   : > { %13754 = vst [vmem:[%s20181_s30 + $0x1e8] sm:$0xff] %v12878_v48 }
 0x6fb   : > { %17956 = shalt.err (!%p17953_p7)
}
 0x6fc   : > { %s17957_s30 = scalar_lea.hbm %s21445_s28, 8192  ;;  %s17961_s17 = scalar_lea.hbm %s21498_s5, 32768 }
 0x6fd   : > { %p17958_p9 = scmp.ne.s32.totalorder %s21445_s28, %s17957_s30  ;;  %p17962_p5 = scmp.lt.u32.totalorder %s21445_s28, %s21498_s5 }
 0x6fe   : > { %p17963_p10 = scmp.lt.u32.totalorder %s17961_s17, %s17957_s30  ;;  %p17965_p1 = scmp.lt.u32.totalorder %s17957_s30, %s21445_s28 }
 0x6ff   : > { %p17959_p12 = pnand %p17958_p9, %p18169_p4 }
 0x700   : > { %p17964_p11 = por %p17963_p10, %p17962_p5 }
 0x701   : > { %p17960_p0 = pneg %p17959_p12 }
 0x702   : > { %p17966_p2 = por %p17965_p1, %p17964_p11 }
 0x704   : > { %p17967_p6 = pnand %p17966_p2, %p17960_p0 }
 0x706   : > { %17970 = shalt.err (!%p17967_p6)
}
 0x707   : > { %s18025_s26 = smov 128   ;;  %s18026_s10 = smov 8  }
 0x708   : > { %17105 = dma.vmem_to_hbm [thread:$0]  (%p18169_p4), %s21447_s8, 8192, %s21445_s28, %s12899_s22, %s18025_s26, %s18025_s26, %s18026_s10  }
 0x709 PF: > { %p17127_p8 = scmp.ge.s32.totalorder %s18013_s21, 2  ;;  %s12928_s11 = sand.u32 1, %s18001_s18  }
 0x70a   : > { %p21735_p13 = scmp.ne.s32.totalorder %s21569_s25, 0  ;;  %s12929_s6 = scalar_lea.sflag [#allocation6], %s12928_s11 }
 0x70c   : > { %p17119_p3 = pnand %p17127_p8, %p21735_p13 }
 0x70e   : > { %17996 = dma.done.wait (!%p17119_p3), %s12929_s6, 8192  }
 0x70f   : > { %17998 = vsyncadd (!%p17119_p3), %s12929_s6, 4294959104  ;;  %p19_p7 = scmp.ge.s32.totalorder %s18159_s14, 6   ;;  %s21736_s18 = smov %s18005_s19 }
 0x710   : > { %s21737_s19 = smov %s18009_s20  ;;  %s21738_s20 = smov %s18175_s27 }
 0x711   : > { %s21739_s21 = smov %s18159_s14  ;;  %21 = sbr.rel (!%p19_p7) target bundleno = 6 (0x6), region = 105 }
 0x718   :  { %12934 = vsyncpa [#allocation5], 1 }
 0x719   :  { %12936 = vsyncpa [#allocation5 + $0x1], 1 }
 0x71a   :  { %12937 = vsyncpa [#allocation8], 1 }
 0x71b   :  { %12938 = vsyncpa [#allocation6], 1 }
 0x71c   :  { %12940 = vsyncpa [#allocation6 + $0x1], 1 }

</bundles_post_ra>
